<compile_context>
chip_gen: v6e
topology: v6e:2x2x1
jax: 0.10.0
libtpu: 0.0.40
codegen_flags: <defaults>
</compile_context>

<pallas_src>
import functools

import jax
import jax.numpy as jnp
from jax import lax
from jax.experimental import pallas as pl
from jax.experimental.pallas import tpu as pltpu


_TILE_N = 512        # rows of new_verts per grid step (sublane axis, multiple of 8)
_LANE = 128          # column-chunk width of the in-kernel sweep (lane axis)
_SENTINEL = 1.0e6    # far-away coordinate for padded rows / columns
_BIG = 3.0e37        # init value for the running minima


def _round_up(x, m):
    return (x + m - 1) // m * m


# ----------------------------------------------------------------------------
# Fused loss kernel factory (all counts are static Python ints -> baked in).
# ----------------------------------------------------------------------------
def _make_loss_kernel(ni, tile_n, n_src, mt, mt_pad, ms, ms_pad, n_faces, n_verts):
    inv_n = 1.0 / float(n_src)
    inv_mt = 1.0 / float(mt)
    inv_ms = 1.0 / float(ms)
    inv_f = 1.0 / float(n_faces)
    inv_v = 1.0 / float(n_verts)
    nct = mt_pad // _LANE      # column chunks of the target segment
    ncs = ms_pad // _LANE      # column chunks of the x-flipped segment
    n_grp = tile_n // 8

    def kernel(a_ref, bt_ref, bs_ref, face_ref, vert_ref, out_ref,
               rowmin_ref, colmin_t_ref, colmin_s_ref, rsum_t_ref, rsum_s_ref):
        i = pl.program_id(0)

        # ---- init persistent accumulators at the very first grid step -------
        @pl.when(i == 0)
        def _init():
            colmin_t_ref[...] = jnp.full((8, mt_pad), _BIG, jnp.float32)
            colmin_s_ref[...] = jnp.full((8, ms_pad), _BIG, jnp.float32)
            rsum_t_ref[...] = jnp.zeros((tile_n, 1), jnp.float32)
            rsum_s_ref[...] = jnp.zeros((tile_n, 1), jnp.float32)

        # ---- lane-broadcast the row coordinates once per grid step ----------
        a = a_ref[...]                                          # (tile_n, 8)
        axb = jnp.broadcast_to(a[:, 0:1], (tile_n, _LANE))
        ayb = jnp.broadcast_to(a[:, 1:2], (tile_n, _LANE))
        azb = jnp.broadcast_to(a[:, 2:3], (tile_n, _LANE))
        row_idx = lax.broadcasted_iota(jnp.int32, (tile_n, 1), 0) + i * tile_n
        row_valid = row_idx < n_src                             # fold-time mask only

        # ---- one online-min sweep over a resident column segment ------------
        def sweep(b_ref, colmin_ref, rsum_ref, n_chunks):
            rowmin_ref[...] = jnp.full((tile_n, _LANE), _BIG, jnp.float32)

            def chunk(c, carry):
                off = pl.multiple_of(c * _LANE, _LANE)
                bx = b_ref[0:1, pl.ds(off, _LANE)]
                by = b_ref[1:2, pl.ds(off, _LANE)]
                bz = b_ref[2:3, pl.ds(off, _LANE)]
                dx = axb - bx
                dy = ayb - by
                dz = azb - bz
                d2 = dx * dx + dy * dy + dz * dz                # (tile_n, 128)
                # lane-resident row-min fold (pure VPU)
                rowmin_ref[...] = jnp.minimum(rowmin_ref[...], d2)
                # sublane-grouped column-min fold (pure VPU, no XLU per chunk)
                part = jnp.min(d2.reshape(n_grp, 8, _LANE), axis=0)   # (8, 128)
                colmin_ref[:, pl.ds(off, _LANE)] = jnp.minimum(
                    colmin_ref[:, pl.ds(off, _LANE)], part)
                return carry

            lax.fori_loop(0, n_chunks, chunk, 0)
            # single cross-lane (XLU) min per sweep, then masked row-sum fold
            rmin = jnp.min(rowmin_ref[...], axis=1, keepdims=True)    # (tile_n, 1)
            rsum_ref[...] = rsum_ref[...] + jnp.where(row_valid, rmin, 0.0)

        sweep(bt_ref, colmin_t_ref, rsum_t_ref, nct)    # chamfer vs target cloud
        sweep(bs_ref, colmin_s_ref, rsum_s_ref, ncs)    # chamfer vs x-flipped copy

        # ---- final grid step: finish reductions + small losses + writeback --
        @pl.when(i == ni - 1)
        def _finalize():
            # column -> row direction of both chamfer terms (one sublane reduce)
            cm_t = jnp.min(colmin_t_ref[...], axis=0, keepdims=True)   # (1, mt_pad)
            cm_s = jnp.min(colmin_s_ref[...], axis=0, keepdims=True)   # (1, ms_pad)
            ct_idx = lax.broadcasted_iota(jnp.int32, (1, mt_pad), 1)
            cs_idx = lax.broadcasted_iota(jnp.int32, (1, ms_pad), 1)
            col_sum_t = jnp.sum(jnp.where(ct_idx < mt, cm_t, 0.0))
            col_sum_s = jnp.sum(jnp.where(cs_idx < ms, cm_s, 0.0))
            row_sum_t = jnp.sum(rsum_t_ref[...])
            row_sum_s = jnp.sum(rsum_s_ref[...])
            cham_trg = row_sum_t * inv_n + col_sum_t * inv_mt
            cham_sym = row_sum_s * inv_n + col_sum_s * inv_ms

            # per-face edge + smoothness losses (padded faces contribute 0.0)
            fp = face_ref[...]                    # (24, F_pad), lane-dense
            v0 = fp[0:3, :]
            v1 = fp[3:6, :]
            v2 = fp[6:9, :]
            o0 = fp[9:12, :]
            o1 = fp[12:15, :]
            o2 = fp[15:18, :]

            def elen(x, y):
                d = x - y
                # TODO(synk): add an epsilon inside the sqrt before wiring a
                # backward pass (padded / degenerate edges are zero-length).
                return jnp.sqrt(jnp.sum(d * d, axis=0, keepdims=True))

            e0 = elen(v0, v1)
            e1 = elen(v1, v2)
            e2 = elen(v2, v0)
            sq = lambda x: jnp.sum(x * x)
            edge_l = (sq(e0 - e1) + sq(e1 - e2) + sq(e2 - e0)) * inv_f

            d0 = v0 - o0
            d1 = v1 - o1
            dd2 = v2 - o2
            l1 = lambda x, y: jnp.sum(jnp.abs(x - y))
            smooth_l = (l1(d0, d1) + l1(d1, dd2) + l1(dd2, d0)) * (inv_f / 3.0)

            # per-vertex normal-consistency + penetration losses
            vp = vert_ref[...]                    # (16, V_pad), lane-dense
            nv = vp[0:3, :]
            iv = vp[3:6, :]
            nn = vp[6:9, :]
            inr = vp[9:12, :]
            dn = nn - inr
            cons_l = jnp.sum(dn * dn) * (inv_v / 3.0)
            pen_dot = jnp.sum((nv - iv) * inr, axis=0, keepdims=True)
            pen_l = jnp.sum(jnp.abs(jnp.minimum(pen_dot, 0.0))) * inv_v

            def _emit(k, val):
                out_ref[k:k + 1, :] = jnp.full((1, _LANE), val, jnp.float32)

            _emit(0, cham_trg)
            _emit(1, edge_l)
            _emit(2, smooth_l)
            _emit(3, cons_l)
            _emit(4, pen_l)
            _emit(5, cham_sym)
            _emit(6, 0.0)
            _emit(7, 0.0)

    return kernel


# ----------------------------------------------------------------------------
# Wrapper: build lane-dense packs and run the single fused pallas_call.
# ----------------------------------------------------------------------------
def _mesh_loss_terms_pallas(new_verts, init_verts, new_normals, init_normals,
                            trg_verts, faces, tile_n=_TILE_N):
    new_verts = new_verts.astype(jnp.float32)
    init_verts = init_verts.astype(jnp.float32)
    new_normals = new_normals.astype(jnp.float32)
    init_normals = init_normals.astype(jnp.float32)
    trg_verts = trg_verts.astype(jnp.float32)

    n = new_verts.shape[0]
    mt = trg_verts.shape[0]
    ms = n
    f = faces.shape[0]

    tile_n = min(tile_n, _round_up(n, 8))
    n_pad = _round_up(n, tile_n)
    ni = n_pad // tile_n
    mt_pad = _round_up(mt, _LANE)
    ms_pad = _round_up(ms, _LANE)
    f_pad = _round_up(f, _LANE)
    v_pad = _round_up(n, _LANE)

    # Row side of both chamfer terms: [x y z . . . . .] per deformed vertex.
    # Padded rows get a far sentinel so they never win a column min; they are
    # dropped from the row sums by the fold-time iota mask.
    a = jnp.full((n_pad, 8), _SENTINEL, jnp.float32)
    a = a.at[:n, 0:3].set(new_verts)

    # Column sides, lane-dense (coords on sublanes, points on lanes), resident.
    # TODO(synk): bt only depends on the fixed target scan; in the real
    # 500-step SGD loop it should be packed once outside the step function.
    bt = jnp.full((8, mt_pad), _SENTINEL, jnp.float32)
    bt = bt.at[0:3, :mt].set(trg_verts.T)

    flipped = new_verts * jnp.array([-1.0, 1.0, 1.0], jnp.float32)
    bs = jnp.full((8, ms_pad), _SENTINEL, jnp.float32)
    bs = bs.at[0:3, :ms].set(flipped.T)

    # Per-face pack (24, F_pad): v0 v1 v2 (new) and o0 o1 o2 (init), lane-dense.
    # TODO(synk): the 6 corner gathers run in XLA; an in-kernel gather from the
    # VMEM-resident vertex table via scalar-prefetched face indices would cut
    # this per-step HBM stream further.
    def corners(vv):
        return [vv[faces[:, k]].T for k in range(3)]   # 3 x (3, F)

    fpack = jnp.zeros((24, f_pad), jnp.float32)
    fpack = fpack.at[0:18, :f].set(
        jnp.concatenate(corners(new_verts) + corners(init_verts), axis=0))

    # Per-vertex pack (16, V_pad): new_verts, init_verts, new / init normals.
    vpack = jnp.zeros((16, v_pad), jnp.float32)
    vpack = vpack.at[0:12, :n].set(
        jnp.concatenate([new_verts.T, init_verts.T,
                         new_normals.T, init_normals.T], axis=0))

    kernel = _make_loss_kernel(ni, tile_n, n, mt, mt_pad, ms, ms_pad, f, n)

    out = pl.pallas_call(
        kernel,
        out_shape=jax.ShapeDtypeStruct((8, _LANE), jnp.float32),
        grid=(ni,),
        in_specs=[
            pl.BlockSpec((tile_n, 8), lambda i: (i, 0)),     # streamed row tiles
            pl.BlockSpec((8, mt_pad), lambda i: (0, 0)),     # target cloud (resident)
            pl.BlockSpec((8, ms_pad), lambda i: (0, 0)),     # flipped verts (resident)
            pl.BlockSpec((24, f_pad), lambda i: (0, 0)),     # face pack (resident)
            pl.BlockSpec((16, v_pad), lambda i: (0, 0)),     # vert pack (resident)
        ],
        out_specs=pl.BlockSpec((8, _LANE), lambda i: (0, 0)),
        scratch_shapes=[
            pltpu.VMEM((tile_n, _LANE), jnp.float32),        # lane-resident row-min
            pltpu.VMEM((8, mt_pad), jnp.float32),            # col-min vs target
            pltpu.VMEM((8, ms_pad), jnp.float32),            # col-min vs flipped
            pltpu.VMEM((tile_n, 1), jnp.float32),            # row-min sums (target)
            pltpu.VMEM((tile_n, 1), jnp.float32),            # row-min sums (flipped)
        ],
        compiler_params=pltpu.CompilerParams(
            # The single grid axis carries colmin / row-sum accumulation, so it
            # stays "arbitrary".
            dimension_semantics=("arbitrary",),
            vmem_limit_bytes=32 * 1024 * 1024,
        ),
    )(a, bt, bs, fpack, vpack)

    # [chamfer, edge, smooth, consistency, penetration, symmetry, 0, 0]
    return out[:, 0]


# ----------------------------------------------------------------------------
# Host-side glue (pytorch3d verts_normals_packed semantics).
# TODO(synk): scatter-add vertex normals have no clean Pallas equivalent; XLA.
# ----------------------------------------------------------------------------
def _vertex_normals(verts, faces):
    v0 = verts[faces[:, 0]]
    v1 = verts[faces[:, 1]]
    v2 = verts[faces[:, 2]]
    n = jnp.zeros_like(verts)
    n = n.at[faces[:, 0]].add(jnp.cross(v2 - v1, v0 - v1))
    n = n.at[faces[:, 1]].add(jnp.cross(v0 - v2, v1 - v2))
    n = n.at[faces[:, 2]].add(jnp.cross(v1 - v0, v2 - v0))
    return n / jnp.maximum(jnp.linalg.norm(n, axis=1, keepdims=True), 1e-6)


def _weights(mode):
    w = dict(chamfer=1.0, face=0.1, normal=0.1, laplacian=0.1,
             symmetry=0.1, consistency=0.1, penetration=0.1, smooth=0.1)
    if mode != "init":
        w["penetration"] = 0.0
    return w


@functools.partial(jax.jit, static_argnames=("mode",))
def smpl2mesh_loss(deform_verts, src_verts, src_faces, trg_verts,
                   scale_factor=1.0, mode="init"):
    """One loss evaluation of SMPL2MeshOptimizer's inner SGD loop (hot path)."""
    w = _weights(mode)
    src = src_verts.astype(jnp.float32) * scale_factor
    trg = trg_verts.astype(jnp.float32) * scale_factor
    new_verts = src + deform_verts.astype(jnp.float32)
    init_verts = src
    init_normals = _vertex_normals(init_verts, src_faces)
    new_normals = _vertex_normals(new_verts, src_faces)

    t = _mesh_loss_terms_pallas(new_verts, init_verts, new_normals,
                                init_normals, trg, src_faces)
    loss = (w["chamfer"] * t[0] + w["face"] * t[1] + w["smooth"] * t[2]
            + w["consistency"] * t[3] + w["symmetry"] * t[5])
    if w["penetration"] > 0.0:
        loss = loss + w["penetration"] * t[4]
    # TODO(synk): pytorch3d mesh_normal_consistency and cot-weighted
    # mesh_laplacian_smoothing need variable-degree sparse adjacency; omitted.
    return loss, new_verts


def smpl2mesh_forward(src_verts, src_faces, trg_verts, scale_factor=1.0, mode="init"):
    """Forward pass with deform_verts initialized to zeros (torch.full(..., 0.0))."""
    deform_verts = jnp.zeros_like(src_verts, dtype=jnp.float32)
    loss, new_verts = smpl2mesh_loss(deform_verts, src_verts, src_faces,
                                     trg_verts, scale_factor, mode=mode)
    # TODO(synk): the 500-step SGD(momentum=0.99) autograd loop, trimesh
    # Laplacian filtering, marching-cubes remesh and KDTree vertex-color
    # transfer are host / library code, not TPU kernels.
    return loss, new_verts / scale_factor


# ----------------------------------------------------------------------------
# Pure-JAX reference of the same loss terms (for verification).
# ----------------------------------------------------------------------------
def _reference_loss_terms(deform_verts, src_verts, src_faces, trg_verts,
                          scale_factor=1.0):
    src = src_verts.astype(jnp.float32) * scale_factor
    trg = trg_verts.astype(jnp.float32) * scale_factor
    new_verts = src + deform_verts.astype(jnp.float32)
    init_verts = src
    init_n = _vertex_normals(init_verts, src_faces)
    new_n = _vertex_normals(new_verts, src_faces)

    def cham(x, y):
        d2 = jnp.sum((x[:, None, :] - y[None, :, :]) ** 2, axis=-1)
        return jnp.mean(jnp.min(d2, axis=1)) + jnp.mean(jnp.min(d2, axis=0))

    v0 = new_verts[src_faces[:, 0]]
    v1 = new_verts[src_faces[:, 1]]
    v2 = new_verts[src_faces[:, 2]]
    o0 = init_verts[src_faces[:, 0]]
    o1 = init_verts[src_faces[:, 1]]
    o2 = init_verts[src_faces[:, 2]]
    e0 = jnp.linalg.norm(v0 - v1, axis=1)
    e1 = jnp.linalg.norm(v1 - v2, axis=1)
    e2 = jnp.linalg.norm(v2 - v0, axis=1)
    mse = lambda x, y: jnp.mean((x - y) ** 2)
    edge_l = mse(e0, e1) + mse(e1, e2) + mse(e2, e0)
    l1 = lambda x, y: jnp.mean(jnp.abs(x - y))
    smooth_l = l1(v0 - o0, v1 - o1) + l1(v1 - o1, v2 - o2) + l1(v2 - o2, v0 - o0)
    cons_l = jnp.mean((new_n - init_n) ** 2)
    pen_l = jnp.mean(jnp.abs(jnp.minimum(
        jnp.sum((new_verts - init_verts) * init_n, axis=1), 0.0)))
    sym_l = cham(new_verts, new_verts * jnp.array([-1.0, 1.0, 1.0], jnp.float32))
    return jnp.stack([cham(new_verts, trg), edge_l, smooth_l, cons_l, pen_l, sym_l])


def _reference_total(deform_verts, src_verts, src_faces, trg_verts,
                     scale_factor=1.0, mode="init"):
    w = _weights(mode)
    t = _reference_loss_terms(deform_verts, src_verts, src_faces, trg_verts,
                              scale_factor)
    return (w["chamfer"] * t[0] + w["face"] * t[1] + w["smooth"] * t[2]
            + w["consistency"] * t[3] + w["penetration"] * t[4]
            + w["symmetry"] * t[5])


if __name__ == "__main__":
    key = jax.random.PRNGKey(0)
    kv, kt, kf, kd = jax.random.split(key, 4)
    V, T, F = 600, 400, 800          # small, but exercises a multi-tile grid
    src_verts = jax.random.normal(kv, (V, 3), dtype=jnp.float32)
    trg_verts = jax.random.normal(kt, (T, 3), dtype=jnp.float32)
    src_faces = jax.random.randint(kf, (F, 3), 0, V, dtype=jnp.int32)

    # --- module forward (deform_verts initialized to zeros, as in torch) ----
    loss0, new_verts = smpl2mesh_forward(src_verts, src_faces, trg_verts,
                                         scale_factor=1.0, mode="init")
    loss0 = jax.block_until_ready(loss0)
    new_verts = jax.block_until_ready(new_verts)
    ref0 = _reference_total(jnp.zeros((V, 3), jnp.float32), src_verts,
                            src_faces, trg_verts, 1.0, "init")
    assert jnp.isfinite(loss0), loss0
    assert jnp.allclose(loss0, ref0, rtol=2e-3, atol=1e-5), (float(loss0), float(ref0))
    assert jnp.allclose(new_verts, src_verts), "zero deform must return the source verts"

    # --- hot-path loss with a nonzero deformation (exercises every term) ----
    deform = 0.05 * jax.random.normal(kd, (V, 3), dtype=jnp.float32)
    loss1, _ = smpl2mesh_loss(deform, src_verts, src_faces, trg_verts, 1.0,
                              mode="init")
    loss1 = jax.block_until_ready(loss1)
    ref1 = _reference_total(deform, src_verts, src_faces, trg_verts, 1.0, "init")
    assert jnp.isfinite(loss1), loss1
    assert jnp.allclose(loss1, ref1, rtol=2e-3, atol=1e-5), (float(loss1), float(ref1))

    # --- per-term comparison with a smaller row tile (3 grid steps) ----------
    new_v = src_verts + deform
    terms = _mesh_loss_terms_pallas(new_v, src_verts,
                                    _vertex_normals(new_v, src_faces),
                                    _vertex_normals(src_verts, src_faces),
                                    trg_verts, src_faces, tile_n=256)
    terms = jax.block_until_ready(terms)
    ref_terms = _reference_loss_terms(deform, src_verts, src_faces, trg_verts, 1.0)
    assert jnp.allclose(terms[:6], ref_terms, rtol=2e-3, atol=1e-5), (terms, ref_terms)

    print("KERNEL_OK")
</pallas_src>

<mosaic_0001>
module attributes {stable_mosaic.version = 11 : i64} {
  func.func @kernel(%arg0: i32, %arg1: memref<512x8xf32, #tpu.memory_space<vmem>>, %arg2: memref<8x512xf32, #tpu.memory_space<vmem>>, %arg3: memref<8x640xf32, #tpu.memory_space<vmem>>, %arg4: memref<24x896xf32, #tpu.memory_space<vmem>>, %arg5: memref<16x640xf32, #tpu.memory_space<vmem>>, %arg6: memref<8x128xf32, #tpu.memory_space<vmem>>, %arg7: memref<512x128xf32, #tpu.memory_space<vmem>>, %arg8: memref<8x512xf32, #tpu.memory_space<vmem>>, %arg9: memref<8x640xf32, #tpu.memory_space<vmem>>, %arg10: memref<512x1xf32, #tpu.memory_space<vmem>>, %arg11: memref<512x1xf32, #tpu.memory_space<vmem>>) attributes {dimension_semantics = [#tpu.dimension_semantics<arbitrary>], iteration_bounds = array<i64: 2>, scalar_prefetch = 0 : i64, scratch_operands = 5 : i64, tpu.core_type = #tpu.core_type<tc>, window_params = [{transform_indices = @transform_0, window_bounds = array<i64: 512, 8>}, {pipeline_mode = #tpu.pipeline_mode<synchronous>, transform_indices = @transform_1, window_bounds = array<i64: 8, 512>}, {pipeline_mode = #tpu.pipeline_mode<synchronous>, transform_indices = @transform_2, window_bounds = array<i64: 8, 640>}, {pipeline_mode = #tpu.pipeline_mode<synchronous>, transform_indices = @transform_3, window_bounds = array<i64: 24, 896>}, {pipeline_mode = #tpu.pipeline_mode<synchronous>, transform_indices = @transform_4, window_bounds = array<i64: 16, 640>}, {pipeline_mode = #tpu.pipeline_mode<synchronous>, transform_indices = @transform_5, window_bounds = array<i64: 8, 128>}]} {
    %c0_i32 = arith.constant 0 : i32
    %0 = arith.cmpi eq, %arg0, %c0_i32 : i32
    %1 = arith.extui %0 : i1 to i32
    %c0_i32_0 = arith.constant 0 : i32
    %2 = arith.cmpi ne, %1, %c0_i32_0 : i32
    scf.if %2 {
      %cst_30 = arith.constant 3.000000e+37 : f32
      %44 = vector.broadcast %cst_30 : f32 to vector<8x512xf32>
      %c0_31 = arith.constant 0 : index
      %c0_32 = arith.constant 0 : index
      %45 = vector.load %arg8[%c0_31, %c0_32] : memref<8x512xf32, #tpu.memory_space<vmem>>, vector<8x512xf32>
      tpu.vector_store %arg8[%c0_31, %c0_32], %44 {strides = array<i32>} : memref<8x512xf32, #tpu.memory_space<vmem>>, vector<8x512xf32>,
      %cst_33 = arith.constant 3.000000e+37 : f32
      %46 = vector.broadcast %cst_33 : f32 to vector<8x640xf32>
      %c0_34 = arith.constant 0 : index
      %c0_35 = arith.constant 0 : index
      %47 = vector.load %arg9[%c0_34, %c0_35] : memref<8x640xf32, #tpu.memory_space<vmem>>, vector<8x640xf32>
      tpu.vector_store %arg9[%c0_34, %c0_35], %46 {strides = array<i32>} : memref<8x640xf32, #tpu.memory_space<vmem>>, vector<8x640xf32>,
      %cst_36 = arith.constant 0.000000e+00 : f32
      %48 = vector.broadcast %cst_36 : f32 to vector<512x1xf32>
      %c0_37 = arith.constant 0 : index
      %c0_38 = arith.constant 0 : index
      %49 = vector.load %arg10[%c0_37, %c0_38] : memref<512x1xf32, #tpu.memory_space<vmem>>, vector<512x1xf32>
      tpu.vector_store %arg10[%c0_37, %c0_38], %48 {strides = array<i32>} : memref<512x1xf32, #tpu.memory_space<vmem>>, vector<512x1xf32>,
      %cst_39 = arith.constant 0.000000e+00 : f32
      %50 = vector.broadcast %cst_39 : f32 to vector<512x1xf32>
      %c0_40 = arith.constant 0 : index
      %c0_41 = arith.constant 0 : index
      %51 = vector.load %arg11[%c0_40, %c0_41] : memref<512x1xf32, #tpu.memory_space<vmem>>, vector<512x1xf32>
      tpu.vector_store %arg11[%c0_40, %c0_41], %50 {strides = array<i32>} : memref<512x1xf32, #tpu.memory_space<vmem>>, vector<512x1xf32>,
    } else {
    }
    %c0 = arith.constant 0 : index
    %c0_1 = arith.constant 0 : index
    %3 = vector.load %arg1[%c0, %c0_1] : memref<512x8xf32, #tpu.memory_space<vmem>>, vector<512x8xf32>
    %4 = vector.extract_strided_slice %3 {offsets = [0, 0], sizes = [512, 1], strides = [1, 1]} : vector<512x8xf32> to vector<512x1xf32>
    %5 = vector.shape_cast %4 : vector<512x1xf32> to vector<512x1xf32>
    %6 = vector.broadcast %5 : vector<512x1xf32> to vector<512x128xf32>
    %7 = vector.extract_strided_slice %3 {offsets = [0, 1], sizes = [512, 1], strides = [1, 1]} : vector<512x8xf32> to vector<512x1xf32>
    %8 = vector.shape_cast %7 : vector<512x1xf32> to vector<512x1xf32>
    %9 = vector.broadcast %8 : vector<512x1xf32> to vector<512x128xf32>
    %10 = vector.extract_strided_slice %3 {offsets = [0, 2], sizes = [512, 1], strides = [1, 1]} : vector<512x8xf32> to vector<512x1xf32>
    %11 = vector.shape_cast %10 : vector<512x1xf32> to vector<512x1xf32>
    %12 = vector.broadcast %11 : vector<512x1xf32> to vector<512x128xf32>
    %13 = tpu.iota {dimensions = array<i32: 0>} : vector<512x1xi32>
    %c512_i32 = arith.constant 512 : i32
    %14 = arith.muli %arg0, %c512_i32 : i32
    %15 = vector.broadcast %14 : i32 to vector<512x1xi32>
    %16 = arith.addi %13, %15 : vector<512x1xi32>
    %c600_i32 = arith.constant 600 : i32
    %17 = vector.broadcast %c600_i32 : i32 to vector<512x1xi32>
    %18 = arith.cmpi slt, %16, %17 : vector<512x1xi32>
    %cst = arith.constant 3.000000e+37 : f32
    %19 = vector.broadcast %cst : f32 to vector<512x128xf32>
    %c0_2 = arith.constant 0 : index
    %c0_3 = arith.constant 0 : index
    %20 = vector.load %arg7[%c0_2, %c0_3] : memref<512x128xf32, #tpu.memory_space<vmem>>, vector<512x128xf32>
    tpu.vector_store %arg7[%c0_2, %c0_3], %19 {strides = array<i32>} : memref<512x128xf32, #tpu.memory_space<vmem>>, vector<512x128xf32>,
    %c0_i32_4 = arith.constant 0 : i32
    %c4_i32 = arith.constant 4 : i32
    %21 = arith.addi %c0_i32_4, %c4_i32 : i32
    %c1_i32 = arith.constant 1 : i32
    scf.for %arg12 = %c0_i32_4 to %21 step %c1_i32  : i32 {
      %c128_i32 = arith.constant 128 : i32
      %44 = arith.muli %arg12, %c128_i32 : i32
      %45 = tpu.assume_multiple %44, 128 : i32
      %c0_30 = arith.constant 0 : index
      %46 = arith.index_cast %45 : i32 to index
      %47 = vector.load %arg2[%c0_30, %46] : memref<8x512xf32, #tpu.memory_space<vmem>>, vector<1x128xf32>
      %c1 = arith.constant 1 : index
      %48 = arith.index_cast %45 : i32 to index
      %49 = vector.load %arg2[%c1, %48] : memref<8x512xf32, #tpu.memory_space<vmem>>, vector<1x128xf32>
      %c2 = arith.constant 2 : index
      %50 = arith.index_cast %45 : i32 to index
      %51 = vector.load %arg2[%c2, %50] : memref<8x512xf32, #tpu.memory_space<vmem>>, vector<1x128xf32>
      %52 = vector.broadcast %47 : vector<1x128xf32> to vector<512x128xf32>
      %53 = arith.subf %6, %52 : vector<512x128xf32>
      %54 = vector.broadcast %49 : vector<1x128xf32> to vector<512x128xf32>
      %55 = arith.subf %9, %54 : vector<512x128xf32>
      %56 = vector.broadcast %51 : vector<1x128xf32> to vector<512x128xf32>
      %57 = arith.subf %12, %56 : vector<512x128xf32>
      %58 = arith.mulf %53, %53 : vector<512x128xf32>
      %59 = arith.mulf %55, %55 : vector<512x128xf32>
      %60 = arith.addf %58, %59 : vector<512x128xf32>
      %61 = arith.mulf %57, %57 : vector<512x128xf32>
      %62 = arith.addf %60, %61 : vector<512x128xf32>
      %c0_31 = arith.constant 0 : index
      %c0_32 = arith.constant 0 : index
      %63 = vector.load %arg7[%c0_31, %c0_32] : memref<512x128xf32, #tpu.memory_space<vmem>>, vector<512x128xf32>
      %64 = arith.minimumf %63, %62 : vector<512x128xf32>
      %c0_33 = arith.constant 0 : index
      %c0_34 = arith.constant 0 : index
      %65 = vector.load %arg7[%c0_33, %c0_34] : memref<512x128xf32, #tpu.memory_space<vmem>>, vector<512x128xf32>
      tpu.vector_store %arg7[%c0_33, %c0_34], %64 {strides = array<i32>} : memref<512x128xf32, #tpu.memory_space<vmem>>, vector<512x128xf32>,
      %66 = vector.shape_cast %62 : vector<512x128xf32> to vector<64x8x128xf32>
      %cst_35 = arith.constant dense<0x7F800000> : vector<8x128xf32>
      %67 = vector.multi_reduction <minimumf>, %66, %cst_35 [0] : vector<64x8x128xf32> to vector<8x128xf32>
      %c0_36 = arith.constant 0 : index
      %68 = arith.index_cast %45 : i32 to index
      %69 = vector.load %arg8[%c0_36, %68] : memref<8x512xf32, #tpu.memory_space<vmem>>, vector<8x128xf32>
      %70 = arith.minimumf %69, %67 : vector<8x128xf32>
      %c0_37 = arith.constant 0 : index
      %71 = arith.index_cast %45 : i32 to index
      %72 = vector.load %arg8[%c0_37, %71] : memref<8x512xf32, #tpu.memory_space<vmem>>, vector<8x128xf32>
      tpu.vector_store %arg8[%c0_37, %71], %70 {strides = array<i32>} : memref<8x512xf32, #tpu.memory_space<vmem>>, vector<8x128xf32>,
    }
    %c4_i32_5 = arith.constant 4 : i32
    %c0_6 = arith.constant 0 : index
    %c0_7 = arith.constant 0 : index
    %22 = vector.load %arg7[%c0_6, %c0_7] : memref<512x128xf32, #tpu.memory_space<vmem>>, vector<512x128xf32>
    %cst_8 = arith.constant dense<0x7F800000> : vector<512xf32>
    %23 = vector.multi_reduction <minimumf>, %22, %cst_8 [1] : vector<512x128xf32> to vector<512xf32>
    %24 = vector.shape_cast %23 : vector<512xf32> to vector<512x1xf32>
    %c0_9 = arith.constant 0 : index
    %c0_10 = arith.constant 0 : index
    %25 = vector.load %arg10[%c0_9, %c0_10] : memref<512x1xf32, #tpu.memory_space<vmem>>, vector<512x1xf32>
    %cst_11 = arith.constant 0.000000e+00 : f32
    %26 = vector.broadcast %cst_11 : f32 to vector<512x1xf32>
    %27 = arith.select %18, %24, %26 : vector<512x1xi1>, vector<512x1xf32>
    %28 = arith.addf %25, %27 : vector<512x1xf32>
    %c0_12 = arith.constant 0 : index
    %c0_13 = arith.constant 0 : index
    %29 = vector.load %arg10[%c0_12, %c0_13] : memref<512x1xf32, #tpu.memory_space<vmem>>, vector<512x1xf32>
    tpu.vector_store %arg10[%c0_12, %c0_13], %28 {strides = array<i32>} : memref<512x1xf32, #tpu.memory_space<vmem>>, vector<512x1xf32>,
    %cst_14 = arith.constant 3.000000e+37 : f32
    %30 = vector.broadcast %cst_14 : f32 to vector<512x128xf32>
    %c0_15 = arith.constant 0 : index
    %c0_16 = arith.constant 0 : index
    %31 = vector.load %arg7[%c0_15, %c0_16] : memref<512x128xf32, #tpu.memory_space<vmem>>, vector<512x128xf32>
    tpu.vector_store %arg7[%c0_15, %c0_16], %30 {strides = array<i32>} : memref<512x128xf32, #tpu.memory_space<vmem>>, vector<512x128xf32>,
    %c0_i32_17 = arith.constant 0 : i32
    %c5_i32 = arith.constant 5 : i32
    %32 = arith.addi %c0_i32_17, %c5_i32 : i32
    %c1_i32_18 = arith.constant 1 : i32
    scf.for %arg12 = %c0_i32_17 to %32 step %c1_i32_18  : i32 {
      %c128_i32 = arith.constant 128 : i32
      %44 = arith.muli %arg12, %c128_i32 : i32
      %45 = tpu.assume_multiple %44, 128 : i32
      %c0_30 = arith.constant 0 : index
      %46 = arith.index_cast %45 : i32 to index
      %47 = vector.load %arg3[%c0_30, %46] : memref<8x640xf32, #tpu.memory_space<vmem>>, vector<1x128xf32>
      %c1 = arith.constant 1 : index
      %48 = arith.index_cast %45 : i32 to index
      %49 = vector.load %arg3[%c1, %48] : memref<8x640xf32, #tpu.memory_space<vmem>>, vector<1x128xf32>
      %c2 = arith.constant 2 : index
      %50 = arith.index_cast %45 : i32 to index
      %51 = vector.load %arg3[%c2, %50] : memref<8x640xf32, #tpu.memory_space<vmem>>, vector<1x128xf32>
      %52 = vector.broadcast %47 : vector<1x128xf32> to vector<512x128xf32>
      %53 = arith.subf %6, %52 : vector<512x128xf32>
      %54 = vector.broadcast %49 : vector<1x128xf32> to vector<512x128xf32>
      %55 = arith.subf %9, %54 : vector<512x128xf32>
      %56 = vector.broadcast %51 : vector<1x128xf32> to vector<512x128xf32>
      %57 = arith.subf %12, %56 : vector<512x128xf32>
      %58 = arith.mulf %53, %53 : vector<512x128xf32>
      %59 = arith.mulf %55, %55 : vector<512x128xf32>
      %60 = arith.addf %58, %59 : vector<512x128xf32>
      %61 = arith.mulf %57, %57 : vector<512x128xf32>
      %62 = arith.addf %60, %61 : vector<512x128xf32>
      %c0_31 = arith.constant 0 : index
      %c0_32 = arith.constant 0 : index
      %63 = vector.load %arg7[%c0_31, %c0_32] : memref<512x128xf32, #tpu.memory_space<vmem>>, vector<512x128xf32>
      %64 = arith.minimumf %63, %62 : vector<512x128xf32>
      %c0_33 = arith.constant 0 : index
      %c0_34 = arith.constant 0 : index
      %65 = vector.load %arg7[%c0_33, %c0_34] : memref<512x128xf32, #tpu.memory_space<vmem>>, vector<512x128xf32>
      tpu.vector_store %arg7[%c0_33, %c0_34], %64 {strides = array<i32>} : memref<512x128xf32, #tpu.memory_space<vmem>>, vector<512x128xf32>,
      %66 = vector.shape_cast %62 : vector<512x128xf32> to vector<64x8x128xf32>
      %cst_35 = arith.constant dense<0x7F800000> : vector<8x128xf32>
      %67 = vector.multi_reduction <minimumf>, %66, %cst_35 [0] : vector<64x8x128xf32> to vector<8x128xf32>
      %c0_36 = arith.constant 0 : index
      %68 = arith.index_cast %45 : i32 to index
      %69 = vector.load %arg9[%c0_36, %68] : memref<8x640xf32, #tpu.memory_space<vmem>>, vector<8x128xf32>
      %70 = arith.minimumf %69, %67 : vector<8x128xf32>
      %c0_37 = arith.constant 0 : index
      %71 = arith.index_cast %45 : i32 to index
      %72 = vector.load %arg9[%c0_37, %71] : memref<8x640xf32, #tpu.memory_space<vmem>>, vector<8x128xf32>
      tpu.vector_store %arg9[%c0_37, %71], %70 {strides = array<i32>} : memref<8x640xf32, #tpu.memory_space<vmem>>, vector<8x128xf32>,
    }
    %c5_i32_19 = arith.constant 5 : i32
    %c0_20 = arith.constant 0 : index
    %c0_21 = arith.constant 0 : index
    %33 = vector.load %arg7[%c0_20, %c0_21] : memref<512x128xf32, #tpu.memory_space<vmem>>, vector<512x128xf32>
    %cst_22 = arith.constant dense<0x7F800000> : vector<512xf32>
    %34 = vector.multi_reduction <minimumf>, %33, %cst_22 [1] : vector<512x128xf32> to vector<512xf32>
    %35 = vector.shape_cast %34 : vector<512xf32> to vector<512x1xf32>
    %c0_23 = arith.constant 0 : index
    %c0_24 = arith.constant 0 : index
    %36 = vector.load %arg11[%c0_23, %c0_24] : memref<512x1xf32, #tpu.memory_space<vmem>>, vector<512x1xf32>
    %cst_25 = arith.constant 0.000000e+00 : f32
    %37 = vector.broadcast %cst_25 : f32 to vector<512x1xf32>
    %38 = arith.select %18, %35, %37 : vector<512x1xi1>, vector<512x1xf32>
    %39 = arith.addf %36, %38 : vector<512x1xf32>
    %c0_26 = arith.constant 0 : index
    %c0_27 = arith.constant 0 : index
    %40 = vector.load %arg11[%c0_26, %c0_27] : memref<512x1xf32, #tpu.memory_space<vmem>>, vector<512x1xf32>
    tpu.vector_store %arg11[%c0_26, %c0_27], %39 {strides = array<i32>} : memref<512x1xf32, #tpu.memory_space<vmem>>, vector<512x1xf32>,
    %c1_i32_28 = arith.constant 1 : i32
    %41 = arith.cmpi eq, %arg0, %c1_i32_28 : i32
    %42 = arith.extui %41 : i1 to i32
    %c0_i32_29 = arith.constant 0 : i32
    %43 = arith.cmpi ne, %42, %c0_i32_29 : i32
    scf.if %43 {
      %c0_30 = arith.constant 0 : index
      %c0_31 = arith.constant 0 : index
      %44 = vector.load %arg8[%c0_30, %c0_31] : memref<8x512xf32, #tpu.memory_space<vmem>>, vector<8x512xf32>
      %cst_32 = arith.constant dense<0x7F800000> : vector<512xf32>
      %45 = vector.multi_reduction <minimumf>, %44, %cst_32 [0] : vector<8x512xf32> to vector<512xf32>
      %46 = vector.shape_cast %45 : vector<512xf32> to vector<1x512xf32>
      %c0_33 = arith.constant 0 : index
      %c0_34 = arith.constant 0 : index
      %47 = vector.load %arg9[%c0_33, %c0_34] : memref<8x640xf32, #tpu.memory_space<vmem>>, vector<8x640xf32>
      %cst_35 = arith.constant dense<0x7F800000> : vector<640xf32>
      %48 = vector.multi_reduction <minimumf>, %47, %cst_35 [0] : vector<8x640xf32> to vector<640xf32>
      %49 = vector.shape_cast %48 : vector<640xf32> to vector<1x640xf32>
      %50 = tpu.iota {dimensions = array<i32: 1>} : vector<1x512xi32>
      %51 = tpu.iota {dimensions = array<i32: 1>} : vector<1x640xi32>
      %c400_i32 = arith.constant 400 : i32
      %52 = vector.broadcast %c400_i32 : i32 to vector<1x512xi32>
      %53 = arith.cmpi slt, %50, %52 : vector<1x512xi32>
      %cst_36 = arith.constant 0.000000e+00 : f32
      %54 = vector.broadcast %cst_36 : f32 to vector<1x512xf32>
      %55 = arith.select %53, %46, %54 : vector<1x512xi1>, vector<1x512xf32>
      %56 = vector.shape_cast %55 : vector<1x512xf32> to vector<1x1x512xf32>
      %cst_37 = arith.constant dense<0.000000e+00> : vector<1xf32>
      %57 = vector.multi_reduction <add>, %56, %cst_37 [1, 2] : vector<1x1x512xf32> to vector<1xf32>
      %58 = vector.shape_cast %57 : vector<1xf32> to vector<1x1x1xf32>
      %59 = vector.extract %58[0, 0, 0] : f32 from vector<1x1x1xf32>
      %c600_i32_38 = arith.constant 600 : i32
      %60 = vector.broadcast %c600_i32_38 : i32 to vector<1x640xi32>
      %61 = arith.cmpi slt, %51, %60 : vector<1x640xi32>
      %cst_39 = arith.constant 0.000000e+00 : f32
      %62 = vector.broadcast %cst_39 : f32 to vector<1x640xf32>
      %63 = arith.select %61, %49, %62 : vector<1x640xi1>, vector<1x640xf32>
      %64 = vector.shape_cast %63 : vector<1x640xf32> to vector<1x1x640xf32>
      %cst_40 = arith.constant dense<0.000000e+00> : vector<1xf32>
      %65 = vector.multi_reduction <add>, %64, %cst_40 [1, 2] : vector<1x1x640xf32> to vector<1xf32>
      %66 = vector.shape_cast %65 : vector<1xf32> to vector<1x1x1xf32>
      %67 = vector.extract %66[0, 0, 0] : f32 from vector<1x1x1xf32>
      %c0_41 = arith.constant 0 : index
      %c0_42 = arith.constant 0 : index
      %68 = vector.load %arg10[%c0_41, %c0_42] : memref<512x1xf32, #tpu.memory_space<vmem>>, vector<512x1xf32>
      %69 = vector.shape_cast %68 : vector<512x1xf32> to vector<1x512x1xf32>
      %cst_43 = arith.constant dense<0.000000e+00> : vector<1xf32>
      %70 = vector.multi_reduction <add>, %69, %cst_43 [1, 2] : vector<1x512x1xf32> to vector<1xf32>
      %71 = vector.shape_cast %70 : vector<1xf32> to vector<1x1x1xf32>
      %72 = vector.extract %71[0, 0, 0] : f32 from vector<1x1x1xf32>
      %c0_44 = arith.constant 0 : index
      %c0_45 = arith.constant 0 : index
      %73 = vector.load %arg11[%c0_44, %c0_45] : memref<512x1xf32, #tpu.memory_space<vmem>>, vector<512x1xf32>
      %74 = vector.shape_cast %73 : vector<512x1xf32> to vector<1x512x1xf32>
      %cst_46 = arith.constant dense<0.000000e+00> : vector<1xf32>
      %75 = vector.multi_reduction <add>, %74, %cst_46 [1, 2] : vector<1x512x1xf32> to vector<1xf32>
      %76 = vector.shape_cast %75 : vector<1xf32> to vector<1x1x1xf32>
      %77 = vector.extract %76[0, 0, 0] : f32 from vector<1x1x1xf32>
      %cst_47 = arith.constant 0.00166666671 : f32
      %78 = arith.mulf %72, %cst_47 : f32
      %cst_48 = arith.constant 2.500000e-03 : f32
      %79 = arith.mulf %59, %cst_48 : f32
      %80 = arith.addf %78, %79 : f32
      %cst_49 = arith.constant 0.00166666671 : f32
      %81 = arith.mulf %77, %cst_49 : f32
      %cst_50 = arith.constant 0.00166666671 : f32
      %82 = arith.mulf %67, %cst_50 : f32
      %83 = arith.addf %81, %82 : f32
      %c0_51 = arith.constant 0 : index
      %c0_52 = arith.constant 0 : index
      %84 = vector.load %arg4[%c0_51, %c0_52] : memref<24x896xf32, #tpu.memory_space<vmem>>, vector<24x896xf32>
      %85 = vector.extract_strided_slice %84 {offsets = [0, 0], sizes = [3, 896], strides = [1, 1]} : vector<24x896xf32> to vector<3x896xf32>
      %86 = vector.extract_strided_slice %84 {offsets = [3, 0], sizes = [3, 896], strides = [1, 1]} : vector<24x896xf32> to vector<3x896xf32>
      %87 = vector.extract_strided_slice %84 {offsets = [6, 0], sizes = [3, 896], strides = [1, 1]} : vector<24x896xf32> to vector<3x896xf32>
      %88 = vector.extract_strided_slice %84 {offsets = [9, 0], sizes = [3, 896], strides = [1, 1]} : vector<24x896xf32> to vector<3x896xf32>
      %89 = vector.extract_strided_slice %84 {offsets = [12, 0], sizes = [3, 896], strides = [1, 1]} : vector<24x896xf32> to vector<3x896xf32>
      %90 = vector.extract_strided_slice %84 {offsets = [15, 0], sizes = [3, 896], strides = [1, 1]} : vector<24x896xf32> to vector<3x896xf32>
      %91 = arith.subf %85, %86 : vector<3x896xf32>
      %92 = arith.mulf %91, %91 : vector<3x896xf32>
      %cst_53 = arith.constant dense<0.000000e+00> : vector<896xf32>
      %93 = vector.multi_reduction <add>, %92, %cst_53 [0] : vector<3x896xf32> to vector<896xf32>
      %94 = vector.shape_cast %93 : vector<896xf32> to vector<1x896xf32>
      %95 = math.sqrt %94 : vector<1x896xf32>
      %96 = arith.subf %86, %87 : vector<3x896xf32>
      %97 = arith.mulf %96, %96 : vector<3x896xf32>
      %cst_54 = arith.constant dense<0.000000e+00> : vector<896xf32>
      %98 = vector.multi_reduction <add>, %97, %cst_54 [0] : vector<3x896xf32> to vector<896xf32>
      %99 = vector.shape_cast %98 : vector<896xf32> to vector<1x896xf32>
      %100 = math.sqrt %99 : vector<1x896xf32>
      %101 = arith.subf %87, %85 : vector<3x896xf32>
      %102 = arith.mulf %101, %101 : vector<3x896xf32>
      %cst_55 = arith.constant dense<0.000000e+00> : vector<896xf32>
      %103 = vector.multi_reduction <add>, %102, %cst_55 [0] : vector<3x896xf32> to vector<896xf32>
      %104 = vector.shape_cast %103 : vector<896xf32> to vector<1x896xf32>
      %105 = math.sqrt %104 : vector<1x896xf32>
      %106 = arith.subf %95, %100 : vector<1x896xf32>
      %107 = arith.mulf %106, %106 : vector<1x896xf32>
      %108 = vector.shape_cast %107 : vector<1x896xf32> to vector<1x1x896xf32>
      %cst_56 = arith.constant dense<0.000000e+00> : vector<1xf32>
      %109 = vector.multi_reduction <add>, %108, %cst_56 [1, 2] : vector<1x1x896xf32> to vector<1xf32>
      %110 = vector.shape_cast %109 : vector<1xf32> to vector<1x1x1xf32>
      %111 = vector.extract %110[0, 0, 0] : f32 from vector<1x1x1xf32>
      %112 = arith.subf %100, %105 : vector<1x896xf32>
      %113 = arith.mulf %112, %112 : vector<1x896xf32>
      %114 = vector.shape_cast %113 : vector<1x896xf32> to vector<1x1x896xf32>
      %cst_57 = arith.constant dense<0.000000e+00> : vector<1xf32>
      %115 = vector.multi_reduction <add>, %114, %cst_57 [1, 2] : vector<1x1x896xf32> to vector<1xf32>
      %116 = vector.shape_cast %115 : vector<1xf32> to vector<1x1x1xf32>
      %117 = vector.extract %116[0, 0, 0] : f32 from vector<1x1x1xf32>
      %118 = arith.addf %111, %117 : f32
      %119 = arith.subf %105, %95 : vector<1x896xf32>
      %120 = arith.mulf %119, %119 : vector<1x896xf32>
      %121 = vector.shape_cast %120 : vector<1x896xf32> to vector<1x1x896xf32>
      %cst_58 = arith.constant dense<0.000000e+00> : vector<1xf32>
      %122 = vector.multi_reduction <add>, %121, %cst_58 [1, 2] : vector<1x1x896xf32> to vector<1xf32>
      %123 = vector.shape_cast %122 : vector<1xf32> to vector<1x1x1xf32>
      %124 = vector.extract %123[0, 0, 0] : f32 from vector<1x1x1xf32>
      %125 = arith.addf %118, %124 : f32
      %cst_59 = arith.constant 1.250000e-03 : f32
      %126 = arith.mulf %125, %cst_59 : f32
      %127 = arith.subf %85, %88 : vector<3x896xf32>
      %128 = arith.subf %86, %89 : vector<3x896xf32>
      %129 = arith.subf %87, %90 : vector<3x896xf32>
      %130 = arith.subf %127, %128 : vector<3x896xf32>
      %131 = math.absf %130 : vector<3x896xf32>
      %132 = vector.shape_cast %131 : vector<3x896xf32> to vector<1x3x896xf32>
      %cst_60 = arith.constant dense<0.000000e+00> : vector<1xf32>
      %133 = vector.multi_reduction <add>, %132, %cst_60 [1, 2] : vector<1x3x896xf32> to vector<1xf32>
      %134 = vector.shape_cast %133 : vector<1xf32> to vector<1x1x1xf32>
      %135 = vector.extract %134[0, 0, 0] : f32 from vector<1x1x1xf32>
      %136 = arith.subf %128, %129 : vector<3x896xf32>
      %137 = math.absf %136 : vector<3x896xf32>
      %138 = vector.shape_cast %137 : vector<3x896xf32> to vector<1x3x896xf32>
      %cst_61 = arith.constant dense<0.000000e+00> : vector<1xf32>
      %139 = vector.multi_reduction <add>, %138, %cst_61 [1, 2] : vector<1x3x896xf32> to vector<1xf32>
      %140 = vector.shape_cast %139 : vector<1xf32> to vector<1x1x1xf32>
      %141 = vector.extract %140[0, 0, 0] : f32 from vector<1x1x1xf32>
      %142 = arith.addf %135, %141 : f32
      %143 = arith.subf %129, %127 : vector<3x896xf32>
      %144 = math.absf %143 : vector<3x896xf32>
      %145 = vector.shape_cast %144 : vector<3x896xf32> to vector<1x3x896xf32>
      %cst_62 = arith.constant dense<0.000000e+00> : vector<1xf32>
      %146 = vector.multi_reduction <add>, %145, %cst_62 [1, 2] : vector<1x3x896xf32> to vector<1xf32>
      %147 = vector.shape_cast %146 : vector<1xf32> to vector<1x1x1xf32>
      %148 = vector.extract %147[0, 0, 0] : f32 from vector<1x1x1xf32>
      %149 = arith.addf %142, %148 : f32
      %cst_63 = arith.constant 4.16666677E-4 : f32
      %150 = arith.mulf %149, %cst_63 : f32
      %c0_64 = arith.constant 0 : index
      %c0_65 = arith.constant 0 : index
      %151 = vector.load %arg5[%c0_64, %c0_65] : memref<16x640xf32, #tpu.memory_space<vmem>>, vector<16x640xf32>
      %152 = vector.extract_strided_slice %151 {offsets = [0, 0], sizes = [3, 640], strides = [1, 1]} : vector<16x640xf32> to vector<3x640xf32>
      %153 = vector.extract_strided_slice %151 {offsets = [3, 0], sizes = [3, 640], strides = [1, 1]} : vector<16x640xf32> to vector<3x640xf32>
      %154 = vector.extract_strided_slice %151 {offsets = [6, 0], sizes = [3, 640], strides = [1, 1]} : vector<16x640xf32> to vector<3x640xf32>
      %155 = vector.extract_strided_slice %151 {offsets = [9, 0], sizes = [3, 640], strides = [1, 1]} : vector<16x640xf32> to vector<3x640xf32>
      %156 = arith.subf %154, %155 : vector<3x640xf32>
      %157 = arith.mulf %156, %156 : vector<3x640xf32>
      %158 = vector.shape_cast %157 : vector<3x640xf32> to vector<1x3x640xf32>
      %cst_66 = arith.constant dense<0.000000e+00> : vector<1xf32>
      %159 = vector.multi_reduction <add>, %158, %cst_66 [1, 2] : vector<1x3x640xf32> to vector<1xf32>
      %160 = vector.shape_cast %159 : vector<1xf32> to vector<1x1x1xf32>
      %161 = vector.extract %160[0, 0, 0] : f32 from vector<1x1x1xf32>
      %cst_67 = arith.constant 5.55555569E-4 : f32
      %162 = arith.mulf %161, %cst_67 : f32
      %163 = arith.subf %152, %153 : vector<3x640xf32>
      %164 = arith.mulf %163, %155 : vector<3x640xf32>
      %cst_68 = arith.constant dense<0.000000e+00> : vector<640xf32>
      %165 = vector.multi_reduction <add>, %164, %cst_68 [0] : vector<3x640xf32> to vector<640xf32>
      %166 = vector.shape_cast %165 : vector<640xf32> to vector<1x640xf32>
      %cst_69 = arith.constant 0.000000e+00 : f32
      %167 = vector.broadcast %cst_69 : f32 to vector<1x640xf32>
      %168 = arith.minimumf %166, %167 : vector<1x640xf32>
      %169 = math.absf %168 : vector<1x640xf32>
      %170 = vector.shape_cast %169 : vector<1x640xf32> to vector<1x1x640xf32>
      %cst_70 = arith.constant dense<0.000000e+00> : vector<1xf32>
      %171 = vector.multi_reduction <add>, %170, %cst_70 [1, 2] : vector<1x1x640xf32> to vector<1xf32>
      %172 = vector.shape_cast %171 : vector<1xf32> to vector<1x1x1xf32>
      %173 = vector.extract %172[0, 0, 0] : f32 from vector<1x1x1xf32>
      %cst_71 = arith.constant 0.00166666671 : f32
      %174 = arith.mulf %173, %cst_71 : f32
      %175 = vector.broadcast %80 : f32 to vector<1x128xf32>
      %c0_72 = arith.constant 0 : index
      %c0_73 = arith.constant 0 : index
      %176 = vector.load %arg6[%c0_72, %c0_73] : memref<8x128xf32, #tpu.memory_space<vmem>>, vector<1x128xf32>
      tpu.vector_store %arg6[%c0_72, %c0_73], %175 {strides = array<i32>} : memref<8x128xf32, #tpu.memory_space<vmem>>, vector<1x128xf32>,
      %177 = vector.broadcast %126 : f32 to vector<1x128xf32>
      %c1 = arith.constant 1 : index
      %c0_74 = arith.constant 0 : index
      %178 = vector.load %arg6[%c1, %c0_74] : memref<8x128xf32, #tpu.memory_space<vmem>>, vector<1x128xf32>
      tpu.vector_store %arg6[%c1, %c0_74], %177 {strides = array<i32>} : memref<8x128xf32, #tpu.memory_space<vmem>>, vector<1x128xf32>,
      %179 = vector.broadcast %150 : f32 to vector<1x128xf32>
      %c2 = arith.constant 2 : index
      %c0_75 = arith.constant 0 : index
      %180 = vector.load %arg6[%c2, %c0_75] : memref<8x128xf32, #tpu.memory_space<vmem>>, vector<1x128xf32>
      tpu.vector_store %arg6[%c2, %c0_75], %179 {strides = array<i32>} : memref<8x128xf32, #tpu.memory_space<vmem>>, vector<1x128xf32>,
      %181 = vector.broadcast %162 : f32 to vector<1x128xf32>
      %c3 = arith.constant 3 : index
      %c0_76 = arith.constant 0 : index
      %182 = vector.load %arg6[%c3, %c0_76] : memref<8x128xf32, #tpu.memory_space<vmem>>, vector<1x128xf32>
      tpu.vector_store %arg6[%c3, %c0_76], %181 {strides = array<i32>} : memref<8x128xf32, #tpu.memory_space<vmem>>, vector<1x128xf32>,
      %183 = vector.broadcast %174 : f32 to vector<1x128xf32>
      %c4 = arith.constant 4 : index
      %c0_77 = arith.constant 0 : index
      %184 = vector.load %arg6[%c4, %c0_77] : memref<8x128xf32, #tpu.memory_space<vmem>>, vector<1x128xf32>
      tpu.vector_store %arg6[%c4, %c0_77], %183 {strides = array<i32>} : memref<8x128xf32, #tpu.memory_space<vmem>>, vector<1x128xf32>,
      %185 = vector.broadcast %83 : f32 to vector<1x128xf32>
      %c5 = arith.constant 5 : index
      %c0_78 = arith.constant 0 : index
      %186 = vector.load %arg6[%c5, %c0_78] : memref<8x128xf32, #tpu.memory_space<vmem>>, vector<1x128xf32>
      tpu.vector_store %arg6[%c5, %c0_78], %185 {strides = array<i32>} : memref<8x128xf32, #tpu.memory_space<vmem>>, vector<1x128xf32>,
      %cst_79 = arith.constant 0.000000e+00 : f32
      %187 = vector.broadcast %cst_79 : f32 to vector<1x128xf32>
      %c6 = arith.constant 6 : index
      %c0_80 = arith.constant 0 : index
      %188 = vector.load %arg6[%c6, %c0_80] : memref<8x128xf32, #tpu.memory_space<vmem>>, vector<1x128xf32>
      tpu.vector_store %arg6[%c6, %c0_80], %187 {strides = array<i32>} : memref<8x128xf32, #tpu.memory_space<vmem>>, vector<1x128xf32>,
      %cst_81 = arith.constant 0.000000e+00 : f32
      %189 = vector.broadcast %cst_81 : f32 to vector<1x128xf32>
      %c7 = arith.constant 7 : index
      %c0_82 = arith.constant 0 : index
      %190 = vector.load %arg6[%c7, %c0_82] : memref<8x128xf32, #tpu.memory_space<vmem>>, vector<1x128xf32>
      tpu.vector_store %arg6[%c7, %c0_82], %189 {strides = array<i32>} : memref<8x128xf32, #tpu.memory_space<vmem>>, vector<1x128xf32>,
    } else {
    }
    return
  }
  func.func @transform_0(%arg0: i32) -> (i32, i32) {
    %c0_i32 = arith.constant 0 : i32
    %c0_i32_0 = arith.constant 0 : i32
    return %arg0, %c0_i32 : i32, i32
  }
  func.func @transform_1(%arg0: i32) -> (i32, i32) {
    %c0_i32 = arith.constant 0 : i32
    %c0_i32_0 = arith.constant 0 : i32
    %c0_i32_1 = arith.constant 0 : i32
    return %c0_i32, %c0_i32_0 : i32, i32
  }
  func.func @transform_2(%arg0: i32) -> (i32, i32) {
    %c0_i32 = arith.constant 0 : i32
    %c0_i32_0 = arith.constant 0 : i32
    %c0_i32_1 = arith.constant 0 : i32
    return %c0_i32, %c0_i32_0 : i32, i32
  }
  func.func @transform_3(%arg0: i32) -> (i32, i32) {
    %c0_i32 = arith.constant 0 : i32
    %c0_i32_0 = arith.constant 0 : i32
    %c0_i32_1 = arith.constant 0 : i32
    return %c0_i32, %c0_i32_0 : i32, i32
  }
  func.func @transform_4(%arg0: i32) -> (i32, i32) {
    %c0_i32 = arith.constant 0 : i32
    %c0_i32_0 = arith.constant 0 : i32
    %c0_i32_1 = arith.constant 0 : i32
    return %c0_i32, %c0_i32_0 : i32, i32
  }
  func.func @transform_5(%arg0: i32) -> (i32, i32) {
    %c0_i32 = arith.constant 0 : i32
    %c0_i32_0 = arith.constant 0 : i32
    %c0_i32_1 = arith.constant 0 : i32
    return %c0_i32, %c0_i32_0 : i32, i32
  }
}

</mosaic_0001>

<bundles_post_ra>
// kernel: smpl2mesh_loss.1
= control target key start
LH: loop header
LB: loop body
LE: loop exit
PB: predicated region body
PF: predicated region fallthrough
CT: control target
= control target key end

     0   :  { %s5961_s18 = smov 0   ;;  %s10509_s0 = inlined_call_operand.vmem [shape: f32[1024,8], index: 0, kind: input, shape index: {}]   ;;  %s10510_s1 = inlined_call_operand.vmem [shape: f32[8,512], index: 1, kind: input, shape index: {}]   ;;  %s10511_s2 = inlined_call_operand.vmem [shape: f32[8,640], index: 2, kind: input, shape index: {}]   ;;  %s10512_s3 = inlined_call_operand.vmem [shape: f32[24,896], index: 3, kind: input, shape index: {}]   ;;  %s10513_s4 = inlined_call_operand.vmem [shape: f32[16,640], index: 4, kind: input, shape index: {}]   ;;  %s10514_s5 = inlined_call_operand.vmem [shape: f32[8,128], index: 5, kind: output, shape index: {}]  }
   0x1 LB: > { %s5967_s19 = sadd.s32 4294967295, %s5914_s18   ;;  %p5777_p0 = scmp.ge.s32.totalorder %s5914_s18, 1  ;;  %s5914_s18 = sphi %s5961_s18, %s15_s18  }
   0x2   : > { %p183_p1 = scmp.lt.s32.totalorder %s5914_s18, 3 }
   0x4   : > { %p184_p2 = pnand %p5777_p0, %p183_p1 }
   0x6   : > { %187 = sbr.rel (%p184_p2) target bundleno = 2055 (0x807), region = 40 }
   0xb   : > { %s5778_s20 = sshll.u32 %s5967_s19, 6  ;;  %p5780_p4 = scmp.ne.s32.totalorder %s5967_s19, 0 }
   0xc   : > { %p207_p3 = scmp.lt.s32.totalorder %s5778_s20, 127 }
   0xd   : > { %215 = sbr.rel (%p5780_p4) target bundleno = 88 (0x58), region = 44 }
   0xe   : > { %s11713_s20 = smov (!%p207_p3, %s5778_s20), 127 }
   0xf   : > { %s5779_s21 = sshll.u32 %s11713_s20, 3 }
  0x10   : > { %s5975_s24 = scalar_lea.vmem %s10509_s0, %s5779_s21 }
  0x12   : > { %vm225_vm0 = vcmask 7168   ;;  %v5924_v0 = vmov 3e+37   ;;  %v5925_v1 = vmov 0.0  }
  0x13   : > { %216 = vst [vmem:[#allocation3] sm:$0xff] %v5924_v0  ;;  %217 = vst [vmem:[#allocation3 + $0x8] sm:$0xff] %v5924_v0 }
  0x14   : > { %218 = vst [vmem:[#allocation3 + $0x10] sm:$0xff] %v5924_v0  ;;  %219 = vst [vmem:[#allocation3 + $0x18] sm:$0xff] %v5924_v0 }
  0x15   : > { %220 = vst [vmem:[#allocation4] sm:$0xff] %v5924_v0  ;;  %221 = vst [vmem:[#allocation4 + $0x8] sm:$0xff] %v5924_v0 }
  0x16   : > { %222 = vst [vmem:[#allocation4 + $0x10] sm:$0xff] %v5924_v0  ;;  %223 = vst [vmem:[#allocation4 + $0x18] sm:$0xff] %v5924_v0 }
  0x17   : > { %224 = vst [vmem:[#allocation4 + $0x20] sm:$0xff] %v5924_v0  ;;  %226 = vst.msk [vmem:[#allocation5] sm:$0xff] %vm225_vm0, %v5925_v1 }
  0x18   : > { %227 = vst.msk [vmem:[#allocation5 + $0x8] sm:$0xff] %vm225_vm0, %v5925_v1  ;;  %228 = vst.msk [vmem:[#allocation5 + $0x10] sm:$0xff] %vm225_vm0, %v5925_v1 }
  0x19   : > { %229 = vst.msk [vmem:[#allocation5 + $0x18] sm:$0xff] %vm225_vm0, %v5925_v1  ;;  %230 = vst.msk [vmem:[#allocation5 + $0x20] sm:$0xff] %vm225_vm0, %v5925_v1 }
  0x1a   : > { %231 = vst.msk [vmem:[#allocation5 + $0x28] sm:$0xff] %vm225_vm0, %v5925_v1  ;;  %232 = vst.msk [vmem:[#allocation5 + $0x30] sm:$0xff] %vm225_vm0, %v5925_v1 }
  0x1b   : > { %233 = vst.msk [vmem:[#allocation5 + $0x38] sm:$0xff] %vm225_vm0, %v5925_v1  ;;  %234 = vst.msk [vmem:[#allocation5 + $0x40] sm:$0xff] %vm225_vm0, %v5925_v1 }
  0x1c   : > { %235 = vst.msk [vmem:[#allocation5 + $0x48] sm:$0xff] %vm225_vm0, %v5925_v1  ;;  %236 = vst.msk [vmem:[#allocation5 + $0x50] sm:$0xff] %vm225_vm0, %v5925_v1 }
  0x1d   : > { %237 = vst.msk [vmem:[#allocation5 + $0x58] sm:$0xff] %vm225_vm0, %v5925_v1  ;;  %238 = vst.msk [vmem:[#allocation5 + $0x60] sm:$0xff] %vm225_vm0, %v5925_v1 }
  0x1e   : > { %239 = vst.msk [vmem:[#allocation5 + $0x68] sm:$0xff] %vm225_vm0, %v5925_v1  ;;  %240 = vst.msk [vmem:[#allocation5 + $0x70] sm:$0xff] %vm225_vm0, %v5925_v1 }
  0x1f   : > { %241 = vst.msk [vmem:[#allocation5 + $0x78] sm:$0xff] %vm225_vm0, %v5925_v1  ;;  %242 = vst.msk [vmem:[#allocation5 + $0x80] sm:$0xff] %vm225_vm0, %v5925_v1 }
  0x20   : > { %243 = vst.msk [vmem:[#allocation5 + $0x88] sm:$0xff] %vm225_vm0, %v5925_v1  ;;  %244 = vst.msk [vmem:[#allocation5 + $0x90] sm:$0xff] %vm225_vm0, %v5925_v1 }
  0x21   : > { %245 = vst.msk [vmem:[#allocation5 + $0x98] sm:$0xff] %vm225_vm0, %v5925_v1  ;;  %246 = vst.msk [vmem:[#allocation5 + $0xa0] sm:$0xff] %vm225_vm0, %v5925_v1 }
  0x22   : > { %247 = vst.msk [vmem:[#allocation5 + $0xa8] sm:$0xff] %vm225_vm0, %v5925_v1  ;;  %248 = vst.msk [vmem:[#allocation5 + $0xb0] sm:$0xff] %vm225_vm0, %v5925_v1 }
  0x23   : > { %249 = vst.msk [vmem:[#allocation5 + $0xb8] sm:$0xff] %vm225_vm0, %v5925_v1  ;;  %250 = vst.msk [vmem:[#allocation5 + $0xc0] sm:$0xff] %vm225_vm0, %v5925_v1 }
  0x24   : > { %251 = vst.msk [vmem:[#allocation5 + $0xc8] sm:$0xff] %vm225_vm0, %v5925_v1  ;;  %252 = vst.msk [vmem:[#allocation5 + $0xd0] sm:$0xff] %vm225_vm0, %v5925_v1 }
  0x25   : > { %253 = vst.msk [vmem:[#allocation5 + $0xd8] sm:$0xff] %vm225_vm0, %v5925_v1  ;;  %254 = vst.msk [vmem:[#allocation5 + $0xe0] sm:$0xff] %vm225_vm0, %v5925_v1 }
  0x26   : > { %255 = vst.msk [vmem:[#allocation5 + $0xe8] sm:$0xff] %vm225_vm0, %v5925_v1  ;;  %256 = vst.msk [vmem:[#allocation5 + $0xf0] sm:$0xff] %vm225_vm0, %v5925_v1 }
  0x27   : > { %257 = vst.msk [vmem:[#allocation5 + $0xf8] sm:$0xff] %vm225_vm0, %v5925_v1  ;;  %258 = vst.msk [vmem:[#allocation5 + $0x100] sm:$0xff] %vm225_vm0, %v5925_v1 }
  0x28   : > { %259 = vst.msk [vmem:[#allocation5 + $0x108] sm:$0xff] %vm225_vm0, %v5925_v1  ;;  %260 = vst.msk [vmem:[#allocation5 + $0x110] sm:$0xff] %vm225_vm0, %v5925_v1 }
  0x29   : > { %261 = vst.msk [vmem:[#allocation5 + $0x118] sm:$0xff] %vm225_vm0, %v5925_v1  ;;  %262 = vst.msk [vmem:[#allocation5 + $0x120] sm:$0xff] %vm225_vm0, %v5925_v1 }
  0x2a   : > { %263 = vst.msk [vmem:[#allocation5 + $0x128] sm:$0xff] %vm225_vm0, %v5925_v1  ;;  %264 = vst.msk [vmem:[#allocation5 + $0x130] sm:$0xff] %vm225_vm0, %v5925_v1 }
  0x2b   : > { %265 = vst.msk [vmem:[#allocation5 + $0x138] sm:$0xff] %vm225_vm0, %v5925_v1  ;;  %266 = vst.msk [vmem:[#allocation5 + $0x140] sm:$0xff] %vm225_vm0, %v5925_v1 }
  0x2c   : > { %267 = vst.msk [vmem:[#allocation5 + $0x148] sm:$0xff] %vm225_vm0, %v5925_v1  ;;  %268 = vst.msk [vmem:[#allocation5 + $0x150] sm:$0xff] %vm225_vm0, %v5925_v1 }
  0x2d   : > { %269 = vst.msk [vmem:[#allocation5 + $0x158] sm:$0xff] %vm225_vm0, %v5925_v1  ;;  %270 = vst.msk [vmem:[#allocation5 + $0x160] sm:$0xff] %vm225_vm0, %v5925_v1 }
  0x2e   : > { %271 = vst.msk [vmem:[#allocation5 + $0x168] sm:$0xff] %vm225_vm0, %v5925_v1  ;;  %272 = vst.msk [vmem:[#allocation5 + $0x170] sm:$0xff] %vm225_vm0, %v5925_v1 }
  0x2f   : > { %273 = vst.msk [vmem:[#allocation5 + $0x178] sm:$0xff] %vm225_vm0, %v5925_v1  ;;  %274 = vst.msk [vmem:[#allocation5 + $0x180] sm:$0xff] %vm225_vm0, %v5925_v1 }
  0x30   : > { %275 = vst.msk [vmem:[#allocation5 + $0x188] sm:$0xff] %vm225_vm0, %v5925_v1  ;;  %276 = vst.msk [vmem:[#allocation5 + $0x190] sm:$0xff] %vm225_vm0, %v5925_v1 }
  0x31   : > { %277 = vst.msk [vmem:[#allocation5 + $0x198] sm:$0xff] %vm225_vm0, %v5925_v1  ;;  %278 = vst.msk [vmem:[#allocation5 + $0x1a0] sm:$0xff] %vm225_vm0, %v5925_v1 }
  0x32   : > { %279 = vst.msk [vmem:[#allocation5 + $0x1a8] sm:$0xff] %vm225_vm0, %v5925_v1  ;;  %280 = vst.msk [vmem:[#allocation5 + $0x1b0] sm:$0xff] %vm225_vm0, %v5925_v1 }
  0x33   : > { %281 = vst.msk [vmem:[#allocation5 + $0x1b8] sm:$0xff] %vm225_vm0, %v5925_v1  ;;  %282 = vst.msk [vmem:[#allocation5 + $0x1c0] sm:$0xff] %vm225_vm0, %v5925_v1 }
  0x34   : > { %283 = vst.msk [vmem:[#allocation5 + $0x1c8] sm:$0xff] %vm225_vm0, %v5925_v1  ;;  %284 = vst.msk [vmem:[#allocation5 + $0x1d0] sm:$0xff] %vm225_vm0, %v5925_v1 }
  0x35   : > { %285 = vst.msk [vmem:[#allocation5 + $0x1d8] sm:$0xff] %vm225_vm0, %v5925_v1  ;;  %286 = vst.msk [vmem:[#allocation5 + $0x1e0] sm:$0xff] %vm225_vm0, %v5925_v1 }
  0x36   : > { %287 = vst.msk [vmem:[#allocation5 + $0x1e8] sm:$0xff] %vm225_vm0, %v5925_v1  ;;  %288 = vst.msk [vmem:[#allocation5 + $0x1f0] sm:$0xff] %vm225_vm0, %v5925_v1 }
  0x37   : > { %289 = vst.msk [vmem:[#allocation5 + $0x1f8] sm:$0xff] %vm225_vm0, %v5925_v1  ;;  %290 = vst.msk [vmem:[#allocation6] sm:$0xff] %vm225_vm0, %v5925_v1 }
  0x38   : > { %291 = vst.msk [vmem:[#allocation6 + $0x8] sm:$0xff] %vm225_vm0, %v5925_v1  ;;  %292 = vst.msk [vmem:[#allocation6 + $0x10] sm:$0xff] %vm225_vm0, %v5925_v1 }
  0x39   : > { %293 = vst.msk [vmem:[#allocation6 + $0x18] sm:$0xff] %vm225_vm0, %v5925_v1  ;;  %294 = vst.msk [vmem:[#allocation6 + $0x20] sm:$0xff] %vm225_vm0, %v5925_v1 }
  0x3a   : > { %295 = vst.msk [vmem:[#allocation6 + $0x28] sm:$0xff] %vm225_vm0, %v5925_v1  ;;  %296 = vst.msk [vmem:[#allocation6 + $0x30] sm:$0xff] %vm225_vm0, %v5925_v1 }
  0x3b   : > { %297 = vst.msk [vmem:[#allocation6 + $0x38] sm:$0xff] %vm225_vm0, %v5925_v1  ;;  %298 = vst.msk [vmem:[#allocation6 + $0x40] sm:$0xff] %vm225_vm0, %v5925_v1 }
  0x3c   : > { %299 = vst.msk [vmem:[#allocation6 + $0x48] sm:$0xff] %vm225_vm0, %v5925_v1  ;;  %300 = vst.msk [vmem:[#allocation6 + $0x50] sm:$0xff] %vm225_vm0, %v5925_v1 }
  0x3d   : > { %301 = vst.msk [vmem:[#allocation6 + $0x58] sm:$0xff] %vm225_vm0, %v5925_v1  ;;  %302 = vst.msk [vmem:[#allocation6 + $0x60] sm:$0xff] %vm225_vm0, %v5925_v1 }
  0x3e   : > { %303 = vst.msk [vmem:[#allocation6 + $0x68] sm:$0xff] %vm225_vm0, %v5925_v1  ;;  %304 = vst.msk [vmem:[#allocation6 + $0x70] sm:$0xff] %vm225_vm0, %v5925_v1 }
  0x3f   : > { %305 = vst.msk [vmem:[#allocation6 + $0x78] sm:$0xff] %vm225_vm0, %v5925_v1  ;;  %306 = vst.msk [vmem:[#allocation6 + $0x80] sm:$0xff] %vm225_vm0, %v5925_v1 }
  0x40   : > { %307 = vst.msk [vmem:[#allocation6 + $0x88] sm:$0xff] %vm225_vm0, %v5925_v1  ;;  %308 = vst.msk [vmem:[#allocation6 + $0x90] sm:$0xff] %vm225_vm0, %v5925_v1 }
  0x41   : > { %309 = vst.msk [vmem:[#allocation6 + $0x98] sm:$0xff] %vm225_vm0, %v5925_v1  ;;  %310 = vst.msk [vmem:[#allocation6 + $0xa0] sm:$0xff] %vm225_vm0, %v5925_v1 }
  0x42   : > { %311 = vst.msk [vmem:[#allocation6 + $0xa8] sm:$0xff] %vm225_vm0, %v5925_v1  ;;  %312 = vst.msk [vmem:[#allocation6 + $0xb0] sm:$0xff] %vm225_vm0, %v5925_v1 }
  0x43   : > { %313 = vst.msk [vmem:[#allocation6 + $0xb8] sm:$0xff] %vm225_vm0, %v5925_v1  ;;  %314 = vst.msk [vmem:[#allocation6 + $0xc0] sm:$0xff] %vm225_vm0, %v5925_v1 }
  0x44   : > { %315 = vst.msk [vmem:[#allocation6 + $0xc8] sm:$0xff] %vm225_vm0, %v5925_v1  ;;  %316 = vst.msk [vmem:[#allocation6 + $0xd0] sm:$0xff] %vm225_vm0, %v5925_v1 }
  0x45   : > { %317 = vst.msk [vmem:[#allocation6 + $0xd8] sm:$0xff] %vm225_vm0, %v5925_v1  ;;  %318 = vst.msk [vmem:[#allocation6 + $0xe0] sm:$0xff] %vm225_vm0, %v5925_v1 }
  0x46   : > { %319 = vst.msk [vmem:[#allocation6 + $0xe8] sm:$0xff] %vm225_vm0, %v5925_v1  ;;  %320 = vst.msk [vmem:[#allocation6 + $0xf0] sm:$0xff] %vm225_vm0, %v5925_v1 }
  0x47   : > { %321 = vst.msk [vmem:[#allocation6 + $0xf8] sm:$0xff] %vm225_vm0, %v5925_v1  ;;  %322 = vst.msk [vmem:[#allocation6 + $0x100] sm:$0xff] %vm225_vm0, %v5925_v1 }
  0x48   : > { %323 = vst.msk [vmem:[#allocation6 + $0x108] sm:$0xff] %vm225_vm0, %v5925_v1  ;;  %324 = vst.msk [vmem:[#allocation6 + $0x110] sm:$0xff] %vm225_vm0, %v5925_v1 }
  0x49   : > { %325 = vst.msk [vmem:[#allocation6 + $0x118] sm:$0xff] %vm225_vm0, %v5925_v1  ;;  %326 = vst.msk [vmem:[#allocation6 + $0x120] sm:$0xff] %vm225_vm0, %v5925_v1 }
  0x4a   : > { %327 = vst.msk [vmem:[#allocation6 + $0x128] sm:$0xff] %vm225_vm0, %v5925_v1  ;;  %328 = vst.msk [vmem:[#allocation6 + $0x130] sm:$0xff] %vm225_vm0, %v5925_v1 }
  0x4b   : > { %329 = vst.msk [vmem:[#allocation6 + $0x138] sm:$0xff] %vm225_vm0, %v5925_v1  ;;  %330 = vst.msk [vmem:[#allocation6 + $0x140] sm:$0xff] %vm225_vm0, %v5925_v1 }
  0x4c   : > { %331 = vst.msk [vmem:[#allocation6 + $0x148] sm:$0xff] %vm225_vm0, %v5925_v1  ;;  %332 = vst.msk [vmem:[#allocation6 + $0x150] sm:$0xff] %vm225_vm0, %v5925_v1 }
  0x4d   : > { %333 = vst.msk [vmem:[#allocation6 + $0x158] sm:$0xff] %vm225_vm0, %v5925_v1  ;;  %334 = vst.msk [vmem:[#allocation6 + $0x160] sm:$0xff] %vm225_vm0, %v5925_v1 }
  0x4e   : > { %335 = vst.msk [vmem:[#allocation6 + $0x168] sm:$0xff] %vm225_vm0, %v5925_v1  ;;  %336 = vst.msk [vmem:[#allocation6 + $0x170] sm:$0xff] %vm225_vm0, %v5925_v1 }
  0x4f   : > { %337 = vst.msk [vmem:[#allocation6 + $0x178] sm:$0xff] %vm225_vm0, %v5925_v1  ;;  %338 = vst.msk [vmem:[#allocation6 + $0x180] sm:$0xff] %vm225_vm0, %v5925_v1 }
  0x50   : > { %339 = vst.msk [vmem:[#allocation6 + $0x188] sm:$0xff] %vm225_vm0, %v5925_v1  ;;  %340 = vst.msk [vmem:[#allocation6 + $0x190] sm:$0xff] %vm225_vm0, %v5925_v1 }
  0x51   : > { %341 = vst.msk [vmem:[#allocation6 + $0x198] sm:$0xff] %vm225_vm0, %v5925_v1  ;;  %342 = vst.msk [vmem:[#allocation6 + $0x1a0] sm:$0xff] %vm225_vm0, %v5925_v1 }
  0x52   : > { %343 = vst.msk [vmem:[#allocation6 + $0x1a8] sm:$0xff] %vm225_vm0, %v5925_v1  ;;  %344 = vst.msk [vmem:[#allocation6 + $0x1b0] sm:$0xff] %vm225_vm0, %v5925_v1 }
  0x53   : > { %345 = vst.msk [vmem:[#allocation6 + $0x1b8] sm:$0xff] %vm225_vm0, %v5925_v1  ;;  %346 = vst.msk [vmem:[#allocation6 + $0x1c0] sm:$0xff] %vm225_vm0, %v5925_v1 }
  0x54   : > { %347 = vst.msk [vmem:[#allocation6 + $0x1c8] sm:$0xff] %vm225_vm0, %v5925_v1  ;;  %348 = vst.msk [vmem:[#allocation6 + $0x1d0] sm:$0xff] %vm225_vm0, %v5925_v1 }
  0x55   : > { %349 = vst.msk [vmem:[#allocation6 + $0x1d8] sm:$0xff] %vm225_vm0, %v5925_v1  ;;  %350 = vst.msk [vmem:[#allocation6 + $0x1e0] sm:$0xff] %vm225_vm0, %v5925_v1 }
  0x56   : > { %351 = vst.msk [vmem:[#allocation6 + $0x1e8] sm:$0xff] %vm225_vm0, %v5925_v1  ;;  %352 = vst.msk [vmem:[#allocation6 + $0x1f0] sm:$0xff] %vm225_vm0, %v5925_v1 }
  0x57   : > { %353 = vst.msk [vmem:[#allocation6 + $0x1f8] sm:$0xff] %vm225_vm0, %v5925_v1 }
  0x58 PF: > { %v6235_v2 = vld [vmem:[%s5975_s24 + $0x10] sm:$0xff]  ;;  %v6238_v3 = vld [vmem:[%s5975_s24] sm:$0xff]  ;;  %v5926_v4 = vmov 0   ;;  %v6243_v5 = vld [vmem:[%s5975_s24 + $0x18] sm:$0xff]  ;;  %s5781_s25 = sshll.u32 %s5967_s19, 9  ;;  %s7581_s26 = smov 0  }
  0x59   : > { %5847 = vset.pattern.permute.xlu1 %v5926_v4  ;;  %5846 = vset.pattern.permute.xlu0 %v5926_v4  ;;  %v6246_v6 = vld [vmem:[%s5975_s24 + $0x8] sm:$0xff]  ;;  %v6254_v8 = vld [vmem:[%s5975_s24 + $0x20] sm:$0xff]  ;;  %v6259_v9 = vld [vmem:[%s5975_s24 + $0x38] sm:$0xff] }
  0x5a   : > { %430 = vperm.xlu1 %5847, %v6235_v2   ;;  %420 = vperm.xlu0 %5846, %v6238_v3   ;;  %v6251_v7 = vld [vmem:[%s5975_s24 + $0x28] sm:$0xff]  ;;  %v6262_v10 = vld [vmem:[%s5975_s24 + $0x30] sm:$0xff]  ;;  %v6270_v12 = vld [vmem:[%s5975_s24 + $0x40] sm:$0xff] }
  0x5b   : > { %v6267_v11 = vld [vmem:[%s5975_s24 + $0x48] sm:$0xff]  ;;  %v6275_v13 = vld [vmem:[%s5975_s24 + $0x58] sm:$0xff]  ;;  %v6278_v14 = vld [vmem:[%s5975_s24 + $0x50] sm:$0xff] }
  0x5c   : > { %v6283_v15 = vld [vmem:[%s5975_s24 + $0x68] sm:$0xff]  ;;  %v6286_v16 = vld [vmem:[%s5975_s24 + $0x60] sm:$0xff]  ;;  %v6291_v17 = vld [vmem:[%s5975_s24 + $0x78] sm:$0xff] }
  0x5d   : > { %v6294_v18 = vld [vmem:[%s5975_s24 + $0x70] sm:$0xff]  ;;  %v6299_v19 = vld [vmem:[%s5975_s24 + $0x88] sm:$0xff]  ;;  %v6302_v20 = vld [vmem:[%s5975_s24 + $0x80] sm:$0xff] }
  0x5e   : > { %435 = vperm.xlu1 %5847, %v6243_v5   ;;  %425 = vperm.xlu0 %5846, %v6246_v6   ;;  %v6307_v21 = vld [vmem:[%s5975_s24 + $0x98] sm:$0xff]  ;;  %v6310_v22 = vld [vmem:[%s5975_s24 + $0x90] sm:$0xff]  ;;  %v6315_v23 = vld [vmem:[%s5975_s24 + $0xa8] sm:$0xff] }
  0x5f   : > { %v6318_v24 = vld [vmem:[%s5975_s24 + $0xa0] sm:$0xff]  ;;  %v6323_v25 = vld [vmem:[%s5975_s24 + $0xb8] sm:$0xff]  ;;  %v6326_v26 = vld [vmem:[%s5975_s24 + $0xb0] sm:$0xff] }
  0x60   : > { %v6331_v27 = vld [vmem:[%s5975_s24 + $0xc8] sm:$0xff]  ;;  %v6334_v28 = vld [vmem:[%s5975_s24 + $0xc0] sm:$0xff]  ;;  %v6339_v29 = vld [vmem:[%s5975_s24 + $0xd8] sm:$0xff] }
  0x61   : > { %v6342_v30 = vld [vmem:[%s5975_s24 + $0xd0] sm:$0xff]  ;;  %v6347_v31 = vld [vmem:[%s5975_s24 + $0xe8] sm:$0xff]  ;;  %v6350_v32 = vld [vmem:[%s5975_s24 + $0xe0] sm:$0xff] }
  0x62   : > { %445 = vperm.xlu1 %5847, %v6251_v7   ;;  %440 = vperm.xlu0 %5846, %v6254_v8   ;;  %v6355_v33 = vld [vmem:[%s5975_s24 + $0xf8] sm:$0xff]  ;;  %v6358_v34 = vld [vmem:[%s5975_s24 + $0xf0] sm:$0xff]  ;;  %v6363_v35 = vld [vmem:[%s5975_s24 + $0x108] sm:$0xff] }
  0x63   : > { %v6366_v36 = vld [vmem:[%s5975_s24 + $0x100] sm:$0xff]  ;;  %v6371_v37 = vld [vmem:[%s5975_s24 + $0x118] sm:$0xff]  ;;  %v6374_v38 = vld [vmem:[%s5975_s24 + $0x110] sm:$0xff] }
  0x64   : > { %v6379_v39 = vld [vmem:[%s5975_s24 + $0x128] sm:$0xff]  ;;  %v6382_v40 = vld [vmem:[%s5975_s24 + $0x120] sm:$0xff]  ;;  %v6387_v41 = vld [vmem:[%s5975_s24 + $0x138] sm:$0xff] }
  0x65   : > { %v6390_v42 = vld [vmem:[%s5975_s24 + $0x130] sm:$0xff]  ;;  %v6395_v43 = vld [vmem:[%s5975_s24 + $0x148] sm:$0xff]  ;;  %v6398_v44 = vld [vmem:[%s5975_s24 + $0x140] sm:$0xff] }
  0x66   : > { %455 = vperm.xlu1 %5847, %v6259_v9   ;;  %450 = vperm.xlu0 %5846, %v6262_v10   ;;  %v6403_v45 = vld [vmem:[%s5975_s24 + $0x158] sm:$0xff]  ;;  %v6406_v46 = vld [vmem:[%s5975_s24 + $0x150] sm:$0xff]  ;;  %v6411_v47 = vld [vmem:[%s5975_s24 + $0x168] sm:$0xff] }
  0x67   : > { %v6414_v48 = vld [vmem:[%s5975_s24 + $0x160] sm:$0xff]  ;;  %v6419_v49 = vld [vmem:[%s5975_s24 + $0x178] sm:$0xff]  ;;  %v6422_v50 = vld [vmem:[%s5975_s24 + $0x170] sm:$0xff] }
  0x68   : > { %v6427_v51 = vld [vmem:[%s5975_s24 + $0x188] sm:$0xff]  ;;  %v6430_v52 = vld [vmem:[%s5975_s24 + $0x180] sm:$0xff]  ;;  %v6435_v53 = vld [vmem:[%s5975_s24 + $0x198] sm:$0xff] }
  0x69   : > { %10632 = vst [vmem:[#allocation7_spill] sm:$0xff] %v6427_v51  ;;  %10633 = vst [vmem:[#allocation8_spill] sm:$0xff] %v6435_v53  ;;  %v6438_v54 = vld [vmem:[%s5975_s24 + $0x190] sm:$0xff]  ;;  %v6443_v55 = vld [vmem:[%s5975_s24 + $0x1a8] sm:$0xff] }
  0x6a   : > { %465 = vperm.xlu1 %5847, %v6267_v11   ;;  %460 = vperm.xlu0 %5846, %v6270_v12   ;;  %10634 = vst [vmem:[#allocation9_spill] sm:$0xff] %v6443_v55  ;;  %v6446_v56 = vld [vmem:[%s5975_s24 + $0x1a0] sm:$0xff]  ;;  %v6451_v57 = vld [vmem:[%s5975_s24 + $0x1b8] sm:$0xff]  ;;  %v6454_v58 = vld [vmem:[%s5975_s24 + $0x1b0] sm:$0xff] }
  0x6b   : > { %10635 = vst [vmem:[#allocation10_spill] sm:$0xff] %v6446_v56  ;;  %10636 = vst [vmem:[#allocation11_spill] sm:$0xff] %v6451_v57  ;;  %v6459_v59 = vld [vmem:[%s5975_s24 + $0x1c8] sm:$0xff]  ;;  %v6462_v60 = vld [vmem:[%s5975_s24 + $0x1c0] sm:$0xff] }
  0x6c   : > { %10637 = vst [vmem:[#allocation12_spill] sm:$0xff] %v6454_v58  ;;  %10638 = vst [vmem:[#allocation13_spill] sm:$0xff] %v6459_v59  ;;  %v6467_v61 = vld [vmem:[%s5975_s24 + $0x1d8] sm:$0xff]  ;;  %v6470_v62 = vld [vmem:[%s5975_s24 + $0x1d0] sm:$0xff] }
  0x6d   : > { %10639 = vst [vmem:[#allocation14_spill] sm:$0xff] %v6462_v60  ;;  %10640 = vst [vmem:[#allocation15_spill] sm:$0xff] %v6467_v61  ;;  %v6475_v63 = vld [vmem:[%s5975_s24 + $0x1e8] sm:$0xff]  ;;  %v6478_v0 = vld [vmem:[%s5975_s24 + $0x1e0] sm:$0xff] }
  0x6e   : > { %475 = vperm.xlu1 %5847, %v6275_v13   ;;  %470 = vperm.xlu0 %5846, %v6278_v14   ;;  %10641 = vst [vmem:[#allocation16_spill] sm:$0xff] %v6470_v62  ;;  %10642 = vst [vmem:[#allocation17_spill] sm:$0xff] %v6475_v63  ;;  %v6483_v1 = vld [vmem:[%s5975_s24 + $0x1f8] sm:$0xff]  ;;  %v6486_v4 = vld [vmem:[%s5975_s24 + $0x1f0] sm:$0xff] }
  0x72   : > { %485 = vperm.xlu1 %5847, %v6283_v15   ;;  %480 = vperm.xlu0 %5846, %v6286_v16  }
  0x76   : > { %495 = vperm.xlu1 %5847, %v6291_v17   ;;  %490 = vperm.xlu0 %5846, %v6294_v18  }
  0x7a   : > { %505 = vperm.xlu1 %5847, %v6299_v19   ;;  %500 = vperm.xlu0 %5846, %v6302_v20  }
  0x7e   : > { %515 = vperm.xlu1 %5847, %v6307_v21   ;;  %510 = vperm.xlu0 %5846, %v6310_v22  }
  0x82   : > { %525 = vperm.xlu1 %5847, %v6315_v23   ;;  %520 = vperm.xlu0 %5846, %v6318_v24  }
  0x86   : > { %535 = vperm.xlu1 %5847, %v6323_v25   ;;  %530 = vperm.xlu0 %5846, %v6326_v26  }
  0x8a   : > { %545 = vperm.xlu1 %5847, %v6331_v27   ;;  %540 = vperm.xlu0 %5846, %v6334_v28  }
  0x8e   : > { %555 = vperm.xlu1 %5847, %v6339_v29   ;;  %550 = vperm.xlu0 %5846, %v6342_v30  }
  0x92   : > { %565 = vperm.xlu1 %5847, %v6347_v31   ;;  %560 = vperm.xlu0 %5846, %v6350_v32  }
  0x96   : > { %575 = vperm.xlu1 %5847, %v6355_v33   ;;  %570 = vperm.xlu0 %5846, %v6358_v34  }
  0x9a   : > { %585 = vperm.xlu1 %5847, %v6363_v35   ;;  %580 = vperm.xlu0 %5846, %v6366_v36  }
  0x9e   : > { %595 = vperm.xlu1 %5847, %v6371_v37   ;;  %590 = vperm.xlu0 %5846, %v6374_v38  }
  0xa2   : > { %605 = vperm.xlu1 %5847, %v6379_v39   ;;  %600 = vperm.xlu0 %5846, %v6382_v40  }
  0xa6   : > { %615 = vperm.xlu1 %5847, %v6387_v41   ;;  %610 = vperm.xlu0 %5846, %v6390_v42  }
  0xaa   : > { %625 = vperm.xlu1 %5847, %v6395_v43   ;;  %620 = vperm.xlu0 %5846, %v6398_v44  }
  0xae   : > { %635 = vperm.xlu1 %5847, %v6403_v45   ;;  %630 = vperm.xlu0 %5846, %v6406_v46  }
  0xb2   : > { %645 = vperm.xlu1 %5847, %v6411_v47   ;;  %640 = vperm.xlu0 %5846, %v6414_v48  }
  0xb6   : > { %655 = vperm.xlu1 %5847, %v6419_v49   ;;  %650 = vperm.xlu0 %5846, %v6422_v50  }
  0xba   : > { %665 = vperm.xlu1 %5847, %v6427_v51   ;;  %660 = vperm.xlu0 %5846, %v6430_v52  }
  0xbe   : > { %675 = vperm.xlu1 %5847, %v6435_v53   ;;  %670 = vperm.xlu0 %5846, %v6438_v54  }
  0xc2   : > { %685 = vperm.xlu1 %5847, %v6443_v55   ;;  %680 = vperm.xlu0 %5846, %v6446_v56  }
  0xc6   : > { %695 = vperm.xlu1 %5847, %v6451_v57   ;;  %690 = vperm.xlu0 %5846, %v6454_v58   ;;  %v5927_v57 = vmov 1  }
  0xca   : > { %705 = vperm.xlu1 %5847, %v6459_v59   ;;  %700 = vperm.xlu0 %5846, %v6462_v60  }
  0xce   : > { %715 = vperm.xlu1 %5847, %v6467_v61   ;;  %710 = vperm.xlu0 %5846, %v6470_v62  }
  0xd2   : > { %725 = vperm.xlu1 %5847, %v6475_v63   ;;  %720 = vperm.xlu0 %5846, %v6478_v0  }
  0xd5   : > { %v6488_v59 = vpop.permute.xlu1 %430  ;;  %v6490_v60 = vpop.permute.xlu0 %420 }
  0xd6   : > { %10643 = vst [vmem:[#allocation18_spill] sm:$0xff] %v6488_v59  ;;  %10644 = vst [vmem:[#allocation19_spill] sm:$0xff] %v6490_v60  ;;  %735 = vperm.xlu1 %5847, %v6483_v1   ;;  %730 = vperm.xlu0 %5846, %v6486_v4  }
  0xd9   : > { %v6494_v61 = vpop.permute.xlu1 %435  ;;  %v6496_v62 = vpop.permute.xlu0 %425 }
  0xda   : > { %10645 = vst [vmem:[#allocation20_spill] sm:$0xff] %v6494_v61  ;;  %10646 = vst [vmem:[#allocation21_spill] sm:$0xff] %v6496_v62  ;;  %5849 = vset.pattern.permute.xlu1 %v5927_v57  ;;  %5848 = vset.pattern.permute.xlu0 %v5927_v57 }
  0xdb   : > { %743 = vperm.xlu1 %5849, %v6246_v6   ;;  %739 = vperm.xlu0 %5848, %v6238_v3  }
  0xdd   : > { %v6500_v63 = vpop.permute.xlu1 %445  ;;  %v6502_v59 = vpop.permute.xlu0 %440 }
  0xde   : > { %10647 = vst [vmem:[#allocation22_spill] sm:$0xff] %v6500_v63  ;;  %10648 = vst [vmem:[#allocation23_spill] sm:$0xff] %v6502_v59 }
  0xdf   : > { %747 = vperm.xlu1 %5849, %v6235_v2   ;;  %751 = vperm.xlu0 %5848, %v6243_v5  }
  0xe1   : > { %v6506_v60 = vpop.permute.xlu1 %455  ;;  %v6508_v61 = vpop.permute.xlu0 %450 }
  0xe2   : > { %10649 = vst [vmem:[#allocation24_spill] sm:$0xff] %v6506_v60  ;;  %10650 = vst [vmem:[#allocation25_spill] sm:$0xff] %v6508_v61 }
  0xe3   : > { %755 = vperm.xlu1 %5849, %v6254_v8   ;;  %759 = vperm.xlu0 %5848, %v6251_v7  }
  0xe5   : > { %v6512_v57 = vpop.permute.xlu1 %465  ;;  %v6514_v62 = vpop.permute.xlu0 %460 }
  0xe6   : > { %10651 = vst [vmem:[#allocation26_spill] sm:$0xff] %v6512_v57  ;;  %10652 = vst [vmem:[#allocation27_spill] sm:$0xff] %v6514_v62 }
  0xe7   : > { %763 = vperm.xlu1 %5849, %v6262_v10   ;;  %767 = vperm.xlu0 %5848, %v6259_v9  }
  0xe9   : > { %v6518_v63 = vpop.permute.xlu1 %475  ;;  %v6520_v59 = vpop.permute.xlu0 %470 }
  0xea   : > { %10653 = vst [vmem:[#allocation28_spill] sm:$0xff] %v6518_v63  ;;  %10654 = vst [vmem:[#allocation29_spill] sm:$0xff] %v6520_v59 }
  0xeb   : > { %771 = vperm.xlu1 %5849, %v6270_v12   ;;  %775 = vperm.xlu0 %5848, %v6267_v11  }
  0xed   : > { %v6524_v60 = vpop.permute.xlu1 %485  ;;  %v6526_v61 = vpop.permute.xlu0 %480 }
  0xee   : > { %10655 = vst [vmem:[#allocation30_spill] sm:$0xff] %v6524_v60  ;;  %10656 = vst [vmem:[#allocation31_spill] sm:$0xff] %v6526_v61 }
  0xef   : > { %779 = vperm.xlu1 %5849, %v6278_v14   ;;  %783 = vperm.xlu0 %5848, %v6275_v13  }
  0xf1   : > { %v6530_v57 = vpop.permute.xlu1 %495  ;;  %v6532_v62 = vpop.permute.xlu0 %490 }
  0xf2   : > { %10657 = vst [vmem:[#allocation32_spill] sm:$0xff] %v6530_v57  ;;  %10658 = vst [vmem:[#allocation33_spill] sm:$0xff] %v6532_v62 }
  0xf3   : > { %787 = vperm.xlu1 %5849, %v6286_v16   ;;  %791 = vperm.xlu0 %5848, %v6283_v15  }
  0xf5   : > { %v6536_v63 = vpop.permute.xlu1 %505  ;;  %v6538_v59 = vpop.permute.xlu0 %500 }
  0xf6   : > { %10659 = vst [vmem:[#allocation34_spill] sm:$0xff] %v6536_v63  ;;  %10660 = vst [vmem:[#allocation35_spill] sm:$0xff] %v6538_v59 }
  0xf7   : > { %795 = vperm.xlu1 %5849, %v6294_v18   ;;  %799 = vperm.xlu0 %5848, %v6291_v17  }
  0xf9   : > { %v6542_v60 = vpop.permute.xlu1 %515  ;;  %v6544_v61 = vpop.permute.xlu0 %510 }
  0xfa   : > { %10661 = vst [vmem:[#allocation36_spill] sm:$0xff] %v6542_v60  ;;  %10662 = vst [vmem:[#allocation37_spill] sm:$0xff] %v6544_v61 }
  0xfb   : > { %803 = vperm.xlu1 %5849, %v6302_v20   ;;  %807 = vperm.xlu0 %5848, %v6299_v19  }
  0xfd   : > { %v6548_v57 = vpop.permute.xlu1 %525  ;;  %v6550_v62 = vpop.permute.xlu0 %520 }
  0xfe   : > { %10663 = vst [vmem:[#allocation38_spill] sm:$0xff] %v6548_v57  ;;  %10664 = vst [vmem:[#allocation39_spill] sm:$0xff] %v6550_v62 }
  0xff   : > { %811 = vperm.xlu1 %5849, %v6310_v22   ;;  %815 = vperm.xlu0 %5848, %v6307_v21  }
 0x101   : > { %v6554_v63 = vpop.permute.xlu1 %535  ;;  %v6556_v59 = vpop.permute.xlu0 %530 }
 0x102   : > { %10665 = vst [vmem:[#allocation40_spill] sm:$0xff] %v6554_v63  ;;  %10666 = vst [vmem:[#allocation41_spill] sm:$0xff] %v6556_v59 }
 0x103   : > { %819 = vperm.xlu1 %5849, %v6318_v24   ;;  %823 = vperm.xlu0 %5848, %v6315_v23  }
 0x105   : > { %v6560_v60 = vpop.permute.xlu1 %545  ;;  %v6562_v61 = vpop.permute.xlu0 %540 }
 0x106   : > { %10667 = vst [vmem:[#allocation42_spill] sm:$0xff] %v6560_v60  ;;  %10668 = vst [vmem:[#allocation43_spill] sm:$0xff] %v6562_v61 }
 0x107   : > { %827 = vperm.xlu1 %5849, %v6326_v26   ;;  %831 = vperm.xlu0 %5848, %v6323_v25  }
 0x109   : > { %v6566_v57 = vpop.permute.xlu1 %555  ;;  %v6568_v62 = vpop.permute.xlu0 %550 }
 0x10a   : > { %10669 = vst [vmem:[#allocation44_spill] sm:$0xff] %v6566_v57  ;;  %10670 = vst [vmem:[#allocation45_spill] sm:$0xff] %v6568_v62 }
 0x10b   : > { %835 = vperm.xlu1 %5849, %v6334_v28   ;;  %839 = vperm.xlu0 %5848, %v6331_v27  }
 0x10d   : > { %v6572_v63 = vpop.permute.xlu1 %565  ;;  %v6574_v59 = vpop.permute.xlu0 %560 }
 0x10e   : > { %10671 = vst [vmem:[#allocation46_spill] sm:$0xff] %v6572_v63  ;;  %10672 = vst [vmem:[#allocation47_spill] sm:$0xff] %v6574_v59 }
 0x10f   : > { %843 = vperm.xlu1 %5849, %v6342_v30   ;;  %847 = vperm.xlu0 %5848, %v6339_v29  }
 0x111   : > { %v6578_v60 = vpop.permute.xlu1 %575  ;;  %v6580_v61 = vpop.permute.xlu0 %570 }
 0x112   : > { %10673 = vst [vmem:[#allocation48_spill] sm:$0xff] %v6578_v60  ;;  %10674 = vst [vmem:[#allocation49_spill] sm:$0xff] %v6580_v61 }
 0x113   : > { %851 = vperm.xlu1 %5849, %v6350_v32   ;;  %855 = vperm.xlu0 %5848, %v6347_v31  }
 0x115   : > { %v6584_v57 = vpop.permute.xlu1 %585  ;;  %v6586_v62 = vpop.permute.xlu0 %580 }
 0x116   : > { %10675 = vst [vmem:[#allocation50_spill] sm:$0xff] %v6584_v57  ;;  %10676 = vst [vmem:[#allocation51_spill] sm:$0xff] %v6586_v62 }
 0x117   : > { %859 = vperm.xlu1 %5849, %v6358_v34   ;;  %863 = vperm.xlu0 %5848, %v6355_v33  }
 0x119   : > { %v6590_v63 = vpop.permute.xlu1 %595  ;;  %v6592_v59 = vpop.permute.xlu0 %590 }
 0x11a   : > { %10677 = vst [vmem:[#allocation52_spill] sm:$0xff] %v6590_v63  ;;  %10678 = vst [vmem:[#allocation53_spill] sm:$0xff] %v6592_v59 }
 0x11b   : > { %867 = vperm.xlu1 %5849, %v6366_v36   ;;  %871 = vperm.xlu0 %5848, %v6363_v35  }
 0x11d   : > { %v6596_v60 = vpop.permute.xlu1 %605  ;;  %v6598_v61 = vpop.permute.xlu0 %600 }
 0x11e   : > { %10679 = vst [vmem:[#allocation54_spill] sm:$0xff] %v6596_v60  ;;  %10680 = vst [vmem:[#allocation55_spill] sm:$0xff] %v6598_v61 }
 0x11f   : > { %875 = vperm.xlu1 %5849, %v6374_v38   ;;  %879 = vperm.xlu0 %5848, %v6371_v37  }
 0x121   : > { %v6602_v57 = vpop.permute.xlu1 %615  ;;  %v6604_v62 = vpop.permute.xlu0 %610 }
 0x122   : > { %10681 = vst [vmem:[#allocation56_spill] sm:$0xff] %v6602_v57  ;;  %10682 = vst [vmem:[#allocation57_spill] sm:$0xff] %v6604_v62 }
 0x123   : > { %883 = vperm.xlu1 %5849, %v6382_v40   ;;  %887 = vperm.xlu0 %5848, %v6379_v39  }
 0x125   : > { %v6608_v63 = vpop.permute.xlu1 %625  ;;  %v6610_v59 = vpop.permute.xlu0 %620 }
 0x126   : > { %10683 = vst [vmem:[#allocation58_spill] sm:$0xff] %v6608_v63  ;;  %10684 = vst [vmem:[#allocation59_spill] sm:$0xff] %v6610_v59 }
 0x127   : > { %891 = vperm.xlu1 %5849, %v6390_v42   ;;  %895 = vperm.xlu0 %5848, %v6387_v41  }
 0x129   : > { %v6614_v60 = vpop.permute.xlu1 %635  ;;  %v6616_v61 = vpop.permute.xlu0 %630 }
 0x12a   : > { %10685 = vst [vmem:[#allocation60_spill] sm:$0xff] %v6614_v60  ;;  %10686 = vst [vmem:[#allocation61_spill] sm:$0xff] %v6616_v61 }
 0x12b   : > { %899 = vperm.xlu1 %5849, %v6398_v44   ;;  %903 = vperm.xlu0 %5848, %v6395_v43  }
 0x12d   : > { %v6620_v57 = vpop.permute.xlu1 %645  ;;  %v6622_v62 = vpop.permute.xlu0 %640 }
 0x12e   : > { %10687 = vst [vmem:[#allocation62_spill] sm:$0xff] %v6620_v57  ;;  %10688 = vst [vmem:[#allocation63_spill] sm:$0xff] %v6622_v62 }
 0x12f   : > { %907 = vperm.xlu1 %5849, %v6406_v46   ;;  %911 = vperm.xlu0 %5848, %v6403_v45  }
 0x131   : > { %v6626_v63 = vpop.permute.xlu1 %655  ;;  %v6628_v59 = vpop.permute.xlu0 %650 }
 0x132   : > { %10689 = vst [vmem:[#allocation64_spill] sm:$0xff] %v6626_v63  ;;  %10690 = vst [vmem:[#allocation65_spill] sm:$0xff] %v6628_v59 }
 0x133   : > { %915 = vperm.xlu1 %5849, %v6414_v48   ;;  %919 = vperm.xlu0 %5848, %v6411_v47  }
 0x135   : > { %v6632_v60 = vpop.permute.xlu1 %665  ;;  %v6634_v61 = vpop.permute.xlu0 %660 }
 0x136   : > { %10691 = vst [vmem:[#allocation66_spill] sm:$0xff] %v6632_v60  ;;  %10692 = vst [vmem:[#allocation67_spill] sm:$0xff] %v6634_v61 }
 0x137   : > { %923 = vperm.xlu1 %5849, %v6422_v50   ;;  %927 = vperm.xlu0 %5848, %v6419_v49  }
 0x139   : > { %v6638_v57 = vpop.permute.xlu1 %675  ;;  %v6640_v62 = vpop.permute.xlu0 %670 }
 0x13a   : > { %10693 = vst [vmem:[#allocation68_spill] sm:$0xff] %v6638_v57  ;;  %10694 = vst [vmem:[#allocation69_spill] sm:$0xff] %v6640_v62 }
 0x13b   : > { %931 = vperm.xlu1 %5849, %v6430_v52   ;;  %935 = vperm.xlu0 %5848, %v6427_v51  }
 0x13d   : > { %v6644_v63 = vpop.permute.xlu1 %685  ;;  %v6646_v59 = vpop.permute.xlu0 %680 }
 0x13e   : > { %10695 = vst [vmem:[#allocation70_spill] sm:$0xff] %v6644_v63  ;;  %10696 = vst [vmem:[#allocation71_spill] sm:$0xff] %v6646_v59  ;;  %v10701_v63 = vld [vmem:[#allocation11_spill] sm:$0xff] }
 0x13f   : > { %939 = vperm.xlu1 %5849, %v6438_v54   ;;  %943 = vperm.xlu0 %5848, %v6435_v53   ;;  %v10704_v53 = vld [vmem:[#allocation14_spill] sm:$0xff] }
 0x141   : > { %v6650_v60 = vpop.permute.xlu1 %695  ;;  %v6652_v61 = vpop.permute.xlu0 %690 }
 0x142   : > { %10697 = vst [vmem:[#allocation72_spill] sm:$0xff] %v6650_v60  ;;  %10698 = vst [vmem:[#allocation73_spill] sm:$0xff] %v6652_v61  ;;  %v10705_v60 = vld [vmem:[#allocation13_spill] sm:$0xff] }
 0x143   : > { %947 = vperm.xlu1 %5849, %v6446_v56   ;;  %951 = vperm.xlu0 %5848, %v6443_v55   ;;  %v10708_v55 = vld [vmem:[#allocation16_spill] sm:$0xff] }
 0x145   : > { %v6656_v57 = vpop.permute.xlu1 %705  ;;  %v6658_v62 = vpop.permute.xlu0 %700 }
 0x146   : > { %10699 = vst [vmem:[#allocation74_spill] sm:$0xff] %v6656_v57  ;;  %10700 = vst [vmem:[#allocation75_spill] sm:$0xff] %v6658_v62  ;;  %v10709_v57 = vld [vmem:[#allocation15_spill] sm:$0xff] }
 0x147   : > { %955 = vperm.xlu1 %5849, %v6454_v58   ;;  %959 = vperm.xlu0 %5848, %v10701_v63  }
 0x149   : > { %v6662_v59 = vpop.permute.xlu1 %715  ;;  %v6664_v51 = vpop.permute.xlu0 %710 }
 0x14a   : > { %10702 = vst [vmem:[#allocation76_spill] sm:$0xff] %v6662_v59  ;;  %10703 = vst [vmem:[#allocation77_spill] sm:$0xff] %v6664_v51  ;;  %v10712_v59 = vld [vmem:[#allocation17_spill] sm:$0xff] }
 0x14b   : > { %963 = vperm.xlu1 %5849, %v10704_v53   ;;  %967 = vperm.xlu0 %5848, %v10705_v60  }
 0x14d   : > { %v6668_v61 = vpop.permute.xlu1 %725  ;;  %v6670_v56 = vpop.permute.xlu0 %720 }
 0x14e   : > { %10706 = vst [vmem:[#allocation14_spill] sm:$0xff] %v6668_v61  ;;  %10707 = vst [vmem:[#allocation13_spill] sm:$0xff] %v6670_v56 }
 0x14f   : > { %971 = vperm.xlu1 %5849, %v10708_v55   ;;  %975 = vperm.xlu0 %5848, %v10709_v57   ;;  %v5928_v57 = vmov 2  }
 0x151   : > { %v6674_v62 = vpop.permute.xlu1 %735  ;;  %v6676_v58 = vpop.permute.xlu0 %730 }
 0x152   : > { %10710 = vst [vmem:[#allocation16_spill] sm:$0xff] %v6674_v62  ;;  %10711 = vst [vmem:[#allocation78_spill] sm:$0xff] %v6676_v58 }
 0x153   : > { %979 = vperm.xlu1 %5849, %v6478_v0   ;;  %983 = vperm.xlu0 %5848, %v10712_v59  }
 0x156   : > { %v6680_v51 = vpop.permute.xlu1 %743  ;;  %v6682_v63 = vpop.permute.xlu0 %739 }
 0x157   : > { %10713 = vst [vmem:[#allocation17_spill] sm:$0xff] %v6680_v51  ;;  %10714 = vst [vmem:[#allocation79_spill] sm:$0xff] %v6682_v63  ;;  %987 = vperm.xlu1 %5849, %v6486_v4   ;;  %991 = vperm.xlu0 %5848, %v6483_v1  }
 0x15a   : > { %v6686_v61 = vpop.permute.xlu1 %747  ;;  %v6688_v56 = vpop.permute.xlu0 %751 }
 0x15b   : > { %10715 = vst [vmem:[#allocation80_spill] sm:$0xff] %v6686_v61  ;;  %10716 = vst [vmem:[#allocation81_spill] sm:$0xff] %v6688_v56  ;;  %5850 = vset.pattern.permute.xlu1 %v5928_v57  ;;  %5851 = vset.pattern.permute.xlu0 %v5928_v57 }
 0x15c   : > { %995 = vperm.xlu1 %5850, %v6238_v3   ;;  %999 = vperm.xlu0 %5851, %v6246_v6  }
 0x15e   : > { %v6692_v62 = vpop.permute.xlu1 %755  ;;  %v6694_v58 = vpop.permute.xlu0 %759 }
 0x15f   : > { %10717 = vst [vmem:[#allocation82_spill] sm:$0xff] %v6692_v62  ;;  %10718 = vst [vmem:[#allocation83_spill] sm:$0xff] %v6694_v58 }
 0x160   : > { %1003 = vperm.xlu1 %5850, %v6235_v2   ;;  %1011 = vperm.xlu0 %5851, %v6254_v8  }
 0x162   : > { %v6698_v51 = vpop.permute.xlu1 %763  ;;  %v6700_v61 = vpop.permute.xlu0 %767 }
 0x163   : > { %10719 = vst [vmem:[#allocation84_spill] sm:$0xff] %v6698_v51  ;;  %10720 = vst [vmem:[#allocation85_spill] sm:$0xff] %v6700_v61 }
 0x164   : > { %1007 = vperm.xlu1 %5850, %v6243_v5   ;;  %1019 = vperm.xlu0 %5851, %v6262_v10  }
 0x166   : > { %v6704_v57 = vpop.permute.xlu1 %771  ;;  %v6706_v3 = vpop.permute.xlu0 %775 }
 0x167   : > { %10721 = vst [vmem:[#allocation86_spill] sm:$0xff] %v6704_v57  ;;  %10722 = vst [vmem:[#allocation87_spill] sm:$0xff] %v6706_v3 }
 0x168   : > { %1015 = vperm.xlu1 %5850, %v6251_v7   ;;  %1027 = vperm.xlu0 %5851, %v6270_v12  }
 0x16a   : > { %v6710_v6 = vpop.permute.xlu1 %779  ;;  %v6712_v2 = vpop.permute.xlu0 %783 }
 0x16b   : > { %10723 = vst [vmem:[#allocation88_spill] sm:$0xff] %v6710_v6  ;;  %10724 = vst [vmem:[#allocation89_spill] sm:$0xff] %v6712_v2 }
 0x16c   : > { %1023 = vperm.xlu1 %5850, %v6259_v9   ;;  %1035 = vperm.xlu0 %5851, %v6278_v14  }
 0x16e   : > { %v6716_v8 = vpop.permute.xlu1 %787  ;;  %v6718_v5 = vpop.permute.xlu0 %791 }
 0x16f   : > { %10725 = vst [vmem:[#allocation90_spill] sm:$0xff] %v6716_v8  ;;  %10726 = vst [vmem:[#allocation91_spill] sm:$0xff] %v6718_v5 }
 0x170   : > { %1031 = vperm.xlu1 %5850, %v6267_v11   ;;  %1043 = vperm.xlu0 %5851, %v6286_v16  }
 0x172   : > { %v6722_v10 = vpop.permute.xlu1 %795  ;;  %v6724_v7 = vpop.permute.xlu0 %799 }
 0x173   : > { %10727 = vst [vmem:[#allocation92_spill] sm:$0xff] %v6722_v10  ;;  %10728 = vst [vmem:[#allocation93_spill] sm:$0xff] %v6724_v7 }
 0x174   : > { %1039 = vperm.xlu1 %5850, %v6275_v13   ;;  %1051 = vperm.xlu0 %5851, %v6294_v18  }
 0x176   : > { %v6728_v12 = vpop.permute.xlu1 %803  ;;  %v6730_v9 = vpop.permute.xlu0 %807 }
 0x177   : > { %10729 = vst [vmem:[#allocation94_spill] sm:$0xff] %v6728_v12  ;;  %10730 = vst [vmem:[#allocation95_spill] sm:$0xff] %v6730_v9 }
 0x178   : > { %1047 = vperm.xlu1 %5850, %v6283_v15   ;;  %1059 = vperm.xlu0 %5851, %v6302_v20  }
 0x17a   : > { %v6734_v14 = vpop.permute.xlu1 %811  ;;  %v6736_v11 = vpop.permute.xlu0 %815 }
 0x17b   : > { %10731 = vst [vmem:[#allocation96_spill] sm:$0xff] %v6734_v14  ;;  %10732 = vst [vmem:[#allocation97_spill] sm:$0xff] %v6736_v11 }
 0x17c   : > { %1055 = vperm.xlu1 %5850, %v6291_v17   ;;  %1067 = vperm.xlu0 %5851, %v6310_v22  }
 0x17e   : > { %v6740_v16 = vpop.permute.xlu1 %819  ;;  %v6742_v13 = vpop.permute.xlu0 %823 }
 0x17f   : > { %10733 = vst [vmem:[#allocation98_spill] sm:$0xff] %v6740_v16  ;;  %10734 = vst [vmem:[#allocation99_spill] sm:$0xff] %v6742_v13 }
 0x180   : > { %1063 = vperm.xlu1 %5850, %v6299_v19   ;;  %1075 = vperm.xlu0 %5851, %v6318_v24  }
 0x182   : > { %v6746_v18 = vpop.permute.xlu1 %827  ;;  %v6748_v15 = vpop.permute.xlu0 %831 }
 0x183   : > { %10735 = vst [vmem:[#allocation100_spill] sm:$0xff] %v6746_v18  ;;  %10736 = vst [vmem:[#allocation101_spill] sm:$0xff] %v6748_v15 }
 0x184   : > { %1071 = vperm.xlu1 %5850, %v6307_v21   ;;  %1083 = vperm.xlu0 %5851, %v6326_v26  }
 0x186   : > { %v6752_v20 = vpop.permute.xlu1 %835  ;;  %v6754_v17 = vpop.permute.xlu0 %839 }
 0x187   : > { %10737 = vst [vmem:[#allocation102_spill] sm:$0xff] %v6752_v20  ;;  %10738 = vst [vmem:[#allocation103_spill] sm:$0xff] %v6754_v17 }
 0x188   : > { %1079 = vperm.xlu1 %5850, %v6315_v23   ;;  %1091 = vperm.xlu0 %5851, %v6334_v28  }
 0x18a   : > { %v6758_v22 = vpop.permute.xlu1 %843  ;;  %v6760_v19 = vpop.permute.xlu0 %847 }
 0x18b   : > { %10739 = vst [vmem:[#allocation104_spill] sm:$0xff] %v6758_v22  ;;  %10740 = vst [vmem:[#allocation105_spill] sm:$0xff] %v6760_v19 }
 0x18c   : > { %1087 = vperm.xlu1 %5850, %v6323_v25   ;;  %1099 = vperm.xlu0 %5851, %v6342_v30  }
 0x18e   : > { %v6764_v24 = vpop.permute.xlu1 %851  ;;  %v6766_v21 = vpop.permute.xlu0 %855 }
 0x18f   : > { %10741 = vst [vmem:[#allocation106_spill] sm:$0xff] %v6764_v24  ;;  %10742 = vst [vmem:[#allocation107_spill] sm:$0xff] %v6766_v21 }
 0x190   : > { %1095 = vperm.xlu1 %5850, %v6331_v27   ;;  %1107 = vperm.xlu0 %5851, %v6350_v32  }
 0x192   : > { %v6770_v26 = vpop.permute.xlu1 %859  ;;  %v6772_v23 = vpop.permute.xlu0 %863 }
 0x193   : > { %10743 = vst [vmem:[#allocation108_spill] sm:$0xff] %v6770_v26  ;;  %10744 = vst [vmem:[#allocation109_spill] sm:$0xff] %v6772_v23 }
 0x194   : > { %1103 = vperm.xlu1 %5850, %v6339_v29   ;;  %1115 = vperm.xlu0 %5851, %v6358_v34  }
 0x196   : > { %v6776_v28 = vpop.permute.xlu1 %867  ;;  %v6778_v25 = vpop.permute.xlu0 %871 }
 0x197   : > { %10745 = vst [vmem:[#allocation110_spill] sm:$0xff] %v6776_v28  ;;  %10746 = vst [vmem:[#allocation111_spill] sm:$0xff] %v6778_v25 }
 0x198   : > { %1111 = vperm.xlu1 %5850, %v6347_v31   ;;  %1123 = vperm.xlu0 %5851, %v6366_v36  }
 0x19a   : > { %v6782_v30 = vpop.permute.xlu1 %875  ;;  %v6784_v27 = vpop.permute.xlu0 %879 }
 0x19b   : > { %10747 = vst [vmem:[#allocation112_spill] sm:$0xff] %v6782_v30  ;;  %10748 = vst [vmem:[#allocation113_spill] sm:$0xff] %v6784_v27 }
 0x19c   : > { %1119 = vperm.xlu1 %5850, %v6355_v33   ;;  %1131 = vperm.xlu0 %5851, %v6374_v38  }
 0x19e   : > { %v6788_v32 = vpop.permute.xlu1 %883  ;;  %v6790_v29 = vpop.permute.xlu0 %887 }
 0x19f   : > { %10749 = vst [vmem:[#allocation114_spill] sm:$0xff] %v6788_v32  ;;  %10750 = vst [vmem:[#allocation115_spill] sm:$0xff] %v6790_v29 }
 0x1a0   : > { %1127 = vperm.xlu1 %5850, %v6363_v35   ;;  %1139 = vperm.xlu0 %5851, %v6382_v40  }
 0x1a2   : > { %v6794_v34 = vpop.permute.xlu1 %891  ;;  %v6796_v31 = vpop.permute.xlu0 %895 }
 0x1a3   : > { %10751 = vst [vmem:[#allocation116_spill] sm:$0xff] %v6794_v34  ;;  %10752 = vst [vmem:[#allocation117_spill] sm:$0xff] %v6796_v31 }
 0x1a4   : > { %1135 = vperm.xlu1 %5850, %v6371_v37   ;;  %1147 = vperm.xlu0 %5851, %v6390_v42  }
 0x1a6   : > { %v6800_v36 = vpop.permute.xlu1 %899  ;;  %v6802_v33 = vpop.permute.xlu0 %903 }
 0x1a7   : > { %10753 = vst [vmem:[#allocation118_spill] sm:$0xff] %v6800_v36  ;;  %10754 = vst [vmem:[#allocation119_spill] sm:$0xff] %v6802_v33 }
 0x1a8   : > { %1143 = vperm.xlu1 %5850, %v6379_v39   ;;  %1155 = vperm.xlu0 %5851, %v6398_v44  }
 0x1aa   : > { %v6806_v38 = vpop.permute.xlu1 %907  ;;  %v6808_v35 = vpop.permute.xlu0 %911 }
 0x1ab   : > { %10755 = vst [vmem:[#allocation120_spill] sm:$0xff] %v6806_v38  ;;  %10756 = vst [vmem:[#allocation121_spill] sm:$0xff] %v6808_v35 }
 0x1ac   : > { %1151 = vperm.xlu1 %5850, %v6387_v41   ;;  %1163 = vperm.xlu0 %5851, %v6406_v46  }
 0x1ae   : > { %v6812_v40 = vpop.permute.xlu1 %915  ;;  %v6814_v37 = vpop.permute.xlu0 %919 }
 0x1af   : > { %10757 = vst [vmem:[#allocation122_spill] sm:$0xff] %v6812_v40  ;;  %10758 = vst [vmem:[#allocation123_spill] sm:$0xff] %v6814_v37 }
 0x1b0   : > { %1159 = vperm.xlu1 %5850, %v6395_v43   ;;  %1171 = vperm.xlu0 %5851, %v6414_v48  }
 0x1b2   : > { %v6818_v42 = vpop.permute.xlu1 %923  ;;  %v6820_v39 = vpop.permute.xlu0 %927 }
 0x1b3   : > { %10759 = vst [vmem:[#allocation124_spill] sm:$0xff] %v6818_v42  ;;  %10760 = vst [vmem:[#allocation125_spill] sm:$0xff] %v6820_v39 }
 0x1b4   : > { %1167 = vperm.xlu1 %5850, %v6403_v45   ;;  %1179 = vperm.xlu0 %5851, %v6422_v50   ;;  %v10767_v50 = vld [vmem:[#allocation7_spill] sm:$0xff] }
 0x1b6   : > { %v6824_v44 = vpop.permute.xlu1 %931  ;;  %v6826_v41 = vpop.permute.xlu0 %935 }
 0x1b7   : > { %10761 = vst [vmem:[#allocation126_spill] sm:$0xff] %v6824_v44  ;;  %10762 = vst [vmem:[#allocation127_spill] sm:$0xff] %v6826_v41  ;;  %v10768_v44 = vld [vmem:[#allocation10_spill] sm:$0xff] }
 0x1b8   : > { %1175 = vperm.xlu1 %5850, %v6411_v47   ;;  %1187 = vperm.xlu0 %5851, %v6430_v52   ;;  %v10771_v52 = vld [vmem:[#allocation8_spill] sm:$0xff] }
 0x1ba   : > { %v6830_v46 = vpop.permute.xlu1 %939  ;;  %v6832_v43 = vpop.permute.xlu0 %943 }
 0x1bb   : > { %10763 = vst [vmem:[#allocation128_spill] sm:$0xff] %v6830_v46  ;;  %10764 = vst [vmem:[#allocation129_spill] sm:$0xff] %v6832_v43  ;;  %v10772_v46 = vld [vmem:[#allocation12_spill] sm:$0xff] }
 0x1bc   : > { %1183 = vperm.xlu1 %5850, %v6419_v49   ;;  %1195 = vperm.xlu0 %5851, %v6438_v54   ;;  %v10775_v54 = vld [vmem:[#allocation9_spill] sm:$0xff] }
 0x1be   : > { %v6836_v48 = vpop.permute.xlu1 %947  ;;  %v6838_v45 = vpop.permute.xlu0 %951 }
 0x1bf   : > { %10765 = vst [vmem:[#allocation130_spill] sm:$0xff] %v6836_v48  ;;  %10766 = vst [vmem:[#allocation131_spill] sm:$0xff] %v6838_v45 }
 0x1c0   : > { %1191 = vperm.xlu1 %5850, %v10767_v50   ;;  %1203 = vperm.xlu0 %5851, %v10768_v44   ;;  %v10778_v44 = vld [vmem:[#allocation11_spill] sm:$0xff] }
 0x1c2   : > { %v6842_v41 = vpop.permute.xlu1 %955  ;;  %v6844_v47 = vpop.permute.xlu0 %959 }
 0x1c3   : > { %10769 = vst [vmem:[#allocation7_spill] sm:$0xff] %v6842_v41  ;;  %10770 = vst [vmem:[#allocation10_spill] sm:$0xff] %v6844_v47 }
 0x1c4   : > { %1199 = vperm.xlu1 %5850, %v10771_v52   ;;  %1211 = vperm.xlu0 %5851, %v10772_v46   ;;  %v10532_v46 = vlaneseq }
 0x1c6   : > { %v6848_v43 = vpop.permute.xlu1 %963  ;;  %v6850_v49 = vpop.permute.xlu0 %967 }
 0x1c7   : > { %10773 = vst [vmem:[#allocation8_spill] sm:$0xff] %v6848_v43  ;;  %10774 = vst [vmem:[#allocation12_spill] sm:$0xff] %v6850_v49 }
 0x1c8   : > { %1207 = vperm.xlu1 %5850, %v10775_v54   ;;  %1219 = vperm.xlu0 %5851, %v10704_v53   ;;  %v6867_v54 = vshrl.u32 %v10532_v46, 7 }
 0x1ca   : > { %v6854_v45 = vpop.permute.xlu1 %971  ;;  %v6856_v50 = vpop.permute.xlu0 %975  ;;  %v6888_v46 = vadd.s32 40, %v6867_v54  ;;  %v6903_v49 = vadd.s32 80, %v6867_v54  ;;  %v6912_v43 = vadd.s32 104, %v6867_v54  ;;  %v6915_v41 = vadd.s32 112, %v6867_v54 }
 0x1cb   : > { %10776 = vst [vmem:[#allocation9_spill] sm:$0xff] %v6854_v45  ;;  %10777 = vst [vmem:[#allocation132_spill] sm:$0xff] %v6856_v50  ;;  %v6900_v50 = vadd.s32 72, %v6867_v54  ;;  %v6918_v48 = vadd.s32 120, %v6867_v54  ;;  %v6921_v39 = vadd.s32 128, %v6867_v54  ;;  %v6928_v40 = vadd.s32 136, %v6867_v54 }
 0x1cc   : > { %1215 = vperm.xlu1 %5850, %v10778_v44   ;;  %1227 = vperm.xlu0 %5851, %v10708_v55   ;;  %v6874_v44 = vadd.s32 8, %v6867_v54  ;;  %v6877_v55 = vadd.s32 16, %v6867_v54  ;;  %v6931_v35 = vadd.s32 144, %v6867_v54  ;;  %v6934_v38 = vadd.s32 152, %v6867_v54 }
 0x1cd   : > { %v6937_v33 = vadd.s32 160, %v6867_v54  ;;  %v6941_v36 = vadd.s32 168, %v6867_v54  ;;  %v6944_v31 = vadd.s32 176, %v6867_v54  ;;  %v6947_v34 = vadd.s32 184, %v6867_v54 }
 0x1ce   : > { %v6860_v47 = vpop.permute.xlu1 %979  ;;  %v6862_v52 = vpop.permute.xlu0 %983  ;;  %v6950_v29 = vadd.s32 192, %v6867_v54  ;;  %v6953_v32 = vadd.s32 200, %v6867_v54  ;;  %v6956_v27 = vadd.s32 208, %v6867_v54  ;;  %v6962_v30 = vadd.s32 224, %v6867_v54 }
 0x1cf   : > { %10779 = vst [vmem:[#allocation11_spill] sm:$0xff] %v6860_v47  ;;  %10780 = vst [vmem:[#allocation133_spill] sm:$0xff] %v6862_v52  ;;  %v6880_v52 = vadd.s32 24, %v6867_v54  ;;  %v6897_v47 = vadd.s32 64, %v6867_v54  ;;  %v6965_v25 = vadd.s32 232, %v6867_v54  ;;  %v6968_v28 = vadd.s32 240, %v6867_v54 }
 0x1d0   : > { %1223 = vperm.xlu1 %5850, %v10705_v60   ;;  %1235 = vperm.xlu0 %5851, %v6478_v0   ;;  %v6883_v60 = vadd.s32 32, %v6867_v54  ;;  %v10783_v0 = vld [vmem:[#allocation15_spill] sm:$0xff]  ;;  %v6971_v23 = vadd.s32 248, %v6867_v54  ;;  %v6974_v26 = vadd.s32 256, %v6867_v54  ;;  %v6981_v19 = vadd.s32 264, %v6867_v54 }
 0x1d1   : > { %v6984_v22 = vadd.s32 272, %v6867_v54  ;;  %v6987_v17 = vadd.s32 280, %v6867_v54  ;;  %v6990_v20 = vadd.s32 288, %v6867_v54  ;;  %v6994_v15 = vadd.s32 296, %v6867_v54 }
 0x1d2   : > { %v6869_v53 = vpop.permute.xlu1 %987  ;;  %v6871_v45 = vpop.permute.xlu0 %991  ;;  %v6997_v18 = vadd.s32 304, %v6867_v54  ;;  %v7000_v13 = vadd.s32 312, %v6867_v54  ;;  %v7003_v16 = vadd.s32 320, %v6867_v54  ;;  %v7006_v11 = vadd.s32 328, %v6867_v54 }
 0x1d3   : > { %10781 = vst [vmem:[#allocation134_spill] sm:$0xff] %v6869_v53  ;;  %10782 = vst [vmem:[#allocation135_spill] sm:$0xff] %v6871_v45  ;;  %v6891_v45 = vadd.s32 48, %v6867_v54  ;;  %v6894_v53 = vadd.s32 56, %v6867_v54  ;;  %v7009_v14 = vadd.s32 336, %v6867_v54  ;;  %v7015_v9 = vadd.s32 352, %v6867_v54 }
 0x1d4   : > { %1231 = vperm.xlu1 %5850, %v10783_v0   ;;  %1243 = vperm.xlu0 %5851, %v6486_v4   ;;  %v6906_v4 = vadd.s32 88, %v6867_v54  ;;  %v6909_v0 = vadd.s32 96, %v6867_v54  ;;  %v7018_v12 = vadd.s32 360, %v6867_v54  ;;  %v7021_v7 = vadd.s32 368, %v6867_v54 }
 0x1d5   : > { %v7024_v10 = vadd.s32 376, %v6867_v54  ;;  %v7027_v5 = vadd.s32 384, %v6867_v54  ;;  %v7034_v6 = vadd.s32 392, %v6867_v54  ;;  %v7037_v3 = vadd.s32 400, %v6867_v54 }
 0x1d6   : > { %v7040_v57 = vadd.s32 408, %v6867_v54  ;;  %v7043_v61 = vadd.s32 416, %v6867_v54  ;;  %v7047_v51 = vadd.s32 424, %v6867_v54  ;;  %v7050_v58 = vadd.s32 432, %v6867_v54 }
 0x1d7   : > { %v6923_v42 = vpop.permute.xlu1 %995  ;;  %v6925_v37 = vpop.permute.xlu0 %999  ;;  %v7059_v62 = vadd.s32 456, %v6867_v54  ;;  %v7065_v56 = vadd.s32 472, %v6867_v54  ;;  %v7077_v63 = vadd.s32 504, %v6867_v54 }
 0x1d8   : > { %10784 = vst [vmem:[#allocation15_spill] sm:$0xff] %v6923_v42  ;;  %10785 = vst [vmem:[#allocation136_spill] sm:$0xff] %v6925_v37  ;;  %1239 = vperm.xlu1 %5850, %v10712_v59   ;;  %v6959_v59 = vadd.s32 216, %v6867_v54  ;;  %v7071_v37 = vadd.s32 488, %v6867_v54  ;;  %v7074_v42 = vadd.s32 496, %v6867_v54 }
 0x1d9   : > { %10791 = vst [vmem:[#allocation142_spill] sm:$0xff] %v7059_v62  ;;  %10793 = vst [vmem:[#allocation144_spill] sm:$0xff] %v7065_v56 }
 0x1da   : > { %10795 = vst [vmem:[#allocation146_spill] sm:$0xff] %v7074_v42  ;;  %10796 = vst [vmem:[#allocation147_spill] sm:$0xff] %v7077_v63 }
 0x1db   : > { %v6976_v21 = vpop.permute.xlu1 %1003  ;;  %v6978_v24 = vpop.permute.xlu0 %1011 }
 0x1dc   : > { %10786 = vst [vmem:[#allocation137_spill] sm:$0xff] %v6976_v21  ;;  %10787 = vst [vmem:[#allocation138_spill] sm:$0xff] %v6978_v24  ;;  %1247 = vperm.xlu1 %5850, %v6483_v1   ;;  %v7012_v1 = vadd.s32 344, %v6867_v54  ;;  %v7056_v24 = vadd.s32 448, %v6867_v54  ;;  %v7068_v21 = vadd.s32 480, %v6867_v54 }
 0x1de   : > { %10790 = vst [vmem:[#allocation141_spill] sm:$0xff] %v7056_v24  ;;  %10794 = vst [vmem:[#allocation145_spill] sm:$0xff] %v7068_v21  ;;  %v7079_v24 = vstv %s5781_s25 }
 0x1df   : > { %v7029_v8 = vpop.permute.xlu1 %1007  ;;  %v7031_v2 = vpop.permute.xlu0 %1019  ;;  %v7087_v56 = vadd.s32 %v7079_v24, %v6867_v54  ;;  %v7091_v21 = vadd.s32 %v7079_v24, %v6874_v44  ;;  %v7095_v42 = vadd.s32 %v7079_v24, %v6877_v55  ;;  %v7099_v63 = vadd.s32 %v7079_v24, %v6880_v52 }
 0x1e0   : > { %10788 = vst [vmem:[#allocation139_spill] sm:$0xff] %v7029_v8  ;;  %10789 = vst [vmem:[#allocation140_spill] sm:$0xff] %v7031_v2  ;;  %v7053_v2 = vadd.s32 440, %v6867_v54  ;;  %v7062_v8 = vadd.s32 464, %v6867_v54  ;;  %v7107_v54 = vadd.s32 %v7079_v24, %v6888_v46  ;;  %v7111_v44 = vadd.s32 %v7079_v24, %v6891_v45 }
 0x1e1   : > { %10799 = vst [vmem:[#allocation150_spill] sm:$0xff] %v7087_v56  ;;  %10800 = vst [vmem:[#allocation151_spill] sm:$0xff] %v7091_v21  ;;  %v7115_v55 = vadd.s32 %v7079_v24, %v6894_v53  ;;  %v7119_v52 = vadd.s32 %v7079_v24, %v6897_v47  ;;  %v7127_v46 = vadd.s32 %v7079_v24, %v6903_v49  ;;  %vm1381_vm1 = vcmp.lt.s32.totalorder %v7087_v56, 600 }
 0x1e2   : > { %10792 = vst [vmem:[#allocation143_spill] sm:$0xff] %v7062_v8  ;;  %10801 = vst [vmem:[#allocation152_spill] sm:$0xff] %v7095_v42  ;;  %v7131_v45 = vadd.s32 %v7079_v24, %v6906_v4  ;;  %v7135_v53 = vadd.s32 %v7079_v24, %v6909_v0  ;;  %v7139_v47 = vadd.s32 %v7079_v24, %v6912_v43  ;;  %vm10610_vm2 = vcmp.lt.s32.totalorder %v7091_v21, 600 }
 0x1e3   : > { %v7081_v62 = vpop.permute.xlu1 %1015  ;;  %v7083_v8 = vpop.permute.xlu0 %1027  ;;  %10802 = vst [vmem:[#allocation153_spill] sm:$0xff] %v7099_v63  ;;  %10804 = vst [vmem:[#allocation155_spill] sm:$0xff] %v7107_v54  ;;  %v7147_v49 = vadd.s32 %v7079_v24, %v6918_v48  ;;  %v7155_v0 = vadd.s32 %v7079_v24, %v6921_v39  ;;  %v7159_v43 = vadd.s32 %v7079_v24, %v6928_v40  ;;  %vm1383_vm3 = vcmp.lt.s32.totalorder %v7095_v42, 600 }
 0x1e4   : > { %10797 = vst [vmem:[#allocation148_spill] sm:$0xff] %v7081_v62  ;;  %10798 = vst [vmem:[#allocation149_spill] sm:$0xff] %v7083_v8  ;;  %v7103_v62 = vadd.s32 %v7079_v24, %v6883_v60  ;;  %v7123_v60 = vadd.s32 %v7079_v24, %v6900_v50  ;;  %v7143_v50 = vadd.s32 %v7079_v24, %v6915_v41  ;;  %vm10611_vm4 = vcmp.lt.s32.totalorder %v7099_v63, 600 }
 0x1e5   : > { %10805 = vst [vmem:[#allocation156_spill] sm:$0xff] %v7111_v44  ;;  %10806 = vst [vmem:[#allocation157_spill] sm:$0xff] %v7115_v55  ;;  %v7163_v41 = vadd.s32 %v7079_v24, %v6931_v35  ;;  %v7167_v48 = vadd.s32 %v7079_v24, %v6934_v38  ;;  %v7175_v39 = vadd.s32 %v7079_v24, %v6941_v36  ;;  %vm10613_vm6 = vcmp.lt.s32.totalorder %v7107_v54, 600 }
 0x1e6   : > { %10803 = vst [vmem:[#allocation154_spill] sm:$0xff] %v7103_v62  ;;  %10807 = vst [vmem:[#allocation158_spill] sm:$0xff] %v7119_v52  ;;  %v7179_v40 = vadd.s32 %v7079_v24, %v6944_v31  ;;  %v7183_v35 = vadd.s32 %v7079_v24, %v6947_v34  ;;  %v7187_v38 = vadd.s32 %v7079_v24, %v6950_v29  ;;  %vm10612_vm5 = vcmp.lt.s32.totalorder %v7103_v62, 600 }
 0x1e7   : > { %10808 = vst [vmem:[#allocation159_spill] sm:$0xff] %v7123_v60  ;;  %10809 = vst [vmem:[#allocation160_spill] sm:$0xff] %v7127_v46  ;;  %v7149_v8 = vpop.permute.xlu1 %1023  ;;  %v7151_v4 = vpop.permute.xlu0 %1035  ;;  %v7195_v36 = vadd.s32 %v7079_v24, %v6956_v27  ;;  %v7199_v31 = vadd.s32 %v7079_v24, %v6959_v59  ;;  %v7203_v34 = vadd.s32 %v7079_v24, %v6962_v30 }
 0x1e8   : > { %10810 = vst [vmem:[#allocation161_spill] sm:$0xff] %v7131_v45  ;;  %10811 = vst [vmem:[#allocation162_spill] sm:$0xff] %v7135_v53  ;;  %v7207_v29 = vadd.s32 %v7079_v24, %v6965_v25  ;;  %v7215_v27 = vadd.s32 %v7079_v24, %v6971_v23  ;;  %v7223_v30 = vadd.s32 %v7079_v24, %v6974_v26 }
 0x1e9   : > { %10812 = vst [vmem:[#allocation163_spill] sm:$0xff] %v7139_v47  ;;  %10813 = vst [vmem:[#allocation164_spill] sm:$0xff] %v7143_v50  ;;  %v7227_v25 = vadd.s32 %v7079_v24, %v6981_v19  ;;  %v7235_v23 = vadd.s32 %v7079_v24, %v6987_v17  ;;  %v7243_v26 = vadd.s32 %v7079_v24, %v6994_v15 }
 0x1ea   : > { %10814 = vst [vmem:[#allocation165_spill] sm:$0xff] %v7147_v49  ;;  %10815 = vst [vmem:[#allocation166_spill] sm:$0xff] %v7149_v8  ;;  %v7171_v8 = vadd.s32 %v7079_v24, %v6937_v33  ;;  %v7191_v33 = vadd.s32 %v7079_v24, %v6953_v32  ;;  %v7211_v32 = vadd.s32 %v7079_v24, %v6968_v28 }
 0x1eb   : > { %10816 = vst [vmem:[#allocation167_spill] sm:$0xff] %v7151_v4  ;;  %10817 = vst [vmem:[#allocation168_spill] sm:$0xff] %v7155_v0  ;;  %v7217_v4 = vpop.permute.xlu1 %1031  ;;  %v7219_v59 = vpop.permute.xlu0 %1043  ;;  %v7231_v28 = vadd.s32 %v7079_v24, %v6984_v22  ;;  %v7247_v19 = vadd.s32 %v7079_v24, %v6997_v18  ;;  %v7251_v22 = vadd.s32 %v7079_v24, %v7000_v13 }
 0x1ec   : > { %10818 = vst [vmem:[#allocation169_spill] sm:$0xff] %v7159_v43  ;;  %10819 = vst [vmem:[#allocation170_spill] sm:$0xff] %v7163_v41  ;;  %v7255_v17 = vadd.s32 %v7079_v24, %v7003_v16  ;;  %v7263_v15 = vadd.s32 %v7079_v24, %v7009_v14  ;;  %v7267_v18 = vadd.s32 %v7079_v24, %v7012_v1 }
 0x1ed   : > { %10820 = vst [vmem:[#allocation171_spill] sm:$0xff] %v7167_v48  ;;  %10821 = vst [vmem:[#allocation172_spill] sm:$0xff] %v7171_v8  ;;  %v7271_v13 = vadd.s32 %v7079_v24, %v7015_v9  ;;  %v7275_v16 = vadd.s32 %v7079_v24, %v7018_v12  ;;  %v7283_v14 = vadd.s32 %v7079_v24, %v7024_v10 }
 0x1ee   : > { %10822 = vst [vmem:[#allocation173_spill] sm:$0xff] %v7175_v39  ;;  %10823 = vst [vmem:[#allocation174_spill] sm:$0xff] %v7179_v40  ;;  %v7291_v9 = vadd.s32 %v7079_v24, %v7027_v5  ;;  %v7295_v12 = vadd.s32 %v7079_v24, %v7034_v6  ;;  %v7303_v10 = vadd.s32 %v7079_v24, %v7040_v57 }
 0x1ef   : > { %10824 = vst [vmem:[#allocation175_spill] sm:$0xff] %v7183_v35  ;;  %10825 = vst [vmem:[#allocation176_spill] sm:$0xff] %v7187_v38  ;;  %v7287_v1 = vpop.permute.xlu0 %1051  ;;  %v7311_v5 = vadd.s32 %v7079_v24, %v7047_v51  ;;  %v7315_v6 = vadd.s32 %v7079_v24, %v7050_v58 }
 0x1f0   : > { %10826 = vst [vmem:[#allocation177_spill] sm:$0xff] %v7191_v33  ;;  %10827 = vst [vmem:[#allocation178_spill] sm:$0xff] %v7195_v36 }
 0x1f1   : > { %10828 = vst [vmem:[#allocation179_spill] sm:$0xff] %v7199_v31  ;;  %10829 = vst [vmem:[#allocation180_spill] sm:$0xff] %v7203_v34 }
 0x1f2   : > { %10830 = vst [vmem:[#allocation181_spill] sm:$0xff] %v7207_v29  ;;  %10831 = vst [vmem:[#allocation182_spill] sm:$0xff] %v7211_v32 }
 0x1f3   : > { %10832 = vst [vmem:[#allocation183_spill] sm:$0xff] %v7215_v27  ;;  %10833 = vst [vmem:[#allocation184_spill] sm:$0xff] %v7217_v4  ;;  %v7239_v4 = vadd.s32 %v7079_v24, %v6990_v20  ;;  %v7259_v20 = vadd.s32 %v7079_v24, %v7006_v11  ;;  %v7279_v11 = vadd.s32 %v7079_v24, %v7021_v7 }
 0x1f4   : > { %10834 = vst [vmem:[#allocation185_spill] sm:$0xff] %v7219_v59  ;;  %10835 = vst [vmem:[#allocation186_spill] sm:$0xff] %v7223_v30  ;;  %v7285_v59 = vpop.permute.xlu1 %1039  ;;  %v7299_v7 = vadd.s32 %v7079_v24, %v7037_v3  ;;  %v7319_v3 = vadd.s32 %v7079_v24, %v7053_v2 }
 0x1f5   : > { %10836 = vst [vmem:[#allocation187_spill] sm:$0xff] %v7227_v25  ;;  %10837 = vst [vmem:[#allocation188_spill] sm:$0xff] %v7231_v28 }
 0x1f6   : > { %10838 = vst [vmem:[#allocation189_spill] sm:$0xff] %v7235_v23  ;;  %10839 = vst [vmem:[#allocation190_spill] sm:$0xff] %v7239_v4  ;;  %vm1436_vm12 = vcmp.lt.s32.totalorder %v7319_v3, 600 }
 0x1f7   : > { %10840 = vst [vmem:[#allocation191_spill] sm:$0xff] %v7243_v26  ;;  %10841 = vst [vmem:[#allocation192_spill] sm:$0xff] %v7247_v19 }
 0x1f8   : > { %10842 = vst [vmem:[#allocation193_spill] sm:$0xff] %v7251_v22  ;;  %10843 = vst [vmem:[#allocation194_spill] sm:$0xff] %v7255_v17 }
 0x1f9   : > { %10844 = vst [vmem:[#allocation195_spill] sm:$0xff] %v7259_v20  ;;  %10845 = vst [vmem:[#allocation196_spill] sm:$0xff] %v7263_v15 }
 0x1fa   : > { %10846 = vst [vmem:[#allocation197_spill] sm:$0xff] %v7267_v18  ;;  %10847 = vst [vmem:[#allocation198_spill] sm:$0xff] %v7271_v13  ;;  %v10547_v13 = vmov 3e+37  }
 0x1fb   : > { %10848 = vst [vmem:[#allocation199_spill] sm:$0xff] %v7275_v16  ;;  %10849 = vst [vmem:[#allocation200_spill] sm:$0xff] %v7279_v11 }
 0x1fc   : > { %10850 = vst [vmem:[#allocation201_spill] sm:$0xff] %v7283_v14  ;;  %10851 = vst [vmem:[#allocation202_spill] sm:$0xff] %v7285_v59  ;;  %v7307_v59 = vadd.s32 %v7079_v24, %v7043_v61 }
 0x1fd   : > { %10852 = vst [vmem:[#allocation203_spill] sm:$0xff] %v7287_v1  ;;  %10853 = vst [vmem:[#allocation204_spill] sm:$0xff] %v7291_v9  ;;  %v10861_v1 = vld [vmem:[#allocation141_spill] sm:$0xff] }
 0x1fe   : > { %10854 = vst [vmem:[#allocation205_spill] sm:$0xff] %v7295_v12  ;;  %10855 = vst [vmem:[#allocation206_spill] sm:$0xff] %v7299_v7  ;;  %v7323_v57 = vadd.s32 %v7079_v24, %v10861_v1  ;;  %v7343_v1 = vadd.s32 %v7079_v24, %v7071_v37 }
 0x1ff   : > { %10856 = vst [vmem:[#allocation207_spill] sm:$0xff] %v7303_v10  ;;  %10857 = vst [vmem:[#allocation208_spill] sm:$0xff] %v7307_v59  ;;  %v10863_v10 = vld [vmem:[#allocation142_spill] sm:$0xff]  ;;  %v10865_v59 = vld [vmem:[#allocation143_spill] sm:$0xff] }
 0x200   : > { %10858 = vst [vmem:[#allocation209_spill] sm:$0xff] %v7311_v5  ;;  %10859 = vst [vmem:[#allocation210_spill] sm:$0xff] %v7315_v6  ;;  %v7327_v61 = vadd.s32 %v7079_v24, %v10863_v10  ;;  %v7331_v51 = vadd.s32 %v7079_v24, %v10865_v59  ;;  %v10867_v5 = vld [vmem:[#allocation144_spill] sm:$0xff]  ;;  %v10869_v6 = vld [vmem:[#allocation145_spill] sm:$0xff]  ;;  %vm1442_vm8 = vcmp.lt.s32.totalorder %v7343_v1, 600 }
 0x201   : > { %10860 = vst [vmem:[#allocation211_spill] sm:$0xff] %v7319_v3  ;;  %10862 = vst [vmem:[#allocation141_spill] sm:$0xff] %v7323_v57  ;;  %v7335_v58 = vadd.s32 %v7079_v24, %v10867_v5  ;;  %v7339_v2 = vadd.s32 %v7079_v24, %v10869_v6  ;;  %v10872_v57 = vld [vmem:[#allocation146_spill] sm:$0xff]  ;;  %v7355_v5 = vpop.permute.xlu0 %1059 }
 0x202   : > { %10864 = vst [vmem:[#allocation142_spill] sm:$0xff] %v7327_v61  ;;  %10866 = vst [vmem:[#allocation143_spill] sm:$0xff] %v7331_v51  ;;  %v7347_v10 = vadd.s32 %v7079_v24, %v10872_v57  ;;  %v10874_v61 = vld [vmem:[#allocation147_spill] sm:$0xff]  ;;  %v7353_v51 = vpop.permute.xlu1 %1047 }
 0x203   : > { %10868 = vst [vmem:[#allocation144_spill] sm:$0xff] %v7335_v58  ;;  %10870 = vst [vmem:[#allocation145_spill] sm:$0xff] %v7339_v2  ;;  %v7351_v59 = vadd.s32 %v7079_v24, %v10874_v61  ;;  %vm1440_vm0 = vcmp.lt.s32.totalorder %v7335_v58, 600  ;;  %vm1441_vm7 = vcmp.lt.s32.totalorder %v7339_v2, 600 }
 0x204   : > { %10871 = vst [vmem:[#allocation212_spill] sm:$0xff] %v7343_v1  ;;  %10873 = vst [vmem:[#allocation146_spill] sm:$0xff] %v7347_v10 }
 0x205   : > { %10875 = vst [vmem:[#allocation147_spill] sm:$0xff] %v7351_v59  ;;  %v7375_v37 = vpop.permute.xlu0 %1067  ;;  %vm1444_vm10 = vcmp.lt.s32.totalorder %v7351_v59, 600  ;;  %1445 = vst [vmem:[#allocation2 + $0xb0] sm:$0xff] %v10547_v13 }
 0x206   : > { %v7373_v24 = vpop.permute.xlu1 %1055  ;;  %1446 = vst [vmem:[#allocation2 + $0x1b0] sm:$0xff] %v10547_v13  ;;  %1447 = vst [vmem:[#allocation2 + $0xd8] sm:$0xff] %v10547_v13 }
 0x207   : > { %v10879_v16 = vld [vmem:[#allocation210_spill] sm:$0xff]  ;;  %1448 = vst [vmem:[#allocation2 + $0x18] sm:$0xff] %v10547_v13  ;;  %1449 = vst [vmem:[#allocation2 + $0x50] sm:$0xff] %v10547_v13 }
 0x208   : > { %vm1435_vm11 = vcmp.lt.s32.totalorder %v10879_v16, 600  ;;  %v10880_v11 = vld [vmem:[#allocation141_spill] sm:$0xff]  ;;  %1450 = vst [vmem:[#allocation2 + $0x168] sm:$0xff] %v10547_v13  ;;  %1451 = vst [vmem:[#allocation2 + $0x130] sm:$0xff] %v10547_v13 }
 0x209   : > { %v7395_v57 = vpop.permute.xlu0 %1075  ;;  %vm1437_vm13 = vcmp.lt.s32.totalorder %v10880_v11, 600  ;;  %v10881_v14 = vld [vmem:[#allocation142_spill] sm:$0xff]  ;;  %v10882_v17 = vld [vmem:[#allocation143_spill] sm:$0xff]  ;;  %1452 = vst [vmem:[#allocation2 + $0x48] sm:$0xff] %v10547_v13  ;;  %1453 = vst [vmem:[#allocation2 + $0x180] sm:$0xff] %v10547_v13 }
 0x20a   : > { %v7393_v6 = vpop.permute.xlu1 %1063  ;;  %vm1438_vm14 = vcmp.lt.s32.totalorder %v10881_v14, 600  ;;  %vm1439_vm15 = vcmp.lt.s32.totalorder %v10882_v17, 600  ;;  %1454 = vst [vmem:[#allocation2 + $0x110] sm:$0xff] %v10547_v13  ;;  %1455 = vst [vmem:[#allocation2 + $0x118] sm:$0xff] %v10547_v13 }
 0x20b   : > { %1456 = vst [vmem:[#allocation2 + $0x98] sm:$0xff] %v10547_v13  ;;  %1457 = vst [vmem:[#allocation2 + $0x120] sm:$0xff] %v10547_v13 }
 0x20c   : > { %1458 = vst [vmem:[#allocation2 + $0x150] sm:$0xff] %v10547_v13  ;;  %1459 = vst [vmem:[#allocation2 + $0x108] sm:$0xff] %v10547_v13 }
 0x20d   : > { %v7415_v19 = vpop.permute.xlu0 %1083  ;;  %1460 = vst [vmem:[#allocation2 + $0x60] sm:$0xff] %v10547_v13  ;;  %1461 = vst [vmem:[#allocation2 + $0xe0] sm:$0xff] %v10547_v13 }
 0x20e   : > { %v7413_v61 = vpop.permute.xlu1 %1071  ;;  %1462 = vst [vmem:[#allocation2 + $0x188] sm:$0xff] %v10547_v13  ;;  %1463 = vst [vmem:[#allocation2 + $0x138] sm:$0xff] %v10547_v13 }
 0x20f   : > { %1464 = vst [vmem:[#allocation2 + $0x140] sm:$0xff] %v10547_v13  ;;  %1465 = vst [vmem:[#allocation2 + $0x80] sm:$0xff] %v10547_v13 }
 0x210   : > { %1466 = vst [vmem:[#allocation2 + $0x1a8] sm:$0xff] %v10547_v13  ;;  %1467 = vst [vmem:[#allocation2 + $0x1b8] sm:$0xff] %v10547_v13 }
 0x211   : > { %v7435_v18 = vpop.permute.xlu0 %1091  ;;  %1468 = vst [vmem:[#allocation2 + $0x28] sm:$0xff] %v10547_v13  ;;  %1469 = vst [vmem:[#allocation2 + $0x1e8] sm:$0xff] %v10547_v13 }
 0x212   : > { %v7433_v15 = vpop.permute.xlu1 %1079  ;;  %10883 = vst [vmem:[#allocation213_spill] sm:$0xff] %v7435_v18  ;;  %1470 = vst [vmem:[#allocation2 + $0xf8] sm:$0xff] %v10547_v13 }
 0x213   : > { %1471 = vst [vmem:[#allocation2 + $0x160] sm:$0xff] %v10547_v13  ;;  %1472 = vst [vmem:[#allocation2 + $0x30] sm:$0xff] %v10547_v13 }
 0x214   : > { %1473 = vst [vmem:[#allocation2 + $0x1e0] sm:$0xff] %v10547_v13  ;;  %1474 = vst [vmem:[#allocation2] sm:$0xff] %v10547_v13 }
 0x215   : > { %1475 = vst [vmem:[#allocation2 + $0xf0] sm:$0xff] %v10547_v13  ;;  %1476 = vst [vmem:[#allocation2 + $0x8] sm:$0xff] %v10547_v13  ;;  %v7503_v16 = vpop.permute.xlu0 %1099 }
 0x216   : > { %1477 = vst [vmem:[#allocation2 + $0x148] sm:$0xff] %v10547_v13  ;;  %1478 = vst [vmem:[#allocation2 + $0x1d0] sm:$0xff] %v10547_v13  ;;  %v7501_v17 = vpop.permute.xlu1 %1087 }
 0x217   : > { %1479 = vst [vmem:[#allocation2 + $0x100] sm:$0xff] %v10547_v13  ;;  %1480 = vst [vmem:[#allocation2 + $0xc8] sm:$0xff] %v10547_v13 }
 0x218   : > { %1481 = vst [vmem:[#allocation2 + $0x40] sm:$0xff] %v10547_v13  ;;  %1482 = vst [vmem:[#allocation2 + $0x1f8] sm:$0xff] %v10547_v13 }
 0x219   : > { %1483 = vst [vmem:[#allocation2 + $0x20] sm:$0xff] %v10547_v13  ;;  %1484 = vst [vmem:[#allocation2 + $0x128] sm:$0xff] %v10547_v13  ;;  %v7507_v14 = vpop.permute.xlu0 %1107 }
 0x21a   : > { %1485 = vst [vmem:[#allocation2 + $0x1a0] sm:$0xff] %v10547_v13  ;;  %1486 = vst [vmem:[#allocation2 + $0x1f0] sm:$0xff] %v10547_v13  ;;  %v7505_v11 = vpop.permute.xlu1 %1095 }
 0x21b   : > { %1487 = vst [vmem:[#allocation2 + $0xe8] sm:$0xff] %v10547_v13  ;;  %1488 = vst [vmem:[#allocation2 + $0x78] sm:$0xff] %v10547_v13 }
 0x21c   : > { %1489 = vst [vmem:[#allocation2 + $0x70] sm:$0xff] %v10547_v13  ;;  %1490 = vst [vmem:[#allocation2 + $0x90] sm:$0xff] %v10547_v13 }
 0x21d   : > { %1491 = vst [vmem:[#allocation2 + $0x1d8] sm:$0xff] %v10547_v13  ;;  %1492 = vst [vmem:[#allocation2 + $0xd0] sm:$0xff] %v10547_v13  ;;  %v7511_v59 = vpop.permute.xlu0 %1115 }
 0x21e   : > { %1493 = vst [vmem:[#allocation2 + $0xb8] sm:$0xff] %v10547_v13  ;;  %1494 = vst [vmem:[#allocation2 + $0x88] sm:$0xff] %v10547_v13  ;;  %v7509_v10 = vpop.permute.xlu1 %1103 }
 0x21f   : > { %1495 = vst [vmem:[#allocation2 + $0xa8] sm:$0xff] %v10547_v13  ;;  %1496 = vst [vmem:[#allocation2 + $0x1c8] sm:$0xff] %v10547_v13 }
 0x220   : > { %1497 = vst [vmem:[#allocation2 + $0x170] sm:$0xff] %v10547_v13  ;;  %1498 = vst [vmem:[#allocation2 + $0x178] sm:$0xff] %v10547_v13 }
 0x221   : > { %1499 = vst [vmem:[#allocation2 + $0x68] sm:$0xff] %v10547_v13  ;;  %1500 = vst [vmem:[#allocation2 + $0x190] sm:$0xff] %v10547_v13  ;;  %v7515_v1 = vpop.permute.xlu0 %1123 }
 0x222   : > { %1501 = vst [vmem:[#allocation2 + $0x198] sm:$0xff] %v10547_v13  ;;  %1502 = vst [vmem:[#allocation2 + $0x38] sm:$0xff] %v10547_v13  ;;  %v7513_v2 = vpop.permute.xlu1 %1111 }
 0x223   : > { %1503 = vst [vmem:[#allocation2 + $0xc0] sm:$0xff] %v10547_v13  ;;  %1504 = vst [vmem:[#allocation2 + $0x1c0] sm:$0xff] %v10547_v13 }
 0x224   : > { %1505 = vst [vmem:[#allocation2 + $0x158] sm:$0xff] %v10547_v13  ;;  %1506 = vst [vmem:[#allocation2 + $0x10] sm:$0xff] %v10547_v13 }
 0x225   : > { %1507 = vst [vmem:[#allocation2 + $0x58] sm:$0xff] %v10547_v13  ;;  %1508 = vst [vmem:[#allocation2 + $0xa0] sm:$0xff] %v10547_v13  ;;  %v7519_v3 = vpop.permute.xlu0 %1131 }
 0x226   : > { %10884 = vst [vmem:[#allocation214_spill] sm:$0xff] %v7501_v17  ;;  %10885 = vst [vmem:[#allocation215_spill] sm:$0xff] %v7503_v16  ;;  %v7517_v58 = vpop.permute.xlu1 %1119 }
 0x227   : > { %10886 = vst [vmem:[#allocation216_spill] sm:$0xff] %v7505_v11  ;;  %10887 = vst [vmem:[#allocation217_spill] sm:$0xff] %v7507_v14 }
 0x228   : > { %10888 = vst [vmem:[#allocation218_spill] sm:$0xff] %v7509_v10  ;;  %10889 = vst [vmem:[#allocation219_spill] sm:$0xff] %v7511_v59 }
 0x229   : > { %10890 = vst [vmem:[#allocation220_spill] sm:$0xff] %v7513_v2  ;;  %10891 = vst [vmem:[#allocation221_spill] sm:$0xff] %v7515_v1  ;;  %v7523_v7 = vpop.permute.xlu0 %1139 }
 0x22a   : > { %10892 = vst [vmem:[#allocation222_spill] sm:$0xff] %v7517_v58  ;;  %10893 = vst [vmem:[#allocation223_spill] sm:$0xff] %v7519_v3  ;;  %v7521_v13 = vpop.permute.xlu1 %1127 }
 0x22b   : > { %10894 = vst [vmem:[#allocation224_spill] sm:$0xff] %v7521_v13  ;;  %10895 = vst [vmem:[#allocation225_spill] sm:$0xff] %v7523_v7 }
 0x22d   : > { %v7527_v12 = vpop.permute.xlu0 %1147 }
 0x22e   : > { %v7525_v9 = vpop.permute.xlu1 %1135  ;;  %10897 = vst [vmem:[#allocation227_spill] sm:$0xff] %v7527_v12 }
 0x22f   : > { %10896 = vst [vmem:[#allocation226_spill] sm:$0xff] %v7525_v9 }
 0x231   : > { %v7531_v22 = vpop.permute.xlu0 %1155 }
 0x232   : > { %v7529_v20 = vpop.permute.xlu1 %1143  ;;  %10899 = vst [vmem:[#allocation229_spill] sm:$0xff] %v7531_v22 }
 0x233   : > { %10898 = vst [vmem:[#allocation228_spill] sm:$0xff] %v7529_v20 }
 0x235   : > { %v7535_v26 = vpop.permute.xlu0 %1163 }
 0x236   : > { %v7533_v4 = vpop.permute.xlu1 %1151  ;;  %10901 = vst [vmem:[#allocation231_spill] sm:$0xff] %v7535_v26 }
 0x237   : > { %10900 = vst [vmem:[#allocation230_spill] sm:$0xff] %v7533_v4 }
 0x239   : > { %v7539_v23 = vpop.permute.xlu0 %1171 }
 0x23a   : > { %v7537_v28 = vpop.permute.xlu1 %1159  ;;  %10903 = vst [vmem:[#allocation233_spill] sm:$0xff] %v7539_v23 }
 0x23b   : > { %10902 = vst [vmem:[#allocation232_spill] sm:$0xff] %v7537_v28 }
 0x23d   : > { %v7543_v25 = vpop.permute.xlu0 %1179 }
 0x23e   : > { %v7541_v30 = vpop.permute.xlu1 %1167  ;;  %10905 = vst [vmem:[#allocation235_spill] sm:$0xff] %v7543_v25 }
 0x23f   : > { %10904 = vst [vmem:[#allocation234_spill] sm:$0xff] %v7541_v30 }
 0x241   : > { %v7547_v27 = vpop.permute.xlu0 %1187 }
 0x242   : > { %v7545_v32 = vpop.permute.xlu1 %1175  ;;  %10907 = vst [vmem:[#allocation237_spill] sm:$0xff] %v7547_v27 }
 0x243   : > { %10906 = vst [vmem:[#allocation236_spill] sm:$0xff] %v7545_v32 }
 0x245   : > { %v7551_v29 = vpop.permute.xlu0 %1195 }
 0x246   : > { %v7549_v34 = vpop.permute.xlu1 %1183  ;;  %10909 = vst [vmem:[#allocation239_spill] sm:$0xff] %v7551_v29 }
 0x247   : > { %10908 = vst [vmem:[#allocation238_spill] sm:$0xff] %v7549_v34 }
 0x249   : > { %v7555_v31 = vpop.permute.xlu0 %1203 }
 0x24a   : > { %v7553_v36 = vpop.permute.xlu1 %1191  ;;  %10911 = vst [vmem:[#allocation241_spill] sm:$0xff] %v7555_v31 }
 0x24b   : > { %10910 = vst [vmem:[#allocation240_spill] sm:$0xff] %v7553_v36 }
 0x24d   : > { %v7559_v33 = vpop.permute.xlu0 %1211 }
 0x24e   : > { %v7557_v38 = vpop.permute.xlu1 %1199  ;;  %10913 = vst [vmem:[#allocation243_spill] sm:$0xff] %v7559_v33 }
 0x24f   : > { %10912 = vst [vmem:[#allocation242_spill] sm:$0xff] %v7557_v38 }
 0x251   : > { %v7563_v35 = vpop.permute.xlu0 %1219 }
 0x252   : > { %v7561_v40 = vpop.permute.xlu1 %1207  ;;  %10915 = vst [vmem:[#allocation245_spill] sm:$0xff] %v7563_v35 }
 0x253   : > { %10914 = vst [vmem:[#allocation244_spill] sm:$0xff] %v7561_v40 }
 0x255   : > { %v7567_v39 = vpop.permute.xlu0 %1227 }
 0x256   : > { %v7565_v8 = vpop.permute.xlu1 %1215  ;;  %10917 = vst [vmem:[#allocation247_spill] sm:$0xff] %v7567_v39 }
 0x257   : > { %10916 = vst [vmem:[#allocation246_spill] sm:$0xff] %v7565_v8 }
 0x259   : > { %v7571_v48 = vpop.permute.xlu0 %1235 }
 0x25a   : > { %v7569_v41 = vpop.permute.xlu1 %1223  ;;  %10919 = vst [vmem:[#allocation249_spill] sm:$0xff] %v7571_v48 }
 0x25b   : > { %10918 = vst [vmem:[#allocation248_spill] sm:$0xff] %v7569_v41 }
 0x25d   : > { %v7575_v43 = vpop.permute.xlu0 %1243 }
 0x25e   : > { %v7573_v0 = vpop.permute.xlu1 %1231  ;;  %10921 = vst [vmem:[#allocation251_spill] sm:$0xff] %v7575_v43 }
 0x25f   : > { %10920 = vst [vmem:[#allocation250_spill] sm:$0xff] %v7573_v0 }
 0x262   : > { %v7577_v50 = vpop.permute.xlu1 %1239 }
 0x263   : > { %10922 = vst [vmem:[#allocation252_spill] sm:$0xff] %v7577_v50 }
 0x266   : > { %v7579_v49 = vpop.permute.xlu1 %1247 }
 0x267   : > { %10923 = vst [vmem:[#allocation253_spill] sm:$0xff] %v7579_v49 }
 0x268 LB: >> { %s5782_s27 = sshll.u32 %s5918_s26, 7  ;;  %v10924_v45 = vld [vmem:[#allocation19_spill] sm:$0xff]  ;;  %v10927_v54 = vld [vmem:[#allocation21_spill] sm:$0xff]  ;;  %v10929_v42 = vld [vmem:[#allocation136_spill] sm:$0xff]  ;;  %s1514_s26 = sadd.s32 1, %s5918_s26   ;;  %s5918_s26 = sphi %s7581_s26, %s1514_s26  }
 0x269   : >> { %s7587_s28 = sshra.s32 %s5782_s27, 7  ;;  %v10925_v60 = vld [vmem:[#allocation79_spill] sm:$0xff]  ;;  %v10928_v63 = vld [vmem:[#allocation17_spill] sm:$0xff]  ;;  %v10930_v43 = vld [vmem:[#allocation18_spill] sm:$0xff]  ;;  %p1511_p5 = scmp.ge.s32.totalorder %s1514_s26, 4  }
 0x26a   : >> { %s5783_s29 = sshll.u32 %s7587_s28, 3  ;;  %v10926_v55 = vld [vmem:[#allocation15_spill] sm:$0xff]  ;;  %v2035_v29 = vld [vmem:[#allocation2 + $0xb0] sm:$0xff]  ;;  %v11011_v9 = vld [vmem:[#allocation226_spill] sm:$0xff]  ;;  %vm10629_vm9 = vcmask (%p1511_p5), 7168   ;;  %s8570_s9 = smov (%p1511_p5), 0  }
 0x26b   : >> { %s7595_s7 = scalar_lea.vmem %s10510_s1, %s5783_s29  ;;  %v2040_v25 = vld [vmem:[#allocation2 + $0x168] sm:$0xff]  ;;  %v11016_v20 = vld [vmem:[#allocation228_spill] sm:$0xff]  ;;  %s2291_s8 = scalar_lea.vmem [#allocation3], %s5783_s29 }
 0x26c   : >> { %v7598_v53 = vld [vmem:[%s7595_s7] ss:$0 sm:$0xff]  ;;  %v7601_v47 = vld [vmem:[%s7595_s7 + $0x1] ss:$0 sm:$0xff]  ;;  %v7604_v46 = vld [vmem:[%s7595_s7 + $0x2] ss:$0 sm:$0xff] }
 0x26d   : >> { %v1523_v52 = vsub.f32 %v10924_v45, %v7598_v53  ;;  %v1587_v44 = vsub.f32 %v10925_v60, %v7601_v47  ;;  %v1651_v62 = vsub.f32 %v10926_v55, %v7604_v46  ;;  %v1524_v21 = vsub.f32 %v10927_v54, %v7598_v53  ;;  %v10931_v45 = vld [vmem:[#allocation80_spill] sm:$0xff]  ;;  %v10932_v54 = vld [vmem:[#allocation137_spill] sm:$0xff]  ;;  %v11008_v3 = vld [vmem:[#allocation223_spill] sm:$0xff] }
 0x26e   : >> { %v1588_v56 = vsub.f32 %v10928_v63, %v7601_v47  ;;  %v1652_v49 = vsub.f32 %v10929_v42, %v7604_v46  ;;  %v1525_v50 = vsub.f32 %v10930_v43, %v7598_v53  ;;  %v1589_v48 = vsub.f32 %v10931_v45, %v7601_v47  ;;  %v10933_v42 = vld [vmem:[#allocation20_spill] sm:$0xff]  ;;  %v10934_v43 = vld [vmem:[#allocation81_spill] sm:$0xff]  ;;  %v11019_v12 = vld [vmem:[#allocation227_spill] sm:$0xff] }
 0x26f   : >> { %v1715_v0 = vmul.f32 %v1523_v52, %v1523_v52  ;;  %v1779_v60 = vmul.f32 %v1587_v44, %v1587_v44  ;;  %v1907_v39 = vmul.f32 %v1651_v62, %v1651_v62  ;;  %v1716_v41 = vmul.f32 %v1524_v21, %v1524_v21  ;;  %v10935_v62 = vld [vmem:[#allocation139_spill] sm:$0xff] }
 0x270   : >> { %v1780_v55 = vmul.f32 %v1588_v56, %v1588_v56  ;;  %v1908_v35 = vmul.f32 %v1652_v49, %v1652_v49  ;;  %v1653_v8 = vsub.f32 %v10932_v54, %v7604_v46  ;;  %v1717_v33 = vmul.f32 %v1525_v50, %v1525_v50  ;;  %v10936_v56 = vld [vmem:[#allocation23_spill] sm:$0xff]  ;;  %v2036_v50 = vld [vmem:[#allocation2 + $0x1b0] sm:$0xff] }
 0x271   : >> { %v1843_v63 = vadd.f32 %v1779_v60, %v1715_v0  ;;  %v1781_v40 = vmul.f32 %v1589_v48, %v1589_v48  ;;  %v1526_v31 = vsub.f32 %v10933_v42, %v7598_v53  ;;  %v1590_v38 = vsub.f32 %v10934_v43, %v7601_v47  ;;  %v2037_v42 = vld [vmem:[#allocation2 + $0xd8] sm:$0xff]  ;;  %v10937_v43 = vld [vmem:[#allocation82_spill] sm:$0xff] }
 0x272   : >> { %v1844_v45 = vadd.f32 %v1780_v55, %v1716_v41  ;;  %v1909_v52 = vmul.f32 %v1653_v8, %v1653_v8  ;;  %v1654_v21 = vsub.f32 %v10935_v62, %v7604_v46  ;;  %v1527_v44 = vsub.f32 %v10936_v56, %v7598_v53  ;;  %v10938_v8 = vld [vmem:[#allocation138_spill] sm:$0xff] }
 0x273   : >> { %v7632_v49 = vadd.f32 %v1907_v39, %v1843_v63  ;;  %v1845_v0 = vadd.f32 %v1781_v40, %v1717_v33  ;;  %v1718_v48 = vmul.f32 %v1526_v31, %v1526_v31  ;;  %v1782_v60 = vmul.f32 %v1590_v38, %v1590_v38  ;;  %v2038_v33 = vld [vmem:[#allocation2 + $0x18] sm:$0xff]  ;;  %v10939_v31 = vld [vmem:[#allocation22_spill] sm:$0xff] }
 0x274   : >> { %v7634_v54 = vadd.f32 %v1908_v35, %v1844_v45  ;;  %v1910_v36 = vmul.f32 %v1654_v21, %v1654_v21  ;;  %v1591_v41 = vsub.f32 %v10937_v43, %v7601_v47  ;;  %v1655_v55 = vsub.f32 %v10938_v8, %v7604_v46  ;;  %v10940_v43 = vld [vmem:[#allocation83_spill] sm:$0xff] }
 0x275   : >> { %v2099_v62 = vmin.f32 %v2035_v29, %v7632_v49  ;;  %v7641_v27 = vadd.f32 %v1909_v52, %v1845_v0  ;;  %v1846_v39 = vadd.f32 %v1782_v60, %v1718_v48  ;;  %v1719_v63 = vmul.f32 %v1527_v44, %v1527_v44  ;;  %v10941_v52 = vld [vmem:[#allocation148_spill] sm:$0xff]  ;;  %v10942_v48 = vld [vmem:[#allocation25_spill] sm:$0xff] }
 0x276   : >> { %v2100_v40 = vmin.f32 %v2036_v50, %v7634_v54  ;;  %v1783_v38 = vmul.f32 %v1591_v41, %v1591_v41  ;;  %v1911_v35 = vmul.f32 %v1655_v55, %v1655_v55  ;;  %v1528_v45 = vsub.f32 %v10939_v31, %v7598_v53  ;;  %v10943_v41 = vld [vmem:[#allocation84_spill] sm:$0xff] }
 0x277   : >> { %2163 = vst [vmem:[#allocation2 + $0xb0] sm:$0xff] %v2099_v62  ;;  %v2101_v21 = vmin.f32 %v2037_v42, %v7641_v27  ;;  %v7647_v56 = vadd.f32 %v1910_v36, %v1846_v39  ;;  %v1592_v29 = vsub.f32 %v10940_v43, %v7601_v47  ;;  %v1656_v0 = vsub.f32 %v10941_v52, %v7604_v46  ;;  %v2039_v36 = vld [vmem:[#allocation2 + $0x50] sm:$0xff] }
 0x278   : >> { %2164 = vst [vmem:[#allocation2 + $0x1b0] sm:$0xff] %v2100_v40  ;;  %v1847_v44 = vadd.f32 %v1783_v38, %v1719_v63  ;;  %v1720_v50 = vmul.f32 %v1528_v45, %v1528_v45  ;;  %v1529_v60 = vsub.f32 %v10942_v48, %v7598_v53  ;;  %v1593_v8 = vsub.f32 %v10943_v41, %v7601_v47  ;;  %v10944_v39 = vld [vmem:[#allocation140_spill] sm:$0xff]  ;;  %v10946_v41 = vld [vmem:[#allocation85_spill] sm:$0xff] }
 0x279   : >> { %2165 = vst [vmem:[#allocation2 + $0xd8] sm:$0xff] %v2101_v21  ;;  %v2102_v42 = vmin.f32 %v2038_v33, %v7647_v56  ;;  %v1784_v55 = vmul.f32 %v1592_v29, %v1592_v29  ;;  %v1912_v62 = vmul.f32 %v1656_v0, %v1656_v0  ;;  %v1657_v31 = vsub.f32 %v10944_v39, %v7604_v46  ;;  %v10945_v63 = vld [vmem:[#allocation24_spill] sm:$0xff]  ;;  %v10947_v33 = vld [vmem:[#allocation166_spill] sm:$0xff] }
 0x27a   : >> { %v1975_v43 = vadd.f32 %v1911_v35, %v1847_v44  ;;  %v1721_v52 = vmul.f32 %v1529_v60, %v1529_v60  ;;  %v1785_v40 = vmul.f32 %v1593_v8, %v1593_v8  ;;  %v1530_v38 = vsub.f32 %v10945_v63, %v7598_v53  ;;  %v2041_v60 = vld [vmem:[#allocation2 + $0x130] sm:$0xff] }
 0x27b   : >> { %2166 = vst [vmem:[#allocation2 + $0x18] sm:$0xff] %v2102_v42  ;;  %v1848_v45 = vadd.f32 %v1784_v55, %v1720_v50  ;;  %v1913_v48 = vmul.f32 %v1657_v31, %v1657_v31  ;;  %v1594_v21 = vsub.f32 %v10946_v41, %v7601_v47  ;;  %v1658_v34 = vsub.f32 %v10947_v33, %v7604_v46  ;;  %v10948_v42 = vld [vmem:[#allocation27_spill] sm:$0xff]  ;;  %v10949_v31 = vld [vmem:[#allocation86_spill] sm:$0xff]  ;;  %v10950_v41 = vld [vmem:[#allocation149_spill] sm:$0xff] }
 0x27c   : >> { %v2103_v29 = vmin.f32 %v2039_v36, %v1975_v43  ;;  %v2227_v0 = vmin.f32 %v7632_v49, %v1975_v43  ;;  %v1849_v39 = vadd.f32 %v1785_v40, %v1721_v52  ;;  %v1722_v35 = vmul.f32 %v1530_v38, %v1530_v38  ;;  %v10951_v49 = vld [vmem:[#allocation26_spill] sm:$0xff] }
 0x27d   : >> { %v1976_v44 = vadd.f32 %v1912_v62, %v1848_v45  ;;  %v1786_v8 = vmul.f32 %v1594_v21, %v1594_v21  ;;  %v1914_v32 = vmul.f32 %v1658_v34, %v1658_v34  ;;  %v1531_v50 = vsub.f32 %v10948_v42, %v7598_v53  ;;  %v2042_v21 = vld [vmem:[#allocation2 + $0x48] sm:$0xff] }
 0x27e   : >> { %2167 = vst [vmem:[#allocation2 + $0x50] sm:$0xff] %v2103_v29  ;;  %v1977_v55 = vadd.f32 %v1913_v48, %v1849_v39  ;;  %v1595_v63 = vsub.f32 %v10949_v31, %v7601_v47  ;;  %v1659_v36 = vsub.f32 %v10950_v41, %v7604_v46  ;;  %v1532_v43 = vsub.f32 %v10951_v49, %v7598_v53  ;;  %v10952_v39 = vld [vmem:[#allocation87_spill] sm:$0xff]  ;;  %v10953_v31 = vld [vmem:[#allocation184_spill] sm:$0xff] }
 0x27f   : >> { %v2104_v52 = vmin.f32 %v2040_v25, %v1976_v44  ;;  %v2228_v62 = vmin.f32 %v7634_v54, %v1976_v44  ;;  %v1850_v40 = vadd.f32 %v1786_v8, %v1722_v35  ;;  %v1723_v38 = vmul.f32 %v1531_v50, %v1531_v50  ;;  %v10954_v54 = vld [vmem:[#allocation29_spill] sm:$0xff]  ;;  %v10955_v44 = vld [vmem:[#allocation88_spill] sm:$0xff] }
 0x280   : >> { %v2105_v34 = vmin.f32 %v2041_v60, %v1977_v55  ;;  %v2229_v45 = vmin.f32 %v7641_v27, %v1977_v55  ;;  %v1787_v33 = vmul.f32 %v1595_v63, %v1595_v63  ;;  %v1915_v48 = vmul.f32 %v1659_v36, %v1659_v36  ;;  %v10956_v60 = vld [vmem:[#allocation167_spill] sm:$0xff]  ;;  %v2043_v55 = vld [vmem:[#allocation2 + $0x180] sm:$0xff] }
 0x281   : >> { %2168 = vst [vmem:[#allocation2 + $0x168] sm:$0xff] %v2104_v52  ;;  %v1978_v29 = vadd.f32 %v1914_v32, %v1850_v40  ;;  %v1596_v42 = vsub.f32 %v10952_v39, %v7601_v47  ;;  %v1660_v41 = vsub.f32 %v10953_v31, %v7604_v46  ;;  %v1724_v49 = vmul.f32 %v1532_v43, %v1532_v43  ;;  %v10958_v31 = vld [vmem:[#allocation89_spill] sm:$0xff] }
 0x282   : >> { %2169 = vst [vmem:[#allocation2 + $0x130] sm:$0xff] %v2105_v34  ;;  %v1851_v25 = vadd.f32 %v1787_v33, %v1723_v38  ;;  %v1533_v35 = vsub.f32 %v10954_v54, %v7598_v53  ;;  %v1597_v27 = vsub.f32 %v10955_v44, %v7601_v47  ;;  %v1661_v8 = vsub.f32 %v10956_v60, %v7604_v46  ;;  %v10957_v33 = vld [vmem:[#allocation28_spill] sm:$0xff]  ;;  %v10959_v44 = vld [vmem:[#allocation202_spill] sm:$0xff] }
 0x283   : >> { %v2106_v50 = vmin.f32 %v2042_v21, %v1978_v29  ;;  %v2230_v32 = vmin.f32 %v7647_v56, %v1978_v29  ;;  %v1788_v63 = vmul.f32 %v1596_v42, %v1596_v42  ;;  %v1916_v36 = vmul.f32 %v1660_v41, %v1660_v41  ;;  %v2044_v29 = vld [vmem:[#allocation2 + $0x110] sm:$0xff] }
 0x284   : >> { %v1979_v52 = vadd.f32 %v1915_v48, %v1851_v25  ;;  %v1725_v40 = vmul.f32 %v1533_v35, %v1533_v35  ;;  %v1789_v43 = vmul.f32 %v1597_v27, %v1597_v27  ;;  %v1917_v34 = vmul.f32 %v1661_v8, %v1661_v8  ;;  %v10960_v48 = vld [vmem:[#allocation31_spill] sm:$0xff]  ;;  %v2045_v35 = vld [vmem:[#allocation2 + $0x118] sm:$0xff] }
 0x285   : >> { %2170 = vst [vmem:[#allocation2 + $0x48] sm:$0xff] %v2106_v50  ;;  %v1852_v38 = vadd.f32 %v1788_v63, %v1724_v49  ;;  %v1534_v39 = vsub.f32 %v10957_v33, %v7598_v53  ;;  %v1598_v54 = vsub.f32 %v10958_v31, %v7601_v47  ;;  %v1662_v21 = vsub.f32 %v10959_v44, %v7604_v46  ;;  %v10961_v63 = vld [vmem:[#allocation90_spill] sm:$0xff]  ;;  %v10962_v31 = vld [vmem:[#allocation185_spill] sm:$0xff] }
 0x286   : >> { %v2107_v60 = vmin.f32 %v2043_v55, %v1979_v52  ;;  %v7694_v56 = vmin.f32 %v2227_v0, %v1979_v52  ;;  %v1853_v42 = vadd.f32 %v1789_v43, %v1725_v40  ;;  %v1535_v41 = vsub.f32 %v10960_v48, %v7598_v53  ;;  %v10963_v43 = vld [vmem:[#allocation30_spill] sm:$0xff] }
 0x287   : >> { %v1980_v25 = vadd.f32 %v1916_v36, %v1852_v38  ;;  %v1726_v49 = vmul.f32 %v1534_v39, %v1534_v39  ;;  %v1790_v27 = vmul.f32 %v1598_v54, %v1598_v54  ;;  %v1918_v8 = vmul.f32 %v1662_v21, %v1662_v21  ;;  %v2046_v54 = vld [vmem:[#allocation2 + $0x98] sm:$0xff] }
 0x288   : >> { %2171 = vst [vmem:[#allocation2 + $0x180] sm:$0xff] %v2107_v60  ;;  %v1981_v50 = vadd.f32 %v1917_v34, %v1853_v42  ;;  %v1599_v33 = vsub.f32 %v10961_v63, %v7601_v47  ;;  %v1663_v55 = vsub.f32 %v10962_v31, %v7604_v46  ;;  %v1727_v0 = vmul.f32 %v1535_v41, %v1535_v41  ;;  %v10964_v42 = vld [vmem:[#allocation91_spill] sm:$0xff] }
 0x289   : >> { %v2108_v52 = vmin.f32 %v2044_v29, %v1980_v25  ;;  %v7702_v44 = vmin.f32 %v2228_v62, %v1980_v25  ;;  %v1854_v40 = vadd.f32 %v1790_v27, %v1726_v49  ;;  %v1536_v36 = vsub.f32 %v10963_v43, %v7598_v53  ;;  %v10965_v25 = vld [vmem:[#allocation33_spill] sm:$0xff]  ;;  %v10967_v27 = vld [vmem:[#allocation203_spill] sm:$0xff] }
 0x28a   : >> { %v2109_v38 = vmin.f32 %v2045_v35, %v1981_v50  ;;  %v7706_v39 = vmin.f32 %v2229_v45, %v1981_v50  ;;  %v1791_v21 = vmul.f32 %v1599_v33, %v1599_v33  ;;  %v1919_v34 = vmul.f32 %v1663_v55, %v1663_v55  ;;  %v10966_v45 = vld [vmem:[#allocation92_spill] sm:$0xff]  ;;  %v2047_v33 = vld [vmem:[#allocation2 + $0x120] sm:$0xff] }
 0x28b   : >> { %2172 = vst [vmem:[#allocation2 + $0x110] sm:$0xff] %v2108_v52  ;;  %v1982_v60 = vadd.f32 %v1918_v8, %v1854_v40  ;;  %v1600_v48 = vsub.f32 %v10964_v42, %v7601_v47  ;;  %v1664_v29 = vsub.f32 %v7353_v51, %v7604_v46  ;;  %v1728_v62 = vmul.f32 %v1536_v36, %v1536_v36  ;;  %v10969_v42 = vld [vmem:[#allocation93_spill] sm:$0xff] }
 0x28c   : >> { %2173 = vst [vmem:[#allocation2 + $0x118] sm:$0xff] %v2109_v38  ;;  %v1855_v41 = vadd.f32 %v1791_v21, %v1727_v0  ;;  %v1537_v49 = vsub.f32 %v10965_v25, %v7598_v53  ;;  %v1601_v35 = vsub.f32 %v10966_v45, %v7601_v47  ;;  %v1665_v50 = vsub.f32 %v10967_v27, %v7604_v46  ;;  %v10968_v38 = vld [vmem:[#allocation32_spill] sm:$0xff]  ;;  %v2049_v45 = vld [vmem:[#allocation2 + $0x108] sm:$0xff] }
 0x28d   : >> { %v2110_v63 = vmin.f32 %v2046_v54, %v1982_v60  ;;  %v7718_v8 = vmin.f32 %v2230_v32, %v1982_v60  ;;  %v1792_v31 = vmul.f32 %v1600_v48, %v1600_v48  ;;  %v1920_v55 = vmul.f32 %v1664_v29, %v1664_v29  ;;  %v2048_v48 = vld [vmem:[#allocation2 + $0x150] sm:$0xff] }
 0x28e   : >> { %v1983_v52 = vadd.f32 %v1919_v34, %v1855_v41  ;;  %v1729_v40 = vmul.f32 %v1537_v49, %v1537_v49  ;;  %v1793_v43 = vmul.f32 %v1601_v35, %v1601_v35  ;;  %v1921_v36 = vmul.f32 %v1665_v50, %v1665_v50  ;;  %v10970_v34 = vld [vmem:[#allocation35_spill] sm:$0xff] }
 0x28f   : >> { %2174 = vst [vmem:[#allocation2 + $0x98] sm:$0xff] %v2110_v63  ;;  %v1856_v0 = vadd.f32 %v1792_v31, %v1728_v62  ;;  %v1538_v21 = vsub.f32 %v10968_v38, %v7598_v53  ;;  %v1602_v25 = vsub.f32 %v10969_v42, %v7601_v47  ;;  %v1666_v54 = vsub.f32 %v7373_v24, %v7604_v46  ;;  %v10971_v63 = vld [vmem:[#allocation94_spill] sm:$0xff] }
 0x290   : >> { %v2111_v32 = vmin.f32 %v2047_v33, %v1983_v52  ;;  %v2235_v60 = vmin.f32 %v7694_v56, %v1983_v52  ;;  %v1857_v29 = vadd.f32 %v1793_v43, %v1729_v40  ;;  %v1539_v41 = vsub.f32 %v10970_v34, %v7598_v53  ;;  %v10972_v43 = vld [vmem:[#allocation34_spill] sm:$0xff] }
 0x291   : >> { %v1984_v49 = vadd.f32 %v1920_v55, %v1856_v0  ;;  %v1730_v62 = vmul.f32 %v1538_v21, %v1538_v21  ;;  %v1794_v35 = vmul.f32 %v1602_v25, %v1602_v25  ;;  %v1922_v27 = vmul.f32 %v1666_v54, %v1666_v54  ;;  %v2050_v42 = vld [vmem:[#allocation2 + $0x60] sm:$0xff] }
 0x292   : >> { %2175 = vst [vmem:[#allocation2 + $0x120] sm:$0xff] %v2111_v32  ;;  %v1985_v50 = vadd.f32 %v1921_v36, %v1857_v29  ;;  %v1603_v31 = vsub.f32 %v10971_v63, %v7601_v47  ;;  %v1667_v33 = vsub.f32 %v7355_v5, %v7604_v46  ;;  %v1731_v38 = vmul.f32 %v1539_v41, %v1539_v41  ;;  %v10973_v32 = vld [vmem:[#allocation95_spill] sm:$0xff]  ;;  %v10974_v41 = vld [vmem:[#allocation37_spill] sm:$0xff] }
 0x293   : >> { %v2112_v56 = vmin.f32 %v2048_v48, %v1984_v49  ;;  %v2236_v52 = vmin.f32 %v7702_v44, %v1984_v49  ;;  %v1858_v40 = vadd.f32 %v1794_v35, %v1730_v62  ;;  %v1540_v55 = vsub.f32 %v10972_v43, %v7598_v53 }
 0x294   : >> { %v2113_v0 = vmin.f32 %v2049_v45, %v1985_v50  ;;  %v2237_v21 = vmin.f32 %v7706_v39, %v1985_v50  ;;  %v1795_v25 = vmul.f32 %v1603_v31, %v1603_v31  ;;  %v1923_v36 = vmul.f32 %v1667_v33, %v1667_v33  ;;  %v10975_v45 = vld [vmem:[#allocation96_spill] sm:$0xff]  ;;  %v2051_v50 = vld [vmem:[#allocation2 + $0xe0] sm:$0xff] }
 0x295   : >> { %2176 = vst [vmem:[#allocation2 + $0x150] sm:$0xff] %v2112_v56  ;;  %v1986_v54 = vadd.f32 %v1922_v27, %v1858_v40  ;;  %v1604_v29 = vsub.f32 %v10973_v32, %v7601_v47  ;;  %v1668_v48 = vsub.f32 %v7393_v6, %v7604_v46  ;;  %v1732_v34 = vmul.f32 %v1540_v55, %v1540_v55  ;;  %v10976_v55 = vld [vmem:[#allocation36_spill] sm:$0xff] }
 0x296   : >> { %2177 = vst [vmem:[#allocation2 + $0x108] sm:$0xff] %v2113_v0  ;;  %v1859_v44 = vadd.f32 %v1795_v25, %v1731_v38  ;;  %v1541_v49 = vsub.f32 %v10974_v41, %v7598_v53  ;;  %v1605_v39 = vsub.f32 %v10975_v45, %v7601_v47  ;;  %v1669_v62 = vsub.f32 %v7375_v37, %v7604_v46  ;;  %v10977_v25 = vld [vmem:[#allocation97_spill] sm:$0xff] }
 0x297   : >> { %v2114_v35 = vmin.f32 %v2050_v42, %v1986_v54  ;;  %v2238_v27 = vmin.f32 %v7718_v8, %v1986_v54  ;;  %v1796_v63 = vmul.f32 %v1604_v29, %v1604_v29  ;;  %v1924_v31 = vmul.f32 %v1668_v48, %v1668_v48  ;;  %v2052_v54 = vld [vmem:[#allocation2 + $0x188] sm:$0xff] }
 0x298   : >> { %v1987_v33 = vadd.f32 %v1923_v36, %v1859_v44  ;;  %v1733_v56 = vmul.f32 %v1541_v49, %v1541_v49  ;;  %v1797_v40 = vmul.f32 %v1605_v39, %v1605_v39  ;;  %v1925_v43 = vmul.f32 %v1669_v62, %v1669_v62  ;;  %v10978_v36 = vld [vmem:[#allocation39_spill] sm:$0xff]  ;;  %v2053_v49 = vld [vmem:[#allocation2 + $0x138] sm:$0xff] }
 0x299   : >> { %2178 = vst [vmem:[#allocation2 + $0x60] sm:$0xff] %v2114_v35  ;;  %v1860_v38 = vadd.f32 %v1796_v63, %v1732_v34  ;;  %v1542_v0 = vsub.f32 %v10976_v55, %v7598_v53  ;;  %v1606_v32 = vsub.f32 %v10977_v25, %v7601_v47  ;;  %v1670_v42 = vsub.f32 %v7413_v61, %v7604_v46  ;;  %v10979_v35 = vld [vmem:[#allocation98_spill] sm:$0xff] }
 0x29a   : >> { %v2115_v41 = vmin.f32 %v2051_v50, %v1987_v33  ;;  %v7754_v8 = vmin.f32 %v2235_v60, %v1987_v33  ;;  %v1861_v29 = vadd.f32 %v1797_v40, %v1733_v56  ;;  %v1543_v48 = vsub.f32 %v10978_v36, %v7598_v53  ;;  %v10980_v40 = vld [vmem:[#allocation38_spill] sm:$0xff] }
 0x29b   : >> { %v1988_v44 = vadd.f32 %v1924_v31, %v1860_v38  ;;  %v1734_v34 = vmul.f32 %v1542_v0, %v1542_v0  ;;  %v1798_v45 = vmul.f32 %v1606_v32, %v1606_v32  ;;  %v1926_v39 = vmul.f32 %v1670_v42, %v1670_v42  ;;  %v2054_v25 = vld [vmem:[#allocation2 + $0x140] sm:$0xff] }
 0x29c   : >> { %2179 = vst [vmem:[#allocation2 + $0xe0] sm:$0xff] %v2115_v41  ;;  %v1989_v62 = vadd.f32 %v1925_v43, %v1861_v29  ;;  %v1607_v63 = vsub.f32 %v10979_v35, %v7601_v47  ;;  %v1671_v50 = vsub.f32 %v7395_v57, %v7604_v46  ;;  %v1735_v60 = vmul.f32 %v1543_v48, %v1543_v48  ;;  %v10981_v41 = vld [vmem:[#allocation99_spill] sm:$0xff]  ;;  %v10982_v48 = vld [vmem:[#allocation41_spill] sm:$0xff] }
 0x29d   : >> { %v2116_v33 = vmin.f32 %v2052_v54, %v1988_v44  ;;  %v7762_v55 = vmin.f32 %v2236_v52, %v1988_v44  ;;  %v1862_v56 = vadd.f32 %v1798_v45, %v1734_v34  ;;  %v1544_v31 = vsub.f32 %v10980_v40, %v7598_v53 }
 0x29e   : >> { %v2117_v38 = vmin.f32 %v2053_v49, %v1989_v62  ;;  %v7766_v0 = vmin.f32 %v2237_v21, %v1989_v62  ;;  %v1799_v32 = vmul.f32 %v1607_v63, %v1607_v63  ;;  %v1927_v43 = vmul.f32 %v1671_v50, %v1671_v50  ;;  %v10983_v21 = vld [vmem:[#allocation100_spill] sm:$0xff]  ;;  %v2055_v62 = vld [vmem:[#allocation2 + $0x80] sm:$0xff] }
 0x29f   : >> { %2180 = vst [vmem:[#allocation2 + $0x188] sm:$0xff] %v2116_v33  ;;  %v1990_v42 = vadd.f32 %v1926_v39, %v1862_v56  ;;  %v1608_v29 = vsub.f32 %v10981_v41, %v7601_v47  ;;  %v1672_v54 = vsub.f32 %v7433_v15, %v7604_v46  ;;  %v1736_v52 = vmul.f32 %v1544_v31, %v1544_v31  ;;  %v10984_v31 = vld [vmem:[#allocation40_spill] sm:$0xff] }
 0x2a0   : >> { %2181 = vst [vmem:[#allocation2 + $0x138] sm:$0xff] %v2117_v38  ;;  %v1863_v36 = vadd.f32 %v1799_v32, %v1735_v60  ;;  %v1545_v44 = vsub.f32 %v10982_v48, %v7598_v53  ;;  %v1609_v49 = vsub.f32 %v10983_v21, %v7601_v47  ;;  %v1673_v34 = vsub.f32 %v7415_v19, %v7604_v46  ;;  %v10985_v32 = vld [vmem:[#allocation101_spill] sm:$0xff] }
 0x2a1   : >> { %v2118_v45 = vmin.f32 %v2054_v25, %v1990_v42  ;;  %v7778_v39 = vmin.f32 %v2238_v27, %v1990_v42  ;;  %v1800_v35 = vmul.f32 %v1608_v29, %v1608_v29  ;;  %v1928_v63 = vmul.f32 %v1672_v54, %v1672_v54  ;;  %v2056_v29 = vld [vmem:[#allocation2 + $0x1a8] sm:$0xff] }
 0x2a2   : >> { %v1991_v50 = vadd.f32 %v1927_v43, %v1863_v36  ;;  %v1737_v33 = vmul.f32 %v1545_v44, %v1545_v44  ;;  %v1801_v56 = vmul.f32 %v1609_v49, %v1609_v49  ;;  %v1929_v40 = vmul.f32 %v1673_v34, %v1673_v34  ;;  %v10986_v43 = vld [vmem:[#allocation43_spill] sm:$0xff]  ;;  %v2057_v44 = vld [vmem:[#allocation2 + $0x1b8] sm:$0xff] }
 0x2a3   : >> { %2182 = vst [vmem:[#allocation2 + $0x140] sm:$0xff] %v2118_v45  ;;  %v1864_v60 = vadd.f32 %v1800_v35, %v1736_v52  ;;  %v1546_v38 = vsub.f32 %v10984_v31, %v7598_v53  ;;  %v1610_v41 = vsub.f32 %v10985_v32, %v7601_v47  ;;  %v1674_v25 = vsub.f32 %v7501_v17, %v7604_v46  ;;  %v10987_v45 = vld [vmem:[#allocation102_spill] sm:$0xff]  ;;  %v2058_v32 = vld [vmem:[#allocation2 + $0x28] sm:$0xff] }
 0x2a4   : >> { %v2119_v27 = vmin.f32 %v2055_v62, %v1991_v50  ;;  %v2243_v42 = vmin.f32 %v7754_v8, %v1991_v50  ;;  %v1865_v54 = vadd.f32 %v1801_v56, %v1737_v33  ;;  %v1547_v36 = vsub.f32 %v10986_v43, %v7598_v53  ;;  %v10988_v56 = vld [vmem:[#allocation42_spill] sm:$0xff] }
 0x2a5   : >> { %v1992_v48 = vadd.f32 %v1928_v63, %v1864_v60  ;;  %v1738_v52 = vmul.f32 %v1546_v38, %v1546_v38  ;;  %v1802_v21 = vmul.f32 %v1610_v41, %v1610_v41  ;;  %v1930_v49 = vmul.f32 %v1674_v25, %v1674_v25 }
 0x2a6   : >> { %2183 = vst [vmem:[#allocation2 + $0x80] sm:$0xff] %v2119_v27  ;;  %v1993_v34 = vadd.f32 %v1929_v40, %v1865_v54  ;;  %v1611_v35 = vsub.f32 %v10987_v45, %v7601_v47  ;;  %v1675_v62 = vsub.f32 %v7435_v18, %v7604_v46  ;;  %v1739_v31 = vmul.f32 %v1547_v36, %v1547_v36  ;;  %v10989_v27 = vld [vmem:[#allocation103_spill] sm:$0xff]  ;;  %v10990_v36 = vld [vmem:[#allocation45_spill] sm:$0xff] }
 0x2a7   : >> { %v2120_v8 = vmin.f32 %v2056_v29, %v1992_v48  ;;  %v2244_v50 = vmin.f32 %v7762_v55, %v1992_v48  ;;  %v1866_v33 = vadd.f32 %v1802_v21, %v1738_v52  ;;  %v1548_v63 = vsub.f32 %v10988_v56, %v7598_v53 }
 0x2a8   : >> { %v2121_v60 = vmin.f32 %v2057_v44, %v1993_v34  ;;  %v2245_v38 = vmin.f32 %v7766_v0, %v1993_v34  ;;  %v1803_v41 = vmul.f32 %v1611_v35, %v1611_v35  ;;  %v1931_v40 = vmul.f32 %v1675_v62, %v1675_v62  ;;  %v10991_v44 = vld [vmem:[#allocation104_spill] sm:$0xff]  ;;  %v2059_v34 = vld [vmem:[#allocation2 + $0x1e8] sm:$0xff] }
 0x2a9   : >> { %2184 = vst [vmem:[#allocation2 + $0x1a8] sm:$0xff] %v2120_v8  ;;  %v1994_v25 = vadd.f32 %v1930_v49, %v1866_v33  ;;  %v1612_v54 = vsub.f32 %v10989_v27, %v7601_v47  ;;  %v1676_v29 = vsub.f32 %v7505_v11, %v7604_v46  ;;  %v1740_v43 = vmul.f32 %v1548_v63, %v1548_v63  ;;  %v10992_v63 = vld [vmem:[#allocation44_spill] sm:$0xff] }
 0x2aa   : >> { %2185 = vst [vmem:[#allocation2 + $0x1b8] sm:$0xff] %v2121_v60  ;;  %v1867_v55 = vadd.f32 %v1803_v41, %v1739_v31  ;;  %v1549_v48 = vsub.f32 %v10990_v36, %v7598_v53  ;;  %v1613_v0 = vsub.f32 %v10991_v44, %v7601_v47  ;;  %v1677_v52 = vsub.f32 %v7503_v16, %v7604_v46  ;;  %v10993_v41 = vld [vmem:[#allocation105_spill] sm:$0xff] }
 0x2ab   : >> { %v2122_v21 = vmin.f32 %v2058_v32, %v1994_v25  ;;  %v2246_v49 = vmin.f32 %v7778_v39, %v1994_v25  ;;  %v1804_v45 = vmul.f32 %v1612_v54, %v1612_v54  ;;  %v1932_v35 = vmul.f32 %v1676_v29, %v1676_v29  ;;  %v2060_v25 = vld [vmem:[#allocation2 + $0xf8] sm:$0xff] }
 0x2ac   : >> { %v1995_v62 = vadd.f32 %v1931_v40, %v1867_v55  ;;  %v1741_v8 = vmul.f32 %v1549_v48, %v1549_v48  ;;  %v1805_v33 = vmul.f32 %v1613_v0, %v1613_v0  ;;  %v1933_v56 = vmul.f32 %v1677_v52, %v1677_v52  ;;  %v10994_v40 = vld [vmem:[#allocation47_spill] sm:$0xff]  ;;  %v2061_v48 = vld [vmem:[#allocation2 + $0x160] sm:$0xff] }
 0x2ad   : >> { %2186 = vst [vmem:[#allocation2 + $0x28] sm:$0xff] %v2122_v21  ;;  %v1868_v31 = vadd.f32 %v1804_v45, %v1740_v43  ;;  %v1550_v60 = vsub.f32 %v10992_v63, %v7598_v53  ;;  %v1614_v27 = vsub.f32 %v10993_v41, %v7601_v47  ;;  %v1678_v32 = vsub.f32 %v7509_v10, %v7604_v46  ;;  %v10995_v21 = vld [vmem:[#allocation106_spill] sm:$0xff]  ;;  %v2062_v41 = vld [vmem:[#allocation2 + $0x30] sm:$0xff] }
 0x2ae   : >> { %v2123_v36 = vmin.f32 %v2059_v34, %v1995_v62  ;;  %v7814_v39 = vmin.f32 %v2243_v42, %v1995_v62  ;;  %v1869_v54 = vadd.f32 %v1805_v33, %v1741_v8  ;;  %v1551_v29 = vsub.f32 %v10994_v40, %v7598_v53  ;;  %v10996_v33 = vld [vmem:[#allocation46_spill] sm:$0xff] }
 0x2af   : >> { %v1996_v55 = vadd.f32 %v1932_v35, %v1868_v31  ;;  %v1742_v43 = vmul.f32 %v1550_v60, %v1550_v60  ;;  %v1806_v44 = vmul.f32 %v1614_v27, %v1614_v27  ;;  %v1934_v0 = vmul.f32 %v1678_v32, %v1678_v32 }
 0x2b0   : >> { %2187 = vst [vmem:[#allocation2 + $0x1e8] sm:$0xff] %v2123_v36  ;;  %v1997_v52 = vadd.f32 %v1933_v56, %v1869_v54  ;;  %v1615_v45 = vsub.f32 %v10995_v21, %v7601_v47  ;;  %v1679_v34 = vsub.f32 %v7507_v14, %v7604_v46  ;;  %v1743_v42 = vmul.f32 %v1551_v29, %v1551_v29  ;;  %v10997_v36 = vld [vmem:[#allocation107_spill] sm:$0xff]  ;;  %v10998_v29 = vld [vmem:[#allocation49_spill] sm:$0xff] }
 0x2b1   : >> { %v2124_v62 = vmin.f32 %v2060_v25, %v1996_v55  ;;  %v7822_v63 = vmin.f32 %v2244_v50, %v1996_v55  ;;  %v1870_v8 = vadd.f32 %v1806_v44, %v1742_v43  ;;  %v1552_v35 = vsub.f32 %v10996_v33, %v7598_v53 }
 0x2b2   : >> { %v2125_v31 = vmin.f32 %v2061_v48, %v1997_v52  ;;  %v7826_v60 = vmin.f32 %v2245_v38, %v1997_v52  ;;  %v1807_v27 = vmul.f32 %v1615_v45, %v1615_v45  ;;  %v1935_v56 = vmul.f32 %v1679_v34, %v1679_v34  ;;  %v10999_v38 = vld [vmem:[#allocation108_spill] sm:$0xff]  ;;  %v2063_v52 = vld [vmem:[#allocation2 + $0x1e0] sm:$0xff] }
 0x2b3   : >> { %2188 = vst [vmem:[#allocation2 + $0xf8] sm:$0xff] %v2124_v62  ;;  %v1998_v32 = vadd.f32 %v1934_v0, %v1870_v8  ;;  %v1616_v54 = vsub.f32 %v10997_v36, %v7601_v47  ;;  %v1680_v25 = vsub.f32 %v7513_v2, %v7604_v46  ;;  %v1744_v50 = vmul.f32 %v1552_v35, %v1552_v35  ;;  %v11000_v35 = vld [vmem:[#allocation48_spill] sm:$0xff] }
 0x2b4   : >> { %2189 = vst [vmem:[#allocation2 + $0x160] sm:$0xff] %v2125_v31  ;;  %v1871_v40 = vadd.f32 %v1807_v27, %v1743_v42  ;;  %v1553_v55 = vsub.f32 %v10998_v29, %v7598_v53  ;;  %v1617_v48 = vsub.f32 %v10999_v38, %v7601_v47  ;;  %v1681_v43 = vsub.f32 %v7511_v59, %v7604_v46  ;;  %v11001_v27 = vld [vmem:[#allocation109_spill] sm:$0xff] }
 0x2b5   : >> { %v2126_v44 = vmin.f32 %v2062_v41, %v1998_v32  ;;  %v7838_v0 = vmin.f32 %v2246_v49, %v1998_v32  ;;  %v1808_v21 = vmul.f32 %v1616_v54, %v1616_v54  ;;  %v1936_v45 = vmul.f32 %v1680_v25, %v1680_v25  ;;  %v2064_v54 = vld [vmem:[#allocation2] sm:$0xff] }
 0x2b6   : >> { %v1999_v34 = vadd.f32 %v1935_v56, %v1871_v40  ;;  %v1745_v62 = vmul.f32 %v1553_v55, %v1553_v55  ;;  %v1809_v8 = vmul.f32 %v1617_v48, %v1617_v48  ;;  %v1937_v33 = vmul.f32 %v1681_v43, %v1681_v43  ;;  %v11002_v56 = vld [vmem:[#allocation51_spill] sm:$0xff] }
 0x2b7   : >> { %2190 = vst [vmem:[#allocation2 + $0x30] sm:$0xff] %v2126_v44  ;;  %v1872_v42 = vadd.f32 %v1808_v21, %v1744_v50  ;;  %v1554_v31 = vsub.f32 %v11000_v35, %v7598_v53  ;;  %v1618_v36 = vsub.f32 %v11001_v27, %v7601_v47  ;;  %v1682_v41 = vsub.f32 %v7517_v58, %v7604_v46  ;;  %v2065_v50 = vld [vmem:[#allocation2 + $0xf0] sm:$0xff]  ;;  %v11003_v44 = vld [vmem:[#allocation110_spill] sm:$0xff] }
 0x2b8   : >> { %v2127_v49 = vmin.f32 %v2063_v52, %v1999_v34  ;;  %v2251_v32 = vmin.f32 %v7814_v39, %v1999_v34  ;;  %v1873_v25 = vadd.f32 %v1809_v8, %v1745_v62  ;;  %v1555_v40 = vsub.f32 %v11002_v56, %v7598_v53  ;;  %v11004_v8 = vld [vmem:[#allocation50_spill] sm:$0xff] }
 0x2b9   : >> { %v7849_v29 = vadd.f32 %v1936_v45, %v1872_v42  ;;  %v1746_v55 = vmul.f32 %v1554_v31, %v1554_v31  ;;  %v1810_v38 = vmul.f32 %v1618_v36, %v1618_v36  ;;  %v1938_v48 = vmul.f32 %v1682_v41, %v1682_v41  ;;  %v2066_v31 = vld [vmem:[#allocation2 + $0x8] sm:$0xff] }
 0x2ba   : >> { %2191 = vst [vmem:[#allocation2 + $0x1e0] sm:$0xff] %v2127_v49  ;;  %v7851_v43 = vadd.f32 %v1937_v33, %v1873_v25  ;;  %v1619_v21 = vsub.f32 %v11003_v44, %v7601_v47  ;;  %v1683_v39 = vsub.f32 %v7515_v1, %v7604_v46  ;;  %v1747_v52 = vmul.f32 %v1555_v40, %v1555_v40  ;;  %v11005_v49 = vld [vmem:[#allocation111_spill] sm:$0xff]  ;;  %v11010_v33 = vld [vmem:[#allocation113_spill] sm:$0xff] }
 0x2bb   : >> { %v2128_v34 = vmin.f32 %v2064_v54, %v7849_v29  ;;  %v1874_v62 = vadd.f32 %v1810_v38, %v1746_v55  ;;  %v1556_v42 = vsub.f32 %v11004_v8, %v7598_v53  ;;  %v1620_v54 = vsub.f32 %v11005_v49, %v7601_v47  ;;  %v11007_v38 = vld [vmem:[#allocation112_spill] sm:$0xff] }
 0x2bc   : >> { %v2129_v35 = vmin.f32 %v2065_v50, %v7851_v43  ;;  %v1811_v27 = vmul.f32 %v1619_v21, %v1619_v21  ;;  %v1939_v36 = vmul.f32 %v1683_v39, %v1683_v39  ;;  %v1684_v25 = vsub.f32 %v7521_v13, %v7604_v46  ;;  %v11006_v50 = vld [vmem:[#allocation53_spill] sm:$0xff] }
 0x2bd   : >> { %2192 = vst [vmem:[#allocation2] sm:$0xff] %v2128_v34  ;;  %v7865_v41 = vadd.f32 %v1938_v48, %v1874_v62  ;;  %v1748_v56 = vmul.f32 %v1556_v42, %v1556_v42  ;;  %v1557_v55 = vsub.f32 %v11006_v50, %v7598_v53  ;;  %v1621_v44 = vsub.f32 %v11007_v38, %v7601_v47  ;;  %v2067_v34 = vld [vmem:[#allocation2 + $0x148] sm:$0xff]  ;;  %v11009_v50 = vld [vmem:[#allocation52_spill] sm:$0xff] }
 0x2be   : >> { %2193 = vst [vmem:[#allocation2 + $0xf0] sm:$0xff] %v2129_v35  ;;  %v1875_v40 = vadd.f32 %v1811_v27, %v1747_v52  ;;  %v1685_v21 = vsub.f32 %v11008_v3, %v7604_v46  ;;  %v1812_v62 = vmul.f32 %v1620_v54, %v1620_v54  ;;  %v1940_v8 = vmul.f32 %v1684_v25, %v1684_v25  ;;  %v2068_v54 = vld [vmem:[#allocation2 + $0x1d0] sm:$0xff] }
 0x2bf   : >> { %v2130_v48 = vmin.f32 %v2066_v31, %v7865_v41  ;;  %v1749_v35 = vmul.f32 %v1557_v55, %v1557_v55  ;;  %v1813_v52 = vmul.f32 %v1621_v44, %v1621_v44  ;;  %v1558_v38 = vsub.f32 %v11009_v50, %v7598_v53  ;;  %v2069_v44 = vld [vmem:[#allocation2 + $0x100] sm:$0xff] }
 0x2c0   : >> { %v2003_v42 = vadd.f32 %v1939_v36, %v1875_v40  ;;  %v1941_v27 = vmul.f32 %v1685_v21, %v1685_v21  ;;  %v1876_v49 = vadd.f32 %v1812_v62, %v1748_v56  ;;  %v1622_v45 = vsub.f32 %v11010_v33, %v7601_v47  ;;  %v11012_v36 = vld [vmem:[#allocation55_spill] sm:$0xff]  ;;  %v11013_v33 = vld [vmem:[#allocation114_spill] sm:$0xff] }
 0x2c1   : >> { %2194 = vst [vmem:[#allocation2 + $0x8] sm:$0xff] %v2130_v48  ;;  %v1686_v31 = vsub.f32 %v11011_v9, %v7604_v46  ;;  %v1877_v25 = vadd.f32 %v1813_v52, %v1749_v35  ;;  %v1559_v40 = vsub.f32 %v11012_v36, %v7598_v53  ;;  %v1750_v56 = vmul.f32 %v1558_v38, %v1558_v38  ;;  %v11014_v35 = vld [vmem:[#allocation54_spill] sm:$0xff] }
 0x2c2   : >> { %v2131_v3 = vmin.f32 %v2067_v34, %v2003_v42  ;;  %v7886_v39 = vmin.f32 %v2251_v32, %v2003_v42  ;;  %v2004_v55 = vadd.f32 %v1940_v8, %v1876_v49  ;;  %v1814_v21 = vmul.f32 %v1622_v45, %v1622_v45  ;;  %v2070_v8 = vld [vmem:[#allocation2 + $0xc8] sm:$0xff] }
 0x2c3   : >> { %v1942_v48 = vmul.f32 %v1686_v31, %v1686_v31  ;;  %v2005_v62 = vadd.f32 %v1941_v27, %v1877_v25  ;;  %v1623_v50 = vsub.f32 %v11013_v33, %v7601_v47  ;;  %v1687_v34 = vsub.f32 %v7523_v7, %v7604_v46 }
 0x2c4   : >> { %2195 = vst [vmem:[#allocation2 + $0x148] sm:$0xff] %v2131_v3  ;;  %v1751_v32 = vmul.f32 %v1559_v40, %v1559_v40  ;;  %v2132_v42 = vmin.f32 %v2068_v54, %v2004_v55  ;;  %v1878_v9 = vadd.f32 %v1814_v21, %v1750_v56  ;;  %v1560_v52 = vsub.f32 %v11014_v35, %v7598_v53  ;;  %v11015_v3 = vld [vmem:[#allocation115_spill] sm:$0xff]  ;;  %v11017_v54 = vld [vmem:[#allocation57_spill] sm:$0xff]  ;;  %v11018_v21 = vld [vmem:[#allocation116_spill] sm:$0xff] }
 0x2c5   : >> { %v2133_v36 = vmin.f32 %v2069_v44, %v2005_v62  ;;  %v1815_v49 = vmul.f32 %v1623_v50, %v1623_v50  ;;  %v1943_v38 = vmul.f32 %v1687_v34, %v1687_v34  ;;  %v1624_v27 = vsub.f32 %v11015_v3, %v7601_v47  ;;  %v2071_v34 = vld [vmem:[#allocation2 + $0x40] sm:$0xff] }
 0x2c6   : >> { %2196 = vst [vmem:[#allocation2 + $0x1d0] sm:$0xff] %v2132_v42  ;;  %v2006_v45 = vadd.f32 %v1942_v48, %v1878_v9  ;;  %v1688_v31 = vsub.f32 %v11016_v20, %v7604_v46  ;;  %v1752_v25 = vmul.f32 %v1560_v52, %v1560_v52  ;;  %v1561_v56 = vsub.f32 %v11017_v54, %v7598_v53  ;;  %v11021_v54 = vld [vmem:[#allocation56_spill] sm:$0xff] }
 0x2c7   : >> { %2197 = vst [vmem:[#allocation2 + $0x100] sm:$0xff] %v2133_v36  ;;  %v1879_v40 = vadd.f32 %v1815_v49, %v1751_v32  ;;  %v1625_v44 = vsub.f32 %v11018_v21, %v7601_v47  ;;  %v1689_v33 = vsub.f32 %v11019_v12, %v7604_v46  ;;  %v11020_v9 = vmin.f32 %v7822_v63, %v7849_v29  ;;  %v11022_v12 = vld [vmem:[#allocation117_spill] sm:$0xff] }
 0x2c8   : >> { %v2134_v50 = vmin.f32 %v2070_v8, %v2006_v45  ;;  %v1816_v42 = vmul.f32 %v1624_v27, %v1624_v27  ;;  %v1944_v35 = vmul.f32 %v1688_v31, %v1688_v31  ;;  %v1753_v32 = vmul.f32 %v1561_v56, %v1561_v56  ;;  %v11024_v31 = vld [vmem:[#allocation59_spill] sm:$0xff]  ;;  %v2073_v56 = vld [vmem:[#allocation2 + $0x20] sm:$0xff] }
 0x2c9   : >> { %v7909_v48 = vmin.f32 %v11020_v9, %v2004_v55  ;;  %v7911_v52 = vadd.f32 %v1943_v38, %v1879_v40  ;;  %v1817_v36 = vmul.f32 %v1625_v44, %v1625_v44  ;;  %v1945_v49 = vmul.f32 %v1689_v33, %v1689_v33  ;;  %v2072_v38 = vld [vmem:[#allocation2 + $0x1f8] sm:$0xff] }
 0x2ca   : >> { %2198 = vst [vmem:[#allocation2 + $0xc8] sm:$0xff] %v2134_v50  ;;  %v1880_v3 = vadd.f32 %v1816_v42, %v1752_v25  ;;  %v1562_v21 = vsub.f32 %v11021_v54, %v7598_v53  ;;  %v1626_v20 = vsub.f32 %v11022_v12, %v7601_v47  ;;  %v1690_v63 = vsub.f32 %v7533_v4, %v7604_v46  ;;  %v2074_v54 = vld [vmem:[#allocation2 + $0x128] sm:$0xff] }
 0x2cb   : >> { %v11023_v29 = vmin.f32 %v7826_v60, %v7851_v43  ;;  %v2135_v8 = vmin.f32 %v2071_v34, %v7911_v52  ;;  %v1881_v27 = vadd.f32 %v1817_v36, %v1753_v32  ;;  %v1563_v25 = vsub.f32 %v11024_v31, %v7598_v53  ;;  %v11025_v60 = vld [vmem:[#allocation118_spill] sm:$0xff] }
 0x2cc   : >> { %v7927_v40 = vadd.f32 %v1944_v35, %v1880_v3  ;;  %v1754_v44 = vmul.f32 %v1562_v21, %v1562_v21  ;;  %v1818_v12 = vmul.f32 %v1626_v20, %v1626_v20  ;;  %v1946_v33 = vmul.f32 %v1690_v63, %v1690_v63  ;;  %v11027_v20 = vld [vmem:[#allocation58_spill] sm:$0xff] }
 0x2cd   : >> { %v7922_v55 = vmin.f32 %v11023_v29, %v2005_v62  ;;  %2199 = vst [vmem:[#allocation2 + $0x40] sm:$0xff] %v2135_v8  ;;  %v7929_v9 = vadd.f32 %v1945_v49, %v1881_v27  ;;  %v1627_v43 = vsub.f32 %v11025_v60, %v7601_v47  ;;  %v1691_v62 = vsub.f32 %v7531_v22, %v7604_v46  ;;  %v11029_v27 = vld [vmem:[#allocation61_spill] sm:$0xff] }
 0x2ce   : >> { %v1755_v50 = vmul.f32 %v1563_v25, %v1563_v25  ;;  %v11026_v34 = vmin.f32 %v7838_v0, %v7865_v41  ;;  %v2136_v35 = vmin.f32 %v2072_v38, %v7927_v40  ;;  %v1882_v32 = vadd.f32 %v1818_v12, %v1754_v44  ;;  %v11028_v0 = vld [vmem:[#allocation119_spill] sm:$0xff]  ;;  %v2075_v12 = vld [vmem:[#allocation2 + $0x1a0] sm:$0xff] }
 0x2cf   : >> { %v1564_v36 = vsub.f32 %v11027_v20, %v7598_v53  ;;  %v2259_v49 = vmin.f32 %v7886_v39, %v7911_v52  ;;  %v2137_v3 = vmin.f32 %v2073_v56, %v7929_v9  ;;  %v1819_v21 = vmul.f32 %v1627_v43, %v1627_v43  ;;  %v11030_v52 = vld [vmem:[#allocation120_spill] sm:$0xff] }
 0x2d0   : >> { %v7938_v42 = vmin.f32 %v11026_v34, %v2006_v45  ;;  %v1947_v63 = vmul.f32 %v1691_v62, %v1691_v62  ;;  %2200 = vst [vmem:[#allocation2 + $0x1f8] sm:$0xff] %v2136_v35  ;;  %v7946_v29 = vadd.f32 %v1946_v33, %v1882_v32  ;;  %v1628_v41 = vsub.f32 %v11028_v0, %v7601_v47  ;;  %v11031_v32 = vld [vmem:[#allocation60_spill] sm:$0xff]  ;;  %v11033_v0 = vld [vmem:[#allocation63_spill] sm:$0xff] }
 0x2d1   : >> { %v1692_v45 = vsub.f32 %v7537_v28, %v7604_v46  ;;  %v1756_v8 = vmul.f32 %v1564_v36, %v1564_v36  ;;  %2201 = vst [vmem:[#allocation2 + $0x20] sm:$0xff] %v2137_v3  ;;  %v1883_v38 = vadd.f32 %v1819_v21, %v1755_v50  ;;  %v1565_v39 = vsub.f32 %v11029_v27, %v7598_v53  ;;  %v11032_v36 = vld [vmem:[#allocation121_spill] sm:$0xff]  ;;  %v2076_v21 = vld [vmem:[#allocation2 + $0x1f0] sm:$0xff] }
 0x2d2   : >> { %v1629_v31 = vsub.f32 %v11030_v52, %v7601_v47  ;;  %v1693_v25 = vsub.f32 %v7535_v26, %v7604_v46  ;;  %v2260_v56 = vmin.f32 %v7909_v48, %v7927_v40  ;;  %v2138_v44 = vmin.f32 %v2074_v54, %v7946_v29  ;;  %v7972_v52 = vld [vmem:[%s7595_s7 + $0x1] ss:$0 sm:$0xff] }
 0x2d3   : >> { %v1820_v33 = vmul.f32 %v1628_v41, %v1628_v41  ;;  %v1948_v60 = vmul.f32 %v1692_v45, %v1692_v45  ;;  %v2011_v43 = vadd.f32 %v1947_v63, %v1883_v38  ;;  %v1757_v62 = vmul.f32 %v1565_v39, %v1565_v39 }
 0x2d4   : >> { %v1821_v50 = vmul.f32 %v1629_v31, %v1629_v31  ;;  %v1949_v34 = vmul.f32 %v1693_v25, %v1693_v25  ;;  %2202 = vst [vmem:[#allocation2 + $0x128] sm:$0xff] %v2138_v44  ;;  %v1566_v20 = vsub.f32 %v11031_v32, %v7598_v53  ;;  %v1630_v3 = vsub.f32 %v11032_v36, %v7601_v47 }
 0x2d5   : >> { %v1884_v35 = vadd.f32 %v1820_v33, %v1756_v8  ;;  %v1694_v48 = vsub.f32 %v7541_v30, %v7604_v46  ;;  %v2261_v40 = vmin.f32 %v7922_v55, %v7929_v9  ;;  %v2139_v54 = vmin.f32 %v2075_v12, %v2011_v43  ;;  %v2077_v8 = vld [vmem:[#allocation2 + $0xe8] sm:$0xff]  ;;  %v11034_v46 = vld [vmem:[#allocation122_spill] sm:$0xff] }
 0x2d6   : >> { %v1885_v63 = vadd.f32 %v1821_v50, %v1757_v62  ;;  %v1567_v41 = vsub.f32 %v11033_v0, %v7598_v53  ;;  %v1758_v38 = vmul.f32 %v1566_v20, %v1566_v20  ;;  %v1822_v27 = vmul.f32 %v1630_v3, %v1630_v3  ;;  %v7977_v55 = vld [vmem:[%s7595_s7 + $0x2] ss:$0 sm:$0xff]  ;;  %v7984_v33 = vld [vmem:[%s7595_s7] ss:$0 sm:$0xff]  ;;  %v11036_v3 = vld [vmem:[#allocation123_spill] sm:$0xff] }
 0x2d7   : >> { %v2012_v45 = vadd.f32 %v1948_v60, %v1884_v35  ;;  %v1950_v39 = vmul.f32 %v1694_v48, %v1694_v48  ;;  %2203 = vst [vmem:[#allocation2 + $0x1a0] sm:$0xff] %v2139_v54  ;;  %v1631_v31 = vsub.f32 %v11034_v46, %v7972_v52  ;;  %v1695_v9 = vsub.f32 %v7539_v23, %v7977_v55  ;;  %v11035_v60 = vld [vmem:[#allocation62_spill] sm:$0xff]  ;;  %v2078_v35 = vld [vmem:[#allocation2 + $0x78] sm:$0xff] }
 0x2d8   : >> { %v2013_v47 = vadd.f32 %v1949_v34, %v1885_v63  ;;  %v1759_v25 = vmul.f32 %v1567_v41, %v1567_v41  ;;  %v2262_v53 = vmin.f32 %v7938_v42, %v7946_v29  ;;  %v1886_v12 = vadd.f32 %v1822_v27, %v1758_v38  ;;  %v11037_v42 = vld [vmem:[#allocation236_spill] sm:$0xff]  ;;  %v11038_v63 = vld [vmem:[#allocation65_spill] sm:$0xff]  ;;  %v11040_v41 = vld [vmem:[#allocation235_spill] sm:$0xff] }
 0x2d9   : >> { %v2140_v44 = vmin.f32 %v2076_v21, %v2012_v45  ;;  %v1568_v62 = vsub.f32 %v11035_v60, %v7984_v33  ;;  %v7988_v50 = vmin.f32 %v2259_v49, %v2011_v43  ;;  %v1823_v32 = vmul.f32 %v1631_v31, %v1631_v31  ;;  %v11039_v49 = vld [vmem:[#allocation124_spill] sm:$0xff] }
 0x2da   : >> { %v2141_v34 = vmin.f32 %v2077_v8, %v2013_v47  ;;  %v1951_v20 = vmul.f32 %v1695_v9, %v1695_v9  ;;  %v2014_v36 = vadd.f32 %v1950_v39, %v1886_v12  ;;  %v1632_v48 = vsub.f32 %v11036_v3, %v7972_v52  ;;  %v2079_v39 = vld [vmem:[#allocation2 + $0x70] sm:$0xff] }
 0x2db   : >> { %2204 = vst [vmem:[#allocation2 + $0x1f0] sm:$0xff] %v2140_v44  ;;  %v1696_v29 = vsub.f32 %v11037_v42, %v7977_v55  ;;  %v1760_v54 = vmul.f32 %v1568_v62, %v1568_v62  ;;  %v1887_v21 = vadd.f32 %v1823_v32, %v1759_v25  ;;  %v1569_v0 = vsub.f32 %v11038_v63, %v7984_v33  ;;  %v11041_v62 = vld [vmem:[#allocation64_spill] sm:$0xff]  ;;  %v11042_v32 = vld [vmem:[#allocation125_spill] sm:$0xff] }
 0x2dc   : >> { %2205 = vst [vmem:[#allocation2 + $0xe8] sm:$0xff] %v2141_v34  ;;  %v1633_v43 = vsub.f32 %v11039_v49, %v7972_v52  ;;  %v1697_v8 = vsub.f32 %v11040_v41, %v7977_v55  ;;  %v8000_v38 = vmin.f32 %v2260_v56, %v2012_v45  ;;  %v2142_v27 = vmin.f32 %v2078_v35, %v2014_v36  ;;  %v11043_v56 = vld [vmem:[#allocation238_spill] sm:$0xff] }
 0x2dd   : >> { %v1824_v46 = vmul.f32 %v1632_v48, %v1632_v48  ;;  %v1952_v31 = vmul.f32 %v1696_v29, %v1696_v29  ;;  %v8002_v9 = vadd.f32 %v1951_v20, %v1887_v21  ;;  %v1761_v44 = vmul.f32 %v1569_v0, %v1569_v0  ;;  %v2080_v20 = vld [vmem:[#allocation2 + $0x90] sm:$0xff]  ;;  %v11044_v29 = vld [vmem:[#allocation67_spill] sm:$0xff] }
 0x2de   : >> { %v1825_v12 = vmul.f32 %v1633_v43, %v1633_v43  ;;  %v1953_v25 = vmul.f32 %v1697_v8, %v1697_v8  ;;  %2206 = vst [vmem:[#allocation2 + $0x78] sm:$0xff] %v2142_v27  ;;  %v1570_v34 = vsub.f32 %v11041_v62, %v7984_v33  ;;  %v1634_v3 = vsub.f32 %v11042_v32, %v7972_v52  ;;  %v11045_v8 = vld [vmem:[#allocation126_spill] sm:$0xff] }
 0x2df   : >> { %v1888_v60 = vadd.f32 %v1824_v46, %v1760_v54  ;;  %v1698_v45 = vsub.f32 %v11043_v56, %v7977_v55  ;;  %v8010_v35 = vmin.f32 %v2261_v40, %v2013_v47  ;;  %v2143_v48 = vmin.f32 %v2079_v39, %v8002_v9  ;;  %v2081_v54 = vld [vmem:[#allocation2 + $0x1d8] sm:$0xff] }
 0x2e0   : >> { %v1889_v42 = vadd.f32 %v1825_v12, %v1761_v44  ;;  %v1571_v21 = vsub.f32 %v11044_v29, %v7984_v33  ;;  %v1762_v0 = vmul.f32 %v1570_v34, %v1570_v34  ;;  %v1826_v49 = vmul.f32 %v1634_v3, %v1634_v3  ;;  %v11046_v47 = vld [vmem:[#allocation237_spill] sm:$0xff]  ;;  %v11047_v12 = vld [vmem:[#allocation66_spill] sm:$0xff]  ;;  %v2082_v34 = vld [vmem:[#allocation2 + $0xd0] sm:$0xff] }
 0x2e1   : >> { %v8015_v63 = vadd.f32 %v1952_v31, %v1888_v60  ;;  %v1954_v43 = vmul.f32 %v1698_v45, %v1698_v45  ;;  %2207 = vst [vmem:[#allocation2 + $0x70] sm:$0xff] %v2143_v48  ;;  %v1635_v40 = vsub.f32 %v11045_v8, %v7972_v52  ;;  %v1699_v27 = vsub.f32 %v11046_v47, %v7977_v55  ;;  %v11049_v45 = vld [vmem:[#allocation240_spill] sm:$0xff]  ;;  %v11050_v29 = vld [vmem:[#allocation69_spill] sm:$0xff] }
 0x2e2   : >> { %v8017_v41 = vadd.f32 %v1953_v25, %v1889_v42  ;;  %v1763_v39 = vmul.f32 %v1571_v21, %v1571_v21  ;;  %v8023_v46 = vmin.f32 %v2262_v53, %v2014_v36  ;;  %v1890_v31 = vadd.f32 %v1826_v49, %v1762_v0  ;;  %v11048_v53 = vld [vmem:[#allocation127_spill] sm:$0xff]  ;;  %v2083_v8 = vld [vmem:[#allocation2 + $0xb8] sm:$0xff] }
 0x2e3   : >> { %v2144_v44 = vmin.f32 %v2080_v20, %v8015_v63  ;;  %v1572_v60 = vsub.f32 %v11047_v12, %v7984_v33  ;;  %v2267_v62 = vmin.f32 %v7988_v50, %v8002_v9  ;;  %v1827_v32 = vmul.f32 %v1635_v40, %v1635_v40  ;;  %v11051_v9 = vld [vmem:[#allocation128_spill] sm:$0xff] }
 0x2e4   : >> { %v2145_v25 = vmin.f32 %v2081_v54, %v8017_v41  ;;  %v1955_v3 = vmul.f32 %v1699_v27, %v1699_v27  ;;  %v8031_v56 = vadd.f32 %v1954_v43, %v1890_v31  ;;  %v1636_v36 = vsub.f32 %v11048_v53, %v7972_v52  ;;  %v11052_v54 = vld [vmem:[#allocation239_spill] sm:$0xff] }
 0x2e5   : >> { %2208 = vst [vmem:[#allocation2 + $0x90] sm:$0xff] %v2144_v44  ;;  %v1700_v48 = vsub.f32 %v11049_v45, %v7977_v55  ;;  %v1764_v20 = vmul.f32 %v1572_v60, %v1572_v60  ;;  %v1891_v42 = vadd.f32 %v1827_v32, %v1763_v39  ;;  %v1573_v50 = vsub.f32 %v11050_v29, %v7984_v33  ;;  %v11053_v60 = vld [vmem:[#allocation68_spill] sm:$0xff]  ;;  %v11054_v32 = vld [vmem:[#allocation129_spill] sm:$0xff]  ;;  %v11055_v45 = vld [vmem:[#allocation242_spill] sm:$0xff] }
 0x2e6   : >> { %2209 = vst [vmem:[#allocation2 + $0x1d8] sm:$0xff] %v2145_v25  ;;  %v1637_v21 = vsub.f32 %v11051_v9, %v7972_v52  ;;  %v1701_v0 = vsub.f32 %v11052_v54, %v7977_v55  ;;  %v2268_v49 = vmin.f32 %v8000_v38, %v8015_v63  ;;  %v2146_v43 = vmin.f32 %v2082_v34, %v8031_v56 }
 0x2e7   : >> { %v1828_v40 = vmul.f32 %v1636_v36, %v1636_v36  ;;  %v1956_v47 = vmul.f32 %v1700_v48, %v1700_v48  ;;  %v2019_v27 = vadd.f32 %v1955_v3, %v1891_v42  ;;  %v1765_v44 = vmul.f32 %v1573_v50, %v1573_v50  ;;  %v2084_v36 = vld [vmem:[#allocation2 + $0x88] sm:$0xff] }
 0x2e8   : >> { %v1829_v39 = vmul.f32 %v1637_v21, %v1637_v21  ;;  %v1957_v31 = vmul.f32 %v1701_v0, %v1701_v0  ;;  %2210 = vst [vmem:[#allocation2 + $0xd0] sm:$0xff] %v2146_v43  ;;  %v1574_v25 = vsub.f32 %v11053_v60, %v7984_v33  ;;  %v1638_v53 = vsub.f32 %v11054_v32, %v7972_v52  ;;  %v11056_v48 = vld [vmem:[#allocation71_spill] sm:$0xff]  ;;  %v11057_v0 = vld [vmem:[#allocation130_spill] sm:$0xff]  ;;  %v8286_v30 = vld [vmem:[#allocation2 + $0x70] sm:$0xff] (%p1511_p5) }
 0x2e9   : >> { %v1892_v12 = vadd.f32 %v1828_v40, %v1764_v20  ;;  %v1702_v38 = vsub.f32 %v11055_v45, %v7977_v55  ;;  %v2269_v63 = vmin.f32 %v8010_v35, %v8017_v41  ;;  %v2147_v34 = vmin.f32 %v2083_v8, %v2019_v27  ;;  %v2085_v20 = vld [vmem:[#allocation2 + $0xa8] sm:$0xff]  ;;  %v11058_v40 = vld [vmem:[#allocation241_spill] sm:$0xff] }
 0x2ea   : >> { %v1893_v3 = vadd.f32 %v1829_v39, %v1765_v44  ;;  %v1575_v42 = vsub.f32 %v11056_v48, %v7984_v33  ;;  %v1766_v50 = vmul.f32 %v1574_v25, %v1574_v25  ;;  %v1830_v9 = vmul.f32 %v1638_v53, %v1638_v53  ;;  %v2086_v32 = vld [vmem:[#allocation2 + $0x1c8] sm:$0xff] }
 0x2eb   : >> { %v2020_v29 = vadd.f32 %v1956_v47, %v1892_v12  ;;  %v1958_v21 = vmul.f32 %v1702_v38, %v1702_v38  ;;  %2211 = vst [vmem:[#allocation2 + $0xb8] sm:$0xff] %v2147_v34  ;;  %v1639_v43 = vsub.f32 %v11057_v0, %v7972_v52  ;;  %v1703_v60 = vsub.f32 %v11058_v40, %v7977_v55  ;;  %v11059_v47 = vld [vmem:[#allocation70_spill] sm:$0xff]  ;;  %v11060_v38 = vld [vmem:[#allocation131_spill] sm:$0xff]  ;;  %v2087_v0 = vld [vmem:[#allocation2 + $0x170] sm:$0xff] }
 0x2ec   : >> { %v2021_v54 = vadd.f32 %v1957_v31, %v1893_v3  ;;  %v1767_v35 = vmul.f32 %v1575_v42, %v1575_v42  ;;  %v2270_v41 = vmin.f32 %v8023_v46, %v8031_v56  ;;  %v1894_v44 = vadd.f32 %v1830_v9, %v1766_v50  ;;  %v11061_v3 = vld [vmem:[#allocation244_spill] sm:$0xff] }
 0x2ed   : >> { %v2148_v8 = vmin.f32 %v2084_v36, %v2020_v29  ;;  %v1576_v39 = vsub.f32 %v11059_v47, %v7984_v33  ;;  %v8064_v12 = vmin.f32 %v2267_v62, %v2019_v27  ;;  %v1831_v31 = vmul.f32 %v1639_v43, %v1639_v43  ;;  %v11062_v36 = vld [vmem:[#allocation73_spill] sm:$0xff]  ;;  %v11063_v62 = vld [vmem:[#allocation7_spill] sm:$0xff]  ;;  %v8281_v23 = vld [vmem:[#allocation2 + $0x90] sm:$0xff] (%p1511_p5) }
 0x2ee   : >> { %v2149_v25 = vmin.f32 %v2085_v20, %v2021_v54  ;;  %v1959_v53 = vmul.f32 %v1703_v60, %v1703_v60  ;;  %v2022_v45 = vadd.f32 %v1958_v21, %v1894_v44  ;;  %v1640_v34 = vsub.f32 %v11060_v38, %v7972_v52  ;;  %v11064_v20 = vld [vmem:[#allocation243_spill] sm:$0xff]  ;;  %v8290_v28 = vld [vmem:[#allocation2 + $0x1d8] sm:$0xff] (%p1511_p5) }
 0x2ef   : >> { %2212 = vst [vmem:[#allocation2 + $0x88] sm:$0xff] %v2148_v8  ;;  %v1704_v48 = vsub.f32 %v11061_v3, %v7977_v55  ;;  %v1768_v46 = vmul.f32 %v1576_v39, %v1576_v39  ;;  %v1895_v56 = vadd.f32 %v1831_v31, %v1767_v35  ;;  %v1577_v42 = vsub.f32 %v11062_v36, %v7984_v33  ;;  %v11065_v39 = vld [vmem:[#allocation72_spill] sm:$0xff]  ;;  %v11066_v31 = vld [vmem:[#allocation10_spill] sm:$0xff] }
 0x2f0   : >> { %2213 = vst [vmem:[#allocation2 + $0xa8] sm:$0xff] %v2149_v25  ;;  %v1641_v27 = vsub.f32 %v11063_v62, %v7972_v52  ;;  %v1705_v50 = vsub.f32 %v11064_v20, %v7977_v55  ;;  %v8076_v9 = vmin.f32 %v2268_v49, %v2020_v29  ;;  %v2150_v21 = vmin.f32 %v2086_v32, %v2022_v45  ;;  %v11067_v49 = vld [vmem:[#allocation246_spill] sm:$0xff]  ;;  %v8288_v26 = vld [vmem:[#allocation2 + $0xd0] sm:$0xff] (%p1511_p5) }
 0x2f1   : >> { %v1832_v43 = vmul.f32 %v1640_v34, %v1640_v34  ;;  %v1960_v40 = vmul.f32 %v1704_v48, %v1704_v48  ;;  %v8078_v60 = vadd.f32 %v1959_v53, %v1895_v56  ;;  %v1769_v8 = vmul.f32 %v1577_v42, %v1577_v42  ;;  %v2088_v53 = vld [vmem:[#allocation2 + $0x178] sm:$0xff]  ;;  %v11068_v48 = vld [vmem:[#allocation75_spill] sm:$0xff] }
 0x2f2   : >> { %v1833_v44 = vmul.f32 %v1641_v27, %v1641_v27  ;;  %v1961_v35 = vmul.f32 %v1705_v50, %v1705_v50  ;;  %2214 = vst [vmem:[#allocation2 + $0x1c8] sm:$0xff] %v2150_v21  ;;  %v1578_v25 = vsub.f32 %v11065_v39, %v7984_v33  ;;  %v1642_v38 = vsub.f32 %v11066_v31, %v7972_v52  ;;  %v11069_v50 = vld [vmem:[#allocation8_spill] sm:$0xff]  ;;  %v8297_v4 = vld [vmem:[#allocation2 + $0xb8] sm:$0xff] (%p1511_p5) }
 0x2f3   : >> { %v1896_v47 = vadd.f32 %v1832_v43, %v1768_v46  ;;  %v1706_v29 = vsub.f32 %v11067_v49, %v7977_v55  ;;  %v8086_v32 = vmin.f32 %v2269_v63, %v2021_v54  ;;  %v2151_v34 = vmin.f32 %v2087_v0, %v8078_v60  ;;  %v2089_v46 = vld [vmem:[#allocation2 + $0x68] sm:$0xff]  ;;  %v11070_v54 = vld [vmem:[#allocation245_spill] sm:$0xff] }
 0x2f4   : >> { %v1897_v3 = vadd.f32 %v1833_v44, %v1769_v8  ;;  %v1579_v56 = vsub.f32 %v11068_v48, %v7984_v33  ;;  %v1770_v42 = vmul.f32 %v1578_v25, %v1578_v25  ;;  %v1834_v62 = vmul.f32 %v1642_v38, %v1642_v38  ;;  %v11071_v44 = vld [vmem:[#allocation74_spill] sm:$0xff]  ;;  %v2090_v25 = vld [vmem:[#allocation2 + $0x190] sm:$0xff]  ;;  %v11074_v48 = vld [vmem:[#allocation77_spill] sm:$0xff] }
 0x2f5   : >> { %v8091_v36 = vadd.f32 %v1960_v40, %v1896_v47  ;;  %v1962_v27 = vmul.f32 %v1706_v29, %v1706_v29  ;;  %2215 = vst [vmem:[#allocation2 + $0x170] sm:$0xff] %v2151_v34  ;;  %v1643_v63 = vsub.f32 %v11069_v50, %v7972_v52  ;;  %v1707_v21 = vsub.f32 %v11070_v54, %v7977_v55  ;;  %v11073_v29 = vld [vmem:[#allocation248_spill] sm:$0xff]  ;;  %v2091_v50 = vld [vmem:[#allocation2 + $0x198] sm:$0xff] }
 0x2f6   : >> { %v8093_v20 = vadd.f32 %v1961_v35, %v1897_v3  ;;  %v1771_v0 = vmul.f32 %v1579_v56, %v1579_v56  ;;  %v8099_v43 = vmin.f32 %v2270_v41, %v2022_v45  ;;  %v1898_v40 = vadd.f32 %v1834_v62, %v1770_v42  ;;  %v11072_v41 = vld [vmem:[#allocation12_spill] sm:$0xff]  ;;  %v8295_v22 = vld [vmem:[#allocation2 + $0x88] sm:$0xff] (%p1511_p5) }
 0x2f7   : >> { %v2152_v8 = vmin.f32 %v2088_v53, %v8091_v36  ;;  %v1580_v47 = vsub.f32 %v11071_v44, %v7984_v33  ;;  %v2275_v39 = vmin.f32 %v8064_v12, %v8078_v60  ;;  %v1835_v31 = vmul.f32 %v1643_v63, %v1643_v63  ;;  %v11075_v60 = vld [vmem:[#allocation9_spill] sm:$0xff]  ;;  %v8306_v13 = vld [vmem:[#allocation2 + $0xa8] sm:$0xff] (%p1511_p5) }
 0x2f8   : >> { %v2153_v35 = vmin.f32 %v2089_v46, %v8093_v20  ;;  %v1963_v38 = vmul.f32 %v1707_v21, %v1707_v21  ;;  %v8107_v49 = vadd.f32 %v1962_v27, %v1898_v40  ;;  %v1644_v45 = vsub.f32 %v11072_v41, %v7972_v52  ;;  %v11076_v46 = vld [vmem:[#allocation247_spill] sm:$0xff] }
 0x2f9   : >> { %2216 = vst [vmem:[#allocation2 + $0x178] sm:$0xff] %v2152_v8  ;;  %v1708_v34 = vsub.f32 %v11073_v29, %v7977_v55  ;;  %v1772_v53 = vmul.f32 %v1580_v47, %v1580_v47  ;;  %v1899_v3 = vadd.f32 %v1835_v31, %v1771_v0  ;;  %v1581_v12 = vsub.f32 %v11074_v48, %v7984_v33  ;;  %v11077_v47 = vld [vmem:[#allocation76_spill] sm:$0xff]  ;;  %v11079_v29 = vld [vmem:[#allocation250_spill] sm:$0xff]  ;;  %v8299_v7 = vld [vmem:[#allocation2 + $0x1c8] sm:$0xff] (%p1511_p5) }
 0x2fa   : >> { %2217 = vst [vmem:[#allocation2 + $0x68] sm:$0xff] %v2153_v35  ;;  %v1645_v56 = vsub.f32 %v11075_v60, %v7972_v52  ;;  %v1709_v42 = vsub.f32 %v11076_v46, %v7977_v55  ;;  %v2276_v62 = vmin.f32 %v8076_v9, %v8091_v36  ;;  %v2154_v27 = vmin.f32 %v2090_v25, %v8107_v49  ;;  %v11078_v31 = vld [vmem:[#allocation132_spill] sm:$0xff] }
 0x2fb   : >> { %v1836_v63 = vmul.f32 %v1644_v45, %v1644_v45  ;;  %v1964_v54 = vmul.f32 %v1708_v34, %v1708_v34  ;;  %v2027_v21 = vadd.f32 %v1963_v38, %v1899_v3  ;;  %v1773_v8 = vmul.f32 %v1581_v12, %v1581_v12  ;;  %v2092_v45 = vld [vmem:[#allocation2 + $0x38] sm:$0xff] }
 0x2fc   : >> { %v1837_v0 = vmul.f32 %v1645_v56, %v1645_v56  ;;  %v1965_v40 = vmul.f32 %v1709_v42, %v1709_v42  ;;  %2218 = vst [vmem:[#allocation2 + $0x190] sm:$0xff] %v2154_v27  ;;  %v1582_v35 = vsub.f32 %v11077_v47, %v7984_v33  ;;  %v1646_v41 = vsub.f32 %v11078_v31, %v7972_v52  ;;  %v11080_v34 = vld [vmem:[#allocation13_spill] sm:$0xff]  ;;  %v11081_v42 = vld [vmem:[#allocation11_spill] sm:$0xff]  ;;  %v2094_v31 = vld [vmem:[#allocation2 + $0x1c0] sm:$0xff] }
 0x2fd   : >> { %v1900_v44 = vadd.f32 %v1836_v63, %v1772_v53  ;;  %v1710_v9 = vsub.f32 %v11079_v29, %v7977_v55  ;;  %v2277_v36 = vmin.f32 %v8086_v32, %v8093_v20  ;;  %v2155_v25 = vmin.f32 %v2091_v50, %v2027_v21  ;;  %v2093_v53 = vld [vmem:[#allocation2 + $0xc0] sm:$0xff]  ;;  %v11082_v63 = vld [vmem:[#allocation249_spill] sm:$0xff]  ;;  %v8310_v58 = vld [vmem:[#allocation2 + $0x170] sm:$0xff] (%p1511_p5) }
 0x2fe   : >> { %v1901_v38 = vadd.f32 %v1837_v0, %v1773_v8  ;;  %v1583_v3 = vsub.f32 %v11080_v34, %v7984_v33  ;;  %v1774_v12 = vmul.f32 %v1582_v35, %v1582_v35  ;;  %v1838_v60 = vmul.f32 %v1646_v41, %v1646_v41 }
 0x2ff   : >> { %v2028_v48 = vadd.f32 %v1964_v54, %v1900_v44  ;;  %v1966_v56 = vmul.f32 %v1710_v9, %v1710_v9  ;;  %2219 = vst [vmem:[#allocation2 + $0x198] sm:$0xff] %v2155_v25  ;;  %v1647_v27 = vsub.f32 %v11081_v42, %v7972_v52  ;;  %v1711_v47 = vsub.f32 %v11082_v63, %v7977_v55  ;;  %v11083_v54 = vld [vmem:[#allocation14_spill] sm:$0xff]  ;;  %v11084_v9 = vld [vmem:[#allocation133_spill] sm:$0xff] }
 0x300   : >> { %v2029_v46 = vadd.f32 %v1965_v40, %v1901_v38  ;;  %v1775_v32 = vmul.f32 %v1583_v3, %v1583_v3  ;;  %v2278_v20 = vmin.f32 %v8099_v43, %v8107_v49  ;;  %v1902_v8 = vadd.f32 %v1838_v60, %v1774_v12  ;;  %v11085_v38 = vld [vmem:[#allocation252_spill] sm:$0xff]  ;;  %v11086_v49 = vld [vmem:[#allocation78_spill] sm:$0xff]  ;;  %v2095_v42 = vld [vmem:[#allocation2 + $0x158] sm:$0xff] }
 0x301   : >> { %v2156_v50 = vmin.f32 %v2092_v45, %v2028_v48  ;;  %v1584_v0 = vsub.f32 %v11083_v54, %v7984_v33  ;;  %v2279_v44 = vmin.f32 %v2275_v39, %v2027_v21  ;;  %v1839_v41 = vmul.f32 %v1647_v27, %v1647_v27  ;;  %v11087_v39 = vld [vmem:[#allocation134_spill] sm:$0xff]  ;;  %v8308_v1 = vld [vmem:[#allocation2 + $0x178] sm:$0xff] (%p1511_p5) }
 0x302   : >> { %v2157_v35 = vmin.f32 %v2093_v53, %v2029_v46  ;;  %v1967_v40 = vmul.f32 %v1711_v47, %v1711_v47  ;;  %v2030_v29 = vadd.f32 %v1966_v56, %v1902_v8  ;;  %v1648_v25 = vsub.f32 %v11084_v9, %v7972_v52  ;;  %v11088_v53 = vld [vmem:[#allocation251_spill] sm:$0xff] }
 0x303   : >> { %2220 = vst [vmem:[#allocation2 + $0x38] sm:$0xff] %v2156_v50  ;;  %v1712_v34 = vsub.f32 %v11085_v38, %v7977_v55  ;;  %v1776_v3 = vmul.f32 %v1584_v0, %v1584_v0  ;;  %v1903_v43 = vadd.f32 %v1839_v41, %v1775_v32  ;;  %v1585_v45 = vsub.f32 %v11086_v49, %v7984_v33  ;;  %v11089_v0 = vld [vmem:[#allocation16_spill] sm:$0xff]  ;;  %v11090_v41 = vld [vmem:[#allocation135_spill] sm:$0xff]  ;;  %v11091_v38 = vld [vmem:[#allocation253_spill] sm:$0xff] }
 0x304   : >> { %2221 = vst [vmem:[#allocation2 + $0xc0] sm:$0xff] %v2157_v35  ;;  %v1649_v21 = vsub.f32 %v11087_v39, %v7972_v52  ;;  %v1713_v12 = vsub.f32 %v11088_v53, %v7977_v55  ;;  %v2280_v60 = vmin.f32 %v2276_v62, %v2028_v48  ;;  %v2158_v56 = vmin.f32 %v2094_v31, %v2030_v29 }
 0x305   : >> { %v1840_v27 = vmul.f32 %v1648_v25, %v1648_v25  ;;  %v1968_v63 = vmul.f32 %v1712_v34, %v1712_v34  ;;  %v2031_v47 = vadd.f32 %v1967_v40, %v1903_v43  ;;  %v1777_v50 = vmul.f32 %v1585_v45, %v1585_v45  ;;  %v2096_v25 = vld [vmem:[#allocation2 + $0x10] sm:$0xff]  ;;  %v2097_v43 = vld [vmem:[#allocation2 + $0x58] sm:$0xff] }
 0x306   : >> { %v1841_v8 = vmul.f32 %v1649_v21, %v1649_v21  ;;  %v1969_v54 = vmul.f32 %v1713_v12, %v1713_v12  ;;  %2222 = vst [vmem:[#allocation2 + $0x1c0] sm:$0xff] %v2158_v56  ;;  %v1586_v35 = vsub.f32 %v11089_v0, %v7984_v33  ;;  %v1650_v9 = vsub.f32 %v11090_v41, %v7972_v52  ;;  %v2300_v0 = vld [vmem:[#allocation2 + $0x168] sm:$0xff] (%p1511_p5)  ;;  %v2351_v2 = vld [vmem:[#allocation2 + $0x198] sm:$0xff] (%p1511_p5) }
 0x307   : >> { %v1904_v32 = vadd.f32 %v1840_v27, %v1776_v3  ;;  %v1714_v49 = vsub.f32 %v11091_v38, %v7977_v55  ;;  %v2281_v62 = vmin.f32 %v2277_v36, %v2029_v46  ;;  %v2159_v48 = vmin.f32 %v2095_v42, %v2031_v47  ;;  %v2098_v27 = vld [vmem:[#allocation2 + $0xa0] sm:$0xff]  ;;  %v8167_v41 = vld [vmem:[#allocation2 + $0x48] sm:$0xff] (%p1511_p5)  ;;  %v8171_v38 = vld [vmem:[#allocation2 + $0x110] sm:$0xff] (%p1511_p5) }
 0x308   : >> { %v2283_v31 = vmin.f32 %v2279_v44, %v2031_v47  ;;  %v1905_v34 = vadd.f32 %v1841_v8, %v1777_v50  ;;  %v1778_v45 = vmul.f32 %v1586_v35, %v1586_v35  ;;  %v1842_v39 = vmul.f32 %v1650_v9, %v1650_v9  ;;  %v2292_v47 = vld [vmem:[%s2291_s8] sm:$0xff]  ;;  %v2299_v35 = vld [vmem:[#allocation2 + $0x50] sm:$0xff] (%p1511_p5) }
 0x309   : >> { %v2032_v40 = vadd.f32 %v1968_v63, %v1904_v32  ;;  %v1970_v21 = vmul.f32 %v1714_v49, %v1714_v49  ;;  %2223 = vst [vmem:[#allocation2 + $0x158] sm:$0xff] %v2159_v48  ;;  %v2282_v33 = vmin.f32 %v2278_v20, %v2030_v29  ;;  %v2297_v20 = vld [vmem:[#allocation2 + $0xd8] sm:$0xff] (%p1511_p5)  ;;  %v2295_v29 = vld [vmem:[#allocation2 + $0xb0] sm:$0xff] (%p1511_p5)  ;;  %v8176_v49 = vld [vmem:[#allocation2 + $0x180] sm:$0xff] (%p1511_p5) }
 0x30a   : >> { %v2033_v3 = vadd.f32 %v1969_v54, %v1905_v34  ;;  %v1906_v52 = vadd.f32 %v1842_v39, %v1778_v45  ;;  %2363 = vmin.xlane.f32.xlu1 (%p1511_p5), %v2297_v20  ;;  %v11092_v54 = vmov (%p1511_p5), 3e+37   ;;  %2359 = vmin.xlane.f32.xlu0 (%p1511_p5), %v2295_v29  ;;  %v2296_v32 = vld [vmem:[#allocation2 + $0x1b0] sm:$0xff] (%p1511_p5)  ;;  %v8180_v48 = vld [vmem:[#allocation2 + $0x118] sm:$0xff] (%p1511_p5)  ;;  %v8189_v34 = vld [vmem:[#allocation2 + $0x60] sm:$0xff] (%p1511_p5) }
 0x30b   : >> { %v2160_v53 = vmin.f32 %v2096_v25, %v2032_v40  ;;  %v2284_v12 = vmin.f32 %v2280_v60, %v2032_v40  ;;  %v2298_v60 = vld [vmem:[#allocation2 + $0x18] sm:$0xff] (%p1511_p5)  ;;  %2746 = vst [vmem:[#allocation2 + $0xd8] sm:$0xff] (%p1511_p5), %v11092_v54  ;;  %2744 = vst [vmem:[#allocation2 + $0xb0] sm:$0xff] (%p1511_p5), %v11092_v54  ;;  %v8169_v9 = vld [vmem:[#allocation2 + $0x130] sm:$0xff] (%p1511_p5) }
 0x30c   : >> { %v2161_v56 = vmin.f32 %v2097_v43, %v2033_v3  ;;  %v2285_v55 = vmin.f32 %v2281_v62, %v2033_v3  ;;  %v2034_v36 = vadd.f32 %v1970_v21, %v1906_v52  ;;  %2747 = vst [vmem:[#allocation2 + $0x18] sm:$0xff] (%p1511_p5), %v11092_v54  ;;  %2745 = vst [vmem:[#allocation2 + $0x1b0] sm:$0xff] (%p1511_p5), %v11092_v54  ;;  %v8178_v62 = vld [vmem:[#allocation2 + $0x98] sm:$0xff] (%p1511_p5)  ;;  %v8187_v25 = vld [vmem:[#allocation2 + $0x120] sm:$0xff] (%p1511_p5) }
 0x30d   : >> { %2224 = vst [vmem:[#allocation2 + $0x10] sm:$0xff] %v2160_v53  ;;  %v2287_v46 = vmin.f32 %v2283_v31, %v2284_v12  ;;  %2749 = vst [vmem:[#allocation2 + $0x168] sm:$0xff] (%p1511_p5), %v11092_v54  ;;  %v8185_v31 = vld [vmem:[#allocation2 + $0x150] sm:$0xff] (%p1511_p5)  ;;  %v8194_v40 = vld [vmem:[#allocation2 + $0x108] sm:$0xff] (%p1511_p5) }
 0x30e   : >> { %2225 = vst [vmem:[#allocation2 + $0x58] sm:$0xff] %v2161_v56  ;;  %v2162_v44 = vmin.f32 %v2098_v27, %v2034_v36  ;;  %v2286_v42 = vmin.f32 %v2282_v33, %v2034_v36  ;;  %2748 = vst [vmem:[#allocation2 + $0x50] sm:$0xff] (%p1511_p5), %v11092_v54  ;;  %2365 = vmin.xlane.f32.xlu1 (%p1511_p5), %v2298_v60  ;;  %2361 = vmin.xlane.f32.xlu0 (%p1511_p5), %v2296_v32  ;;  %v8196_v43 = vld [vmem:[#allocation2 + $0x188] sm:$0xff] (%p1511_p5)  ;;  %v8198_v45 = vld [vmem:[#allocation2 + $0xe0] sm:$0xff] (%p1511_p5) }
 0x30f   : > { %2751 = vst [vmem:[#allocation2 + $0x48] sm:$0xff] (%p1511_p5), %v11092_v54  ;;  %2750 = vst [vmem:[#allocation2 + $0x130] sm:$0xff] (%p1511_p5), %v11092_v54  ;;  %v8203_v39 = vld [vmem:[#allocation2 + $0x140] sm:$0xff] (%p1511_p5)  ;;  %v8205_v21 = vld [vmem:[#allocation2 + $0x138] sm:$0xff] (%p1511_p5) }
 0x310   : >> { %2226 = vst [vmem:[#allocation2 + $0xa0] sm:$0xff] %v2162_v44  ;;  %v2288_v63 = vmin.f32 %v2285_v55, %v2286_v42  ;;  %2753 = vst [vmem:[#allocation2 + $0x110] sm:$0xff] (%p1511_p5), %v11092_v54  ;;  %v8207_v3 = vld [vmem:[#allocation2 + $0x1a8] sm:$0xff] (%p1511_p5)  ;;  %v8212_v33 = vld [vmem:[#allocation2 + $0x80] sm:$0xff] (%p1511_p5) }
 0x311   : > { %2752 = vst [vmem:[#allocation2 + $0x180] sm:$0xff] (%p1511_p5), %v11092_v54  ;;  %2755 = vst [vmem:[#allocation2 + $0x98] sm:$0xff] (%p1511_p5), %v11092_v54  ;;  %v8214_v53 = vld [vmem:[#allocation2 + $0x28] sm:$0xff] (%p1511_p5)  ;;  %v8216_v12 = vld [vmem:[#allocation2 + $0x1b8] sm:$0xff] (%p1511_p5) }
 0x312   : >> { %v2289_v50 = vmin.f32 %v2287_v46, %v2288_v63  ;;  %1513 = sbr.rel (!%p1511_p5) target bundleno = 616 (0x268), region = 92  ;;  %2754 = vst [vmem:[#allocation2 + $0x118] sm:$0xff] (%p1511_p5), %v11092_v54  ;;  %2757 = vst [vmem:[#allocation2 + $0x150] sm:$0xff] (%p1511_p5), %v11092_v54  ;;  %v8221_v52 = vld [vmem:[#allocation2 + $0xf8] sm:$0xff] (%p1511_p5)  ;;  %v8223_v56 = vld [vmem:[#allocation2 + $0x1e8] sm:$0xff] (%p1511_p5)  ;;  %2369 = vmin.xlane.f32.xlu1 (%p1511_p5), %v2300_v0  ;;  %2367 = vmin.xlane.f32.xlu0 (%p1511_p5), %v2299_v35 }
 0x313   : > { %2756 = vst [vmem:[#allocation2 + $0x120] sm:$0xff] (%p1511_p5), %v11092_v54  ;;  %2759 = vst [vmem:[#allocation2 + $0x60] sm:$0xff] (%p1511_p5), %v11092_v54  ;;  %v8225_v27 = vld [vmem:[#allocation2 + $0x30] sm:$0xff] (%p1511_p5)  ;;  %v8230_v55 = vld [vmem:[#allocation2 + $0x160] sm:$0xff] (%p1511_p5) }
 0x314   : >> { %v2293_v8 = vmin.f32 %v2292_v47, %v2289_v50  ;;  %2758 = vst [vmem:[#allocation2 + $0x108] sm:$0xff] (%p1511_p5), %v11092_v54  ;;  %2761 = vst [vmem:[#allocation2 + $0x188] sm:$0xff] (%p1511_p5), %v11092_v54  ;;  %v8232_v36 = vld [vmem:[#allocation2] sm:$0xff] (%p1511_p5)  ;;  %v8239_v44 = vld [vmem:[#allocation2 + $0x8] sm:$0xff] (%p1511_p5) }
 0x315   : > { %2760 = vst [vmem:[#allocation2 + $0xe0] sm:$0xff] (%p1511_p5), %v11092_v54  ;;  %2763 = vst [vmem:[#allocation2 + $0x140] sm:$0xff] (%p1511_p5), %v11092_v54  ;;  %v8234_v46 = vld [vmem:[#allocation2 + $0x1e0] sm:$0xff] (%p1511_p5)  ;;  %v8241_v42 = vld [vmem:[#allocation2 + $0xf0] sm:$0xff] (%p1511_p5) }
 0x316   : >> { %2294 = vst [vmem:[%s2291_s8] sm:$0xff] %v2293_v8  ;;  %2762 = vst [vmem:[#allocation2 + $0x138] sm:$0xff] (%p1511_p5), %v11092_v54  ;;  %v8243_v63 = vld [vmem:[#allocation2 + $0x1d0] sm:$0xff] (%p1511_p5)  ;;  %v8248_v47 = vld [vmem:[#allocation2 + $0x148] sm:$0xff] (%p1511_p5)  ;;  %2373 = vmin.xlane.f32.xlu1 (%p1511_p5), %v8167_v41  ;;  %2371 = vmin.xlane.f32.xlu0 (%p1511_p5), %v8169_v9 }
 0x317   : > { %2765 = vst [vmem:[#allocation2 + $0x1a8] sm:$0xff] %v11092_v54  ;;  %2764 = vst [vmem:[#allocation2 + $0x80] sm:$0xff] %v11092_v54  ;;  %v8250_v50 = vld [vmem:[#allocation2 + $0xc8] sm:$0xff]  ;;  %v8252_v8 = vld [vmem:[#allocation2 + $0x100] sm:$0xff] }
 0x318   : > { %2767 = vst [vmem:[#allocation2 + $0x28] sm:$0xff] %v11092_v54  ;;  %2766 = vst [vmem:[#allocation2 + $0x1b8] sm:$0xff] %v11092_v54  ;;  %v8257_v20 = vld [vmem:[#allocation2 + $0x1f8] sm:$0xff]  ;;  %v8259_v29 = vld [vmem:[#allocation2 + $0x40] sm:$0xff] }
 0x319   : > { %2769 = vst [vmem:[#allocation2 + $0xf8] sm:$0xff] %v11092_v54  ;;  %2768 = vst [vmem:[#allocation2 + $0x1e8] sm:$0xff] %v11092_v54  ;;  %v8261_v60 = vld [vmem:[#allocation2 + $0x128] sm:$0xff]  ;;  %v8268_v32 = vld [vmem:[#allocation2 + $0x20] sm:$0xff] }
 0x31a   : > { %2771 = vst [vmem:[#allocation2 + $0x30] sm:$0xff] %v11092_v54  ;;  %2770 = vst [vmem:[#allocation2 + $0x160] sm:$0xff] %v11092_v54  ;;  %v8270_v0 = vld [vmem:[#allocation2 + $0x1f0] sm:$0xff]  ;;  %v8272_v35 = vld [vmem:[#allocation2 + $0x1a0] sm:$0xff]  ;;  %2377 = vmin.xlane.f32.xlu1 %v8171_v38  ;;  %2375 = vmin.xlane.f32.xlu0 %v8176_v49 }
 0x31b   : > { %2773 = vst [vmem:[#allocation2] sm:$0xff] %v11092_v54  ;;  %2772 = vst [vmem:[#allocation2 + $0x1e0] sm:$0xff] %v11092_v54  ;;  %v8277_v41 = vld [vmem:[#allocation2 + $0x78] sm:$0xff]  ;;  %v8279_v9 = vld [vmem:[#allocation2 + $0xe8] sm:$0xff] }
 0x31c   : > { %2775 = vst [vmem:[#allocation2 + $0x8] sm:$0xff] %v11092_v54  ;;  %2774 = vst [vmem:[#allocation2 + $0xf0] sm:$0xff] %v11092_v54  ;;  %v8315_v38 = vld [vmem:[#allocation2 + $0x190] sm:$0xff]  ;;  %v8317_v49 = vld [vmem:[#allocation2 + $0x68] sm:$0xff] }
 0x31d   : > { %2777 = vst [vmem:[#allocation2 + $0x1d0] sm:$0xff] %v11092_v54  ;;  %2776 = vst [vmem:[#allocation2 + $0x148] sm:$0xff] %v11092_v54  ;;  %v8319_v59 = vld [vmem:[#allocation2 + $0x38] sm:$0xff]  ;;  %v2354_v14 = vld [vmem:[#allocation2 + $0x1c0] sm:$0xff] }
 0x31e   : > { %2779 = vst [vmem:[#allocation2 + $0xc8] sm:$0xff] %v11092_v54  ;;  %2778 = vst [vmem:[#allocation2 + $0x100] sm:$0xff] %v11092_v54  ;;  %v2353_v10 = vld [vmem:[#allocation2 + $0xc0] sm:$0xff]  ;;  %v2356_v16 = vld [vmem:[#allocation2 + $0x10] sm:$0xff]  ;;  %2381 = vmin.xlane.f32.xlu1 %v8178_v62  ;;  %2379 = vmin.xlane.f32.xlu0 %v8180_v48 }
 0x31f   : > { %2781 = vst [vmem:[#allocation2 + $0x1f8] sm:$0xff] %v11092_v54  ;;  %2780 = vst [vmem:[#allocation2 + $0x40] sm:$0xff] %v11092_v54  ;;  %v2355_v11 = vld [vmem:[#allocation2 + $0x158] sm:$0xff]  ;;  %v2358_v18 = vld [vmem:[#allocation2 + $0xa0] sm:$0xff] }
 0x320   : > { %2783 = vst [vmem:[#allocation2 + $0x128] sm:$0xff] %v11092_v54  ;;  %2782 = vst [vmem:[#allocation2 + $0x20] sm:$0xff] %v11092_v54  ;;  %v2357_v17 = vld [vmem:[#allocation2 + $0x58] sm:$0xff]  ;;  %v2492_v48 = vld [vmem:[#allocation5 + $0x28] sm:$0xff] }
 0x321   : > { %2785 = vst [vmem:[#allocation2 + $0x1f0] sm:$0xff] %v11092_v54  ;;  %2784 = vst [vmem:[#allocation2 + $0x1a0] sm:$0xff] %v11092_v54 }
 0x322   : > { %2787 = vst [vmem:[#allocation2 + $0x78] sm:$0xff] %v11092_v54  ;;  %2786 = vst [vmem:[#allocation2 + $0xe8] sm:$0xff] %v11092_v54  ;;  %2385 = vmin.xlane.f32.xlu1 %v8185_v31  ;;  %2383 = vmin.xlane.f32.xlu0 %v8187_v25  ;;  %v2491_v31 = vld [vmem:[#allocation5 + $0x20] sm:$0xff] }
 0x323   : > { %2789 = vst [vmem:[#allocation2 + $0x90] sm:$0xff] %v11092_v54  ;;  %2788 = vst [vmem:[#allocation2 + $0x70] sm:$0xff] %v11092_v54 }
 0x324   : > { %2791 = vst [vmem:[#allocation2 + $0xd0] sm:$0xff] %v11092_v54  ;;  %2790 = vst [vmem:[#allocation2 + $0x1d8] sm:$0xff] %v11092_v54 }
 0x325   : > { %2793 = vst [vmem:[#allocation2 + $0x88] sm:$0xff] %v11092_v54  ;;  %2792 = vst [vmem:[#allocation2 + $0xb8] sm:$0xff] %v11092_v54 }
 0x326   : > { %2795 = vst [vmem:[#allocation2 + $0x1c8] sm:$0xff] %v11092_v54  ;;  %2794 = vst [vmem:[#allocation2 + $0xa8] sm:$0xff] %v11092_v54  ;;  %2389 = vmin.xlane.f32.xlu1 %v8189_v34  ;;  %2387 = vmin.xlane.f32.xlu0 %v8194_v40 }
 0x327   : > { %2797 = vst [vmem:[#allocation2 + $0x178] sm:$0xff] %v11092_v54  ;;  %2796 = vst [vmem:[#allocation2 + $0x170] sm:$0xff] %v11092_v54 }
 0x328   : > { %2799 = vst [vmem:[#allocation2 + $0x190] sm:$0xff] %v11092_v54  ;;  %2798 = vst [vmem:[#allocation2 + $0x68] sm:$0xff] %v11092_v54 }
 0x329   : > { %2801 = vst [vmem:[#allocation2 + $0x38] sm:$0xff] %v11092_v54  ;;  %2800 = vst [vmem:[#allocation2 + $0x198] sm:$0xff] %v11092_v54 }
 0x32a   : > { %2803 = vst [vmem:[#allocation2 + $0x1c0] sm:$0xff] %v11092_v54  ;;  %2802 = vst [vmem:[#allocation2 + $0xc0] sm:$0xff] %v11092_v54  ;;  %2393 = vmin.xlane.f32.xlu1 %v8196_v43  ;;  %2391 = vmin.xlane.f32.xlu0 %v8198_v45  ;;  %v2503_v45 = vld [vmem:[#allocation5 + $0x80] sm:$0xff] }
 0x32b   : > { %2805 = vst [vmem:[#allocation2 + $0x10] sm:$0xff] %v11092_v54  ;;  %2804 = vst [vmem:[#allocation2 + $0x158] sm:$0xff] %v11092_v54 }
 0x32c   : > { %2807 = vst [vmem:[#allocation2 + $0xa0] sm:$0xff] %v11092_v54  ;;  %2806 = vst [vmem:[#allocation2 + $0x58] sm:$0xff] %v11092_v54 }
 0x32e   : > { %2397 = vmin.xlane.f32.xlu1 %v8203_v39  ;;  %2395 = vmin.xlane.f32.xlu0 %v8205_v21 }
 0x332   : > { %2401 = vmin.xlane.f32.xlu1 %v8207_v3  ;;  %2399 = vmin.xlane.f32.xlu0 %v8212_v33  ;;  %v2494_v33 = vld [vmem:[#allocation5 + $0x38] sm:$0xff] }
 0x336   : > { %2405 = vmin.xlane.f32.xlu1 %v8214_v53  ;;  %2403 = vmin.xlane.f32.xlu0 %v8216_v12  ;;  %v2493_v53 = vld [vmem:[#allocation5 + $0x30] sm:$0xff] }
 0x33a   : > { %2409 = vmin.xlane.f32.xlu1 %v8221_v52  ;;  %2407 = vmin.xlane.f32.xlu0 %v8223_v56  ;;  %v11099_v56 = vld [vmem:[#allocation157_spill] sm:$0xff] }
 0x33e   : > { %2413 = vmin.xlane.f32.xlu1 %v8225_v27  ;;  %2411 = vmin.xlane.f32.xlu0 %v8230_v55  ;;  %v11101_v55 = vld [vmem:[#allocation156_spill] sm:$0xff] }
 0x342   : > { %2417 = vmin.xlane.f32.xlu1 %v8232_v36  ;;  %2415 = vmin.xlane.f32.xlu0 %v8234_v46 }
 0x346   : > { %2421 = vmin.xlane.f32.xlu1 %v8239_v44  ;;  %2419 = vmin.xlane.f32.xlu0 %v8241_v42  ;;  %v2496_v42 = vld [vmem:[#allocation5 + $0x48] sm:$0xff] }
 0x34a   : > { %2425 = vmin.xlane.f32.xlu1 %v8243_v63  ;;  %2423 = vmin.xlane.f32.xlu0 %v8248_v47  ;;  %v2495_v63 = vld [vmem:[#allocation5 + $0x40] sm:$0xff] }
 0x34e   : > { %2429 = vmin.xlane.f32.xlu1 %v8250_v50  ;;  %2427 = vmin.xlane.f32.xlu0 %v8252_v8  ;;  %v11103_v8 = vld [vmem:[#allocation159_spill] sm:$0xff] }
 0x352   : > { %2433 = vmin.xlane.f32.xlu1 %v8257_v20  ;;  %2431 = vmin.xlane.f32.xlu0 %v8259_v29  ;;  %v11105_v29 = vld [vmem:[#allocation158_spill] sm:$0xff] }
 0x356   : > { %2437 = vmin.xlane.f32.xlu1 %v8261_v60  ;;  %2435 = vmin.xlane.f32.xlu0 %v8268_v32 }
 0x35a   : > { %2441 = vmin.xlane.f32.xlu1 %v8270_v0  ;;  %2439 = vmin.xlane.f32.xlu0 %v8272_v35  ;;  %v2498_v35 = vld [vmem:[#allocation5 + $0x58] sm:$0xff] }
 0x35e   : > { %2445 = vmin.xlane.f32.xlu1 %v8277_v41  ;;  %2443 = vmin.xlane.f32.xlu0 %v8279_v9  ;;  %v2497_v41 = vld [vmem:[#allocation5 + $0x50] sm:$0xff] }
 0x362   : > { %2449 = vmin.xlane.f32.xlu1 %v8281_v23  ;;  %2447 = vmin.xlane.f32.xlu0 %v8286_v30  ;;  %v2487_v30 = vld [vmem:[#allocation5] sm:$0xff] }
 0x366   : > { %2453 = vmin.xlane.f32.xlu1 %v8288_v26  ;;  %2451 = vmin.xlane.f32.xlu0 %v8290_v28 }
 0x36a   : > { %2457 = vmin.xlane.f32.xlu1 %v8295_v22  ;;  %2455 = vmin.xlane.f32.xlu0 %v8297_v4  ;;  %v2489_v4 = vld [vmem:[#allocation5 + $0x10] sm:$0xff] }
 0x36e   : > { %2461 = vmin.xlane.f32.xlu1 %v8299_v7  ;;  %2459 = vmin.xlane.f32.xlu0 %v8306_v13  ;;  %v2488_v13 = vld [vmem:[#allocation5 + $0x8] sm:$0xff]  ;;  %v2499_v7 = vld [vmem:[#allocation5 + $0x60] sm:$0xff] }
 0x372   : > { %2465 = vmin.xlane.f32.xlu1 %v8308_v1  ;;  %2463 = vmin.xlane.f32.xlu0 %v8310_v58 }
 0x376   : > { %2469 = vmin.xlane.f32.xlu1 %v8315_v38  ;;  %2467 = vmin.xlane.f32.xlu0 %v8317_v49  ;;  %v11107_v49 = vld [vmem:[#allocation161_spill] sm:$0xff] }
 0x37a   : > { %2473 = vmin.xlane.f32.xlu1 %v8319_v59  ;;  %2471 = vmin.xlane.f32.xlu0 %v2351_v2  ;;  %v2490_v2 = vld [vmem:[#allocation5 + $0x18] sm:$0xff] }
 0x37e   : > { %2477 = vmin.xlane.f32.xlu1 %v2354_v14  ;;  %2475 = vmin.xlane.f32.xlu0 %v2353_v10 }
 0x382   : > { %2481 = vmin.xlane.f32.xlu1 %v2356_v16  ;;  %2479 = vmin.xlane.f32.xlu0 %v2355_v11  ;;  %v2501_v11 = vld [vmem:[#allocation5 + $0x70] sm:$0xff] }
 0x386   : > { %2485 = vmin.xlane.f32.xlu1 %v2358_v18  ;;  %2483 = vmin.xlane.f32.xlu0 %v2357_v17 }
 0x393   : > { %v2364_v28 = vpop.xlane.xlu1 %2363  ;;  %v2360_v23 = vpop.xlane.xlu0 %2359 }
 0x394   : > { %v2553_v22 = vsel %vm1383_vm3, %v2364_v28, 0.0  ;;  %v2551_v58 = vsel %vm1381_vm1, %v2360_v23, 0.0 }
 0x395   : > { %v2617_v1 = vadd.f32 %v2553_v22, %v2489_v4  ;;  %v2615_v59 = vadd.f32 %v2551_v58, %v2487_v30  ;;  %v11109_v30 = vld [vmem:[#allocation160_spill] sm:$0xff] }
 0x396   : > { %v2500_v22 = vld [vmem:[#allocation5 + $0x68] sm:$0xff] }
 0x397   : > { %2682 = vst.msk [vmem:[#allocation5 + $0x10] sm:$0xff] %vm10629_vm9, %v2617_v1  ;;  %2680 = vst.msk [vmem:[#allocation5] sm:$0xff] %vm10629_vm9, %v2615_v59  ;;  %v2366_v10 = vpop.xlane.xlu1 %2365  ;;  %v2362_v18 = vpop.xlane.xlu0 %2361  ;;  %v11111_v59 = vld [vmem:[#allocation163_spill] sm:$0xff] }
 0x398   : > { %v2554_v16 = vsel %vm10611_vm4, %v2366_v10, 0.0  ;;  %v2552_v14 = vsel %vm10610_vm2, %v2362_v18, 0.0  ;;  %vm11100_vm2 = vcmp.lt.s32.totalorder %v11099_v56, 600  ;;  %vm11102_vm4 = vcmp.lt.s32.totalorder %v11101_v55, 600  ;;  %v2505_v55 = vld [vmem:[#allocation5 + $0x90] sm:$0xff] }
 0x399   : > { %v2618_v54 = vadd.f32 %v2554_v16, %v2490_v2  ;;  %v2616_v62 = vadd.f32 %v2552_v14, %v2488_v13  ;;  %v11113_v13 = vld [vmem:[#allocation162_spill] sm:$0xff] }
 0x39a   : > { %v2502_v16 = vld [vmem:[#allocation5 + $0x78] sm:$0xff] }
 0x39b   : > { %2683 = vst.msk [vmem:[#allocation5 + $0x18] sm:$0xff] %vm10629_vm9, %v2618_v54  ;;  %2681 = vst.msk [vmem:[#allocation5 + $0x8] sm:$0xff] %vm10629_vm9, %v2616_v62  ;;  %v2370_v25 = vpop.xlane.xlu1 %2369  ;;  %v2368_v34 = vpop.xlane.xlu0 %2367  ;;  %v11115_v62 = vld [vmem:[#allocation165_spill] sm:$0xff] }
 0x39c   : > { %v2556_v43 = vsel %vm10613_vm6, %v2370_v25, 0.0  ;;  %v2555_v39 = vsel %vm10612_vm5, %v2368_v34, 0.0  ;;  %vm11104_vm5 = vcmp.lt.s32.totalorder %v11103_v8, 600  ;;  %vm11106_vm6 = vcmp.lt.s32.totalorder %v11105_v29, 600  ;;  %v2507_v29 = vld [vmem:[#allocation5 + $0xa0] sm:$0xff] }
 0x39d   : > { %v2620_v21 = vadd.f32 %v2556_v43, %v2492_v48  ;;  %v2619_v3 = vadd.f32 %v2555_v39, %v2491_v31  ;;  %v11117_v31 = vld [vmem:[#allocation164_spill] sm:$0xff] }
 0x39e   : > { %v2504_v43 = vld [vmem:[#allocation5 + $0x88] sm:$0xff] }
 0x39f   : > { %2685 = vst.msk [vmem:[#allocation5 + $0x28] sm:$0xff] %vm10629_vm9, %v2620_v21  ;;  %2684 = vst.msk [vmem:[#allocation5 + $0x20] sm:$0xff] %vm10629_vm9, %v2619_v3  ;;  %v2374_v12 = vpop.xlane.xlu1 %2373  ;;  %v2372_v52 = vpop.xlane.xlu0 %2371  ;;  %v11119_v3 = vld [vmem:[#allocation169_spill] sm:$0xff] }
 0x3a0   : > { %v2558_v27 = vsel %vm11100_vm2, %v2374_v12, 0.0  ;;  %v2557_v36 = vsel %vm11102_vm4, %v2372_v52, 0.0  ;;  %vm11108_vm2 = vcmp.lt.s32.totalorder %v11107_v49, 600  ;;  %vm11110_vm4 = vcmp.lt.s32.totalorder %v11109_v30, 600  ;;  %v2509_v30 = vld [vmem:[#allocation5 + $0xb0] sm:$0xff] }
 0x3a1   : > { %v2622_v46 = vadd.f32 %v2558_v27, %v2494_v33  ;;  %v2621_v44 = vadd.f32 %v2557_v36, %v2493_v53  ;;  %v11121_v53 = vld [vmem:[#allocation168_spill] sm:$0xff]  ;;  %v2506_v27 = vld [vmem:[#allocation5 + $0x98] sm:$0xff] }
 0x3a3   : > { %2687 = vst.msk [vmem:[#allocation5 + $0x38] sm:$0xff] %vm10629_vm9, %v2622_v46  ;;  %2686 = vst.msk [vmem:[#allocation5 + $0x30] sm:$0xff] %vm10629_vm9, %v2621_v44  ;;  %v2378_v47 = vpop.xlane.xlu1 %2377  ;;  %v2376_v50 = vpop.xlane.xlu0 %2375  ;;  %v11123_v44 = vld [vmem:[#allocation171_spill] sm:$0xff] }
 0x3a4   : > { %v2560_v20 = vsel %vm11104_vm5, %v2378_v47, 0.0  ;;  %v2559_v60 = vsel %vm11106_vm6, %v2376_v50, 0.0  ;;  %vm11112_vm5 = vcmp.lt.s32.totalorder %v11111_v59, 600  ;;  %vm11114_vm6 = vcmp.lt.s32.totalorder %v11113_v13, 600  ;;  %v2511_v13 = vld [vmem:[#allocation5 + $0xc0] sm:$0xff] }
 0x3a5   : > { %v2624_v32 = vadd.f32 %v2560_v20, %v2496_v42  ;;  %v2623_v0 = vadd.f32 %v2559_v60, %v2495_v63  ;;  %v11125_v63 = vld [vmem:[#allocation170_spill] sm:$0xff]  ;;  %v2508_v20 = vld [vmem:[#allocation5 + $0xa8] sm:$0xff] }
 0x3a7   : > { %2689 = vst.msk [vmem:[#allocation5 + $0x48] sm:$0xff] %vm10629_vm9, %v2624_v32  ;;  %2688 = vst.msk [vmem:[#allocation5 + $0x40] sm:$0xff] %vm10629_vm9, %v2623_v0  ;;  %v2382_v9 = vpop.xlane.xlu1 %2381  ;;  %v2380_v38 = vpop.xlane.xlu0 %2379  ;;  %v11127_v0 = vld [vmem:[#allocation173_spill] sm:$0xff] }
 0x3a8   : > { %v2562_v4 = vsel %vm11108_vm2, %v2382_v9, 0.0  ;;  %v2561_v28 = vsel %vm11110_vm4, %v2380_v38, 0.0  ;;  %vm11116_vm2 = vcmp.lt.s32.totalorder %v11115_v62, 600  ;;  %vm11118_vm4 = vcmp.lt.s32.totalorder %v11117_v31, 600  ;;  %v2513_v31 = vld [vmem:[#allocation5 + $0xd0] sm:$0xff] }
 0x3a9   : > { %v2626_v23 = vadd.f32 %v2562_v4, %v2498_v35  ;;  %v2625_v26 = vadd.f32 %v2561_v28, %v2497_v41  ;;  %v11129_v41 = vld [vmem:[#allocation172_spill] sm:$0xff]  ;;  %v2510_v4 = vld [vmem:[#allocation5 + $0xb8] sm:$0xff] }
 0x3ab   : > { %2691 = vst.msk [vmem:[#allocation5 + $0x58] sm:$0xff] %vm10629_vm9, %v2626_v23  ;;  %2690 = vst.msk [vmem:[#allocation5 + $0x50] sm:$0xff] %vm10629_vm9, %v2625_v26  ;;  %v2386_v58 = vpop.xlane.xlu1 %2385  ;;  %v2384_v1 = vpop.xlane.xlu0 %2383  ;;  %v11131_v26 = vld [vmem:[#allocation175_spill] sm:$0xff] }
 0x3ac   : > { %v2564_v2 = vsel %vm11112_vm5, %v2386_v58, 0.0  ;;  %v2563_v10 = vsel %vm11114_vm6, %v2384_v1, 0.0  ;;  %vm11120_vm5 = vcmp.lt.s32.totalorder %v11119_v3, 600  ;;  %vm11122_vm6 = vcmp.lt.s32.totalorder %v11121_v53, 600  ;;  %v2515_v53 = vld [vmem:[#allocation5 + $0xe0] sm:$0xff] }
 0x3ad   : > { %v2628_v18 = vadd.f32 %v2564_v2, %v2500_v22  ;;  %v2627_v17 = vadd.f32 %v2563_v10, %v2499_v7  ;;  %v11133_v7 = vld [vmem:[#allocation174_spill] sm:$0xff]  ;;  %v2512_v2 = vld [vmem:[#allocation5 + $0xc8] sm:$0xff] }
 0x3af   : > { %2693 = vst.msk [vmem:[#allocation5 + $0x68] sm:$0xff] %vm10629_vm9, %v2628_v18  ;;  %2692 = vst.msk [vmem:[#allocation5 + $0x60] sm:$0xff] %vm10629_vm9, %v2627_v17  ;;  %v2390_v14 = vpop.xlane.xlu1 %2389  ;;  %v2388_v54 = vpop.xlane.xlu0 %2387  ;;  %v11135_v17 = vld [vmem:[#allocation177_spill] sm:$0xff] }
 0x3b0   : > { %v2566_v48 = vsel %vm11116_vm2, %v2390_v14, 0.0  ;;  %v2565_v25 = vsel %vm11118_vm4, %v2388_v54, 0.0  ;;  %vm11124_vm2 = vcmp.lt.s32.totalorder %v11123_v44, 600  ;;  %vm11126_vm4 = vcmp.lt.s32.totalorder %v11125_v63, 600  ;;  %v2517_v63 = vld [vmem:[#allocation5 + $0xf0] sm:$0xff] }
 0x3b1   : > { %v2630_v34 = vadd.f32 %v2566_v48, %v2502_v16  ;;  %v2629_v40 = vadd.f32 %v2565_v25, %v2501_v11  ;;  %v11137_v11 = vld [vmem:[#allocation176_spill] sm:$0xff]  ;;  %v2514_v48 = vld [vmem:[#allocation5 + $0xd8] sm:$0xff] }
 0x3b3   : > { %2695 = vst.msk [vmem:[#allocation5 + $0x78] sm:$0xff] %vm10629_vm9, %v2630_v34  ;;  %2694 = vst.msk [vmem:[#allocation5 + $0x70] sm:$0xff] %vm10629_vm9, %v2629_v40  ;;  %v2394_v39 = vpop.xlane.xlu1 %2393  ;;  %v2392_v21 = vpop.xlane.xlu0 %2391  ;;  %v11139_v40 = vld [vmem:[#allocation179_spill] sm:$0xff] }
 0x3b4   : > { %v2568_v33 = vsel %vm11120_vm5, %v2394_v39, 0.0  ;;  %v2567_v12 = vsel %vm11122_vm6, %v2392_v21, 0.0  ;;  %vm11128_vm5 = vcmp.lt.s32.totalorder %v11127_v0, 600  ;;  %vm11130_vm6 = vcmp.lt.s32.totalorder %v11129_v41, 600  ;;  %v2519_v41 = vld [vmem:[#allocation5 + $0x100] sm:$0xff] }
 0x3b5   : > { %v2632_v52 = vadd.f32 %v2568_v33, %v2504_v43  ;;  %v2631_v56 = vadd.f32 %v2567_v12, %v2503_v45  ;;  %v11141_v45 = vld [vmem:[#allocation178_spill] sm:$0xff]  ;;  %v2516_v33 = vld [vmem:[#allocation5 + $0xe8] sm:$0xff] }
 0x3b7   : > { %2697 = vst.msk [vmem:[#allocation5 + $0x88] sm:$0xff] %vm10629_vm9, %v2632_v52  ;;  %2696 = vst.msk [vmem:[#allocation5 + $0x80] sm:$0xff] %vm10629_vm9, %v2631_v56  ;;  %v2398_v36 = vpop.xlane.xlu1 %2397  ;;  %v2396_v46 = vpop.xlane.xlu0 %2395  ;;  %v11143_v56 = vld [vmem:[#allocation181_spill] sm:$0xff] }
 0x3b8   : > { %v2570_v42 = vsel %vm11124_vm2, %v2398_v36, 0.0  ;;  %v2569_v47 = vsel %vm11126_vm4, %v2396_v46, 0.0  ;;  %vm11132_vm2 = vcmp.lt.s32.totalorder %v11131_v26, 600  ;;  %vm11134_vm4 = vcmp.lt.s32.totalorder %v11133_v7, 600  ;;  %v2521_v7 = vld [vmem:[#allocation5 + $0x110] sm:$0xff] }
 0x3b9   : > { %v2634_v50 = vadd.f32 %v2570_v42, %v2506_v27  ;;  %v2633_v8 = vadd.f32 %v2569_v47, %v2505_v55  ;;  %v11145_v55 = vld [vmem:[#allocation180_spill] sm:$0xff]  ;;  %v2518_v42 = vld [vmem:[#allocation5 + $0xf8] sm:$0xff] }
 0x3bb   : > { %2699 = vst.msk [vmem:[#allocation5 + $0x98] sm:$0xff] %vm10629_vm9, %v2634_v50  ;;  %2698 = vst.msk [vmem:[#allocation5 + $0x90] sm:$0xff] %vm10629_vm9, %v2633_v8  ;;  %v2402_v60 = vpop.xlane.xlu1 %2401  ;;  %v2400_v32 = vpop.xlane.xlu0 %2399  ;;  %v11147_v8 = vld [vmem:[#allocation183_spill] sm:$0xff] }
 0x3bc   : > { %v2572_v35 = vsel %vm11128_vm5, %v2402_v60, 0.0  ;;  %v2571_v9 = vsel %vm11130_vm6, %v2400_v32, 0.0  ;;  %vm11136_vm5 = vcmp.lt.s32.totalorder %v11135_v17, 600  ;;  %vm11138_vm6 = vcmp.lt.s32.totalorder %v11137_v11, 600  ;;  %v2523_v11 = vld [vmem:[#allocation5 + $0x120] sm:$0xff] }
 0x3bd   : > { %v2636_v38 = vadd.f32 %v2572_v35, %v2508_v20  ;;  %v2635_v49 = vadd.f32 %v2571_v9, %v2507_v29  ;;  %v11149_v29 = vld [vmem:[#allocation182_spill] sm:$0xff]  ;;  %v2520_v35 = vld [vmem:[#allocation5 + $0x108] sm:$0xff] }
 0x3bf   : > { %2701 = vst.msk [vmem:[#allocation5 + $0xa8] sm:$0xff] %vm10629_vm9, %v2636_v38  ;;  %2700 = vst.msk [vmem:[#allocation5 + $0xa0] sm:$0xff] %vm10629_vm9, %v2635_v49  ;;  %v2406_v28 = vpop.xlane.xlu1 %2405  ;;  %v2404_v23 = vpop.xlane.xlu0 %2403  ;;  %v11151_v49 = vld [vmem:[#allocation187_spill] sm:$0xff] }
 0x3c0   : > { %v2574_v22 = vsel %vm11132_vm2, %v2406_v28, 0.0  ;;  %v2573_v58 = vsel %vm11134_vm4, %v2404_v23, 0.0  ;;  %vm11140_vm2 = vcmp.lt.s32.totalorder %v11139_v40, 600  ;;  %vm11142_vm4 = vcmp.lt.s32.totalorder %v11141_v45, 600  ;;  %v2525_v45 = vld [vmem:[#allocation5 + $0x130] sm:$0xff] }
 0x3c1   : > { %v2638_v1 = vadd.f32 %v2574_v22, %v2510_v4  ;;  %v2637_v59 = vadd.f32 %v2573_v58, %v2509_v30  ;;  %v11153_v30 = vld [vmem:[#allocation186_spill] sm:$0xff] }
 0x3c2   : > { %v2522_v22 = vld [vmem:[#allocation5 + $0x118] sm:$0xff] }
 0x3c3   : > { %2703 = vst.msk [vmem:[#allocation5 + $0xb8] sm:$0xff] %vm10629_vm9, %v2638_v1  ;;  %2702 = vst.msk [vmem:[#allocation5 + $0xb0] sm:$0xff] %vm10629_vm9, %v2637_v59  ;;  %v2410_v10 = vpop.xlane.xlu1 %2409  ;;  %v2408_v18 = vpop.xlane.xlu0 %2407  ;;  %v11155_v59 = vld [vmem:[#allocation189_spill] sm:$0xff] }
 0x3c4   : > { %v2576_v16 = vsel %vm11136_vm5, %v2410_v10, 0.0  ;;  %v2575_v14 = vsel %vm11138_vm6, %v2408_v18, 0.0  ;;  %vm11144_vm5 = vcmp.lt.s32.totalorder %v11143_v56, 600  ;;  %vm11146_vm6 = vcmp.lt.s32.totalorder %v11145_v55, 600  ;;  %v2527_v55 = vld [vmem:[#allocation5 + $0x140] sm:$0xff] }
 0x3c5   : > { %v2640_v54 = vadd.f32 %v2576_v16, %v2512_v2  ;;  %v2639_v62 = vadd.f32 %v2575_v14, %v2511_v13  ;;  %v11157_v13 = vld [vmem:[#allocation188_spill] sm:$0xff] }
 0x3c6   : > { %v2524_v16 = vld [vmem:[#allocation5 + $0x128] sm:$0xff] }
 0x3c7   : > { %2705 = vst.msk [vmem:[#allocation5 + $0xc8] sm:$0xff] %vm10629_vm9, %v2640_v54  ;;  %2704 = vst.msk [vmem:[#allocation5 + $0xc0] sm:$0xff] %vm10629_vm9, %v2639_v62  ;;  %v2414_v25 = vpop.xlane.xlu1 %2413  ;;  %v2412_v34 = vpop.xlane.xlu0 %2411  ;;  %v11159_v62 = vld [vmem:[#allocation191_spill] sm:$0xff] }
 0x3c8   : > { %v2578_v43 = vsel %vm11140_vm2, %v2414_v25, 0.0  ;;  %v2577_v39 = vsel %vm11142_vm4, %v2412_v34, 0.0  ;;  %vm11148_vm2 = vcmp.lt.s32.totalorder %v11147_v8, 600  ;;  %vm11150_vm4 = vcmp.lt.s32.totalorder %v11149_v29, 600  ;;  %v2529_v29 = vld [vmem:[#allocation5 + $0x150] sm:$0xff] }
 0x3c9   : > { %v2642_v21 = vadd.f32 %v2578_v43, %v2514_v48  ;;  %v2641_v3 = vadd.f32 %v2577_v39, %v2513_v31  ;;  %v11161_v31 = vld [vmem:[#allocation190_spill] sm:$0xff] }
 0x3ca   : > { %v2526_v43 = vld [vmem:[#allocation5 + $0x138] sm:$0xff] }
 0x3cb   : > { %2707 = vst.msk [vmem:[#allocation5 + $0xd8] sm:$0xff] %vm10629_vm9, %v2642_v21  ;;  %2706 = vst.msk [vmem:[#allocation5 + $0xd0] sm:$0xff] %vm10629_vm9, %v2641_v3  ;;  %v2418_v12 = vpop.xlane.xlu1 %2417  ;;  %v2416_v52 = vpop.xlane.xlu0 %2415  ;;  %v11163_v3 = vld [vmem:[#allocation193_spill] sm:$0xff] }
 0x3cc   : > { %v2580_v27 = vsel %vm11144_vm5, %v2418_v12, 0.0  ;;  %v2579_v36 = vsel %vm11146_vm6, %v2416_v52, 0.0  ;;  %vm11152_vm5 = vcmp.lt.s32.totalorder %v11151_v49, 600  ;;  %vm11154_vm6 = vcmp.lt.s32.totalorder %v11153_v30, 600  ;;  %v2531_v30 = vld [vmem:[#allocation5 + $0x160] sm:$0xff] }
 0x3cd   : > { %v2644_v46 = vadd.f32 %v2580_v27, %v2516_v33  ;;  %v2643_v44 = vadd.f32 %v2579_v36, %v2515_v53  ;;  %v11165_v53 = vld [vmem:[#allocation192_spill] sm:$0xff] }
 0x3ce   : > { %v2528_v27 = vld [vmem:[#allocation5 + $0x148] sm:$0xff] }
 0x3cf   : > { %2709 = vst.msk [vmem:[#allocation5 + $0xe8] sm:$0xff] %vm10629_vm9, %v2644_v46  ;;  %2708 = vst.msk [vmem:[#allocation5 + $0xe0] sm:$0xff] %vm10629_vm9, %v2643_v44  ;;  %v2422_v47 = vpop.xlane.xlu1 %2421  ;;  %v2420_v50 = vpop.xlane.xlu0 %2419  ;;  %v11167_v44 = vld [vmem:[#allocation195_spill] sm:$0xff] }
 0x3d0   : > { %v2582_v20 = vsel %vm11148_vm2, %v2422_v47, 0.0  ;;  %v2581_v60 = vsel %vm11150_vm4, %v2420_v50, 0.0  ;;  %vm11156_vm2 = vcmp.lt.s32.totalorder %v11155_v59, 600  ;;  %vm11158_vm4 = vcmp.lt.s32.totalorder %v11157_v13, 600  ;;  %v2533_v13 = vld [vmem:[#allocation5 + $0x170] sm:$0xff] }
 0x3d1   : > { %v2646_v32 = vadd.f32 %v2582_v20, %v2518_v42  ;;  %v2645_v0 = vadd.f32 %v2581_v60, %v2517_v63  ;;  %v11169_v63 = vld [vmem:[#allocation194_spill] sm:$0xff] }
 0x3d2   : > { %v2530_v20 = vld [vmem:[#allocation5 + $0x158] sm:$0xff] }
 0x3d3   : > { %2711 = vst.msk [vmem:[#allocation5 + $0xf8] sm:$0xff] %vm10629_vm9, %v2646_v32  ;;  %2710 = vst.msk [vmem:[#allocation5 + $0xf0] sm:$0xff] %vm10629_vm9, %v2645_v0  ;;  %v2426_v9 = vpop.xlane.xlu1 %2425  ;;  %v2424_v38 = vpop.xlane.xlu0 %2423  ;;  %v11171_v0 = vld [vmem:[#allocation197_spill] sm:$0xff] }
 0x3d4   : > { %v2584_v4 = vsel %vm11152_vm5, %v2426_v9, 0.0  ;;  %v2583_v28 = vsel %vm11154_vm6, %v2424_v38, 0.0  ;;  %vm11160_vm5 = vcmp.lt.s32.totalorder %v11159_v62, 600  ;;  %vm11162_vm6 = vcmp.lt.s32.totalorder %v11161_v31, 600  ;;  %v2535_v31 = vld [vmem:[#allocation5 + $0x180] sm:$0xff] }
 0x3d5   : > { %v2648_v23 = vadd.f32 %v2584_v4, %v2520_v35  ;;  %v2647_v26 = vadd.f32 %v2583_v28, %v2519_v41  ;;  %v11173_v41 = vld [vmem:[#allocation196_spill] sm:$0xff] }
 0x3d6   : > { %v2532_v4 = vld [vmem:[#allocation5 + $0x168] sm:$0xff] }
 0x3d7   : > { %2713 = vst.msk [vmem:[#allocation5 + $0x108] sm:$0xff] %vm10629_vm9, %v2648_v23  ;;  %2712 = vst.msk [vmem:[#allocation5 + $0x100] sm:$0xff] %vm10629_vm9, %v2647_v26  ;;  %v2430_v58 = vpop.xlane.xlu1 %2429  ;;  %v2428_v1 = vpop.xlane.xlu0 %2427  ;;  %v11175_v26 = vld [vmem:[#allocation199_spill] sm:$0xff] }
 0x3d8   : > { %v2586_v2 = vsel %vm11156_vm2, %v2430_v58, 0.0  ;;  %v2585_v10 = vsel %vm11158_vm4, %v2428_v1, 0.0  ;;  %vm11164_vm2 = vcmp.lt.s32.totalorder %v11163_v3, 600  ;;  %vm11166_vm4 = vcmp.lt.s32.totalorder %v11165_v53, 600  ;;  %v2537_v53 = vld [vmem:[#allocation5 + $0x190] sm:$0xff] }
 0x3d9   : > { %v2650_v18 = vadd.f32 %v2586_v2, %v2522_v22  ;;  %v2649_v17 = vadd.f32 %v2585_v10, %v2521_v7  ;;  %v11177_v7 = vld [vmem:[#allocation198_spill] sm:$0xff] }
 0x3da   : > { %v2534_v2 = vld [vmem:[#allocation5 + $0x178] sm:$0xff] }
 0x3db   : > { %2715 = vst.msk [vmem:[#allocation5 + $0x118] sm:$0xff] %vm10629_vm9, %v2650_v18  ;;  %2714 = vst.msk [vmem:[#allocation5 + $0x110] sm:$0xff] %vm10629_vm9, %v2649_v17  ;;  %v2434_v14 = vpop.xlane.xlu1 %2433  ;;  %v2432_v54 = vpop.xlane.xlu0 %2431  ;;  %v11179_v17 = vld [vmem:[#allocation201_spill] sm:$0xff] }
 0x3dc   : > { %v2588_v48 = vsel %vm11160_vm5, %v2434_v14, 0.0  ;;  %v2587_v25 = vsel %vm11162_vm6, %v2432_v54, 0.0  ;;  %vm11168_vm5 = vcmp.lt.s32.totalorder %v11167_v44, 600  ;;  %vm11170_vm6 = vcmp.lt.s32.totalorder %v11169_v63, 600  ;;  %v2539_v63 = vld [vmem:[#allocation5 + $0x1a0] sm:$0xff] }
 0x3dd   : > { %v2652_v34 = vadd.f32 %v2588_v48, %v2524_v16  ;;  %v2651_v40 = vadd.f32 %v2587_v25, %v2523_v11  ;;  %v11181_v11 = vld [vmem:[#allocation200_spill] sm:$0xff] }
 0x3de   : > { %v2536_v48 = vld [vmem:[#allocation5 + $0x188] sm:$0xff] }
 0x3df   : > { %2717 = vst.msk [vmem:[#allocation5 + $0x128] sm:$0xff] %vm10629_vm9, %v2652_v34  ;;  %2716 = vst.msk [vmem:[#allocation5 + $0x120] sm:$0xff] %vm10629_vm9, %v2651_v40  ;;  %v2438_v39 = vpop.xlane.xlu1 %2437  ;;  %v2436_v21 = vpop.xlane.xlu0 %2435  ;;  %v11183_v40 = vld [vmem:[#allocation205_spill] sm:$0xff] }
 0x3e0   : > { %v2590_v33 = vsel %vm11164_vm2, %v2438_v39, 0.0  ;;  %v2589_v12 = vsel %vm11166_vm4, %v2436_v21, 0.0  ;;  %vm11172_vm2 = vcmp.lt.s32.totalorder %v11171_v0, 600  ;;  %vm11174_vm4 = vcmp.lt.s32.totalorder %v11173_v41, 600  ;;  %v2541_v41 = vld [vmem:[#allocation5 + $0x1b0] sm:$0xff] }
 0x3e1   : > { %v2654_v52 = vadd.f32 %v2590_v33, %v2526_v43  ;;  %v2653_v56 = vadd.f32 %v2589_v12, %v2525_v45  ;;  %v11185_v45 = vld [vmem:[#allocation204_spill] sm:$0xff]  ;;  %v2538_v33 = vld [vmem:[#allocation5 + $0x198] sm:$0xff] }
 0x3e3   : > { %2719 = vst.msk [vmem:[#allocation5 + $0x138] sm:$0xff] %vm10629_vm9, %v2654_v52  ;;  %2718 = vst.msk [vmem:[#allocation5 + $0x130] sm:$0xff] %vm10629_vm9, %v2653_v56  ;;  %v2442_v36 = vpop.xlane.xlu1 %2441  ;;  %v2440_v46 = vpop.xlane.xlu0 %2439  ;;  %v11187_v56 = vld [vmem:[#allocation207_spill] sm:$0xff] }
 0x3e4   : > { %v2592_v42 = vsel %vm11168_vm5, %v2442_v36, 0.0  ;;  %v2591_v47 = vsel %vm11170_vm6, %v2440_v46, 0.0  ;;  %vm11176_vm5 = vcmp.lt.s32.totalorder %v11175_v26, 600  ;;  %vm11178_vm6 = vcmp.lt.s32.totalorder %v11177_v7, 600  ;;  %v2543_v7 = vld [vmem:[#allocation5 + $0x1c0] sm:$0xff] }
 0x3e5   : > { %v2656_v50 = vadd.f32 %v2592_v42, %v2528_v27  ;;  %v2655_v8 = vadd.f32 %v2591_v47, %v2527_v55  ;;  %v11189_v55 = vld [vmem:[#allocation206_spill] sm:$0xff]  ;;  %v2540_v42 = vld [vmem:[#allocation5 + $0x1a8] sm:$0xff] }
 0x3e7   : > { %2721 = vst.msk [vmem:[#allocation5 + $0x148] sm:$0xff] %vm10629_vm9, %v2656_v50  ;;  %2720 = vst.msk [vmem:[#allocation5 + $0x140] sm:$0xff] %vm10629_vm9, %v2655_v8  ;;  %v2446_v60 = vpop.xlane.xlu1 %2445  ;;  %v2444_v32 = vpop.xlane.xlu0 %2443  ;;  %v11191_v8 = vld [vmem:[#allocation209_spill] sm:$0xff] }
 0x3e8   : > { %v2594_v35 = vsel %vm11172_vm2, %v2446_v60, 0.0  ;;  %v2593_v9 = vsel %vm11174_vm4, %v2444_v32, 0.0  ;;  %vm11180_vm2 = vcmp.lt.s32.totalorder %v11179_v17, 600  ;;  %vm11182_vm4 = vcmp.lt.s32.totalorder %v11181_v11, 600  ;;  %v2545_v11 = vld [vmem:[#allocation5 + $0x1d0] sm:$0xff] }
 0x3e9   : > { %v2658_v38 = vadd.f32 %v2594_v35, %v2530_v20  ;;  %v2657_v49 = vadd.f32 %v2593_v9, %v2529_v29  ;;  %v11193_v29 = vld [vmem:[#allocation208_spill] sm:$0xff]  ;;  %v2542_v35 = vld [vmem:[#allocation5 + $0x1b8] sm:$0xff] }
 0x3eb   : > { %2723 = vst.msk [vmem:[#allocation5 + $0x158] sm:$0xff] %vm10629_vm9, %v2658_v38  ;;  %2722 = vst.msk [vmem:[#allocation5 + $0x150] sm:$0xff] %vm10629_vm9, %v2657_v49  ;;  %v2450_v28 = vpop.xlane.xlu1 %2449  ;;  %v2448_v23 = vpop.xlane.xlu0 %2447 }
 0x3ec   : > { %v2596_v22 = vsel %vm11176_vm5, %v2450_v28, 0.0  ;;  %v2595_v58 = vsel %vm11178_vm6, %v2448_v23, 0.0  ;;  %vm11184_vm5 = vcmp.lt.s32.totalorder %v11183_v40, 600  ;;  %vm11186_vm6 = vcmp.lt.s32.totalorder %v11185_v45, 600  ;;  %v2547_v45 = vld [vmem:[#allocation5 + $0x1e0] sm:$0xff] }
 0x3ed   : > { %v2660_v1 = vadd.f32 %v2596_v22, %v2532_v4  ;;  %v2659_v59 = vadd.f32 %v2595_v58, %v2531_v30  ;;  %v2544_v22 = vld [vmem:[#allocation5 + $0x1c8] sm:$0xff] }
 0x3ef   : > { %2725 = vst.msk [vmem:[#allocation5 + $0x168] sm:$0xff] %vm10629_vm9, %v2660_v1  ;;  %2724 = vst.msk [vmem:[#allocation5 + $0x160] sm:$0xff] %vm10629_vm9, %v2659_v59  ;;  %v2454_v10 = vpop.xlane.xlu1 %2453  ;;  %v2452_v18 = vpop.xlane.xlu0 %2451 }
 0x3f0   : > { %v2598_v16 = vsel %vm11180_vm2, %v2454_v10, 0.0  ;;  %v2597_v14 = vsel %vm11182_vm4, %v2452_v18, 0.0  ;;  %vm11188_vm2 = vcmp.lt.s32.totalorder %v11187_v56, 600  ;;  %vm11190_vm4 = vcmp.lt.s32.totalorder %v11189_v55, 600  ;;  %v2549_v55 = vld [vmem:[#allocation5 + $0x1f0] sm:$0xff] }
 0x3f1   : > { %v2662_v54 = vadd.f32 %v2598_v16, %v2534_v2  ;;  %v2661_v62 = vadd.f32 %v2597_v14, %v2533_v13  ;;  %v2546_v16 = vld [vmem:[#allocation5 + $0x1d8] sm:$0xff] }
 0x3f3   : > { %2727 = vst.msk [vmem:[#allocation5 + $0x178] sm:$0xff] %vm10629_vm9, %v2662_v54  ;;  %2726 = vst.msk [vmem:[#allocation5 + $0x170] sm:$0xff] %vm10629_vm9, %v2661_v62  ;;  %v2458_v25 = vpop.xlane.xlu1 %2457  ;;  %v2456_v34 = vpop.xlane.xlu0 %2455 }
 0x3f4   : > { %v2600_v43 = vsel %vm11184_vm5, %v2458_v25, 0.0  ;;  %v2599_v39 = vsel %vm11186_vm6, %v2456_v34, 0.0  ;;  %vm11192_vm5 = vcmp.lt.s32.totalorder %v11191_v8, 600  ;;  %vm11194_vm6 = vcmp.lt.s32.totalorder %v11193_v29, 600 }
 0x3f5   : > { %v2664_v21 = vadd.f32 %v2600_v43, %v2536_v48  ;;  %v2663_v3 = vadd.f32 %v2599_v39, %v2535_v31  ;;  %v2548_v43 = vld [vmem:[#allocation5 + $0x1e8] sm:$0xff] }
 0x3f7   : > { %2729 = vst.msk [vmem:[#allocation5 + $0x188] sm:$0xff] %vm10629_vm9, %v2664_v21  ;;  %2728 = vst.msk [vmem:[#allocation5 + $0x180] sm:$0xff] %vm10629_vm9, %v2663_v3  ;;  %v2462_v12 = vpop.xlane.xlu1 %2461  ;;  %v2460_v52 = vpop.xlane.xlu0 %2459 }
 0x3f8   : > { %v2602_v27 = vsel %vm11188_vm2, %v2462_v12, 0.0  ;;  %v2601_v36 = vsel %vm11190_vm4, %v2460_v52, 0.0 }
 0x3f9   : > { %v2666_v46 = vadd.f32 %v2602_v27, %v2538_v33  ;;  %v2665_v44 = vadd.f32 %v2601_v36, %v2537_v53  ;;  %v2550_v27 = vld [vmem:[#allocation5 + $0x1f8] sm:$0xff] }
 0x3fb   : > { %2731 = vst.msk [vmem:[#allocation5 + $0x198] sm:$0xff] %vm10629_vm9, %v2666_v46  ;;  %2730 = vst.msk [vmem:[#allocation5 + $0x190] sm:$0xff] %vm10629_vm9, %v2665_v44  ;;  %v2466_v47 = vpop.xlane.xlu1 %2465  ;;  %v2464_v50 = vpop.xlane.xlu0 %2463 }
 0x3fc   : > { %v2604_v20 = vsel %vm11192_vm5, %v2466_v47, 0.0  ;;  %v2603_v60 = vsel %vm11194_vm6, %v2464_v50, 0.0 }
 0x3fd   : > { %v2668_v32 = vadd.f32 %v2604_v20, %v2540_v42  ;;  %v2667_v0 = vadd.f32 %v2603_v60, %v2539_v63  ;;  %v11204_v63 = vld [vmem:[#allocation146_spill] sm:$0xff] }
 0x3fe   : > { %vm11205_vm2 = vcmp.lt.s32.totalorder %v11204_v63, 600 }
 0x3ff   : > { %2733 = vst.msk [vmem:[#allocation5 + $0x1a8] sm:$0xff] %vm10629_vm9, %v2668_v32  ;;  %2732 = vst.msk [vmem:[#allocation5 + $0x1a0] sm:$0xff] %vm10629_vm9, %v2667_v0  ;;  %v2470_v9 = vpop.xlane.xlu1 %2469  ;;  %v2468_v38 = vpop.xlane.xlu0 %2467 }
 0x400   : > { %v2606_v4 = vsel %vm1436_vm12, %v2470_v9, 0.0  ;;  %v2605_v28 = vsel %vm1435_vm11, %v2468_v38, 0.0 }
 0x401   : > { %v2670_v23 = vadd.f32 %v2606_v4, %v2542_v35  ;;  %v2669_v26 = vadd.f32 %v2605_v28, %v2541_v41 }
 0x403   : > { %2735 = vst.msk [vmem:[#allocation5 + $0x1b8] sm:$0xff] %vm10629_vm9, %v2670_v23  ;;  %2734 = vst.msk [vmem:[#allocation5 + $0x1b0] sm:$0xff] %vm10629_vm9, %v2669_v26  ;;  %v2474_v58 = vpop.xlane.xlu1 %2473  ;;  %v2472_v1 = vpop.xlane.xlu0 %2471 }
 0x404   : > { %v2608_v2 = vsel %vm1438_vm14, %v2474_v58, 0.0  ;;  %v2607_v10 = vsel %vm1437_vm13, %v2472_v1, 0.0 }
 0x405   : > { %v2672_v18 = vadd.f32 %v2608_v2, %v2544_v22  ;;  %v2671_v17 = vadd.f32 %v2607_v10, %v2543_v7 }
 0x407   : > { %2737 = vst.msk [vmem:[#allocation5 + $0x1c8] sm:$0xff] %vm10629_vm9, %v2672_v18  ;;  %2736 = vst.msk [vmem:[#allocation5 + $0x1c0] sm:$0xff] %vm10629_vm9, %v2671_v17  ;;  %v2478_v14 = vpop.xlane.xlu1 %2477  ;;  %v2476_v54 = vpop.xlane.xlu0 %2475 }
 0x408   : > { %v2610_v48 = vsel %vm1440_vm0, %v2478_v14, 0.0  ;;  %v2609_v25 = vsel %vm1439_vm15, %v2476_v54, 0.0 }
 0x409   : > { %v2674_v34 = vadd.f32 %v2610_v48, %v2546_v16  ;;  %v2673_v40 = vadd.f32 %v2609_v25, %v2545_v11 }
 0x40b   : > { %2739 = vst.msk [vmem:[#allocation5 + $0x1d8] sm:$0xff] %vm10629_vm9, %v2674_v34  ;;  %2738 = vst.msk [vmem:[#allocation5 + $0x1d0] sm:$0xff] %vm10629_vm9, %v2673_v40  ;;  %v2482_v39 = vpop.xlane.xlu1 %2481  ;;  %v2480_v21 = vpop.xlane.xlu0 %2479 }
 0x40c   : > { %v2612_v33 = vsel %vm1442_vm8, %v2482_v39, 0.0  ;;  %v2611_v12 = vsel %vm1441_vm7, %v2480_v21, 0.0 }
 0x40d   : > { %v2676_v52 = vadd.f32 %v2612_v33, %v2548_v43  ;;  %v2675_v56 = vadd.f32 %v2611_v12, %v2547_v45 }
 0x40f   : > { %2741 = vst.msk [vmem:[#allocation5 + $0x1e8] sm:$0xff] %vm10629_vm9, %v2676_v52  ;;  %2740 = vst.msk [vmem:[#allocation5 + $0x1e0] sm:$0xff] %vm10629_vm9, %v2675_v56  ;;  %v2486_v36 = vpop.xlane.xlu1 %2485  ;;  %v2484_v46 = vpop.xlane.xlu0 %2483 }
 0x410   : > { %v2614_v42 = vsel %vm1444_vm10, %v2486_v36, 0.0  ;;  %v2613_v47 = vsel %vm11205_vm2, %v2484_v46, 0.0 }
 0x411   : > { %v2678_v50 = vadd.f32 %v2614_v42, %v2550_v27  ;;  %v2677_v8 = vadd.f32 %v2613_v47, %v2549_v55 }
 0x413   : > { %2743 = vst.msk [vmem:[#allocation5 + $0x1f8] sm:$0xff] %vm10629_vm9, %v2678_v50  ;;  %2742 = vst.msk [vmem:[#allocation5 + $0x1f0] sm:$0xff] %vm10629_vm9, %v2677_v8 }
 0x414 LB: >> { %s5785_s10 = sshll.u32 %s5922_s9, 7  ;;  %v11206_v32 = vld [vmem:[#allocation19_spill] sm:$0xff]  ;;  %v11209_v49 = vld [vmem:[#allocation21_spill] sm:$0xff]  ;;  %v11211_v23 = vld [vmem:[#allocation136_spill] sm:$0xff]  ;;  %s2813_s9 = sadd.s32 1, %s5922_s9   ;;  %s5922_s9 = sphi %s8570_s9, %s2813_s9  }
 0x415   : >> { %s8576_s11 = sshra.s32 %s5785_s10, 7  ;;  %v11207_v35 = vld [vmem:[#allocation79_spill] sm:$0xff]  ;;  %v11210_v30 = vld [vmem:[#allocation17_spill] sm:$0xff]  ;;  %v11212_v22 = vld [vmem:[#allocation18_spill] sm:$0xff]  ;;  %p2810_p6 = scmp.ge.s32.totalorder %s2813_s9, 5  }
 0x416   : >> { %s5786_s12 = sshll.u32 %s8576_s11, 3  ;;  %v11208_v9 = vld [vmem:[#allocation15_spill] sm:$0xff]  ;;  %v11213_v58 = vld [vmem:[#allocation80_spill] sm:$0xff]  ;;  %v11214_v16 = vld [vmem:[#allocation137_spill] sm:$0xff]  ;;  %p5788_p7 = scmp.ne.s32.totalorder (%p2810_p6), %s5967_s19, 1 }
 0x417   : >> { %s8584_s15 = scalar_lea.vmem %s10511_s2, %s5786_s12  ;;  %v11215_v48 = vld [vmem:[#allocation20_spill] sm:$0xff]  ;;  %v11216_v25 = vld [vmem:[#allocation81_spill] sm:$0xff]  ;;  %v11217_v39 = vld [vmem:[#allocation139_spill] sm:$0xff]  ;;  %s3590_s16 = scalar_lea.vmem [#allocation4], %s5786_s12 }
 0x418   : >> { %v8587_v20 = vld [vmem:[%s8584_s15] ss:$0 sm:$0xff]  ;;  %v8590_v29 = vld [vmem:[%s8584_s15 + $0x1] ss:$0 sm:$0xff]  ;;  %v8593_v60 = vld [vmem:[%s8584_s15 + $0x2] ss:$0 sm:$0xff] }
 0x419   : >> { %v2822_v0 = vsub.f32 %v11206_v32, %v8587_v20  ;;  %v2886_v41 = vsub.f32 %v11207_v35, %v8590_v29  ;;  %v2950_v38 = vsub.f32 %v11208_v9, %v8593_v60  ;;  %v2823_v4 = vsub.f32 %v11209_v49, %v8587_v20  ;;  %v3334_v40 = vld [vmem:[#allocation2 + $0xb0] sm:$0xff]  ;;  %v11218_v3 = vld [vmem:[#allocation23_spill] sm:$0xff]  ;;  %v3336_v36 = vld [vmem:[#allocation2 + $0xd8] sm:$0xff] }
 0x41a   : >> { %v2887_v28 = vsub.f32 %v11210_v30, %v8590_v29  ;;  %v2951_v26 = vsub.f32 %v11211_v23, %v8593_v60  ;;  %v2824_v7 = vsub.f32 %v11212_v22, %v8587_v20  ;;  %v2888_v1 = vsub.f32 %v11213_v58, %v8590_v29  ;;  %v3335_v12 = vld [vmem:[#allocation2 + $0x1b0] sm:$0xff]  ;;  %v11219_v44 = vld [vmem:[#allocation82_spill] sm:$0xff]  ;;  %v11222_v23 = vld [vmem:[#allocation83_spill] sm:$0xff] }
 0x41b   : >> { %v3014_v59 = vmul.f32 %v2822_v0, %v2822_v0  ;;  %v3078_v2 = vmul.f32 %v2886_v41, %v2886_v41  ;;  %v3206_v13 = vmul.f32 %v2950_v38, %v2950_v38  ;;  %v3015_v10 = vmul.f32 %v2823_v4, %v2823_v4  ;;  %v11220_v63 = vld [vmem:[#allocation138_spill] sm:$0xff]  ;;  %v3337_v41 = vld [vmem:[#allocation2 + $0x18] sm:$0xff]  ;;  %v11223_v22 = vld [vmem:[#allocation148_spill] sm:$0xff] }
 0x41c   : >> { %v3079_v18 = vmul.f32 %v2887_v28, %v2887_v28  ;;  %v3207_v17 = vmul.f32 %v2951_v26, %v2951_v26  ;;  %v2952_v11 = vsub.f32 %v11214_v16, %v8593_v60  ;;  %v3016_v14 = vmul.f32 %v2824_v7, %v2824_v7  ;;  %v11221_v49 = vld [vmem:[#allocation22_spill] sm:$0xff] }
 0x41d   : >> { %v3142_v54 = vadd.f32 %v3078_v2, %v3014_v59  ;;  %v3080_v62 = vmul.f32 %v2888_v1, %v2888_v1  ;;  %v2825_v31 = vsub.f32 %v11215_v48, %v8587_v20  ;;  %v2889_v34 = vsub.f32 %v11216_v25, %v8590_v29  ;;  %v11224_v59 = vld [vmem:[#allocation25_spill] sm:$0xff]  ;;  %v11227_v25 = vld [vmem:[#allocation24_spill] sm:$0xff] }
 0x41e   : >> { %v3143_v43 = vadd.f32 %v3079_v18, %v3015_v10  ;;  %v3208_v45 = vmul.f32 %v2952_v11, %v2952_v11  ;;  %v2953_v21 = vsub.f32 %v11217_v39, %v8593_v60  ;;  %v2826_v33 = vsub.f32 %v11218_v3, %v8587_v20 }
 0x41f   : >> { %v8621_v53 = vadd.f32 %v3206_v13, %v3142_v54  ;;  %v3144_v52 = vadd.f32 %v3080_v62, %v3016_v14  ;;  %v3017_v56 = vmul.f32 %v2825_v31, %v2825_v31  ;;  %v3081_v27 = vmul.f32 %v2889_v34, %v2889_v34  ;;  %v11225_v13 = vld [vmem:[#allocation84_spill] sm:$0xff] }
 0x420   : >> { %v8623_v55 = vadd.f32 %v3207_v17, %v3143_v43  ;;  %v3209_v46 = vmul.f32 %v2953_v21, %v2953_v21  ;;  %v2890_v42 = vsub.f32 %v11219_v44, %v8590_v29  ;;  %v2954_v47 = vsub.f32 %v11220_v63, %v8593_v60  ;;  %v3338_v17 = vld [vmem:[#allocation2 + $0x50] sm:$0xff]  ;;  %v11229_v21 = vld [vmem:[#allocation166_spill] sm:$0xff]  ;;  %v11230_v63 = vld [vmem:[#allocation27_spill] sm:$0xff] }
 0x421   : >> { %v3398_v50 = vmin.f32 %v3334_v40, %v8621_v53  ;;  %v8630_v8 = vadd.f32 %v3208_v45, %v3144_v52  ;;  %v3145_v32 = vadd.f32 %v3081_v27, %v3017_v56  ;;  %v3018_v0 = vmul.f32 %v2826_v33, %v2826_v33  ;;  %v11226_v14 = vld [vmem:[#allocation140_spill] sm:$0xff]  ;;  %v11228_v45 = vld [vmem:[#allocation85_spill] sm:$0xff]  ;;  %v3339_v52 = vld [vmem:[#allocation2 + $0x168] sm:$0xff] }
 0x422   : >> { %v3399_v35 = vmin.f32 %v3335_v12, %v8623_v55  ;;  %v3082_v9 = vmul.f32 %v2890_v42, %v2890_v42  ;;  %v3210_v38 = vmul.f32 %v2954_v47, %v2954_v47  ;;  %v2827_v4 = vsub.f32 %v11221_v49, %v8587_v20 }
 0x423   : >> { %3462 = vst [vmem:[#allocation2 + $0xb0] sm:$0xff] %v3398_v50  ;;  %v3400_v30 = vmin.f32 %v3336_v36, %v8630_v8  ;;  %v8636_v28 = vadd.f32 %v3209_v46, %v3145_v32  ;;  %v2891_v26 = vsub.f32 %v11222_v23, %v8590_v29  ;;  %v2955_v7 = vsub.f32 %v11223_v22, %v8593_v60  ;;  %v3340_v46 = vld [vmem:[#allocation2 + $0x130] sm:$0xff]  ;;  %v11231_v32 = vld [vmem:[#allocation86_spill] sm:$0xff]  ;;  %v3341_v22 = vld [vmem:[#allocation2 + $0x48] sm:$0xff] }
 0x424   : >> { %3463 = vst [vmem:[#allocation2 + $0x1b0] sm:$0xff] %v3399_v35  ;;  %v3146_v58 = vadd.f32 %v3082_v9, %v3018_v0  ;;  %v3019_v1 = vmul.f32 %v2827_v4, %v2827_v4  ;;  %v2828_v2 = vsub.f32 %v11224_v59, %v8587_v20  ;;  %v2892_v10 = vsub.f32 %v11225_v13, %v8590_v29  ;;  %v11232_v35 = vld [vmem:[#allocation149_spill] sm:$0xff]  ;;  %v11234_v59 = vld [vmem:[#allocation87_spill] sm:$0xff]  ;;  %v11235_v13 = vld [vmem:[#allocation184_spill] sm:$0xff] }
 0x425   : >> { %3464 = vst [vmem:[#allocation2 + $0xd8] sm:$0xff] %v3400_v30  ;;  %v3401_v18 = vmin.f32 %v3337_v41, %v8636_v28  ;;  %v3083_v16 = vmul.f32 %v2891_v26, %v2891_v26  ;;  %v3211_v11 = vmul.f32 %v2955_v7, %v2955_v7  ;;  %v2956_v54 = vsub.f32 %v11226_v14, %v8593_v60  ;;  %v11238_v14 = vld [vmem:[#allocation167_spill] sm:$0xff] }
 0x426   : >> { %v3274_v62 = vadd.f32 %v3210_v38, %v3146_v58  ;;  %v3020_v48 = vmul.f32 %v2828_v2, %v2828_v2  ;;  %v3084_v31 = vmul.f32 %v2892_v10, %v2892_v10  ;;  %v2829_v34 = vsub.f32 %v11227_v25, %v8587_v20 }
 0x427   : >> { %3465 = vst [vmem:[#allocation2 + $0x18] sm:$0xff] %v3401_v18  ;;  %v3147_v40 = vadd.f32 %v3083_v16, %v3019_v1  ;;  %v3212_v43 = vmul.f32 %v2956_v54, %v2956_v54  ;;  %v2893_v39 = vsub.f32 %v11228_v45, %v8590_v29  ;;  %v2957_v3 = vsub.f32 %v11229_v21, %v8593_v60 }
 0x428   : >> { %v3402_v33 = vmin.f32 %v3338_v17, %v3274_v62  ;;  %v3526_v12 = vmin.f32 %v8621_v53, %v3274_v62  ;;  %v3148_v56 = vadd.f32 %v3084_v31, %v3020_v48  ;;  %v3021_v27 = vmul.f32 %v2829_v34, %v2829_v34  ;;  %v11233_v53 = vld [vmem:[#allocation26_spill] sm:$0xff] }
 0x429   : >> { %v3275_v36 = vadd.f32 %v3211_v11, %v3147_v40  ;;  %v3085_v44 = vmul.f32 %v2893_v39, %v2893_v39  ;;  %v3213_v42 = vmul.f32 %v2957_v3, %v2957_v3  ;;  %v2830_v47 = vsub.f32 %v11230_v63, %v8587_v20  ;;  %v11237_v11 = vld [vmem:[#allocation88_spill] sm:$0xff]  ;;  %v3342_v31 = vld [vmem:[#allocation2 + $0x180] sm:$0xff]  ;;  %v11242_v63 = vld [vmem:[#allocation31_spill] sm:$0xff] }
 0x42a   : >> { %3466 = vst [vmem:[#allocation2 + $0x50] sm:$0xff] %v3402_v33  ;;  %v3276_v50 = vadd.f32 %v3212_v43, %v3148_v56  ;;  %v2894_v0 = vsub.f32 %v11231_v32, %v8590_v29  ;;  %v2958_v41 = vsub.f32 %v11232_v35, %v8593_v60  ;;  %v2831_v9 = vsub.f32 %v11233_v53, %v8587_v20  ;;  %v11239_v3 = vld [vmem:[#allocation28_spill] sm:$0xff]  ;;  %v3344_v32 = vld [vmem:[#allocation2 + $0x118] sm:$0xff] }
 0x42b   : >> { %v3403_v38 = vmin.f32 %v3339_v52, %v3275_v36  ;;  %v3527_v49 = vmin.f32 %v8623_v55, %v3275_v36  ;;  %v3149_v4 = vadd.f32 %v3085_v44, %v3021_v27  ;;  %v3022_v30 = vmul.f32 %v2830_v47, %v2830_v47  ;;  %v11236_v55 = vld [vmem:[#allocation29_spill] sm:$0xff]  ;;  %v11241_v27 = vld [vmem:[#allocation202_spill] sm:$0xff]  ;;  %v3343_v44 = vld [vmem:[#allocation2 + $0x110] sm:$0xff] }
 0x42c   : >> { %v3404_v23 = vmin.f32 %v3340_v46, %v3276_v50  ;;  %v3528_v26 = vmin.f32 %v8630_v8, %v3276_v50  ;;  %v3086_v7 = vmul.f32 %v2894_v0, %v2894_v0  ;;  %v3214_v58 = vmul.f32 %v2958_v41, %v2958_v41  ;;  %v11240_v52 = vld [vmem:[#allocation89_spill] sm:$0xff] }
 0x42d   : >> { %3467 = vst [vmem:[#allocation2 + $0x168] sm:$0xff] %v3403_v38  ;;  %v3277_v1 = vadd.f32 %v3213_v42, %v3149_v4  ;;  %v2895_v2 = vsub.f32 %v11234_v59, %v8590_v29  ;;  %v2959_v10 = vsub.f32 %v11235_v13, %v8593_v60  ;;  %v3023_v18 = vmul.f32 %v2831_v9, %v2831_v9  ;;  %v11243_v9 = vld [vmem:[#allocation90_spill] sm:$0xff]  ;;  %v11244_v4 = vld [vmem:[#allocation185_spill] sm:$0xff] }
 0x42e   : >> { %3468 = vst [vmem:[#allocation2 + $0x130] sm:$0xff] %v3404_v23  ;;  %v3150_v17 = vadd.f32 %v3086_v7, %v3022_v30  ;;  %v2832_v16 = vsub.f32 %v11236_v55, %v8587_v20  ;;  %v2896_v8 = vsub.f32 %v11237_v11, %v8590_v29  ;;  %v2960_v54 = vsub.f32 %v11238_v14, %v8593_v60  ;;  %v3345_v13 = vld [vmem:[#allocation2 + $0x98] sm:$0xff]  ;;  %v11246_v55 = vld [vmem:[#allocation91_spill] sm:$0xff] }
 0x42f   : >> { %v3405_v62 = vmin.f32 %v3341_v22, %v3277_v1  ;;  %v3529_v48 = vmin.f32 %v8636_v28, %v3277_v1  ;;  %v3087_v25 = vmul.f32 %v2895_v2, %v2895_v2  ;;  %v3215_v34 = vmul.f32 %v2959_v10, %v2959_v10  ;;  %v11247_v14 = vld [vmem:[#allocation33_spill] sm:$0xff] }
 0x430   : >> { %v3278_v40 = vadd.f32 %v3214_v58, %v3150_v17  ;;  %v3024_v43 = vmul.f32 %v2832_v16, %v2832_v16  ;;  %v3088_v45 = vmul.f32 %v2896_v8, %v2896_v8  ;;  %v3216_v39 = vmul.f32 %v2960_v54, %v2960_v54  ;;  %v11245_v58 = vld [vmem:[#allocation30_spill] sm:$0xff] }
 0x431   : >> { %3469 = vst [vmem:[#allocation2 + $0x48] sm:$0xff] %v3405_v62  ;;  %v3151_v21 = vadd.f32 %v3087_v25, %v3023_v18  ;;  %v2833_v33 = vsub.f32 %v11239_v3, %v8587_v20  ;;  %v2897_v56 = vsub.f32 %v11240_v52, %v8590_v29  ;;  %v2961_v36 = vsub.f32 %v11241_v27, %v8593_v60  ;;  %v11250_v27 = vld [vmem:[#allocation32_spill] sm:$0xff] }
 0x432   : >> { %v3406_v46 = vmin.f32 %v3342_v31, %v3278_v40  ;;  %v8683_v28 = vmin.f32 %v3526_v12, %v3278_v40  ;;  %v3152_v42 = vadd.f32 %v3088_v45, %v3024_v43  ;;  %v2834_v47 = vsub.f32 %v11242_v63, %v8587_v20  ;;  %v11249_v31 = vld [vmem:[#allocation203_spill] sm:$0xff]  ;;  %v3346_v43 = vld [vmem:[#allocation2 + $0x120] sm:$0xff] }
 0x433   : >> { %v3279_v50 = vadd.f32 %v3215_v34, %v3151_v21  ;;  %v3025_v0 = vmul.f32 %v2833_v33, %v2833_v33  ;;  %v3089_v35 = vmul.f32 %v2897_v56, %v2897_v56  ;;  %v3217_v41 = vmul.f32 %v2961_v36, %v2961_v36 }
 0x434   : >> { %3470 = vst [vmem:[#allocation2 + $0x180] sm:$0xff] %v3406_v46  ;;  %v3280_v53 = vadd.f32 %v3216_v39, %v3152_v42  ;;  %v2898_v38 = vsub.f32 %v11243_v9, %v8590_v29  ;;  %v2962_v30 = vsub.f32 %v11244_v4, %v8593_v60  ;;  %v3026_v12 = vmul.f32 %v2834_v47, %v2834_v47  ;;  %v11251_v46 = vld [vmem:[#allocation93_spill] sm:$0xff]  ;;  %v3347_v47 = vld [vmem:[#allocation2 + $0x150] sm:$0xff] }
 0x435   : >> { %v3407_v23 = vmin.f32 %v3343_v44, %v3279_v50  ;;  %v8691_v22 = vmin.f32 %v3527_v49, %v3279_v50  ;;  %v3153_v7 = vadd.f32 %v3089_v35, %v3025_v0  ;;  %v2835_v1 = vsub.f32 %v11245_v58, %v8587_v20 }
 0x436   : >> { %v3408_v59 = vmin.f32 %v3344_v32, %v3280_v53  ;;  %v8695_v2 = vmin.f32 %v3528_v26, %v3280_v53  ;;  %v3090_v10 = vmul.f32 %v2898_v38, %v2898_v38  ;;  %v3218_v18 = vmul.f32 %v2962_v30, %v2962_v30  ;;  %v11248_v26 = vld [vmem:[#allocation92_spill] sm:$0xff]  ;;  %v11252_v32 = vld [vmem:[#allocation35_spill] sm:$0xff]  ;;  %v11253_v30 = vld [vmem:[#allocation94_spill] sm:$0xff] }
 0x437   : >> { %3471 = vst [vmem:[#allocation2 + $0x110] sm:$0xff] %v3407_v23  ;;  %v3281_v17 = vadd.f32 %v3217_v41, %v3153_v7  ;;  %v2899_v16 = vsub.f32 %v11246_v55, %v8590_v29  ;;  %v2963_v11 = vsub.f32 %v7353_v51, %v8593_v60  ;;  %v3027_v49 = vmul.f32 %v2835_v1, %v2835_v1  ;;  %v3348_v41 = vld [vmem:[#allocation2 + $0x108] sm:$0xff] }
 0x438   : >> { %3472 = vst [vmem:[#allocation2 + $0x118] sm:$0xff] %v3408_v59  ;;  %v3154_v8 = vadd.f32 %v3090_v10, %v3026_v12  ;;  %v2836_v54 = vsub.f32 %v11247_v14, %v8587_v20  ;;  %v2900_v62 = vsub.f32 %v11248_v26, %v8590_v29  ;;  %v2964_v25 = vsub.f32 %v11249_v31, %v8593_v60  ;;  %v11254_v59 = vld [vmem:[#allocation34_spill] sm:$0xff]  ;;  %v11256_v26 = vld [vmem:[#allocation37_spill] sm:$0xff]  ;;  %v11257_v31 = vld [vmem:[#allocation96_spill] sm:$0xff] }
 0x439   : >> { %v3409_v34 = vmin.f32 %v3345_v13, %v3281_v17  ;;  %v8707_v40 = vmin.f32 %v3529_v48, %v3281_v17  ;;  %v3091_v45 = vmul.f32 %v2899_v16, %v2899_v16  ;;  %v3219_v39 = vmul.f32 %v2963_v11, %v2963_v11  ;;  %v3349_v17 = vld [vmem:[#allocation2 + $0x60] sm:$0xff] }
 0x43a   : >> { %v3282_v21 = vadd.f32 %v3218_v18, %v3154_v8  ;;  %v3028_v3 = vmul.f32 %v2836_v54, %v2836_v54  ;;  %v3092_v33 = vmul.f32 %v2900_v62, %v2900_v62  ;;  %v3220_v52 = vmul.f32 %v2964_v25, %v2964_v25 }
 0x43b   : >> { %3473 = vst [vmem:[#allocation2 + $0x98] sm:$0xff] %v3409_v34  ;;  %v3155_v56 = vadd.f32 %v3091_v45, %v3027_v49  ;;  %v2837_v36 = vsub.f32 %v11250_v27, %v8587_v20  ;;  %v2901_v44 = vsub.f32 %v11251_v46, %v8590_v29  ;;  %v2965_v42 = vsub.f32 %v7373_v24, %v8593_v60  ;;  %v11255_v49 = vld [vmem:[#allocation95_spill] sm:$0xff]  ;;  %v3350_v45 = vld [vmem:[#allocation2 + $0xe0] sm:$0xff] }
 0x43c   : >> { %v3410_v48 = vmin.f32 %v3346_v43, %v3282_v21  ;;  %v3534_v63 = vmin.f32 %v8683_v28, %v3282_v21  ;;  %v3156_v50 = vadd.f32 %v3092_v33, %v3028_v3  ;;  %v2838_v0 = vsub.f32 %v11252_v32, %v8587_v20 }
 0x43d   : >> { %v3283_v35 = vadd.f32 %v3219_v39, %v3155_v56  ;;  %v3029_v53 = vmul.f32 %v2837_v36, %v2837_v36  ;;  %v3093_v9 = vmul.f32 %v2901_v44, %v2901_v44  ;;  %v3221_v38 = vmul.f32 %v2965_v42, %v2965_v42  ;;  %v11258_v36 = vld [vmem:[#allocation36_spill] sm:$0xff]  ;;  %v11259_v44 = vld [vmem:[#allocation97_spill] sm:$0xff] }
 0x43e   : >> { %3474 = vst [vmem:[#allocation2 + $0x120] sm:$0xff] %v3410_v48  ;;  %v3284_v4 = vadd.f32 %v3220_v52, %v3156_v50  ;;  %v2902_v12 = vsub.f32 %v11253_v30, %v8590_v29  ;;  %v2966_v23 = vsub.f32 %v7355_v5, %v8593_v60  ;;  %v3030_v7 = vmul.f32 %v2838_v0, %v2838_v0  ;;  %v3351_v50 = vld [vmem:[#allocation2 + $0x188] sm:$0xff] }
 0x43f   : >> { %v3411_v28 = vmin.f32 %v3347_v47, %v3283_v35  ;;  %v3535_v58 = vmin.f32 %v8691_v22, %v3283_v35  ;;  %v3157_v1 = vadd.f32 %v3093_v9, %v3029_v53  ;;  %v2839_v13 = vsub.f32 %v11254_v59, %v8587_v20  ;;  %v11260_v0 = vld [vmem:[#allocation39_spill] sm:$0xff]  ;;  %v3352_v53 = vld [vmem:[#allocation2 + $0x138] sm:$0xff] }
 0x440   : >> { %v3412_v10 = vmin.f32 %v3348_v41, %v3284_v4  ;;  %v3536_v18 = vmin.f32 %v8695_v2, %v3284_v4  ;;  %v3094_v55 = vmul.f32 %v2902_v12, %v2902_v12  ;;  %v3222_v16 = vmul.f32 %v2966_v23, %v2966_v23  ;;  %v11261_v12 = vld [vmem:[#allocation98_spill] sm:$0xff]  ;;  %v3604_v51 = vld [vmem:[#allocation2 + $0x118] sm:$0xff] (%p2810_p6) }
 0x441   : >> { %3475 = vst [vmem:[#allocation2 + $0x150] sm:$0xff] %v3411_v28  ;;  %v3285_v11 = vadd.f32 %v3221_v38, %v3157_v1  ;;  %v2903_v8 = vsub.f32 %v11255_v49, %v8590_v29  ;;  %v2967_v14 = vsub.f32 %v7393_v6, %v8593_v60  ;;  %v3031_v54 = vmul.f32 %v2839_v13, %v2839_v13  ;;  %v11262_v13 = vld [vmem:[#allocation38_spill] sm:$0xff] }
 0x442   : >> { %3476 = vst [vmem:[#allocation2 + $0x108] sm:$0xff] %v3412_v10  ;;  %v3158_v22 = vadd.f32 %v3094_v55, %v3030_v7  ;;  %v2840_v62 = vsub.f32 %v11256_v26, %v8587_v20  ;;  %v2904_v2 = vsub.f32 %v11257_v31, %v8590_v29  ;;  %v2968_v25 = vsub.f32 %v7375_v37, %v8593_v60 }
 0x443   : >> { %v3413_v34 = vmin.f32 %v3349_v17, %v3285_v11  ;;  %v3537_v43 = vmin.f32 %v8707_v40, %v3285_v11  ;;  %v3095_v39 = vmul.f32 %v2903_v8, %v2903_v8  ;;  %v3223_v21 = vmul.f32 %v2967_v14, %v2967_v14  ;;  %v11263_v14 = vld [vmem:[#allocation99_spill] sm:$0xff] }
 0x444   : >> { %v3286_v3 = vadd.f32 %v3222_v16, %v3158_v22  ;;  %v3032_v33 = vmul.f32 %v2840_v62, %v2840_v62  ;;  %v3096_v52 = vmul.f32 %v2904_v2, %v2904_v2  ;;  %v3224_v56 = vmul.f32 %v2968_v25, %v2968_v25  ;;  %v3353_v16 = vld [vmem:[#allocation2 + $0x140] sm:$0xff]  ;;  %v11264_v62 = vld [vmem:[#allocation41_spill] sm:$0xff] }
 0x445   : >> { %3477 = vst [vmem:[#allocation2 + $0x60] sm:$0xff] %v3413_v34  ;;  %v3159_v27 = vadd.f32 %v3095_v39, %v3031_v54  ;;  %v2841_v46 = vsub.f32 %v11258_v36, %v8587_v20  ;;  %v2905_v42 = vsub.f32 %v11259_v44, %v8590_v29  ;;  %v2969_v48 = vsub.f32 %v7413_v61, %v8593_v60  ;;  %v3354_v39 = vld [vmem:[#allocation2 + $0x80] sm:$0xff] }
 0x446   : >> { %v3414_v47 = vmin.f32 %v3350_v45, %v3286_v3  ;;  %v8743_v40 = vmin.f32 %v3534_v63, %v3286_v3  ;;  %v3160_v32 = vadd.f32 %v3096_v52, %v3032_v33  ;;  %v2842_v35 = vsub.f32 %v11260_v0, %v8587_v20  ;;  %v3355_v0 = vld [vmem:[#allocation2 + $0x1a8] sm:$0xff]  ;;  %v3606_v24 = vld [vmem:[#allocation2 + $0x120] sm:$0xff] (%p2810_p6) }
 0x447   : >> { %v3287_v41 = vadd.f32 %v3223_v21, %v3159_v27  ;;  %v3033_v9 = vmul.f32 %v2841_v46, %v2841_v46  ;;  %v3097_v38 = vmul.f32 %v2905_v42, %v2905_v42  ;;  %v3225_v4 = vmul.f32 %v2969_v48, %v2969_v48  ;;  %v11266_v46 = vld [vmem:[#allocation40_spill] sm:$0xff]  ;;  %v11267_v42 = vld [vmem:[#allocation101_spill] sm:$0xff] }
 0x448   : >> { %3478 = vst [vmem:[#allocation2 + $0xe0] sm:$0xff] %v3414_v47  ;;  %v3288_v30 = vadd.f32 %v3224_v56, %v3160_v32  ;;  %v2906_v23 = vsub.f32 %v11261_v12, %v8590_v29  ;;  %v2970_v7 = vsub.f32 %v7395_v57, %v8593_v60  ;;  %v3034_v63 = vmul.f32 %v2842_v35, %v2842_v35  ;;  %v11268_v47 = vld [vmem:[#allocation214_spill] sm:$0xff]  ;;  %v3607_v5 = vld [vmem:[#allocation2 + $0x150] sm:$0xff] (%p2810_p6) }
 0x449   : >> { %v3415_v28 = vmin.f32 %v3351_v50, %v3287_v41  ;;  %v8751_v1 = vmin.f32 %v3535_v58, %v3287_v41  ;;  %v3161_v59 = vadd.f32 %v3097_v38, %v3033_v9  ;;  %v2843_v10 = vsub.f32 %v11262_v13, %v8587_v20  ;;  %v11269_v41 = vld [vmem:[#allocation43_spill] sm:$0xff]  ;;  %v3356_v38 = vld [vmem:[#allocation2 + $0x1b8] sm:$0xff] }
 0x44a   : >> { %v3416_v17 = vmin.f32 %v3352_v53, %v3288_v30  ;;  %v8755_v55 = vmin.f32 %v3536_v18, %v3288_v30  ;;  %v3098_v11 = vmul.f32 %v2906_v23, %v2906_v23  ;;  %v3226_v49 = vmul.f32 %v2970_v7, %v2970_v7  ;;  %v11265_v18 = vld [vmem:[#allocation100_spill] sm:$0xff]  ;;  %v11270_v7 = vld [vmem:[#allocation102_spill] sm:$0xff]  ;;  %v3608_v6 = vld [vmem:[#allocation2 + $0x108] sm:$0xff] (%p2810_p6) }
 0x44b   : >> { %3479 = vst [vmem:[#allocation2 + $0x188] sm:$0xff] %v3415_v28  ;;  %v3289_v8 = vadd.f32 %v3225_v4, %v3161_v59  ;;  %v2907_v54 = vsub.f32 %v11263_v14, %v8590_v29  ;;  %v2971_v22 = vsub.f32 %v7433_v15, %v8593_v60  ;;  %v3035_v58 = vmul.f32 %v2843_v10, %v2843_v10  ;;  %v11271_v28 = vld [vmem:[#allocation213_spill] sm:$0xff]  ;;  %v3357_v14 = vld [vmem:[#allocation2 + $0x28] sm:$0xff] }
 0x44c   : >> { %3480 = vst [vmem:[#allocation2 + $0x138] sm:$0xff] %v3416_v17  ;;  %v3162_v26 = vadd.f32 %v3098_v11, %v3034_v63  ;;  %v2844_v31 = vsub.f32 %v11264_v62, %v8587_v20  ;;  %v2908_v2 = vsub.f32 %v11265_v18, %v8590_v29  ;;  %v2972_v25 = vsub.f32 %v7415_v19, %v8593_v60  ;;  %v3605_v19 = vld [vmem:[#allocation2 + $0x98] sm:$0xff] (%p2810_p6)  ;;  %v3609_v37 = vld [vmem:[#allocation2 + $0x60] sm:$0xff] (%p2810_p6) }
 0x44d   : >> { %v3417_v34 = vmin.f32 %v3353_v16, %v3289_v8  ;;  %v8767_v45 = vmin.f32 %v3537_v43, %v3289_v8  ;;  %v3099_v21 = vmul.f32 %v2907_v54, %v2907_v54  ;;  %v3227_v3 = vmul.f32 %v2971_v22, %v2971_v22  ;;  %v11272_v16 = vld [vmem:[#allocation42_spill] sm:$0xff] }
 0x44e   : >> { %v3290_v33 = vadd.f32 %v3226_v49, %v3162_v26  ;;  %v3036_v52 = vmul.f32 %v2844_v31, %v2844_v31  ;;  %v3100_v56 = vmul.f32 %v2908_v2, %v2908_v2  ;;  %v3228_v27 = vmul.f32 %v2972_v25, %v2972_v25  ;;  %v11273_v26 = vld [vmem:[#allocation103_spill] sm:$0xff]  ;;  %v11274_v31 = vld [vmem:[#allocation216_spill] sm:$0xff]  ;;  %v11275_v25 = vld [vmem:[#allocation45_spill] sm:$0xff] }
 0x44f   : >> { %3481 = vst [vmem:[#allocation2 + $0x140] sm:$0xff] %v3417_v34  ;;  %v3163_v36 = vadd.f32 %v3099_v21, %v3035_v58  ;;  %v2845_v44 = vsub.f32 %v11266_v46, %v8587_v20  ;;  %v2909_v48 = vsub.f32 %v11267_v42, %v8590_v29  ;;  %v2973_v50 = vsub.f32 %v11268_v47, %v8593_v60  ;;  %v11277_v21 = vld [vmem:[#allocation215_spill] sm:$0xff]  ;;  %v3610_v61 = vld [vmem:[#allocation2 + $0xe0] sm:$0xff] (%p2810_p6) }
 0x450   : >> { %v3418_v43 = vmin.f32 %v3354_v39, %v3290_v33  ;;  %v3542_v32 = vmin.f32 %v8743_v40, %v3290_v33  ;;  %v3164_v35 = vadd.f32 %v3100_v56, %v3036_v52  ;;  %v2846_v53 = vsub.f32 %v11269_v41, %v8587_v20  ;;  %v11276_v39 = vld [vmem:[#allocation104_spill] sm:$0xff]  ;;  %v3358_v56 = vld [vmem:[#allocation2 + $0x1e8] sm:$0xff]  ;;  %v11280_v41 = vld [vmem:[#allocation218_spill] sm:$0xff] }
 0x451   : >> { %v3291_v9 = vadd.f32 %v3227_v3, %v3163_v36  ;;  %v3037_v4 = vmul.f32 %v2845_v44, %v2845_v44  ;;  %v3101_v30 = vmul.f32 %v2909_v48, %v2909_v48  ;;  %v3229_v12 = vmul.f32 %v2973_v50, %v2973_v50  ;;  %v11278_v50 = vld [vmem:[#allocation44_spill] sm:$0xff] }
 0x452   : >> { %3482 = vst [vmem:[#allocation2 + $0x80] sm:$0xff] %v3418_v43  ;;  %v3292_v23 = vadd.f32 %v3228_v27, %v3164_v35  ;;  %v2910_v63 = vsub.f32 %v11270_v7, %v8590_v29  ;;  %v2974_v59 = vsub.f32 %v11271_v28, %v8593_v60  ;;  %v3038_v13 = vmul.f32 %v2846_v53, %v2846_v53  ;;  %v3360_v7 = vld [vmem:[#allocation2 + $0x160] sm:$0xff]  ;;  %v3611_v57 = vld [vmem:[#allocation2 + $0x188] sm:$0xff] (%p2810_p6) }
 0x453   : >> { %v3419_v40 = vmin.f32 %v3355_v0, %v3291_v9  ;;  %v3543_v10 = vmin.f32 %v8751_v1, %v3291_v9  ;;  %v3165_v17 = vadd.f32 %v3101_v30, %v3037_v4  ;;  %v2847_v11 = vsub.f32 %v11272_v16, %v8587_v20  ;;  %v11279_v0 = vld [vmem:[#allocation105_spill] sm:$0xff]  ;;  %v11281_v30 = vld [vmem:[#allocation47_spill] sm:$0xff] }
 0x454   : >> { %v3420_v49 = vmin.f32 %v3356_v38, %v3292_v23  ;;  %v3544_v8 = vmin.f32 %v8755_v55, %v3292_v23  ;;  %v3102_v54 = vmul.f32 %v2910_v63, %v2910_v63  ;;  %v3230_v22 = vmul.f32 %v2974_v59, %v2974_v59  ;;  %v3359_v38 = vld [vmem:[#allocation2 + $0xf8] sm:$0xff] }
 0x455   : >> { %3483 = vst [vmem:[#allocation2 + $0x1a8] sm:$0xff] %v3419_v40  ;;  %v3293_v58 = vadd.f32 %v3229_v12, %v3165_v17  ;;  %v2911_v62 = vsub.f32 %v11273_v26, %v8590_v29  ;;  %v2975_v18 = vsub.f32 %v11274_v31, %v8593_v60  ;;  %v3039_v2 = vmul.f32 %v2847_v11, %v2847_v11  ;;  %v11282_v40 = vld [vmem:[#allocation106_spill] sm:$0xff]  ;;  %v11283_v16 = vld [vmem:[#allocation217_spill] sm:$0xff]  ;;  %v3361_v31 = vld [vmem:[#allocation2 + $0x30] sm:$0xff] }
 0x456   : >> { %3484 = vst [vmem:[#allocation2 + $0x1b8] sm:$0xff] %v3420_v49  ;;  %v3166_v1 = vadd.f32 %v3102_v54, %v3038_v13  ;;  %v2848_v34 = vsub.f32 %v11275_v25, %v8587_v20  ;;  %v2912_v55 = vsub.f32 %v11276_v39, %v8590_v29  ;;  %v2976_v3 = vsub.f32 %v11277_v21, %v8593_v60  ;;  %v11285_v25 = vld [vmem:[#allocation107_spill] sm:$0xff]  ;;  %v11286_v39 = vld [vmem:[#allocation220_spill] sm:$0xff]  ;;  %v3613_v15 = vld [vmem:[#allocation2 + $0x140] sm:$0xff] (%p2810_p6) }
 0x457   : >> { %v3421_v33 = vmin.f32 %v3357_v14, %v3293_v58  ;;  %v3545_v52 = vmin.f32 %v8767_v45, %v3293_v58  ;;  %v3103_v27 = vmul.f32 %v2911_v62, %v2911_v62  ;;  %v3231_v36 = vmul.f32 %v2975_v18, %v2975_v18 }
 0x458   : >> { %v3294_v46 = vadd.f32 %v3230_v22, %v3166_v1  ;;  %v3040_v44 = vmul.f32 %v2848_v34, %v2848_v34  ;;  %v3104_v42 = vmul.f32 %v2912_v55, %v2912_v55  ;;  %v3232_v48 = vmul.f32 %v2976_v3, %v2976_v3  ;;  %v11284_v22 = vld [vmem:[#allocation46_spill] sm:$0xff]  ;;  %v11287_v3 = vld [vmem:[#allocation49_spill] sm:$0xff] }
 0x459   : >> { %3485 = vst [vmem:[#allocation2 + $0x28] sm:$0xff] %v3421_v33  ;;  %v3167_v47 = vadd.f32 %v3103_v27, %v3039_v2  ;;  %v2849_v43 = vsub.f32 %v11278_v50, %v8587_v20  ;;  %v2913_v35 = vsub.f32 %v11279_v0, %v8590_v29  ;;  %v2977_v53 = vsub.f32 %v11280_v41, %v8593_v60  ;;  %v11289_v27 = vld [vmem:[#allocation219_spill] sm:$0xff] }
 0x45a   : >> { %v3422_v9 = vmin.f32 %v3358_v56, %v3294_v46  ;;  %v8803_v45 = vmin.f32 %v3542_v32, %v3294_v46  ;;  %v3168_v4 = vadd.f32 %v3104_v42, %v3040_v44  ;;  %v2850_v12 = vsub.f32 %v11281_v30, %v8587_v20  ;;  %v3362_v42 = vld [vmem:[#allocation2 + $0x1e0] sm:$0xff] }
 0x45b   : >> { %v3295_v23 = vadd.f32 %v3231_v36, %v3167_v47  ;;  %v3041_v63 = vmul.f32 %v2849_v43, %v2849_v43  ;;  %v3105_v28 = vmul.f32 %v2913_v35, %v2913_v35  ;;  %v3233_v59 = vmul.f32 %v2977_v53, %v2977_v53  ;;  %v11290_v53 = vld [vmem:[#allocation48_spill] sm:$0xff]  ;;  %v11292_v30 = vld [vmem:[#allocation222_spill] sm:$0xff] }
 0x45c   : >> { %3486 = vst [vmem:[#allocation2 + $0x1e8] sm:$0xff] %v3422_v9  ;;  %v3296_v13 = vadd.f32 %v3232_v48, %v3168_v4  ;;  %v2914_v17 = vsub.f32 %v11282_v40, %v8590_v29  ;;  %v2978_v11 = vsub.f32 %v11283_v16, %v8593_v60  ;;  %v3042_v32 = vmul.f32 %v2850_v12, %v2850_v12  ;;  %v3364_v40 = vld [vmem:[#allocation2 + $0xf0] sm:$0xff] }
 0x45d   : >> { %v3423_v49 = vmin.f32 %v3359_v38, %v3295_v23  ;;  %v8811_v14 = vmin.f32 %v3543_v10, %v3295_v23  ;;  %v3169_v54 = vadd.f32 %v3105_v28, %v3041_v63  ;;  %v2851_v58 = vsub.f32 %v11284_v22, %v8587_v20  ;;  %v11291_v38 = vld [vmem:[#allocation109_spill] sm:$0xff]  ;;  %v11293_v28 = vld [vmem:[#allocation51_spill] sm:$0xff] }
 0x45e   : >> { %v3424_v26 = vmin.f32 %v3360_v7, %v3296_v13  ;;  %v8815_v62 = vmin.f32 %v3544_v8, %v3296_v13  ;;  %v3106_v18 = vmul.f32 %v2914_v17, %v2914_v17  ;;  %v3234_v2 = vmul.f32 %v2978_v11, %v2978_v11  ;;  %v11288_v8 = vld [vmem:[#allocation108_spill] sm:$0xff]  ;;  %v3363_v7 = vld [vmem:[#allocation2] sm:$0xff]  ;;  %v11295_v22 = vld [vmem:[#allocation221_spill] sm:$0xff] }
 0x45f   : >> { %3487 = vst [vmem:[#allocation2 + $0xf8] sm:$0xff] %v3423_v49  ;;  %v3297_v1 = vadd.f32 %v3233_v59, %v3169_v54  ;;  %v2915_v34 = vsub.f32 %v11285_v25, %v8590_v29  ;;  %v2979_v55 = vsub.f32 %v11286_v39, %v8593_v60  ;;  %v3043_v10 = vmul.f32 %v2851_v58, %v2851_v58  ;;  %v11294_v49 = vld [vmem:[#allocation110_spill] sm:$0xff]  ;;  %v3365_v39 = vld [vmem:[#allocation2 + $0x8] sm:$0xff] }
 0x460   : >> { %3488 = vst [vmem:[#allocation2 + $0x160] sm:$0xff] %v3424_v26  ;;  %v3170_v21 = vadd.f32 %v3106_v18, %v3042_v32  ;;  %v2852_v33 = vsub.f32 %v11287_v3, %v8587_v20  ;;  %v2916_v56 = vsub.f32 %v11288_v8, %v8590_v29  ;;  %v2980_v36 = vsub.f32 %v11289_v27, %v8593_v60  ;;  %v11297_v3 = vld [vmem:[#allocation111_spill] sm:$0xff]  ;;  %v11298_v8 = vld [vmem:[#allocation224_spill] sm:$0xff] }
 0x461   : >> { %v3425_v46 = vmin.f32 %v3361_v31, %v3297_v1  ;;  %v8827_v44 = vmin.f32 %v3545_v52, %v3297_v1  ;;  %v3107_v48 = vmul.f32 %v2915_v34, %v2915_v34  ;;  %v3235_v47 = vmul.f32 %v2979_v55, %v2979_v55 }
 0x462   : >> { %v3298_v50 = vadd.f32 %v3234_v2, %v3170_v21  ;;  %v3044_v43 = vmul.f32 %v2852_v33, %v2852_v33  ;;  %v3108_v0 = vmul.f32 %v2916_v56, %v2916_v56  ;;  %v3236_v35 = vmul.f32 %v2980_v36, %v2980_v36  ;;  %v11296_v2 = vld [vmem:[#allocation50_spill] sm:$0xff] }
 0x463   : >> { %3489 = vst [vmem:[#allocation2 + $0x30] sm:$0xff] %v3425_v46  ;;  %v3171_v41 = vadd.f32 %v3107_v48, %v3043_v10  ;;  %v2853_v9 = vsub.f32 %v11290_v53, %v8587_v20  ;;  %v2917_v4 = vsub.f32 %v11291_v38, %v8590_v29  ;;  %v2981_v12 = vsub.f32 %v11292_v30, %v8593_v60  ;;  %v11299_v46 = vld [vmem:[#allocation53_spill] sm:$0xff]  ;;  %v11300_v48 = vld [vmem:[#allocation112_spill] sm:$0xff] }
 0x464   : >> { %v3426_v52 = vmin.f32 %v3362_v42, %v3298_v50  ;;  %v3550_v23 = vmin.f32 %v8803_v45, %v3298_v50  ;;  %v3172_v63 = vadd.f32 %v3108_v0, %v3044_v43  ;;  %v2854_v59 = vsub.f32 %v11293_v28, %v8587_v20  ;;  %v11301_v50 = vld [vmem:[#allocation223_spill] sm:$0xff]  ;;  %v11303_v28 = vld [vmem:[#allocation113_spill] sm:$0xff] }
 0x465   : >> { %v8838_v13 = vadd.f32 %v3235_v47, %v3171_v41  ;;  %v3045_v17 = vmul.f32 %v2853_v9, %v2853_v9  ;;  %v3109_v16 = vmul.f32 %v2917_v4, %v2917_v4  ;;  %v3237_v11 = vmul.f32 %v2981_v12, %v2981_v12  ;;  %v3366_v41 = vld [vmem:[#allocation2 + $0x148] sm:$0xff] }
 0x466   : >> { %3490 = vst [vmem:[#allocation2 + $0x1e0] sm:$0xff] %v3426_v52  ;;  %v8840_v32 = vadd.f32 %v3236_v35, %v3172_v63  ;;  %v2918_v54 = vsub.f32 %v11294_v49, %v8590_v29  ;;  %v2982_v45 = vsub.f32 %v11295_v22, %v8593_v60  ;;  %v3046_v58 = vmul.f32 %v2854_v59, %v2854_v59  ;;  %v3367_v49 = vld [vmem:[#allocation2 + $0x1d0] sm:$0xff]  ;;  %v11305_v22 = vld [vmem:[#allocation55_spill] sm:$0xff] }
 0x467   : >> { %v3427_v26 = vmin.f32 %v3363_v7, %v8838_v13  ;;  %v3551_v31 = vmin.f32 %v8811_v14, %v8838_v13  ;;  %v3173_v18 = vadd.f32 %v3109_v16, %v3045_v17  ;;  %v2855_v1 = vsub.f32 %v11296_v2, %v8587_v20  ;;  %v11302_v7 = vld [vmem:[#allocation52_spill] sm:$0xff]  ;;  %v11316_v14 = vld [vmem:[#allocation230_spill] sm:$0xff] }
 0x468   : >> { %v3428_v25 = vmin.f32 %v3364_v40, %v8840_v32  ;;  %v3552_v34 = vmin.f32 %v8815_v62, %v8840_v32  ;;  %v3110_v55 = vmul.f32 %v2918_v54, %v2918_v54  ;;  %v3238_v10 = vmul.f32 %v2982_v45, %v2982_v45  ;;  %v11304_v40 = vld [vmem:[#allocation226_spill] sm:$0xff] }
 0x469   : >> { %3491 = vst [vmem:[#allocation2] sm:$0xff] %v3427_v26  ;;  %v8854_v21 = vadd.f32 %v3237_v11, %v3173_v18  ;;  %v2919_v33 = vsub.f32 %v11297_v3, %v8590_v29  ;;  %v2983_v56 = vsub.f32 %v11298_v8, %v8593_v60  ;;  %v3047_v27 = vmul.f32 %v2855_v1, %v2855_v1  ;;  %v3368_v26 = vld [vmem:[#allocation2 + $0x100] sm:$0xff] }
 0x46a   : >> { %3492 = vst [vmem:[#allocation2 + $0xf0] sm:$0xff] %v3428_v25  ;;  %v3174_v36 = vadd.f32 %v3110_v55, %v3046_v58  ;;  %v2856_v42 = vsub.f32 %v11299_v46, %v8587_v20  ;;  %v2920_v47 = vsub.f32 %v11300_v48, %v8590_v29  ;;  %v2984_v43 = vsub.f32 %v11301_v50, %v8593_v60  ;;  %v3369_v46 = vld [vmem:[#allocation2 + $0xc8] sm:$0xff]  ;;  %v11318_v62 = vld [vmem:[#allocation118_spill] sm:$0xff] }
 0x46b   : >> { %v3429_v0 = vmin.f32 %v3365_v39, %v8854_v21  ;;  %v3553_v35 = vmin.f32 %v8827_v44, %v8854_v21  ;;  %v3111_v53 = vmul.f32 %v2919_v33, %v2919_v33  ;;  %v3239_v9 = vmul.f32 %v2983_v56, %v2983_v56  ;;  %v11306_v39 = vld [vmem:[#allocation114_spill] sm:$0xff]  ;;  %v11309_v50 = vld [vmem:[#allocation115_spill] sm:$0xff] }
 0x46c   : >> { %v3302_v38 = vadd.f32 %v3238_v10, %v3174_v36  ;;  %v3048_v4 = vmul.f32 %v2856_v42, %v2856_v42  ;;  %v3112_v30 = vmul.f32 %v2920_v47, %v2920_v47  ;;  %v3240_v12 = vmul.f32 %v2984_v43, %v2984_v43  ;;  %v11307_v10 = vld [vmem:[#allocation225_spill] sm:$0xff]  ;;  %v11308_v56 = vld [vmem:[#allocation54_spill] sm:$0xff]  ;;  %v11321_v44 = vld [vmem:[#allocation119_spill] sm:$0xff] }
 0x46d   : >> { %3493 = vst [vmem:[#allocation2 + $0x8] sm:$0xff] %v3429_v0  ;;  %v3175_v52 = vadd.f32 %v3111_v53, %v3047_v27  ;;  %v2857_v63 = vsub.f32 %v11302_v7, %v8587_v20  ;;  %v2921_v59 = vsub.f32 %v11303_v28, %v8590_v29  ;;  %v2985_v17 = vsub.f32 %v11304_v40, %v8593_v60  ;;  %v11310_v0 = vld [vmem:[#allocation228_spill] sm:$0xff] }
 0x46e   : >> { %v3430_v16 = vmin.f32 %v3366_v41, %v3302_v38  ;;  %v8875_v11 = vmin.f32 %v3550_v23, %v3302_v38  ;;  %v3176_v54 = vadd.f32 %v3112_v30, %v3048_v4  ;;  %v2858_v45 = vsub.f32 %v11305_v22, %v8587_v20  ;;  %v11311_v38 = vld [vmem:[#allocation57_spill] sm:$0xff]  ;;  %v11312_v30 = vld [vmem:[#allocation116_spill] sm:$0xff] }
 0x46f   : >> { %v3303_v58 = vadd.f32 %v3239_v9, %v3175_v52  ;;  %v3049_v18 = vmul.f32 %v2857_v63, %v2857_v63  ;;  %v3113_v2 = vmul.f32 %v2921_v59, %v2921_v59  ;;  %v3241_v1 = vmul.f32 %v2985_v17, %v2985_v17  ;;  %v11313_v52 = vld [vmem:[#allocation227_spill] sm:$0xff]  ;;  %v3370_v59 = vld [vmem:[#allocation2 + $0x40] sm:$0xff] }
 0x470   : >> { %3494 = vst [vmem:[#allocation2 + $0x148] sm:$0xff] %v3430_v16  ;;  %v3304_v25 = vadd.f32 %v3240_v12, %v3176_v54  ;;  %v2922_v55 = vsub.f32 %v11306_v39, %v8590_v29  ;;  %v2986_v3 = vsub.f32 %v11307_v10, %v8593_v60  ;;  %v3050_v23 = vmul.f32 %v2858_v45, %v2858_v45  ;;  %v3371_v39 = vld [vmem:[#allocation2 + $0x1f8] sm:$0xff]  ;;  %v11317_v10 = vld [vmem:[#allocation59_spill] sm:$0xff] }
 0x471   : >> { %v3431_v33 = vmin.f32 %v3367_v49, %v3303_v58  ;;  %v3177_v8 = vadd.f32 %v3113_v2, %v3049_v18  ;;  %v2859_v27 = vsub.f32 %v11308_v56, %v8587_v20  ;;  %v2923_v43 = vsub.f32 %v11309_v50, %v8590_v29  ;;  %v11315_v2 = vld [vmem:[#allocation117_spill] sm:$0xff] }
 0x472   : >> { %v3432_v36 = vmin.f32 %v3368_v26, %v3304_v25  ;;  %v3114_v42 = vmul.f32 %v2922_v55, %v2922_v55  ;;  %v3242_v48 = vmul.f32 %v2986_v3, %v2986_v3  ;;  %v2987_v41 = vsub.f32 %v11310_v0, %v8593_v60  ;;  %v11314_v26 = vld [vmem:[#allocation56_spill] sm:$0xff] }
 0x473   : >> { %3495 = vst [vmem:[#allocation2 + $0x1d0] sm:$0xff] %v3431_v33  ;;  %v3305_v47 = vadd.f32 %v3241_v1, %v3177_v8  ;;  %v3051_v53 = vmul.f32 %v2859_v27, %v2859_v27  ;;  %v2860_v4 = vsub.f32 %v11311_v38, %v8587_v20  ;;  %v2924_v12 = vsub.f32 %v11312_v30, %v8590_v29  ;;  %v3372_v33 = vld [vmem:[#allocation2 + $0x20] sm:$0xff] }
 0x474   : >> { %3496 = vst [vmem:[#allocation2 + $0x100] sm:$0xff] %v3432_v36  ;;  %v3178_v9 = vadd.f32 %v3114_v42, %v3050_v23  ;;  %v2988_v7 = vsub.f32 %v11313_v52, %v8593_v60  ;;  %v8898_v63 = vmin.f32 %v3551_v31, %v3303_v58  ;;  %v3115_v40 = vmul.f32 %v2923_v43, %v2923_v43  ;;  %v11320_v43 = vld [vmem:[#allocation58_spill] sm:$0xff] }
 0x475   : >> { %v3433_v28 = vmin.f32 %v3369_v46, %v3305_v47  ;;  %v3243_v17 = vmul.f32 %v2987_v41, %v2987_v41  ;;  %v3052_v49 = vmul.f32 %v2860_v4, %v2860_v4  ;;  %v3116_v54 = vmul.f32 %v2924_v12, %v2924_v12 }
 0x476   : >> { %v8900_v16 = vadd.f32 %v3242_v48, %v3178_v9  ;;  %v3244_v22 = vmul.f32 %v2988_v7, %v2988_v7  ;;  %v3179_v45 = vadd.f32 %v3115_v40, %v3051_v53  ;;  %v2861_v18 = vsub.f32 %v11314_v26, %v8587_v20  ;;  %v3373_v9 = vld [vmem:[#allocation2 + $0x128] sm:$0xff]  ;;  %v11323_v7 = vld [vmem:[#allocation61_spill] sm:$0xff] }
 0x477   : >> { %3497 = vst [vmem:[#allocation2 + $0xc8] sm:$0xff] %v3433_v28  ;;  %v2925_v1 = vsub.f32 %v11315_v2, %v8590_v29  ;;  %v2989_v13 = vsub.f32 %v11316_v14, %v8593_v60  ;;  %v8911_v31 = vmin.f32 %v3552_v34, %v3304_v25  ;;  %v3180_v55 = vadd.f32 %v3116_v54, %v3052_v49  ;;  %v11319_v34 = vld [vmem:[#allocation229_spill] sm:$0xff]  ;;  %v11324_v28 = vld [vmem:[#allocation120_spill] sm:$0xff]  ;;  %v11325_v40 = vld [vmem:[#allocation231_spill] sm:$0xff] }
 0x478   : >> { %v3434_v58 = vmin.f32 %v3370_v59, %v8900_v16  ;;  %v2862_v3 = vsub.f32 %v11317_v10, %v8587_v20  ;;  %v8916_v23 = vadd.f32 %v3243_v17, %v3179_v45  ;;  %v3053_v8 = vmul.f32 %v2861_v18, %v2861_v18  ;;  %v3374_v54 = vld [vmem:[#allocation2 + $0x1a0] sm:$0xff] }
 0x479   : >> { %v3117_v56 = vmul.f32 %v2925_v1, %v2925_v1  ;;  %v3245_v27 = vmul.f32 %v2989_v13, %v2989_v13  ;;  %v8918_v36 = vadd.f32 %v3244_v22, %v3180_v55  ;;  %v2926_v32 = vsub.f32 %v11318_v62, %v8590_v29  ;;  %v11326_v13 = vld [vmem:[#allocation60_spill] sm:$0xff] }
 0x47a   : >> { %3498 = vst [vmem:[#allocation2 + $0x40] sm:$0xff] %v3434_v58  ;;  %v2990_v25 = vsub.f32 %v11319_v34, %v8593_v60  ;;  %v3054_v46 = vmul.f32 %v2862_v3, %v2862_v3  ;;  %v8927_v42 = vmin.f32 %v3553_v35, %v3305_v47  ;;  %v3435_v48 = vmin.f32 %v3371_v39, %v8916_v23  ;;  %v11322_v35 = vld [vmem:[#allocation232_spill] sm:$0xff]  ;;  %v11327_v39 = vld [vmem:[#allocation121_spill] sm:$0xff] }
 0x47b   : >> { %v3181_v50 = vadd.f32 %v3117_v56, %v3053_v8  ;;  %v2863_v0 = vsub.f32 %v11320_v43, %v8587_v20  ;;  %v3558_v41 = vmin.f32 %v8875_v11, %v8900_v16  ;;  %v3436_v53 = vmin.f32 %v3372_v33, %v8918_v36  ;;  %v3375_v33 = vld [vmem:[#allocation2 + $0x1f0] sm:$0xff]  ;;  %v11329_v56 = vld [vmem:[#allocation63_spill] sm:$0xff] }
 0x47c   : >> { %v3118_v38 = vmul.f32 %v2926_v32, %v2926_v32  ;;  %v3246_v4 = vmul.f32 %v2990_v25, %v2990_v25  ;;  %3499 = vst [vmem:[#allocation2 + $0x1f8] sm:$0xff] %v3435_v48  ;;  %v2927_v21 = vsub.f32 %v11321_v44, %v8590_v29  ;;  %v2991_v47 = vsub.f32 %v11322_v35, %v8593_v60  ;;  %v3376_v32 = vld [vmem:[#allocation2 + $0xe8] sm:$0xff]  ;;  %v8961_v48 = vld [vmem:[%s8584_s15 + $0x1] ss:$0 sm:$0xff] }
 0x47d   : >> { %v8935_v30 = vadd.f32 %v3245_v27, %v3181_v50  ;;  %v3055_v12 = vmul.f32 %v2863_v0, %v2863_v0  ;;  %3500 = vst [vmem:[#allocation2 + $0x20] sm:$0xff] %v3436_v53  ;;  %v2864_v11 = vsub.f32 %v11323_v7, %v8587_v20  ;;  %v2928_v59 = vsub.f32 %v11324_v28, %v8590_v29 }
 0x47e   : >> { %v3182_v52 = vadd.f32 %v3118_v38, %v3054_v46  ;;  %v2992_v17 = vsub.f32 %v11325_v40, %v8593_v60  ;;  %v3559_v16 = vmin.f32 %v8898_v63, %v8916_v23  ;;  %v3119_v22 = vmul.f32 %v2927_v21, %v2927_v21  ;;  %v11328_v63 = vld [vmem:[#allocation234_spill] sm:$0xff] }
 0x47f   : >> { %v3437_v49 = vmin.f32 %v3373_v9, %v8935_v30  ;;  %v3247_v45 = vmul.f32 %v2991_v47, %v2991_v47  ;;  %v3056_v18 = vmul.f32 %v2864_v11, %v2864_v11  ;;  %v3120_v2 = vmul.f32 %v2928_v59, %v2928_v59  ;;  %v8973_v38 = vld [vmem:[%s8584_s15] ss:$0 sm:$0xff]  ;;  %v3377_v47 = vld [vmem:[#allocation2 + $0x78] sm:$0xff]  ;;  %v11333_v11 = vld [vmem:[#allocation123_spill] sm:$0xff] }
 0x480   : >> { %v3310_v26 = vadd.f32 %v3246_v4, %v3182_v52  ;;  %v3248_v1 = vmul.f32 %v2992_v17, %v2992_v17  ;;  %v3183_v14 = vadd.f32 %v3119_v22, %v3055_v12  ;;  %v2865_v58 = vsub.f32 %v11326_v13, %v8587_v20  ;;  %v11332_v4 = vld [vmem:[#allocation62_spill] sm:$0xff]  ;;  %v11335_v17 = vld [vmem:[#allocation65_spill] sm:$0xff]  ;;  %v11337_v22 = vld [vmem:[#allocation235_spill] sm:$0xff] }
 0x481   : >> { %3501 = vst [vmem:[#allocation2 + $0x128] sm:$0xff] %v3437_v49  ;;  %v2929_v55 = vsub.f32 %v11327_v39, %v8590_v29  ;;  %v2993_v10 = vsub.f32 %v11328_v63, %v8593_v60  ;;  %v3560_v3 = vmin.f32 %v8911_v31, %v8918_v36  ;;  %v3184_v8 = vadd.f32 %v3120_v2, %v3056_v18  ;;  %v11330_v60 = vld [vmem:[#allocation122_spill] sm:$0xff]  ;;  %v11331_v36 = vld [vmem:[#allocation233_spill] sm:$0xff]  ;;  %v3378_v2 = vld [vmem:[#allocation2 + $0x70] sm:$0xff] }
 0x482   : >> { %v3438_v23 = vmin.f32 %v3374_v54, %v3310_v26  ;;  %v2866_v27 = vsub.f32 %v11329_v56, %v8587_v20  ;;  %v3311_v62 = vadd.f32 %v3247_v45, %v3183_v14  ;;  %v3057_v34 = vmul.f32 %v2865_v58, %v2865_v58  ;;  %v8966_v31 = vld [vmem:[%s8584_s15 + $0x2] ss:$0 sm:$0xff] }
 0x483   : >> { %v3121_v25 = vmul.f32 %v2929_v55, %v2929_v55  ;;  %v3249_v46 = vmul.f32 %v2993_v10, %v2993_v10  ;;  %v3312_v29 = vadd.f32 %v3248_v1, %v3184_v8  ;;  %v2930_v50 = vsub.f32 %v11330_v60, %v8961_v48  ;;  %v11338_v10 = vld [vmem:[#allocation64_spill] sm:$0xff] }
 0x484   : >> { %3502 = vst [vmem:[#allocation2 + $0x1a0] sm:$0xff] %v3438_v23  ;;  %v2994_v43 = vsub.f32 %v11331_v36, %v8966_v31  ;;  %v3058_v0 = vmul.f32 %v2866_v27, %v2866_v27  ;;  %v3561_v20 = vmin.f32 %v8927_v42, %v8935_v30  ;;  %v3439_v53 = vmin.f32 %v3375_v33, %v3311_v62  ;;  %v11334_v42 = vld [vmem:[#allocation236_spill] sm:$0xff]  ;;  %v11339_v33 = vld [vmem:[#allocation125_spill] sm:$0xff] }
 0x485   : >> { %v3185_v9 = vadd.f32 %v3121_v25, %v3057_v34  ;;  %v2867_v44 = vsub.f32 %v11332_v4, %v8973_v38  ;;  %v8977_v21 = vmin.f32 %v3558_v41, %v3310_v26  ;;  %v3440_v35 = vmin.f32 %v3376_v32, %v3312_v29  ;;  %v11336_v41 = vld [vmem:[#allocation124_spill] sm:$0xff]  ;;  %v11341_v25 = vld [vmem:[#allocation67_spill] sm:$0xff] }
 0x486   : >> { %v3122_v12 = vmul.f32 %v2930_v50, %v2930_v50  ;;  %v3250_v52 = vmul.f32 %v2994_v43, %v2994_v43  ;;  %3503 = vst [vmem:[#allocation2 + $0x1f0] sm:$0xff] %v3439_v53  ;;  %v2931_v28 = vsub.f32 %v11333_v11, %v8961_v48  ;;  %v2995_v30 = vsub.f32 %v11334_v42, %v8966_v31  ;;  %v3379_v32 = vld [vmem:[#allocation2 + $0x90] sm:$0xff]  ;;  %v3380_v50 = vld [vmem:[#allocation2 + $0x1d8] sm:$0xff] }
 0x487   : >> { %v3313_v7 = vadd.f32 %v3249_v46, %v3185_v9  ;;  %v3059_v59 = vmul.f32 %v2867_v44, %v2867_v44  ;;  %3504 = vst [vmem:[#allocation2 + $0xe8] sm:$0xff] %v3440_v35  ;;  %v2868_v49 = vsub.f32 %v11335_v17, %v8973_v38  ;;  %v2932_v54 = vsub.f32 %v11336_v41, %v8961_v48  ;;  %v11342_v9 = vld [vmem:[#allocation126_spill] sm:$0xff] }
 0x488   : >> { %v3186_v40 = vadd.f32 %v3122_v12, %v3058_v0  ;;  %v2996_v45 = vsub.f32 %v11337_v22, %v8966_v31  ;;  %v8989_v26 = vmin.f32 %v3559_v16, %v3311_v62  ;;  %v3123_v1 = vmul.f32 %v2931_v28, %v2931_v28  ;;  %v11340_v16 = vld [vmem:[#allocation238_spill] sm:$0xff] }
 0x489   : >> { %v3441_v18 = vmin.f32 %v3377_v47, %v3313_v7  ;;  %v3251_v14 = vmul.f32 %v2995_v30, %v2995_v30  ;;  %v3060_v58 = vmul.f32 %v2868_v49, %v2868_v49  ;;  %v3124_v39 = vmul.f32 %v2932_v54, %v2932_v54  ;;  %v3381_v30 = vld [vmem:[#allocation2 + $0xd0] sm:$0xff] }
 0x48a   : >> { %v8991_v13 = vadd.f32 %v3250_v52, %v3186_v40  ;;  %v3252_v55 = vmul.f32 %v2996_v45, %v2996_v45  ;;  %v3187_v63 = vadd.f32 %v3123_v1, %v3059_v59  ;;  %v2869_v23 = vsub.f32 %v11338_v10, %v8973_v38  ;;  %v11344_v52 = vld [vmem:[#allocation66_spill] sm:$0xff]  ;;  %v11346_v49 = vld [vmem:[#allocation240_spill] sm:$0xff]  ;;  %v11347_v45 = vld [vmem:[#allocation69_spill] sm:$0xff] }
 0x48b   : >> { %3505 = vst [vmem:[#allocation2 + $0x78] sm:$0xff] %v3441_v18  ;;  %v2933_v8 = vsub.f32 %v11339_v33, %v8961_v48  ;;  %v2997_v56 = vsub.f32 %v11340_v16, %v8966_v31  ;;  %v8999_v27 = vmin.f32 %v3560_v3, %v3312_v29  ;;  %v3188_v34 = vadd.f32 %v3124_v39, %v3060_v58  ;;  %v11343_v29 = vld [vmem:[#allocation237_spill] sm:$0xff]  ;;  %v11348_v18 = vld [vmem:[#allocation128_spill] sm:$0xff]  ;;  %v11349_v1 = vld [vmem:[#allocation239_spill] sm:$0xff] }
 0x48c   : >> { %v3442_v62 = vmin.f32 %v3378_v2, %v8991_v13  ;;  %v2870_v46 = vsub.f32 %v11341_v25, %v8973_v38  ;;  %v9004_v60 = vadd.f32 %v3251_v14, %v3187_v63  ;;  %v3061_v36 = vmul.f32 %v2869_v23, %v2869_v23  ;;  %v3382_v39 = vld [vmem:[#allocation2 + $0xb8] sm:$0xff]  ;;  %v11352_v25 = vld [vmem:[#allocation242_spill] sm:$0xff] }
 0x48d   : >> { %v3125_v43 = vmul.f32 %v2933_v8, %v2933_v8  ;;  %v3253_v0 = vmul.f32 %v2997_v56, %v2997_v56  ;;  %v9006_v53 = vadd.f32 %v3252_v55, %v3188_v34  ;;  %v2934_v3 = vsub.f32 %v11342_v9, %v8961_v48  ;;  %v11350_v56 = vld [vmem:[#allocation68_spill] sm:$0xff] }
 0x48e   : >> { %3506 = vst [vmem:[#allocation2 + $0x70] sm:$0xff] %v3442_v62  ;;  %v2998_v4 = vsub.f32 %v11343_v29, %v8966_v31  ;;  %v3062_v44 = vmul.f32 %v2870_v46, %v2870_v46  ;;  %v9012_v35 = vmin.f32 %v3561_v20, %v3313_v7  ;;  %v3443_v47 = vmin.f32 %v3379_v32, %v9004_v60  ;;  %v11345_v20 = vld [vmem:[#allocation127_spill] sm:$0xff]  ;;  %v11351_v32 = vld [vmem:[#allocation129_spill] sm:$0xff] }
 0x48f   : >> { %v3189_v12 = vadd.f32 %v3125_v43, %v3061_v36  ;;  %v2871_v11 = vsub.f32 %v11344_v52, %v8973_v38  ;;  %v3566_v28 = vmin.f32 %v8977_v21, %v8991_v13  ;;  %v3444_v42 = vmin.f32 %v3380_v50, %v9006_v53  ;;  %v3383_v50 = vld [vmem:[#allocation2 + $0x88] sm:$0xff] }
 0x490   : >> { %v3126_v59 = vmul.f32 %v2934_v3, %v2934_v3  ;;  %v3254_v40 = vmul.f32 %v2998_v4, %v2998_v4  ;;  %3507 = vst [vmem:[#allocation2 + $0x90] sm:$0xff] %v3443_v47  ;;  %v2935_v7 = vsub.f32 %v11345_v20, %v8961_v48  ;;  %v2999_v41 = vsub.f32 %v11346_v49, %v8966_v31  ;;  %v11353_v43 = vld [vmem:[#allocation71_spill] sm:$0xff] }
 0x491   : >> { %v9020_v17 = vadd.f32 %v3253_v0, %v3189_v12  ;;  %v3063_v54 = vmul.f32 %v2871_v11, %v2871_v11  ;;  %3508 = vst [vmem:[#allocation2 + $0x1d8] sm:$0xff] %v3444_v42  ;;  %v2872_v21 = vsub.f32 %v11347_v45, %v8973_v38  ;;  %v2936_v2 = vsub.f32 %v11348_v18, %v8961_v48  ;;  %v3384_v3 = vld [vmem:[#allocation2 + $0xa8] sm:$0xff]  ;;  %v11354_v12 = vld [vmem:[#allocation130_spill] sm:$0xff]  ;;  %v11355_v11 = vld [vmem:[#allocation241_spill] sm:$0xff] }
 0x492   : >> { %v3190_v22 = vadd.f32 %v3126_v59, %v3062_v44  ;;  %v3000_v14 = vsub.f32 %v11349_v1, %v8966_v31  ;;  %v3567_v13 = vmin.f32 %v8989_v26, %v9004_v60  ;;  %v3127_v55 = vmul.f32 %v2935_v7, %v2935_v7 }
 0x493   : >> { %v3445_v58 = vmin.f32 %v3381_v30, %v9020_v17  ;;  %v3255_v63 = vmul.f32 %v2999_v41, %v2999_v41  ;;  %v3064_v23 = vmul.f32 %v2872_v21, %v2872_v21  ;;  %v3128_v33 = vmul.f32 %v2936_v2, %v2936_v2  ;;  %v3385_v41 = vld [vmem:[#allocation2 + $0x1c8] sm:$0xff]  ;;  %v11358_v2 = vld [vmem:[#allocation244_spill] sm:$0xff] }
 0x494   : >> { %v3318_v10 = vadd.f32 %v3254_v40, %v3190_v22  ;;  %v3256_v8 = vmul.f32 %v3000_v14, %v3000_v14  ;;  %v3191_v16 = vadd.f32 %v3127_v55, %v3063_v54  ;;  %v2873_v62 = vsub.f32 %v11350_v56, %v8973_v38  ;;  %v11356_v40 = vld [vmem:[#allocation70_spill] sm:$0xff]  ;;  %v11357_v21 = vld [vmem:[#allocation131_spill] sm:$0xff]  ;;  %v11359_v14 = vld [vmem:[#allocation73_spill] sm:$0xff] }
 0x495   : >> { %3509 = vst [vmem:[#allocation2 + $0xd0] sm:$0xff] %v3445_v58  ;;  %v2937_v34 = vsub.f32 %v11351_v32, %v8961_v48  ;;  %v3001_v26 = vsub.f32 %v11352_v25, %v8966_v31  ;;  %v3568_v46 = vmin.f32 %v8999_v27, %v9006_v53  ;;  %v3192_v36 = vadd.f32 %v3128_v33, %v3064_v23  ;;  %v11361_v55 = vld [vmem:[#allocation243_spill] sm:$0xff]  ;;  %v3386_v33 = vld [vmem:[#allocation2 + $0x170] sm:$0xff] }
 0x496   : >> { %v3446_v60 = vmin.f32 %v3382_v39, %v3318_v10  ;;  %v2874_v0 = vsub.f32 %v11353_v43, %v8973_v38  ;;  %v3319_v9 = vadd.f32 %v3255_v63, %v3191_v16  ;;  %v3065_v29 = vmul.f32 %v2873_v62, %v2873_v62 }
 0x497   : >> { %v3129_v4 = vmul.f32 %v2937_v34, %v2937_v34  ;;  %v3257_v44 = vmul.f32 %v3001_v26, %v3001_v26  ;;  %v3320_v47 = vadd.f32 %v3256_v8, %v3192_v36  ;;  %v2938_v52 = vsub.f32 %v11354_v12, %v8961_v48  ;;  %v11362_v26 = vld [vmem:[#allocation72_spill] sm:$0xff] }
 0x498   : >> { %3510 = vst [vmem:[#allocation2 + $0xb8] sm:$0xff] %v3446_v60  ;;  %v3002_v42 = vsub.f32 %v11355_v11, %v8966_v31  ;;  %v3066_v27 = vmul.f32 %v2874_v0, %v2874_v0  ;;  %v3569_v53 = vmin.f32 %v9012_v35, %v9020_v17  ;;  %v3447_v30 = vmin.f32 %v3383_v50, %v3319_v9  ;;  %v11363_v50 = vld [vmem:[#allocation10_spill] sm:$0xff] }
 0x499   : >> { %v3193_v59 = vadd.f32 %v3129_v4, %v3065_v29  ;;  %v2875_v20 = vsub.f32 %v11356_v40, %v8973_v38  ;;  %v9053_v7 = vmin.f32 %v3566_v28, %v3318_v10  ;;  %v3448_v49 = vmin.f32 %v3384_v3, %v3320_v47  ;;  %v11360_v28 = vld [vmem:[#allocation7_spill] sm:$0xff]  ;;  %v3387_v3 = vld [vmem:[#allocation2 + $0x178] sm:$0xff] }
 0x49a   : >> { %v3130_v54 = vmul.f32 %v2938_v52, %v2938_v52  ;;  %v3258_v22 = vmul.f32 %v3002_v42, %v3002_v42  ;;  %3511 = vst [vmem:[#allocation2 + $0x88] sm:$0xff] %v3447_v30  ;;  %v2939_v18 = vsub.f32 %v11357_v21, %v8961_v48  ;;  %v3003_v1 = vsub.f32 %v11358_v2, %v8966_v31  ;;  %v11365_v4 = vld [vmem:[#allocation75_spill] sm:$0xff] }
 0x49b   : >> { %v3321_v45 = vadd.f32 %v3257_v44, %v3193_v59  ;;  %v3067_v35 = vmul.f32 %v2875_v20, %v2875_v20  ;;  %3512 = vst [vmem:[#allocation2 + $0xa8] sm:$0xff] %v3448_v49  ;;  %v2876_v58 = vsub.f32 %v11359_v14, %v8973_v38  ;;  %v2940_v39 = vsub.f32 %v11360_v28, %v8961_v48  ;;  %v3388_v52 = vld [vmem:[#allocation2 + $0x68] sm:$0xff]  ;;  %v11366_v59 = vld [vmem:[#allocation8_spill] sm:$0xff] }
 0x49c   : >> { %v3194_v17 = vadd.f32 %v3130_v54, %v3066_v27  ;;  %v3004_v63 = vsub.f32 %v11361_v55, %v8966_v31  ;;  %v9065_v10 = vmin.f32 %v3567_v13, %v3319_v9  ;;  %v3131_v8 = vmul.f32 %v2939_v18, %v2939_v18  ;;  %v11364_v13 = vld [vmem:[#allocation246_spill] sm:$0xff] }
 0x49d   : >> { %v3449_v23 = vmin.f32 %v3385_v41, %v3321_v45  ;;  %v3259_v16 = vmul.f32 %v3003_v1, %v3003_v1  ;;  %v3068_v62 = vmul.f32 %v2876_v58, %v2876_v58  ;;  %v3132_v32 = vmul.f32 %v2940_v39, %v2940_v39  ;;  %v3389_v1 = vld [vmem:[#allocation2 + $0x190] sm:$0xff] }
 0x49e   : >> { %v9067_v56 = vadd.f32 %v3258_v22, %v3194_v17  ;;  %v3260_v34 = vmul.f32 %v3004_v63, %v3004_v63  ;;  %v3195_v25 = vadd.f32 %v3131_v8, %v3067_v35  ;;  %v2877_v60 = vsub.f32 %v11362_v26, %v8973_v38  ;;  %v11368_v22 = vld [vmem:[#allocation74_spill] sm:$0xff]  ;;  %v11370_v58 = vld [vmem:[#allocation248_spill] sm:$0xff]  ;;  %v11371_v63 = vld [vmem:[#allocation77_spill] sm:$0xff] }
 0x49f   : >> { %3513 = vst [vmem:[#allocation2 + $0x1c8] sm:$0xff] %v3449_v23  ;;  %v2941_v36 = vsub.f32 %v11363_v50, %v8961_v48  ;;  %v3005_v43 = vsub.f32 %v11364_v13, %v8966_v31  ;;  %v9075_v0 = vmin.f32 %v3568_v46, %v3320_v47  ;;  %v3196_v29 = vadd.f32 %v3132_v32, %v3068_v62  ;;  %v11367_v47 = vld [vmem:[#allocation245_spill] sm:$0xff]  ;;  %v11373_v8 = vld [vmem:[#allocation247_spill] sm:$0xff] }
 0x4a0   : >> { %v3450_v9 = vmin.f32 %v3386_v33, %v9067_v56  ;;  %v2878_v44 = vsub.f32 %v11365_v4, %v8973_v38  ;;  %v9080_v12 = vadd.f32 %v3259_v16, %v3195_v25  ;;  %v3069_v11 = vmul.f32 %v2877_v60, %v2877_v60  ;;  %v11372_v23 = vld [vmem:[#allocation9_spill] sm:$0xff]  ;;  %v11376_v4 = vld [vmem:[#allocation250_spill] sm:$0xff] }
 0x4a1   : >> { %v3133_v42 = vmul.f32 %v2941_v36, %v2941_v36  ;;  %v3261_v27 = vmul.f32 %v3005_v43, %v3005_v43  ;;  %v9082_v30 = vadd.f32 %v3260_v34, %v3196_v29  ;;  %v2942_v46 = vsub.f32 %v11366_v59, %v8961_v48  ;;  %v3390_v32 = vld [vmem:[#allocation2 + $0x198] sm:$0xff]  ;;  %v11374_v43 = vld [vmem:[#allocation76_spill] sm:$0xff] }
 0x4a2   : >> { %3514 = vst [vmem:[#allocation2 + $0x170] sm:$0xff] %v3450_v9  ;;  %v3006_v40 = vsub.f32 %v11367_v47, %v8966_v31  ;;  %v3070_v20 = vmul.f32 %v2878_v44, %v2878_v44  ;;  %v9088_v49 = vmin.f32 %v3569_v53, %v3321_v45  ;;  %v3451_v41 = vmin.f32 %v3387_v3, %v9080_v12  ;;  %v11369_v53 = vld [vmem:[#allocation12_spill] sm:$0xff] }
 0x4a3   : >> { %v3197_v54 = vadd.f32 %v3133_v42, %v3069_v11  ;;  %v2879_v21 = vsub.f32 %v11368_v22, %v8973_v38  ;;  %v3574_v18 = vmin.f32 %v9053_v7, %v9067_v56  ;;  %v3452_v2 = vmin.f32 %v3388_v52, %v9082_v30  ;;  %v11375_v3 = vld [vmem:[#allocation132_spill] sm:$0xff]  ;;  %v3391_v52 = vld [vmem:[#allocation2 + $0x38] sm:$0xff] }
 0x4a4   : >> { %v3134_v35 = vmul.f32 %v2942_v46, %v2942_v46  ;;  %v3262_v17 = vmul.f32 %v3006_v40, %v3006_v40  ;;  %3515 = vst [vmem:[#allocation2 + $0x178] sm:$0xff] %v3451_v41  ;;  %v2943_v45 = vsub.f32 %v11369_v53, %v8961_v48  ;;  %v3007_v28 = vsub.f32 %v11370_v58, %v8966_v31  ;;  %v11377_v42 = vld [vmem:[#allocation13_spill] sm:$0xff]  ;;  %v3392_v46 = vld [vmem:[#allocation2 + $0xc0] sm:$0xff] }
 0x4a5   : >> { %v9096_v14 = vadd.f32 %v3261_v27, %v3197_v54  ;;  %v3071_v39 = vmul.f32 %v2879_v21, %v2879_v21  ;;  %3516 = vst [vmem:[#allocation2 + $0x68] sm:$0xff] %v3452_v2  ;;  %v2880_v7 = vsub.f32 %v11371_v63, %v8973_v38  ;;  %v2944_v33 = vsub.f32 %v11372_v23, %v8961_v48  ;;  %v11378_v54 = vld [vmem:[#allocation11_spill] sm:$0xff]  ;;  %v11379_v21 = vld [vmem:[#allocation249_spill] sm:$0xff] }
 0x4a6   : >> { %v3198_v55 = vadd.f32 %v3134_v35, %v3070_v20  ;;  %v3008_v16 = vsub.f32 %v11373_v8, %v8966_v31  ;;  %v3575_v56 = vmin.f32 %v9065_v10, %v9080_v12  ;;  %v3135_v34 = vmul.f32 %v2943_v45, %v2943_v45 }
 0x4a7   : >> { %v3453_v62 = vmin.f32 %v3389_v1, %v9096_v14  ;;  %v3263_v25 = vmul.f32 %v3007_v28, %v3007_v28  ;;  %v3072_v60 = vmul.f32 %v2880_v7, %v2880_v7  ;;  %v3136_v50 = vmul.f32 %v2944_v33, %v2944_v33  ;;  %v3393_v28 = vld [vmem:[#allocation2 + $0x1c0] sm:$0xff]  ;;  %v11381_v7 = vld [vmem:[#allocation133_spill] sm:$0xff]  ;;  %v11382_v33 = vld [vmem:[#allocation252_spill] sm:$0xff] }
 0x4a8   : >> { %v3326_v26 = vadd.f32 %v3262_v17, %v3198_v55  ;;  %v3264_v36 = vmul.f32 %v3008_v16, %v3008_v16  ;;  %v3199_v13 = vadd.f32 %v3135_v34, %v3071_v39  ;;  %v2881_v9 = vsub.f32 %v11374_v43, %v8973_v38  ;;  %v11380_v17 = vld [vmem:[#allocation14_spill] sm:$0xff]  ;;  %v11385_v34 = vld [vmem:[#allocation251_spill] sm:$0xff] }
 0x4a9   : >> { %3517 = vst [vmem:[#allocation2 + $0x190] sm:$0xff] %v3453_v62  ;;  %v2945_v29 = vsub.f32 %v11375_v3, %v8961_v48  ;;  %v3009_v10 = vsub.f32 %v11376_v4, %v8966_v31  ;;  %v3576_v44 = vmin.f32 %v9075_v0, %v9082_v30  ;;  %v3200_v11 = vadd.f32 %v3136_v50, %v3072_v60  ;;  %v3394_v50 = vld [vmem:[#allocation2 + $0x158] sm:$0xff] }
 0x4aa   : >> { %v3454_v12 = vmin.f32 %v3390_v32, %v3326_v26  ;;  %v2882_v27 = vsub.f32 %v11377_v42, %v8973_v38  ;;  %v3327_v59 = vadd.f32 %v3263_v25, %v3199_v13  ;;  %v3073_v47 = vmul.f32 %v2881_v9, %v2881_v9  ;;  %v11388_v42 = vld [vmem:[#allocation253_spill] sm:$0xff] }
 0x4ab   : >> { %v3137_v40 = vmul.f32 %v2945_v29, %v2945_v29  ;;  %v3265_v20 = vmul.f32 %v3009_v10, %v3009_v10  ;;  %v3328_v41 = vadd.f32 %v3264_v36, %v3200_v11  ;;  %v2946_v22 = vsub.f32 %v11378_v54, %v8961_v48  ;;  %v11386_v10 = vld [vmem:[#allocation16_spill] sm:$0xff]  ;;  %v3396_v54 = vld [vmem:[#allocation2 + $0x58] sm:$0xff] }
 0x4ac   : >> { %3518 = vst [vmem:[#allocation2 + $0x198] sm:$0xff] %v3454_v12  ;;  %v3010_v2 = vsub.f32 %v11379_v21, %v8966_v31  ;;  %v3074_v0 = vmul.f32 %v2882_v27, %v2882_v27  ;;  %v3577_v30 = vmin.f32 %v9088_v49, %v9096_v14  ;;  %v3455_v1 = vmin.f32 %v3391_v52, %v3327_v59  ;;  %v11383_v14 = vld [vmem:[#allocation78_spill] sm:$0xff]  ;;  %v11387_v52 = vld [vmem:[#allocation135_spill] sm:$0xff] }
 0x4ad   : >> { %v3201_v35 = vadd.f32 %v3137_v40, %v3073_v47  ;;  %v2883_v53 = vsub.f32 %v11380_v17, %v8973_v38  ;;  %v3578_v45 = vmin.f32 %v3574_v18, %v3326_v26  ;;  %v3456_v58 = vmin.f32 %v3392_v46, %v3328_v41  ;;  %v11384_v18 = vld [vmem:[#allocation134_spill] sm:$0xff]  ;;  %v3395_v47 = vld [vmem:[#allocation2 + $0x10] sm:$0xff] }
 0x4ae   : >> { %v3138_v39 = vmul.f32 %v2946_v22, %v2946_v22  ;;  %v3266_v55 = vmul.f32 %v3010_v2, %v3010_v2  ;;  %3519 = vst [vmem:[#allocation2 + $0x38] sm:$0xff] %v3455_v1  ;;  %v2947_v23 = vsub.f32 %v11381_v7, %v8961_v48  ;;  %v3011_v8 = vsub.f32 %v11382_v33, %v8966_v31  ;;  %v3595_v33 = vld [vmem:[#allocation2 + $0x1b0] sm:$0xff] (%p2810_p6) }
 0x4af   : >> { %v3329_v63 = vadd.f32 %v3265_v20, %v3201_v35  ;;  %v3075_v16 = vmul.f32 %v2883_v53, %v2883_v53  ;;  %3520 = vst [vmem:[#allocation2 + $0xc0] sm:$0xff] %v3456_v58  ;;  %v2884_v62 = vsub.f32 %v11383_v14, %v8973_v38  ;;  %v2948_v32 = vsub.f32 %v11384_v18, %v8961_v48  ;;  %v3397_v53 = vld [vmem:[#allocation2 + $0xa0] sm:$0xff]  ;;  %v3600_v14 = vld [vmem:[#allocation2 + $0x130] sm:$0xff] (%p2810_p6) }
 0x4b0   : >> { %v3202_v49 = vadd.f32 %v3138_v39, %v3074_v0  ;;  %v3012_v25 = vsub.f32 %v11385_v34, %v8966_v31  ;;  %v3579_v26 = vmin.f32 %v3575_v56, %v3327_v59  ;;  %v3139_v36 = vmul.f32 %v2947_v23, %v2947_v23  ;;  %v3591_v39 = vld [vmem:[%s3590_s16] sm:$0xff]  ;;  %v3597_v23 = vld [vmem:[#allocation2 + $0x18] sm:$0xff] (%p2810_p6)  ;;  %v3615_v34 = vld [vmem:[#allocation2 + $0x1a8] sm:$0xff] (%p2810_p6) }
 0x4b1   : >> { %v3457_v60 = vmin.f32 %v3393_v28, %v3329_v63  ;;  %v3267_v13 = vmul.f32 %v3011_v8, %v3011_v8  ;;  %v3076_v9 = vmul.f32 %v2884_v62, %v2884_v62  ;;  %v3140_v3 = vmul.f32 %v2948_v32, %v2948_v32  ;;  %v3599_v8 = vld [vmem:[#allocation2 + $0x168] sm:$0xff] (%p2810_p6)  ;;  %v3603_v62 = vld [vmem:[#allocation2 + $0x110] sm:$0xff] (%p2810_p6)  ;;  %v3602_v18 = vld [vmem:[#allocation2 + $0x180] sm:$0xff] (%p2810_p6) }
 0x4b2   : >> { %v3330_v43 = vadd.f32 %v3266_v55, %v3202_v49  ;;  %v3268_v29 = vmul.f32 %v3012_v25, %v3012_v25  ;;  %v3203_v4 = vadd.f32 %v3139_v36, %v3075_v16  ;;  %v2885_v12 = vsub.f32 %v11386_v10, %v8973_v38  ;;  %v3598_v16 = vld [vmem:[#allocation2 + $0x50] sm:$0xff] (%p2810_p6)  ;;  %v3601_v49 = vld [vmem:[#allocation2 + $0x48] sm:$0xff] (%p2810_p6)  ;;  %v3612_v32 = vld [vmem:[#allocation2 + $0x138] sm:$0xff] (%p2810_p6) }
 0x4b3   : >> { %3521 = vst [vmem:[#allocation2 + $0x1c0] sm:$0xff] %v3457_v60  ;;  %v2949_v11 = vsub.f32 %v11387_v52, %v8961_v48  ;;  %v3013_v27 = vsub.f32 %v11388_v42, %v8966_v31  ;;  %v3580_v56 = vmin.f32 %v3576_v44, %v3328_v41  ;;  %v3204_v40 = vadd.f32 %v3140_v3, %v3076_v9  ;;  %v3614_v25 = vld [vmem:[#allocation2 + $0x80] sm:$0xff] (%p2810_p6)  ;;  %v3616_v60 = vld [vmem:[#allocation2 + $0x1b8] sm:$0xff] (%p2810_p6)  ;;  %v3618_v36 = vld [vmem:[#allocation2 + $0x1e8] sm:$0xff] (%p2810_p6) }
 0x4b4   : >> { %v3458_v59 = vmin.f32 %v3394_v50, %v3330_v43  ;;  %v3582_v46 = vmin.f32 %v3578_v45, %v3330_v43  ;;  %v3331_v20 = vadd.f32 %v3267_v13, %v3203_v4  ;;  %v3077_v22 = vmul.f32 %v2885_v12, %v2885_v12  ;;  %v3619_v50 = vld [vmem:[#allocation2 + $0xf8] sm:$0xff] (%p2810_p6)  ;;  %v3621_v13 = vld [vmem:[#allocation2 + $0x30] sm:$0xff] (%p2810_p6)  ;;  %v3620_v43 = vld [vmem:[#allocation2 + $0x160] sm:$0xff] (%p2810_p6) }
 0x4b5   : >> { %v3141_v21 = vmul.f32 %v2949_v11, %v2949_v11  ;;  %v3269_v2 = vmul.f32 %v3013_v27, %v3013_v27  ;;  %v3332_v0 = vadd.f32 %v3268_v29, %v3204_v40  ;;  %v3581_v38 = vmin.f32 %v3577_v30, %v3329_v63  ;;  %v3596_v30 = vld [vmem:[#allocation2 + $0xd8] sm:$0xff] (%p2810_p6)  ;;  %v3594_v63 = vld [vmem:[#allocation2 + $0xb0] sm:$0xff] (%p2810_p6)  ;;  %v3623_v9 = vld [vmem:[#allocation2] sm:$0xff] (%p2810_p6) }
 0x4b6   : >> { %3522 = vst [vmem:[#allocation2 + $0x158] sm:$0xff] %v3458_v59  ;;  %v3459_v1 = vmin.f32 %v3395_v47, %v3331_v20  ;;  %v3583_v35 = vmin.f32 %v3579_v26, %v3331_v20  ;;  %3662 = vmin.xlane.f32.xlu1 (%p2810_p6), %v3596_v30  ;;  %3658 = vmin.xlane.f32.xlu0 (%p2810_p6), %v3594_v63  ;;  %v3617_v26 = vld [vmem:[#allocation2 + $0x28] sm:$0xff] (%p2810_p6)  ;;  %v3622_v3 = vld [vmem:[#allocation2 + $0x1e0] sm:$0xff] (%p2810_p6)  ;;  %v3624_v4 = vld [vmem:[#allocation2 + $0xf0] sm:$0xff] (%p2810_p6) }
 0x4b7   : >> { %v3205_v48 = vadd.f32 %v3141_v21, %v3077_v22  ;;  %v3460_v17 = vmin.f32 %v3396_v54, %v3332_v0  ;;  %v3584_v31 = vmin.f32 %v3580_v56, %v3332_v0  ;;  %v3625_v29 = vld [vmem:[#allocation2 + $0x8] sm:$0xff] (%p2810_p6)  ;;  %v3627_v10 = vld [vmem:[#allocation2 + $0x1d0] sm:$0xff] (%p2810_p6)  ;;  %v3628_v11 = vld [vmem:[#allocation2 + $0x100] sm:$0xff] (%p2810_p6) }
 0x4b8   : >> { %3523 = vst [vmem:[#allocation2 + $0x10] sm:$0xff] %v3459_v1  ;;  %v3586_v41 = vmin.f32 %v3582_v46, %v3583_v35  ;;  %v3626_v12 = vld [vmem:[#allocation2 + $0x148] sm:$0xff] (%p2810_p6)  ;;  %v3631_v42 = vld [vmem:[#allocation2 + $0x1f8] sm:$0xff] (%p2810_p6)  ;;  %v3630_v27 = vld [vmem:[#allocation2 + $0x40] sm:$0xff] (%p2810_p6) }
 0x4b9   : >> { %v3333_v44 = vadd.f32 %v3269_v2, %v3205_v48  ;;  %3524 = vst [vmem:[#allocation2 + $0x58] sm:$0xff] %v3460_v17  ;;  %v3629_v52 = vld [vmem:[#allocation2 + $0xc8] sm:$0xff] (%p2810_p6)  ;;  %v3632_v59 = vld [vmem:[#allocation2 + $0x20] sm:$0xff] (%p2810_p6)  ;;  %v3635_v46 = vld [vmem:[#allocation2 + $0x1f0] sm:$0xff] (%p2810_p6) }
 0x4ba   : > { %3664 = vmin.xlane.f32.xlu1 (%p2810_p6), %v3597_v23  ;;  %3660 = vmin.xlane.f32.xlu0 (%p2810_p6), %v3595_v33  ;;  %v3633_v56 = vld [vmem:[#allocation2 + $0x128] sm:$0xff] (%p2810_p6)  ;;  %v3634_v47 = vld [vmem:[#allocation2 + $0x1a0] sm:$0xff] (%p2810_p6)  ;;  %v3637_v40 = vld [vmem:[#allocation2 + $0x78] sm:$0xff] (%p2810_p6) }
 0x4bb   : >> { %v3461_v45 = vmin.f32 %v3397_v53, %v3333_v44  ;;  %v3585_v58 = vmin.f32 %v3581_v38, %v3333_v44  ;;  %v3636_v20 = vld [vmem:[#allocation2 + $0xe8] sm:$0xff] (%p2810_p6)  ;;  %v3639_v54 = vld [vmem:[#allocation2 + $0x90] sm:$0xff] (%p2810_p6)  ;;  %v3640_v2 = vld [vmem:[#allocation2 + $0x1d8] sm:$0xff] (%p2810_p6) }
 0x4bc   : > { %v3638_v22 = vld [vmem:[#allocation2 + $0x70] sm:$0xff] (%p2810_p6)  ;;  %v3643_v0 = vld [vmem:[#allocation2 + $0x88] sm:$0xff] (%p2810_p6)  ;;  %v3642_v38 = vld [vmem:[#allocation2 + $0xb8] sm:$0xff] (%p2810_p6) }
 0x4bd   : >> { %3525 = vst [vmem:[#allocation2 + $0xa0] sm:$0xff] %v3461_v45  ;;  %v3587_v28 = vmin.f32 %v3584_v31, %v3585_v58  ;;  %v3641_v21 = vld [vmem:[#allocation2 + $0xd0] sm:$0xff] (%p2810_p6)  ;;  %v3645_v1 = vld [vmem:[#allocation2 + $0x1c8] sm:$0xff] (%p2810_p6)  ;;  %v3647_v48 = vld [vmem:[#allocation2 + $0x178] sm:$0xff] (%p2810_p6) }
 0x4be   : > { %3668 = vmin.xlane.f32.xlu1 (%p2810_p6), %v3599_v8  ;;  %3666 = vmin.xlane.f32.xlu0 (%p2810_p6), %v3598_v16  ;;  %v3644_v35 = vld [vmem:[#allocation2 + $0xa8] sm:$0xff] (%p2810_p6)  ;;  %v3646_v17 = vld [vmem:[#allocation2 + $0x170] sm:$0xff] (%p2810_p6)  ;;  %v3651_v44 = vld [vmem:[#allocation2 + $0x38] sm:$0xff] (%p2810_p6) }
 0x4bf   : >> { %v3588_v55 = vmin.f32 %v3586_v41, %v3587_v28  ;;  %2812 = sbr.rel (!%p2810_p6) target bundleno = 1044 (0x414), region = 103  ;;  %v3649_v53 = vld [vmem:[#allocation2 + $0x190] sm:$0xff] (%p2810_p6)  ;;  %v3648_v31 = vld [vmem:[#allocation2 + $0x68] sm:$0xff] (%p2810_p6)  ;;  %v3650_v41 = vld [vmem:[#allocation2 + $0x198] sm:$0xff] (%p2810_p6) }
 0x4c0   : > { %v3653_v45 = vld [vmem:[#allocation2 + $0x1c0] sm:$0xff] (%p2810_p6)  ;;  %v3655_v28 = vld [vmem:[#allocation2 + $0x10] sm:$0xff] (%p2810_p6)  ;;  %v3788_v30 = vld [vmem:[#allocation6 + $0x10] sm:$0xff] (%p2810_p6) }
 0x4c1   : >> { %v3592_v7 = vmin.f32 %v3591_v39, %v3588_v55  ;;  %v3652_v58 = vld [vmem:[#allocation2 + $0xc0] sm:$0xff] (%p2810_p6)  ;;  %v3654_v39 = vld [vmem:[#allocation2 + $0x158] sm:$0xff] (%p2810_p6)  ;;  %v3786_v63 = vld [vmem:[#allocation6] sm:$0xff] (%p2810_p6) }
 0x4c2   : > { %3672 = vmin.xlane.f32.xlu1 (%p2810_p6), %v3601_v49  ;;  %3670 = vmin.xlane.f32.xlu0 (%p2810_p6), %v3600_v14  ;;  %v3801_v49 = vld [vmem:[#allocation6 + $0x78] sm:$0xff] (%p2810_p6) }
 0x4c3   : >> { %3593 = vst [vmem:[%s3590_s16] sm:$0xff] %v3592_v7  ;;  %v3656_v7 = vld [vmem:[#allocation2 + $0x58] sm:$0xff] (%p2810_p6) }
 0x4c4   : > { %v3657_v55 = vld [vmem:[#allocation2 + $0xa0] sm:$0xff] }
 0x4c6   : > { %3676 = vmin.xlane.f32.xlu1 %v3603_v62  ;;  %3674 = vmin.xlane.f32.xlu0 %v3602_v18 }
 0x4ca   : > { %3680 = vmin.xlane.f32.xlu1 %v3605_v19  ;;  %3678 = vmin.xlane.f32.xlu0 %v3604_v51  ;;  %v3789_v19 = vld [vmem:[#allocation6 + $0x18] sm:$0xff]  ;;  %v3787_v51 = vld [vmem:[#allocation6 + $0x8] sm:$0xff] }
 0x4ce   : > { %3684 = vmin.xlane.f32.xlu1 %v3607_v5  ;;  %3682 = vmin.xlane.f32.xlu0 %v3606_v24 }
 0x4d2   : > { %3688 = vmin.xlane.f32.xlu1 %v3609_v37  ;;  %3686 = vmin.xlane.f32.xlu0 %v3608_v6  ;;  %v11391_v37 = vld [vmem:[#allocation153_spill] sm:$0xff] }
 0x4d3   : > { %vm11392_vm4 = vcmp.lt.s32.totalorder %v11391_v37, 600 }
 0x4d6   : > { %3692 = vmin.xlane.f32.xlu1 %v3611_v57  ;;  %3690 = vmin.xlane.f32.xlu0 %v3610_v61  ;;  %v11393_v57 = vld [vmem:[#allocation151_spill] sm:$0xff] }
 0x4d7   : > { %vm11394_vm5 = vcmp.lt.s32.totalorder %v11393_v57, 600  ;;  %v3803_v57 = vld [vmem:[#allocation6 + $0x88] sm:$0xff] }
 0x4da   : > { %3696 = vmin.xlane.f32.xlu1 %v3613_v15  ;;  %3694 = vmin.xlane.f32.xlu0 %v3612_v32 }
 0x4de   : > { %3700 = vmin.xlane.f32.xlu1 %v3615_v34  ;;  %3698 = vmin.xlane.f32.xlu0 %v3614_v25  ;;  %v3791_v34 = vld [vmem:[#allocation6 + $0x28] sm:$0xff]  ;;  %v3790_v25 = vld [vmem:[#allocation6 + $0x20] sm:$0xff] }
 0x4e2   : > { %3704 = vmin.xlane.f32.xlu1 %v3617_v26  ;;  %3702 = vmin.xlane.f32.xlu0 %v3616_v60 }
 0x4e6   : > { %3708 = vmin.xlane.f32.xlu1 %v3619_v50  ;;  %3706 = vmin.xlane.f32.xlu0 %v3618_v36  ;;  %v11395_v50 = vld [vmem:[#allocation155_spill] sm:$0xff] }
 0x4ea   : > { %3712 = vmin.xlane.f32.xlu1 %v3621_v13  ;;  %3710 = vmin.xlane.f32.xlu0 %v3620_v43  ;;  %v11397_v13 = vld [vmem:[#allocation154_spill] sm:$0xff] }
 0x4ee   : > { %3716 = vmin.xlane.f32.xlu1 %v3623_v9  ;;  %3714 = vmin.xlane.f32.xlu0 %v3622_v3 }
 0x4f2   : > { %3720 = vmin.xlane.f32.xlu1 %v3625_v29  ;;  %3718 = vmin.xlane.f32.xlu0 %v3624_v4  ;;  %v3793_v29 = vld [vmem:[#allocation6 + $0x38] sm:$0xff]  ;;  %v3792_v4 = vld [vmem:[#allocation6 + $0x30] sm:$0xff] }
 0x4f6   : > { %3724 = vmin.xlane.f32.xlu1 %v3627_v10  ;;  %3722 = vmin.xlane.f32.xlu0 %v3626_v12 }
 0x4fa   : > { %3728 = vmin.xlane.f32.xlu1 %v3629_v52  ;;  %3726 = vmin.xlane.f32.xlu0 %v3628_v11  ;;  %v11399_v52 = vld [vmem:[#allocation157_spill] sm:$0xff] }
 0x4fb   : > { %vm11400_vm6 = vcmp.lt.s32.totalorder %v11399_v52, 600 }
 0x4fe   : > { %3732 = vmin.xlane.f32.xlu1 %v3631_v42  ;;  %3730 = vmin.xlane.f32.xlu0 %v3630_v27  ;;  %v11401_v42 = vld [vmem:[#allocation156_spill] sm:$0xff] }
 0x4ff   : > { %vm11402_vm2 = vcmp.lt.s32.totalorder %v11401_v42, 600  ;;  %v3807_v42 = vld [vmem:[#allocation6 + $0xa8] sm:$0xff] }
 0x502   : > { %3736 = vmin.xlane.f32.xlu1 %v3633_v56  ;;  %3734 = vmin.xlane.f32.xlu0 %v3632_v59 }
 0x506   : > { %3740 = vmin.xlane.f32.xlu1 %v3635_v46  ;;  %3738 = vmin.xlane.f32.xlu0 %v3634_v47  ;;  %v3795_v46 = vld [vmem:[#allocation6 + $0x48] sm:$0xff]  ;;  %v3794_v47 = vld [vmem:[#allocation6 + $0x40] sm:$0xff] }
 0x50a   : > { %3744 = vmin.xlane.f32.xlu1 %v3637_v40  ;;  %3742 = vmin.xlane.f32.xlu0 %v3636_v20 }
 0x50e   : > { %3748 = vmin.xlane.f32.xlu1 %v3639_v54  ;;  %3746 = vmin.xlane.f32.xlu0 %v3638_v22  ;;  %v11403_v54 = vld [vmem:[#allocation159_spill] sm:$0xff] }
 0x512   : > { %3752 = vmin.xlane.f32.xlu1 %v3641_v21  ;;  %3750 = vmin.xlane.f32.xlu0 %v3640_v2  ;;  %v11405_v21 = vld [vmem:[#allocation158_spill] sm:$0xff] }
 0x516   : > { %3756 = vmin.xlane.f32.xlu1 %v3643_v0  ;;  %3754 = vmin.xlane.f32.xlu0 %v3642_v38 }
 0x51a   : > { %3760 = vmin.xlane.f32.xlu1 %v3645_v1  ;;  %3758 = vmin.xlane.f32.xlu0 %v3644_v35  ;;  %v3797_v1 = vld [vmem:[#allocation6 + $0x58] sm:$0xff]  ;;  %v3796_v35 = vld [vmem:[#allocation6 + $0x50] sm:$0xff] }
 0x51e   : > { %3764 = vmin.xlane.f32.xlu1 %v3647_v48  ;;  %3762 = vmin.xlane.f32.xlu0 %v3646_v17 }
 0x522   : > { %3768 = vmin.xlane.f32.xlu1 %v3649_v53  ;;  %3766 = vmin.xlane.f32.xlu0 %v3648_v31  ;;  %v11407_v53 = vld [vmem:[#allocation161_spill] sm:$0xff] }
 0x526   : > { %3772 = vmin.xlane.f32.xlu1 %v3651_v44  ;;  %3770 = vmin.xlane.f32.xlu0 %v3650_v41  ;;  %v11409_v44 = vld [vmem:[#allocation160_spill] sm:$0xff] }
 0x52a   : > { %3776 = vmin.xlane.f32.xlu1 %v3653_v45  ;;  %3774 = vmin.xlane.f32.xlu0 %v3652_v58 }
 0x52e   : > { %3780 = vmin.xlane.f32.xlu1 %v3655_v28  ;;  %3778 = vmin.xlane.f32.xlu0 %v3654_v39  ;;  %v3799_v28 = vld [vmem:[#allocation6 + $0x68] sm:$0xff]  ;;  %v3798_v39 = vld [vmem:[#allocation6 + $0x60] sm:$0xff] }
 0x532   : > { %3784 = vmin.xlane.f32.xlu1 %v3657_v55  ;;  %3782 = vmin.xlane.f32.xlu0 %v3656_v7 }
 0x53f   : > { %v3663_v23 = vpop.xlane.xlu1 %3662  ;;  %v3659_v33 = vpop.xlane.xlu0 %3658 }
 0x540   : > { %v3852_v16 = vsel %vm1383_vm3, %v3663_v23, 0.0  ;;  %v3850_v14 = vsel %vm1381_vm1, %v3659_v33, 0.0  ;;  %vm11396_vm1 = vcmp.lt.s32.totalorder %v11395_v50, 600  ;;  %vm11398_vm3 = vcmp.lt.s32.totalorder %v11397_v13, 600  ;;  %v11413_v23 = vld [vmem:[#allocation162_spill] sm:$0xff] }
 0x541   : > { %v3916_v62 = vadd.f32 %v3852_v16, %v3788_v30  ;;  %v3914_v18 = vadd.f32 %v3850_v14, %v3786_v63  ;;  %v11411_v30 = vld [vmem:[#allocation163_spill] sm:$0xff]  ;;  %v3800_v14 = vld [vmem:[#allocation6 + $0x70] sm:$0xff]  ;;  %v3805_v13 = vld [vmem:[#allocation6 + $0x98] sm:$0xff] }
 0x543   : > { %3980 = vst.msk [vmem:[#allocation6 + $0x10] sm:$0xff] %vm10629_vm9, %v3916_v62  ;;  %3978 = vst.msk [vmem:[#allocation6] sm:$0xff] %vm10629_vm9, %v3914_v18  ;;  %v3665_v5 = vpop.xlane.xlu1 %3664  ;;  %v3661_v24 = vpop.xlane.xlu0 %3660 }
 0x544   : > { %v3853_v6 = vsel %vm11392_vm4, %v3665_v5, 0.0  ;;  %v3851_v61 = vsel %vm11394_vm5, %v3661_v24, 0.0  ;;  %vm11404_vm4 = vcmp.lt.s32.totalorder %v11403_v54, 600  ;;  %vm11406_vm5 = vcmp.lt.s32.totalorder %v11405_v21, 600  ;;  %v11417_v5 = vld [vmem:[#allocation164_spill] sm:$0xff]  ;;  %v3809_v21 = vld [vmem:[#allocation6 + $0xb8] sm:$0xff] }
 0x545   : > { %v3917_v15 = vadd.f32 %v3853_v6, %v3789_v19  ;;  %v3915_v32 = vadd.f32 %v3851_v61, %v3787_v51  ;;  %v11415_v19 = vld [vmem:[#allocation165_spill] sm:$0xff]  ;;  %v3802_v61 = vld [vmem:[#allocation6 + $0x80] sm:$0xff] }
 0x547   : > { %3981 = vst.msk [vmem:[#allocation6 + $0x18] sm:$0xff] %vm10629_vm9, %v3917_v15  ;;  %3979 = vst.msk [vmem:[#allocation6 + $0x8] sm:$0xff] %vm10629_vm9, %v3915_v32  ;;  %v3669_v26 = vpop.xlane.xlu1 %3668  ;;  %v3667_v60 = vpop.xlane.xlu0 %3666 }
 0x548   : > { %v3855_v36 = vsel %vm11396_vm1, %v3669_v26, 0.0  ;;  %v3854_v43 = vsel %vm11398_vm3, %v3667_v60, 0.0  ;;  %vm11408_vm1 = vcmp.lt.s32.totalorder %v11407_v53, 600  ;;  %vm11410_vm3 = vcmp.lt.s32.totalorder %v11409_v44, 600  ;;  %v11421_v26 = vld [vmem:[#allocation168_spill] sm:$0xff] }
 0x549   : > { %v3919_v9 = vadd.f32 %v3855_v36, %v3791_v34  ;;  %v3918_v3 = vadd.f32 %v3854_v43, %v3790_v25  ;;  %v11419_v34 = vld [vmem:[#allocation169_spill] sm:$0xff]  ;;  %v3811_v44 = vld [vmem:[#allocation6 + $0xc8] sm:$0xff] }
 0x54a   : > { %v3804_v43 = vld [vmem:[#allocation6 + $0x90] sm:$0xff] }
 0x54b   : > { %3983 = vst.msk [vmem:[#allocation6 + $0x28] sm:$0xff] %vm10629_vm9, %v3919_v9  ;;  %3982 = vst.msk [vmem:[#allocation6 + $0x20] sm:$0xff] %vm10629_vm9, %v3918_v3  ;;  %v3673_v10 = vpop.xlane.xlu1 %3672  ;;  %v3671_v12 = vpop.xlane.xlu0 %3670 }
 0x54c   : > { %v3857_v11 = vsel %vm11400_vm6, %v3673_v10, 0.0  ;;  %v3856_v27 = vsel %vm11402_vm2, %v3671_v12, 0.0  ;;  %vm11412_vm6 = vcmp.lt.s32.totalorder %v11411_v30, 600  ;;  %vm11414_vm2 = vcmp.lt.s32.totalorder %v11413_v23, 600  ;;  %v11425_v10 = vld [vmem:[#allocation170_spill] sm:$0xff] }
 0x54d   : > { %v3921_v56 = vadd.f32 %v3857_v11, %v3793_v29  ;;  %v3920_v59 = vadd.f32 %v3856_v27, %v3792_v4  ;;  %v11423_v29 = vld [vmem:[#allocation171_spill] sm:$0xff]  ;;  %v3813_v23 = vld [vmem:[#allocation6 + $0xd8] sm:$0xff] }
 0x54e   : > { %v3806_v27 = vld [vmem:[#allocation6 + $0xa0] sm:$0xff] }
 0x54f   : > { %3985 = vst.msk [vmem:[#allocation6 + $0x38] sm:$0xff] %vm10629_vm9, %v3921_v56  ;;  %3984 = vst.msk [vmem:[#allocation6 + $0x30] sm:$0xff] %vm10629_vm9, %v3920_v59  ;;  %v3677_v40 = vpop.xlane.xlu1 %3676  ;;  %v3675_v20 = vpop.xlane.xlu0 %3674 }
 0x550   : > { %v3859_v22 = vsel %vm11404_vm4, %v3677_v40, 0.0  ;;  %v3858_v2 = vsel %vm11406_vm5, %v3675_v20, 0.0  ;;  %vm11416_vm4 = vcmp.lt.s32.totalorder %v11415_v19, 600  ;;  %vm11418_vm5 = vcmp.lt.s32.totalorder %v11417_v5, 600  ;;  %v11429_v40 = vld [vmem:[#allocation172_spill] sm:$0xff] }
 0x551   : > { %v3923_v0 = vadd.f32 %v3859_v22, %v3795_v46  ;;  %v3922_v38 = vadd.f32 %v3858_v2, %v3794_v47  ;;  %v11427_v46 = vld [vmem:[#allocation173_spill] sm:$0xff]  ;;  %v3815_v5 = vld [vmem:[#allocation6 + $0xe8] sm:$0xff] }
 0x552   : > { %v3808_v2 = vld [vmem:[#allocation6 + $0xb0] sm:$0xff] }
 0x553   : > { %3987 = vst.msk [vmem:[#allocation6 + $0x48] sm:$0xff] %vm10629_vm9, %v3923_v0  ;;  %3986 = vst.msk [vmem:[#allocation6 + $0x40] sm:$0xff] %vm10629_vm9, %v3922_v38  ;;  %v3681_v48 = vpop.xlane.xlu1 %3680  ;;  %v3679_v17 = vpop.xlane.xlu0 %3678 }
 0x554   : > { %v3861_v31 = vsel %vm11408_vm1, %v3681_v48, 0.0  ;;  %v3860_v41 = vsel %vm11410_vm3, %v3679_v17, 0.0  ;;  %vm11420_vm1 = vcmp.lt.s32.totalorder %v11419_v34, 600  ;;  %vm11422_vm3 = vcmp.lt.s32.totalorder %v11421_v26, 600  ;;  %v11433_v48 = vld [vmem:[#allocation174_spill] sm:$0xff] }
 0x555   : > { %v3925_v45 = vadd.f32 %v3861_v31, %v3797_v1  ;;  %v3924_v58 = vadd.f32 %v3860_v41, %v3796_v35  ;;  %v11431_v1 = vld [vmem:[#allocation175_spill] sm:$0xff]  ;;  %v3817_v26 = vld [vmem:[#allocation6 + $0xf8] sm:$0xff] }
 0x556   : > { %v3810_v41 = vld [vmem:[#allocation6 + $0xc0] sm:$0xff] }
 0x557   : > { %3989 = vst.msk [vmem:[#allocation6 + $0x58] sm:$0xff] %vm10629_vm9, %v3925_v45  ;;  %3988 = vst.msk [vmem:[#allocation6 + $0x50] sm:$0xff] %vm10629_vm9, %v3924_v58  ;;  %v3685_v55 = vpop.xlane.xlu1 %3684  ;;  %v3683_v7 = vpop.xlane.xlu0 %3682 }
 0x558   : > { %v3863_v63 = vsel %vm11412_vm6, %v3685_v55, 0.0  ;;  %v3862_v33 = vsel %vm11414_vm2, %v3683_v7, 0.0  ;;  %vm11424_vm6 = vcmp.lt.s32.totalorder %v11423_v29, 600  ;;  %vm11426_vm2 = vcmp.lt.s32.totalorder %v11425_v10, 600  ;;  %v11437_v55 = vld [vmem:[#allocation176_spill] sm:$0xff] }
 0x559   : > { %v3927_v8 = vadd.f32 %v3863_v63, %v3799_v28  ;;  %v3926_v16 = vadd.f32 %v3862_v33, %v3798_v39  ;;  %v11435_v28 = vld [vmem:[#allocation177_spill] sm:$0xff]  ;;  %v3819_v10 = vld [vmem:[#allocation6 + $0x108] sm:$0xff] }
 0x55a   : > { %v3812_v33 = vld [vmem:[#allocation6 + $0xd0] sm:$0xff] }
 0x55b   : > { %3991 = vst.msk [vmem:[#allocation6 + $0x68] sm:$0xff] %vm10629_vm9, %v3927_v8  ;;  %3990 = vst.msk [vmem:[#allocation6 + $0x60] sm:$0xff] %vm10629_vm9, %v3926_v16  ;;  %v3689_v62 = vpop.xlane.xlu1 %3688  ;;  %v3687_v18 = vpop.xlane.xlu0 %3686 }
 0x55c   : > { %v3865_v51 = vsel %vm11416_vm4, %v3689_v62, 0.0  ;;  %v3864_v24 = vsel %vm11418_vm5, %v3687_v18, 0.0  ;;  %vm11428_vm4 = vcmp.lt.s32.totalorder %v11427_v46, 600  ;;  %vm11430_vm5 = vcmp.lt.s32.totalorder %v11429_v40, 600  ;;  %v11441_v62 = vld [vmem:[#allocation178_spill] sm:$0xff] }
 0x55d   : > { %v3929_v37 = vadd.f32 %v3865_v51, %v3801_v49  ;;  %v3928_v6 = vadd.f32 %v3864_v24, %v3800_v14  ;;  %v11439_v49 = vld [vmem:[#allocation179_spill] sm:$0xff]  ;;  %v3821_v40 = vld [vmem:[#allocation6 + $0x118] sm:$0xff] }
 0x55e   : > { %v3814_v24 = vld [vmem:[#allocation6 + $0xe0] sm:$0xff] }
 0x55f   : > { %3993 = vst.msk [vmem:[#allocation6 + $0x78] sm:$0xff] %vm10629_vm9, %v3929_v37  ;;  %3992 = vst.msk [vmem:[#allocation6 + $0x70] sm:$0xff] %vm10629_vm9, %v3928_v6  ;;  %v3693_v15 = vpop.xlane.xlu1 %3692  ;;  %v3691_v32 = vpop.xlane.xlu0 %3690 }
 0x560   : > { %v3867_v25 = vsel %vm11420_vm1, %v3693_v15, 0.0  ;;  %v3866_v60 = vsel %vm11422_vm3, %v3691_v32, 0.0  ;;  %vm11432_vm1 = vcmp.lt.s32.totalorder %v11431_v1, 600  ;;  %vm11434_vm3 = vcmp.lt.s32.totalorder %v11433_v48, 600  ;;  %v11445_v15 = vld [vmem:[#allocation180_spill] sm:$0xff] }
 0x561   : > { %v3931_v50 = vadd.f32 %v3867_v25, %v3803_v57  ;;  %v3930_v36 = vadd.f32 %v3866_v60, %v3802_v61  ;;  %v11443_v57 = vld [vmem:[#allocation181_spill] sm:$0xff]  ;;  %v3823_v48 = vld [vmem:[#allocation6 + $0x128] sm:$0xff] }
 0x562   : > { %v3816_v60 = vld [vmem:[#allocation6 + $0xf0] sm:$0xff] }
 0x563   : > { %3995 = vst.msk [vmem:[#allocation6 + $0x88] sm:$0xff] %vm10629_vm9, %v3931_v50  ;;  %3994 = vst.msk [vmem:[#allocation6 + $0x80] sm:$0xff] %vm10629_vm9, %v3930_v36  ;;  %v3697_v9 = vpop.xlane.xlu1 %3696  ;;  %v3695_v3 = vpop.xlane.xlu0 %3694 }
 0x564   : > { %v3869_v4 = vsel %vm11424_vm6, %v3697_v9, 0.0  ;;  %v3868_v12 = vsel %vm11426_vm2, %v3695_v3, 0.0  ;;  %vm11436_vm6 = vcmp.lt.s32.totalorder %v11435_v28, 600  ;;  %vm11438_vm2 = vcmp.lt.s32.totalorder %v11437_v55, 600  ;;  %v11449_v9 = vld [vmem:[#allocation182_spill] sm:$0xff] }
 0x565   : > { %v3933_v52 = vadd.f32 %v3869_v4, %v3805_v13  ;;  %v3932_v11 = vadd.f32 %v3868_v12, %v3804_v43  ;;  %v11447_v13 = vld [vmem:[#allocation183_spill] sm:$0xff]  ;;  %v3825_v55 = vld [vmem:[#allocation6 + $0x138] sm:$0xff] }
 0x566   : > { %v3818_v12 = vld [vmem:[#allocation6 + $0x100] sm:$0xff] }
 0x567   : > { %3997 = vst.msk [vmem:[#allocation6 + $0x98] sm:$0xff] %vm10629_vm9, %v3933_v52  ;;  %3996 = vst.msk [vmem:[#allocation6 + $0x90] sm:$0xff] %vm10629_vm9, %v3932_v11  ;;  %v3701_v56 = vpop.xlane.xlu1 %3700  ;;  %v3699_v59 = vpop.xlane.xlu0 %3698 }
 0x568   : > { %v3871_v47 = vsel %vm11428_vm4, %v3701_v56, 0.0  ;;  %v3870_v20 = vsel %vm11430_vm5, %v3699_v59, 0.0  ;;  %vm11440_vm4 = vcmp.lt.s32.totalorder %v11439_v49, 600  ;;  %vm11442_vm5 = vcmp.lt.s32.totalorder %v11441_v62, 600  ;;  %v11453_v56 = vld [vmem:[#allocation186_spill] sm:$0xff]  ;;  %v3827_v62 = vld [vmem:[#allocation6 + $0x148] sm:$0xff] }
 0x569   : > { %v3935_v54 = vadd.f32 %v3871_v47, %v3807_v42  ;;  %v3934_v22 = vadd.f32 %v3870_v20, %v3806_v27  ;;  %v11451_v42 = vld [vmem:[#allocation187_spill] sm:$0xff]  ;;  %v3820_v20 = vld [vmem:[#allocation6 + $0x110] sm:$0xff] }
 0x56b   : > { %3999 = vst.msk [vmem:[#allocation6 + $0xa8] sm:$0xff] %vm10629_vm9, %v3935_v54  ;;  %3998 = vst.msk [vmem:[#allocation6 + $0xa0] sm:$0xff] %vm10629_vm9, %v3934_v22  ;;  %v3705_v0 = vpop.xlane.xlu1 %3704  ;;  %v3703_v38 = vpop.xlane.xlu0 %3702 }
 0x56c   : > { %v3873_v35 = vsel %vm11432_vm1, %v3705_v0, 0.0  ;;  %v3872_v17 = vsel %vm11434_vm3, %v3703_v38, 0.0  ;;  %vm11444_vm1 = vcmp.lt.s32.totalorder %v11443_v57, 600  ;;  %vm11446_vm3 = vcmp.lt.s32.totalorder %v11445_v15, 600  ;;  %v11457_v0 = vld [vmem:[#allocation188_spill] sm:$0xff]  ;;  %v3829_v15 = vld [vmem:[#allocation6 + $0x158] sm:$0xff] }
 0x56d   : > { %v3937_v53 = vadd.f32 %v3873_v35, %v3809_v21  ;;  %v3936_v31 = vadd.f32 %v3872_v17, %v3808_v2  ;;  %v11455_v21 = vld [vmem:[#allocation189_spill] sm:$0xff]  ;;  %v3822_v17 = vld [vmem:[#allocation6 + $0x120] sm:$0xff] }
 0x56f   : > { %4001 = vst.msk [vmem:[#allocation6 + $0xb8] sm:$0xff] %vm10629_vm9, %v3937_v53  ;;  %4000 = vst.msk [vmem:[#allocation6 + $0xb0] sm:$0xff] %vm10629_vm9, %v3936_v31  ;;  %v3709_v45 = vpop.xlane.xlu1 %3708  ;;  %v3707_v58 = vpop.xlane.xlu0 %3706 }
 0x570   : > { %v3875_v39 = vsel %vm11436_vm6, %v3709_v45, 0.0  ;;  %v3874_v7 = vsel %vm11438_vm2, %v3707_v58, 0.0  ;;  %vm11448_vm6 = vcmp.lt.s32.totalorder %v11447_v13, 600  ;;  %vm11450_vm2 = vcmp.lt.s32.totalorder %v11449_v9, 600  ;;  %v11461_v45 = vld [vmem:[#allocation190_spill] sm:$0xff]  ;;  %v3831_v9 = vld [vmem:[#allocation6 + $0x168] sm:$0xff] }
 0x571   : > { %v3939_v30 = vadd.f32 %v3875_v39, %v3811_v44  ;;  %v3938_v63 = vadd.f32 %v3874_v7, %v3810_v41  ;;  %v11459_v44 = vld [vmem:[#allocation191_spill] sm:$0xff]  ;;  %v3824_v7 = vld [vmem:[#allocation6 + $0x130] sm:$0xff] }
 0x573   : > { %4003 = vst.msk [vmem:[#allocation6 + $0xc8] sm:$0xff] %vm10629_vm9, %v3939_v30  ;;  %4002 = vst.msk [vmem:[#allocation6 + $0xc0] sm:$0xff] %vm10629_vm9, %v3938_v63  ;;  %v3713_v8 = vpop.xlane.xlu1 %3712  ;;  %v3711_v16 = vpop.xlane.xlu0 %3710 }
 0x574   : > { %v3877_v14 = vsel %vm11440_vm4, %v3713_v8, 0.0  ;;  %v3876_v18 = vsel %vm11442_vm5, %v3711_v16, 0.0  ;;  %vm11452_vm4 = vcmp.lt.s32.totalorder %v11451_v42, 600  ;;  %vm11454_vm5 = vcmp.lt.s32.totalorder %v11453_v56, 600  ;;  %v11465_v8 = vld [vmem:[#allocation192_spill] sm:$0xff]  ;;  %v3833_v56 = vld [vmem:[#allocation6 + $0x178] sm:$0xff] }
 0x575   : > { %v3941_v19 = vadd.f32 %v3877_v14, %v3813_v23  ;;  %v3940_v51 = vadd.f32 %v3876_v18, %v3812_v33  ;;  %v11463_v23 = vld [vmem:[#allocation193_spill] sm:$0xff]  ;;  %v3826_v18 = vld [vmem:[#allocation6 + $0x140] sm:$0xff] }
 0x577   : > { %4005 = vst.msk [vmem:[#allocation6 + $0xd8] sm:$0xff] %vm10629_vm9, %v3941_v19  ;;  %4004 = vst.msk [vmem:[#allocation6 + $0xd0] sm:$0xff] %vm10629_vm9, %v3940_v51  ;;  %v3717_v37 = vpop.xlane.xlu1 %3716  ;;  %v3715_v6 = vpop.xlane.xlu0 %3714 }
 0x578   : > { %v3879_v61 = vsel %vm11444_vm1, %v3717_v37, 0.0  ;;  %v3878_v32 = vsel %vm11446_vm3, %v3715_v6, 0.0  ;;  %vm11456_vm1 = vcmp.lt.s32.totalorder %v11455_v21, 600  ;;  %vm11458_vm3 = vcmp.lt.s32.totalorder %v11457_v0, 600  ;;  %v11469_v37 = vld [vmem:[#allocation194_spill] sm:$0xff]  ;;  %v3835_v0 = vld [vmem:[#allocation6 + $0x188] sm:$0xff] }
 0x579   : > { %v3943_v34 = vadd.f32 %v3879_v61, %v3815_v5  ;;  %v3942_v25 = vadd.f32 %v3878_v32, %v3814_v24  ;;  %v11467_v5 = vld [vmem:[#allocation195_spill] sm:$0xff]  ;;  %v3828_v32 = vld [vmem:[#allocation6 + $0x150] sm:$0xff] }
 0x57b   : > { %4007 = vst.msk [vmem:[#allocation6 + $0xe8] sm:$0xff] %vm10629_vm9, %v3943_v34  ;;  %4006 = vst.msk [vmem:[#allocation6 + $0xe0] sm:$0xff] %vm10629_vm9, %v3942_v25  ;;  %v3721_v50 = vpop.xlane.xlu1 %3720  ;;  %v3719_v36 = vpop.xlane.xlu0 %3718 }
 0x57c   : > { %v3881_v43 = vsel %vm11448_vm6, %v3721_v50, 0.0  ;;  %v3880_v3 = vsel %vm11450_vm2, %v3719_v36, 0.0  ;;  %vm11460_vm6 = vcmp.lt.s32.totalorder %v11459_v44, 600  ;;  %vm11462_vm2 = vcmp.lt.s32.totalorder %v11461_v45, 600  ;;  %v11473_v50 = vld [vmem:[#allocation196_spill] sm:$0xff]  ;;  %v3837_v45 = vld [vmem:[#allocation6 + $0x198] sm:$0xff] }
 0x57d   : > { %v3945_v29 = vadd.f32 %v3881_v43, %v3817_v26  ;;  %v3944_v4 = vadd.f32 %v3880_v3, %v3816_v60  ;;  %v11471_v26 = vld [vmem:[#allocation197_spill] sm:$0xff]  ;;  %v3830_v3 = vld [vmem:[#allocation6 + $0x160] sm:$0xff] }
 0x57f   : > { %4009 = vst.msk [vmem:[#allocation6 + $0xf8] sm:$0xff] %vm10629_vm9, %v3945_v29  ;;  %4008 = vst.msk [vmem:[#allocation6 + $0xf0] sm:$0xff] %vm10629_vm9, %v3944_v4  ;;  %v3725_v52 = vpop.xlane.xlu1 %3724  ;;  %v3723_v11 = vpop.xlane.xlu0 %3722 }
 0x580   : > { %v3883_v27 = vsel %vm11452_vm4, %v3725_v52, 0.0  ;;  %v3882_v59 = vsel %vm11454_vm5, %v3723_v11, 0.0  ;;  %vm11464_vm4 = vcmp.lt.s32.totalorder %v11463_v23, 600  ;;  %vm11466_vm5 = vcmp.lt.s32.totalorder %v11465_v8, 600  ;;  %v11477_v52 = vld [vmem:[#allocation198_spill] sm:$0xff]  ;;  %v3839_v8 = vld [vmem:[#allocation6 + $0x1a8] sm:$0xff] }
 0x581   : > { %v3947_v46 = vadd.f32 %v3883_v27, %v3819_v10  ;;  %v3946_v47 = vadd.f32 %v3882_v59, %v3818_v12  ;;  %v11475_v10 = vld [vmem:[#allocation199_spill] sm:$0xff]  ;;  %v3832_v59 = vld [vmem:[#allocation6 + $0x170] sm:$0xff] }
 0x583   : > { %4011 = vst.msk [vmem:[#allocation6 + $0x108] sm:$0xff] %vm10629_vm9, %v3947_v46  ;;  %4010 = vst.msk [vmem:[#allocation6 + $0x100] sm:$0xff] %vm10629_vm9, %v3946_v47  ;;  %v3729_v54 = vpop.xlane.xlu1 %3728  ;;  %v3727_v22 = vpop.xlane.xlu0 %3726 }
 0x584   : > { %v3885_v2 = vsel %vm11456_vm1, %v3729_v54, 0.0  ;;  %v3884_v38 = vsel %vm11458_vm3, %v3727_v22, 0.0  ;;  %vm11468_vm1 = vcmp.lt.s32.totalorder %v11467_v5, 600  ;;  %vm11470_vm3 = vcmp.lt.s32.totalorder %v11469_v37, 600  ;;  %v11481_v54 = vld [vmem:[#allocation200_spill] sm:$0xff]  ;;  %v3841_v37 = vld [vmem:[#allocation6 + $0x1b8] sm:$0xff] }
 0x585   : > { %v3949_v1 = vadd.f32 %v3885_v2, %v3821_v40  ;;  %v3948_v35 = vadd.f32 %v3884_v38, %v3820_v20  ;;  %v11479_v40 = vld [vmem:[#allocation201_spill] sm:$0xff]  ;;  %v3834_v38 = vld [vmem:[#allocation6 + $0x180] sm:$0xff] }
 0x587   : > { %4013 = vst.msk [vmem:[#allocation6 + $0x118] sm:$0xff] %vm10629_vm9, %v3949_v1  ;;  %4012 = vst.msk [vmem:[#allocation6 + $0x110] sm:$0xff] %vm10629_vm9, %v3948_v35  ;;  %v3733_v53 = vpop.xlane.xlu1 %3732  ;;  %v3731_v31 = vpop.xlane.xlu0 %3730 }
 0x588   : > { %v3887_v41 = vsel %vm11460_vm6, %v3733_v53, 0.0  ;;  %v3886_v58 = vsel %vm11462_vm2, %v3731_v31, 0.0  ;;  %vm11472_vm6 = vcmp.lt.s32.totalorder %v11471_v26, 600  ;;  %vm11474_vm2 = vcmp.lt.s32.totalorder %v11473_v50, 600  ;;  %v11485_v53 = vld [vmem:[#allocation204_spill] sm:$0xff] }
 0x589   : > { %v3951_v28 = vadd.f32 %v3887_v41, %v3823_v48  ;;  %v3950_v39 = vadd.f32 %v3886_v58, %v3822_v17  ;;  %v11483_v48 = vld [vmem:[#allocation205_spill] sm:$0xff]  ;;  %v3843_v50 = vld [vmem:[#allocation6 + $0x1c8] sm:$0xff] }
 0x58a   : > { %v3836_v58 = vld [vmem:[#allocation6 + $0x190] sm:$0xff] }
 0x58b   : > { %4015 = vst.msk [vmem:[#allocation6 + $0x128] sm:$0xff] %vm10629_vm9, %v3951_v28  ;;  %4014 = vst.msk [vmem:[#allocation6 + $0x120] sm:$0xff] %vm10629_vm9, %v3950_v39  ;;  %v3737_v30 = vpop.xlane.xlu1 %3736  ;;  %v3735_v63 = vpop.xlane.xlu0 %3734 }
 0x58c   : > { %v3889_v33 = vsel %vm11464_vm4, %v3737_v30, 0.0  ;;  %v3888_v16 = vsel %vm11466_vm5, %v3735_v63, 0.0  ;;  %vm11476_vm4 = vcmp.lt.s32.totalorder %v11475_v10, 600  ;;  %vm11478_vm5 = vcmp.lt.s32.totalorder %v11477_v52, 600  ;;  %v11489_v30 = vld [vmem:[#allocation206_spill] sm:$0xff] }
 0x58d   : > { %v3953_v49 = vadd.f32 %v3889_v33, %v3825_v55  ;;  %v3952_v14 = vadd.f32 %v3888_v16, %v3824_v7  ;;  %v11487_v55 = vld [vmem:[#allocation207_spill] sm:$0xff]  ;;  %v3845_v52 = vld [vmem:[#allocation6 + $0x1d8] sm:$0xff] }
 0x58e   : > { %v3838_v16 = vld [vmem:[#allocation6 + $0x1a0] sm:$0xff] }
 0x58f   : > { %4017 = vst.msk [vmem:[#allocation6 + $0x138] sm:$0xff] %vm10629_vm9, %v3953_v49  ;;  %4016 = vst.msk [vmem:[#allocation6 + $0x130] sm:$0xff] %vm10629_vm9, %v3952_v14  ;;  %v3741_v19 = vpop.xlane.xlu1 %3740  ;;  %v3739_v51 = vpop.xlane.xlu0 %3738 }
 0x590   : > { %v3891_v24 = vsel %vm11468_vm1, %v3741_v19, 0.0  ;;  %v3890_v6 = vsel %vm11470_vm3, %v3739_v51, 0.0  ;;  %vm11480_vm1 = vcmp.lt.s32.totalorder %v11479_v40, 600  ;;  %vm11482_vm3 = vcmp.lt.s32.totalorder %v11481_v54, 600  ;;  %v11493_v19 = vld [vmem:[#allocation208_spill] sm:$0xff] }
 0x591   : > { %v3955_v57 = vadd.f32 %v3891_v24, %v3827_v62  ;;  %v3954_v61 = vadd.f32 %v3890_v6, %v3826_v18  ;;  %v11491_v62 = vld [vmem:[#allocation209_spill] sm:$0xff]  ;;  %v3847_v54 = vld [vmem:[#allocation6 + $0x1e8] sm:$0xff] }
 0x592   : > { %v3840_v6 = vld [vmem:[#allocation6 + $0x1b0] sm:$0xff] }
 0x593   : > { %4019 = vst.msk [vmem:[#allocation6 + $0x148] sm:$0xff] %vm10629_vm9, %v3955_v57  ;;  %4018 = vst.msk [vmem:[#allocation6 + $0x140] sm:$0xff] %vm10629_vm9, %v3954_v61  ;;  %v3745_v34 = vpop.xlane.xlu1 %3744  ;;  %v3743_v25 = vpop.xlane.xlu0 %3742 }
 0x594   : > { %v3893_v60 = vsel %vm11472_vm6, %v3745_v34, 0.0  ;;  %v3892_v36 = vsel %vm11474_vm2, %v3743_v25, 0.0  ;;  %vm11484_vm6 = vcmp.lt.s32.totalorder %v11483_v48, 600  ;;  %vm11486_vm2 = vcmp.lt.s32.totalorder %v11485_v53, 600  ;;  %v3849_v53 = vld [vmem:[#allocation6 + $0x1f8] sm:$0xff] }
 0x595   : > { %v3957_v13 = vadd.f32 %v3893_v60, %v3829_v15  ;;  %v3956_v43 = vadd.f32 %v3892_v36, %v3828_v32  ;;  %v3842_v36 = vld [vmem:[#allocation6 + $0x1c0] sm:$0xff] }
 0x597   : > { %4021 = vst.msk [vmem:[#allocation6 + $0x158] sm:$0xff] %vm10629_vm9, %v3957_v13  ;;  %4020 = vst.msk [vmem:[#allocation6 + $0x150] sm:$0xff] %vm10629_vm9, %v3956_v43  ;;  %v3749_v29 = vpop.xlane.xlu1 %3748  ;;  %v3747_v4 = vpop.xlane.xlu0 %3746 }
 0x598   : > { %v3895_v12 = vsel %vm11476_vm4, %v3749_v29, 0.0  ;;  %v3894_v11 = vsel %vm11478_vm5, %v3747_v4, 0.0  ;;  %vm11488_vm4 = vcmp.lt.s32.totalorder %v11487_v55, 600  ;;  %vm11490_vm5 = vcmp.lt.s32.totalorder %v11489_v30, 600 }
 0x599   : > { %v3959_v42 = vadd.f32 %v3895_v12, %v3831_v9  ;;  %v3958_v27 = vadd.f32 %v3894_v11, %v3830_v3  ;;  %v3844_v11 = vld [vmem:[#allocation6 + $0x1d0] sm:$0xff] }
 0x59b   : > { %4023 = vst.msk [vmem:[#allocation6 + $0x168] sm:$0xff] %vm10629_vm9, %v3959_v42  ;;  %4022 = vst.msk [vmem:[#allocation6 + $0x160] sm:$0xff] %vm10629_vm9, %v3958_v27  ;;  %v3753_v46 = vpop.xlane.xlu1 %3752  ;;  %v3751_v47 = vpop.xlane.xlu0 %3750 }
 0x59c   : > { %v3897_v20 = vsel %vm11480_vm1, %v3753_v46, 0.0  ;;  %v3896_v22 = vsel %vm11482_vm3, %v3751_v47, 0.0  ;;  %vm11492_vm1 = vcmp.lt.s32.totalorder %v11491_v62, 600  ;;  %vm11494_vm3 = vcmp.lt.s32.totalorder %v11493_v19, 600 }
 0x59d   : > { %v3961_v21 = vadd.f32 %v3897_v20, %v3833_v56  ;;  %v3960_v2 = vadd.f32 %v3896_v22, %v3832_v59  ;;  %v3846_v22 = vld [vmem:[#allocation6 + $0x1e0] sm:$0xff] }
 0x59f   : > { %4025 = vst.msk [vmem:[#allocation6 + $0x178] sm:$0xff] %vm10629_vm9, %v3961_v21  ;;  %4024 = vst.msk [vmem:[#allocation6 + $0x170] sm:$0xff] %vm10629_vm9, %v3960_v2  ;;  %v3757_v1 = vpop.xlane.xlu1 %3756  ;;  %v3755_v35 = vpop.xlane.xlu0 %3754 }
 0x5a0   : > { %v3899_v17 = vsel %vm11484_vm6, %v3757_v1, 0.0  ;;  %v3898_v31 = vsel %vm11486_vm2, %v3755_v35, 0.0 }
 0x5a1   : > { %v3963_v44 = vadd.f32 %v3899_v17, %v3835_v0  ;;  %v3962_v41 = vadd.f32 %v3898_v31, %v3834_v38  ;;  %v3848_v31 = vld [vmem:[#allocation6 + $0x1f0] sm:$0xff] }
 0x5a3   : > { %4027 = vst.msk [vmem:[#allocation6 + $0x188] sm:$0xff] %vm10629_vm9, %v3963_v44  ;;  %4026 = vst.msk [vmem:[#allocation6 + $0x180] sm:$0xff] %vm10629_vm9, %v3962_v41  ;;  %v3761_v28 = vpop.xlane.xlu1 %3760  ;;  %v3759_v39 = vpop.xlane.xlu0 %3758 }
 0x5a4   : > { %v3901_v7 = vsel %vm11488_vm4, %v3761_v28, 0.0  ;;  %v3900_v63 = vsel %vm11490_vm5, %v3759_v39, 0.0  ;;  %v11504_v28 = vld [vmem:[#allocation146_spill] sm:$0xff] }
 0x5a5   : > { %v3965_v23 = vadd.f32 %v3901_v7, %v3837_v45  ;;  %v3964_v33 = vadd.f32 %v3900_v63, %v3836_v58 }
 0x5a7   : > { %4029 = vst.msk [vmem:[#allocation6 + $0x198] sm:$0xff] %vm10629_vm9, %v3965_v23  ;;  %4028 = vst.msk [vmem:[#allocation6 + $0x190] sm:$0xff] %vm10629_vm9, %v3964_v33  ;;  %v3765_v49 = vpop.xlane.xlu1 %3764  ;;  %v3763_v14 = vpop.xlane.xlu0 %3762 }
 0x5a8   : > { %v3903_v18 = vsel %vm11492_vm1, %v3765_v49, 0.0  ;;  %v3902_v51 = vsel %vm11494_vm3, %v3763_v14, 0.0 }
 0x5a9   : > { %v3967_v5 = vadd.f32 %v3903_v18, %v3839_v8  ;;  %v3966_v24 = vadd.f32 %v3902_v51, %v3838_v16 }
 0x5ab   : > { %4031 = vst.msk [vmem:[#allocation6 + $0x1a8] sm:$0xff] %vm10629_vm9, %v3967_v5  ;;  %4030 = vst.msk [vmem:[#allocation6 + $0x1a0] sm:$0xff] %vm10629_vm9, %v3966_v24  ;;  %v3769_v57 = vpop.xlane.xlu1 %3768  ;;  %v3767_v61 = vpop.xlane.xlu0 %3766 }
 0x5ac   : > { %v3905_v32 = vsel %vm1436_vm12, %v3769_v57, 0.0  ;;  %v3904_v25 = vsel %vm1435_vm11, %v3767_v61, 0.0  ;;  %vm11505_vm11 = vcmp.lt.s32.totalorder %v11504_v28, 600 }
 0x5ad   : > { %v3969_v26 = vadd.f32 %v3905_v32, %v3841_v37  ;;  %v3968_v60 = vadd.f32 %v3904_v25, %v3840_v6 }
 0x5af   : > { %4033 = vst.msk [vmem:[#allocation6 + $0x1b8] sm:$0xff] %vm10629_vm9, %v3969_v26  ;;  %4032 = vst.msk [vmem:[#allocation6 + $0x1b0] sm:$0xff] %vm10629_vm9, %v3968_v60  ;;  %v3773_v13 = vpop.xlane.xlu1 %3772  ;;  %v3771_v43 = vpop.xlane.xlu0 %3770 }
 0x5b0   : > { %v3907_v3 = vsel %vm1438_vm14, %v3773_v13, 0.0  ;;  %v3906_v4 = vsel %vm1437_vm13, %v3771_v43, 0.0 }
 0x5b1   : > { %v3971_v10 = vadd.f32 %v3907_v3, %v3843_v50  ;;  %v3970_v12 = vadd.f32 %v3906_v4, %v3842_v36 }
 0x5b3   : > { %4035 = vst.msk [vmem:[#allocation6 + $0x1c8] sm:$0xff] %vm10629_vm9, %v3971_v10  ;;  %4034 = vst.msk [vmem:[#allocation6 + $0x1c0] sm:$0xff] %vm10629_vm9, %v3970_v12  ;;  %v3777_v42 = vpop.xlane.xlu1 %3776  ;;  %v3775_v27 = vpop.xlane.xlu0 %3774 }
 0x5b4   : > { %v3909_v59 = vsel %vm1440_vm0, %v3777_v42, 0.0  ;;  %v3908_v47 = vsel %vm1439_vm15, %v3775_v27, 0.0 }
 0x5b5   : > { %v3973_v40 = vadd.f32 %v3909_v59, %v3845_v52  ;;  %v3972_v20 = vadd.f32 %v3908_v47, %v3844_v11 }
 0x5b7   : > { %4037 = vst.msk [vmem:[#allocation6 + $0x1d8] sm:$0xff] %vm10629_vm9, %v3973_v40  ;;  %4036 = vst.msk [vmem:[#allocation6 + $0x1d0] sm:$0xff] %vm10629_vm9, %v3972_v20  ;;  %v3781_v21 = vpop.xlane.xlu1 %3780  ;;  %v3779_v2 = vpop.xlane.xlu0 %3778 }
 0x5b8   : > { %v3911_v38 = vsel %vm1442_vm8, %v3781_v21, 0.0  ;;  %v3910_v35 = vsel %vm1441_vm7, %v3779_v2, 0.0 }
 0x5b9   : > { %v3975_v48 = vadd.f32 %v3911_v38, %v3847_v54  ;;  %v3974_v17 = vadd.f32 %v3910_v35, %v3846_v22 }
 0x5bb   : > { %4039 = vst.msk [vmem:[#allocation6 + $0x1e8] sm:$0xff] %vm10629_vm9, %v3975_v48  ;;  %4038 = vst.msk [vmem:[#allocation6 + $0x1e0] sm:$0xff] %vm10629_vm9, %v3974_v17  ;;  %v3785_v44 = vpop.xlane.xlu1 %3784  ;;  %v3783_v41 = vpop.xlane.xlu0 %3782  ;;  %4045 = sbr.rel (%p5788_p7) target bundleno = 2055 (0x807), region = 62 }
 0x5bc   : > { %v3913_v58 = vsel %vm1444_vm10, %v3785_v44, 0.0  ;;  %v3912_v39 = vsel %vm11505_vm11, %v3783_v41, 0.0 }
 0x5bd   : > { %v3977_v55 = vadd.f32 %v3913_v58, %v3849_v53  ;;  %v3976_v7 = vadd.f32 %v3912_v39, %v3848_v31 }
 0x5bf   : > { %4041 = vst.msk [vmem:[#allocation6 + $0x1f8] sm:$0xff] %vm10629_vm9, %v3977_v55  ;;  %4040 = vst.msk [vmem:[#allocation6 + $0x1f0] sm:$0xff] %vm10629_vm9, %v3976_v7 }
 0x5c0   : > { %v9346_v30 = vld [vmem:[%s10512_s3 + $0x8] sm:$0xff]  ;;  %v9351_v63 = vld [vmem:[%s10512_s3 + $0x10] sm:$0xff]  ;;  %v9356_v23 = vld [vmem:[%s10512_s3 + $0x18] sm:$0xff]  ;;  %vm4736_vm7 = vcmask 1044480   ;;  %vm10630_vm8 = vcmask 1042432   ;;  %vm10628_vm10 = vcmask 1041408  }
 0x5c1   : > { %v9361_v33 = vld [vmem:[%s10512_s3 + $0x20] sm:$0xff]  ;;  %v4603_v16 = vrot.slane %v9346_v30, 3  ;;  %v9372_v49 = vld [vmem:[%s10512_s3 + $0x28] sm:$0xff]  ;;  %v9377_v14 = vld [vmem:[%s10512_s3 + $0x30] sm:$0xff]  ;;  %v4604_v18 = vrot.slane %v9351_v63, 3  ;;  %v4605_v6 = vrot.slane %v9356_v23, 3 }
 0x5c2   : > { %v9366_v8 = vld [vmem:[%s10512_s3 + $0x40] sm:$0xff]  ;;  %v9382_v62 = vld [vmem:[%s10512_s3 + $0x48] sm:$0xff]  ;;  %v9388_v19 = vld [vmem:[%s10512_s3 + $0x50] sm:$0xff]  ;;  %v4606_v57 = vrot.slane %v9361_v33, 3  ;;  %v4607_v15 = vrot.slane %v9372_v49, 3  ;;  %v4608_v32 = vrot.slane %v9377_v14, 3 }
 0x5c3   : > { %v9393_v51 = vld [vmem:[%s10512_s3 + $0x58] sm:$0xff]  ;;  %v4739_v5 = vrot.slane %v9366_v8, 3  ;;  %v9399_v24 = vld [vmem:[%s10512_s3 + $0x60] sm:$0xff]  ;;  %v9404_v37 = vld [vmem:[%s10512_s3 + $0x68] sm:$0xff]  ;;  %v4741_v61 = vrot.slane %v9382_v62, 3  ;;  %v4743_v26 = vrot.slane %v9388_v19, 3  ;;  %v9433_v56 = vsub.f32 %v9346_v30, %v4603_v16 }
 0x5c4   : > { %v4745_v60 = vrot.slane %v9393_v51, 3  ;;  %v4747_v50 = vrot.slane %v9399_v24, 3  ;;  %v4749_v36 = vrot.slane %v9404_v37, 3  ;;  %v9424_v29 = vld [vmem:[%s10512_s3 + $0x38] sm:$0xff]  ;;  %v9436_v59 = vsub.f32 %v9351_v63, %v4604_v18 }
 0x5c5   : > { %v4740_v34 = vsel %vm4736_vm7, %v4603_v16, %v4739_v5  ;;  %v4742_v25 = vsel %vm4736_vm7, %v4604_v18, %v4741_v61  ;;  %v4744_v9 = vsel %vm4736_vm7, %v4605_v6, %v4743_v26  ;;  %v4892_v47 = vrot.slane %v9346_v30, 2 }
 0x5c6   : > { %v4759_v13 = vsub.f32 %v9346_v30, %v4740_v34  ;;  %v4760_v43 = vsub.f32 %v9351_v63, %v4742_v25  ;;  %v4746_v3 = vsel %vm4736_vm7, %v4606_v57, %v4745_v60  ;;  %v4748_v4 = vsel %vm4736_vm7, %v4607_v15, %v4747_v50 }
 0x5c7   : > { %v4750_v10 = vsel %vm4736_vm7, %v4608_v32, %v4749_v36  ;;  %v4761_v12 = vsub.f32 %v9356_v23, %v4744_v9  ;;  %v4762_v52 = vsub.f32 %v9361_v33, %v4746_v3  ;;  %v4763_v11 = vsub.f32 %v9372_v49, %v4748_v4 }
 0x5c8   : > { %v4764_v42 = vsub.f32 %v9377_v14, %v4750_v10  ;;  %v4766_v27 = vmul.f32 %v4759_v13, %v4759_v13  ;;  %v9438_v46 = vmul.f32 %v4760_v43, %v4760_v43  ;;  %v4737_v40 = vrot.slane %v9424_v29, 3 }
 0x5c9   : > { %v4768_v20 = vmul.f32 %v4761_v12, %v4761_v12  ;;  %v9442_v54 = vmul.f32 %v4762_v52, %v4762_v52  ;;  %v9444_v22 = vmul.f32 %v4763_v11, %v4763_v11  ;;  %v4893_v0 = vrot.slane %v9351_v63, 2 }
 0x5ca   : > { %v9446_v21 = vmul.f32 %v4764_v42, %v4764_v42  ;;  %v4780_v2 = vrot.slane %v4766_v27, 3  ;;  %v4894_v38 = vrot.slane %v9356_v23, 2  ;;  %v4619_v1 = vsub.f32 %v9356_v23, %v4605_v6 }
 0x5cb   : > { %v4895_v35 = vrot.slane %v9361_v33, 2  ;;  %v4896_v48 = vrot.slane %v9372_v49, 2  ;;  %v4897_v17 = vrot.slane %v9377_v14, 2  ;;  %v4620_v53 = vsub.f32 %v9361_v33, %v4606_v57 }
 0x5cc   : > { %v4621_v31 = vsub.f32 %v9372_v49, %v4607_v15  ;;  %v9457_v44 = vsub.f32 %v9377_v14, %v4608_v32  ;;  %v4781_v41 = vrot.slane %v9438_v46, 3  ;;  %v4782_v45 = vrot.slane %v4768_v20, 3 }
 0x5cd   : > { %v4783_v58 = vrot.slane %v9442_v54, 3  ;;  %v4784_v28 = vrot.slane %v9444_v22, 3  ;;  %v4906_v39 = vsub.f32 %v9346_v30, %v4892_v47  ;;  %v4785_v55 = vrot.slane %v9446_v21, 3 }
 0x5ce   : > { %11506 = vst [vmem:[#allocation254_spill] sm:$0xff] %v9457_v44  ;;  %v9465_v7 = vsel %vm10630_vm8, %v4780_v2, 0.0  ;;  %v4907_v16 = vsub.f32 %v9351_v63, %v4893_v0  ;;  %v4908_v18 = vsub.f32 %v9356_v23, %v4894_v38  ;;  %v4909_v5 = vsub.f32 %v9361_v33, %v4895_v35 }
 0x5cf   : > { %v4910_v6 = vsub.f32 %v9372_v49, %v4896_v48  ;;  %v4911_v57 = vsub.f32 %v9377_v14, %v4897_v17  ;;  %v4913_v61 = vsub.f32 %v9366_v8, %v4892_v47  ;;  %v4914_v15 = vsub.f32 %v9382_v62, %v4893_v0 }
 0x5d0   : > { %v4915_v32 = vsub.f32 %v9388_v19, %v4894_v38  ;;  %v4916_v34 = vsub.f32 %v9393_v51, %v4895_v35  ;;  %v4917_v25 = vsub.f32 %v9399_v24, %v4896_v48  ;;  %v4918_v26 = vsub.f32 %v9404_v37, %v4897_v17 }
 0x5d1   : > { %v4920_v60 = vmul.f32 %v4906_v39, %v4906_v39  ;;  %v4921_v50 = vmul.f32 %v4907_v16, %v4907_v16  ;;  %v4922_v36 = vmul.f32 %v4908_v18, %v4908_v18  ;;  %v4923_v13 = vmul.f32 %v4909_v5, %v4909_v5 }
 0x5d2   : > { %v4924_v43 = vmul.f32 %v4910_v6, %v4910_v6  ;;  %v4925_v9 = vmul.f32 %v4911_v57, %v4911_v57  ;;  %v4927_v3 = vmul.f32 %v4913_v61, %v4913_v61  ;;  %v4928_v4 = vmul.f32 %v4914_v15, %v4914_v15 }
 0x5d3   : > { %v4929_v10 = vmul.f32 %v4915_v32, %v4915_v32  ;;  %v4930_v12 = vmul.f32 %v4916_v34, %v4916_v34  ;;  %v4931_v52 = vmul.f32 %v4917_v25, %v4917_v25  ;;  %v4932_v11 = vmul.f32 %v4918_v26, %v4918_v26 }
 0x5d4   : > { %v4951_v42 = vrot.slane %v4920_v60, 6  ;;  %v4952_v27 = vrot.slane %v4927_v3, 6  ;;  %v4954_v46 = vrot.slane %v4921_v50, 6  ;;  %v4955_v47 = vrot.slane %v4928_v4, 6 }
 0x5d5   : > { %v4957_v20 = vrot.slane %v4922_v36, 6  ;;  %v4958_v54 = vrot.slane %v4929_v10, 6  ;;  %v4960_v22 = vrot.slane %v4923_v13, 6  ;;  %v4961_v2 = vrot.slane %v4930_v12, 6 }
 0x5d6   : > { %v4953_v21 = vsel %vm10628_vm10, %v4951_v42, %v4952_v27  ;;  %v4963_v0 = vrot.slane %v4924_v43, 6  ;;  %v4964_v38 = vrot.slane %v4931_v52, 6  ;;  %v4956_v35 = vsel %vm10628_vm10, %v4954_v46, %v4955_v47 }
 0x5d7   : > { %v4959_v48 = vsel %vm10628_vm10, %v4957_v20, %v4958_v54  ;;  %v4966_v17 = vrot.slane %v4925_v9, 6  ;;  %v4967_v39 = vrot.slane %v4932_v11, 6  ;;  %v9482_v16 = vsel %vm10630_vm8, %v4781_v41, 0.0 }
 0x5d8   : > { %v9485_v18 = vsel %vm10630_vm8, %v4782_v45, 0.0  ;;  %v9488_v5 = vsel %vm10628_vm10, %v4960_v22, %v4961_v2  ;;  %v9491_v6 = vsel %vm10628_vm10, %v4963_v0, %v4964_v38  ;;  %v9495_v57 = vmul.f32 %v9433_v56, %v9433_v56 }
 0x5d9   : > { %v9498_v61 = vsel %vm10630_vm8, %v4783_v58, 0.0  ;;  %v9501_v15 = vsel %vm10630_vm8, %v4784_v28, 0.0  ;;  %v9504_v41 = vsel %vm10628_vm10, %v4966_v17, %v4967_v39  ;;  %v9508_v45 = vmul.f32 %v9436_v59, %v9436_v59  ;;  %v4046_v58 = vld [vmem:[#allocation3] sm:$0xff] }
 0x5da   : > { %11507 = vst [vmem:[#allocation255_spill] sm:$0xff] %v9495_v57  ;;  %11508 = vst [vmem:[#allocation256_spill] sm:$0xff] %v9504_v41  ;;  %v9510_v32 = vmul.f32 %v4619_v1, %v4619_v1  ;;  %v9512_v34 = vmul.f32 %v4620_v53, %v4620_v53  ;;  %v9515_v56 = vsel %vm10630_vm8, %v4785_v55, 0.0  ;;  %v9517_v25 = vmul.f32 %v4621_v31, %v4621_v31  ;;  %v9529_v55 = vld [vmem:[%s10512_s3] sm:$0xff] }
 0x5db   : > { %11509 = vst [vmem:[#allocation257_spill] sm:$0xff] %v9508_v45  ;;  %v10621_v1 = vrot.slane %v9424_v29, 1  ;;  %v10619_v53 = vrot.slane %v9366_v8, 1  ;;  %v9533_v50 = vsel %vm10630_vm8, %v4953_v21, 0.0  ;;  %v10618_v36 = vrot.slane %v9382_v62, 1 }
 0x5dc   : > { %11510 = vst [vmem:[#allocation258_spill] sm:$0xff] %v9510_v32  ;;  %11511 = vst [vmem:[#allocation259_spill] sm:$0xff] %v9512_v34  ;;  %v10617_v13 = vrot.slane %v9388_v19, 1  ;;  %v9538_v43 = vsel %vm10630_vm8, %v4956_v35, 0.0  ;;  %v10616_v9 = vrot.slane %v9393_v51, 1  ;;  %v10615_v3 = vrot.slane %v9399_v24, 1 }
 0x5dd   : > { %11512 = vst [vmem:[#allocation260_spill] sm:$0xff] %v9517_v25  ;;  %11513 = vst [vmem:[#allocation261_spill] sm:$0xff] %v9533_v50  ;;  %v10614_v4 = vrot.slane %v9404_v37, 1  ;;  %v9546_v10 = vsub.f32 %v9529_v55, %v10621_v1  ;;  %v9551_v12 = vsub.f32 %v9346_v30, %v10619_v53  ;;  %v9556_v52 = vsub.f32 %v9351_v63, %v10618_v36 }
 0x5de   : > { %11514 = vst [vmem:[#allocation262_spill] sm:$0xff] %v9538_v43  ;;  %v9561_v11 = vsub.f32 %v9356_v23, %v10617_v13  ;;  %v9566_v42 = vsub.f32 %v9361_v33, %v10616_v9  ;;  %v9571_v27 = vsub.f32 %v9372_v49, %v10615_v3  ;;  %v10620_v47 = vrot.slane %v9529_v55, 3 }
 0x5df   : > { %v9576_v46 = vsub.f32 %v9377_v14, %v10614_v4  ;;  %v5263_v20 = vrot.slane %v9546_v10, 3  ;;  %v5264_v54 = vrot.slane %v9551_v12, 3  ;;  %v5265_v22 = vrot.slane %v9556_v52, 3 }
 0x5e0   : > { %v5266_v21 = vrot.slane %v9561_v11, 3  ;;  %v5267_v0 = vrot.slane %v9566_v42, 3  ;;  %v5268_v38 = vrot.slane %v9571_v27, 3  ;;  %v9592_v60 = vsel %vm10630_vm8, %v4959_v48, 0.0 }
 0x5e1   : > { %v5269_v35 = vrot.slane %v9576_v46, 3  ;;  %v5277_v17 = vsub.f32 %v9546_v10, %v5263_v20  ;;  %v5278_v39 = vsub.f32 %v9551_v12, %v5264_v54  ;;  %v5279_v31 = vsub.f32 %v9556_v52, %v5265_v22  ;;  %11515 = vst [vmem:[#allocation263_spill] sm:$0xff] %v9592_v60  ;;  %v4047_v54 = vld [vmem:[#allocation3 + $0x8] sm:$0xff] }
 0x5e2   : > { %v5280_v59 = vsub.f32 %v9561_v11, %v5266_v21  ;;  %v5281_v26 = vsub.f32 %v9566_v42, %v5267_v0  ;;  %v5282_v2 = vsub.f32 %v9571_v27, %v5268_v38  ;;  %v4738_v20 = vsel %vm4736_vm7, %v10620_v47, %v4737_v40  ;;  %v4048_v38 = vld [vmem:[#allocation3 + $0x10] sm:$0xff] }
 0x5e3   : > { %v5283_v28 = vsub.f32 %v9576_v46, %v5269_v35  ;;  %v5284_v4 = vand.u32 2147483647, %v5277_v17  ;;  %v5285_v3 = vand.u32 2147483647, %v5278_v39  ;;  %v5286_v9 = vand.u32 2147483647, %v5279_v31 }
 0x5e4   : > { %v5287_v22 = vand.u32 2147483647, %v5280_v59  ;;  %v5288_v21 = vand.u32 2147483647, %v5281_v26  ;;  %v4758_v0 = vsub.f32 %v9529_v55, %v4738_v20  ;;  %v5289_v13 = vand.u32 2147483647, %v5282_v2 }
 0x5e5   : > { %v5291_v35 = vsel %vm10630_vm8, %v5284_v4, 0.0  ;;  %v5292_v17 = vsel %vm10630_vm8, %v5285_v3, 0.0  ;;  %v5294_v31 = vsel %vm10630_vm8, %v5286_v9, 0.0  ;;  %v4049_v39 = vld [vmem:[#allocation3 + $0x18] sm:$0xff]  ;;  %v5290_v53 = vand.u32 2147483647, %v5283_v28 }
 0x5e6   : > { %v5293_v40 = vadd.f32 %v5292_v17, %v5291_v35  ;;  %v5296_v47 = vsel %vm10630_vm8, %v5287_v22, 0.0  ;;  %v5298_v59 = vsel %vm10630_vm8, %v5288_v21, 0.0  ;;  %v4765_v26 = vmul.f32 %v4758_v0, %v4758_v0 }
 0x5e7   : > { %v4891_v20 = vrot.slane %v9529_v55, 2  ;;  %v4050_v48 = vrot.slane %v4046_v58, 4  ;;  %v4056_v1 = vrot.slane %v4047_v54, 4  ;;  %v4062_v4 = vrot.slane %v4048_v38, 4 }
 0x5e8   : > { %v5295_v2 = vadd.f32 %v5294_v31, %v5293_v40  ;;  %v4068_v25 = vrot.slane %v4049_v39, 4  ;;  %v5300_v3 = vsel %vm10630_vm8, %v5289_v13, 0.0  ;;  %v4779_v21 = vrot.slane %v4765_v26, 3 }
 0x5e9   : > { %v4905_v9 = vsub.f32 %v9529_v55, %v4891_v20  ;;  %v4912_v36 = vsub.f32 %v9424_v29, %v4891_v20  ;;  %v4051_v28 = vmin.f32 %v4046_v58, %v4050_v48  ;;  %v4057_v17 = vmin.f32 %v4047_v54, %v4056_v1 }
 0x5ea   : > { %v5297_v35 = vadd.f32 %v5296_v47, %v5295_v2  ;;  %v4063_v22 = vmin.f32 %v4048_v38, %v4062_v4  ;;  %v4069_v34 = vmin.f32 %v4049_v39, %v4068_v25  ;;  %v5302_v31 = vsel %vm10630_vm8, %v5290_v53, 0.0 }
 0x5eb   : > { %v4919_v0 = vmul.f32 %v4905_v9, %v4905_v9  ;;  %v4926_v32 = vmul.f32 %v4912_v36, %v4912_v36  ;;  %v4052_v45 = vrot.slane %v4051_v28, 2  ;;  %v4058_v40 = vrot.slane %v4057_v17, 2  ;;  %v4593_v9 = vld [vmem:[%s10512_s3 + $0x98] sm:$0xff] }
 0x5ec   : > { %v5299_v57 = vadd.f32 %v5298_v59, %v5297_v35  ;;  %v4064_v44 = vrot.slane %v4063_v22, 2  ;;  %v4070_v50 = vrot.slane %v4069_v34, 2  ;;  %v11516_v47 = vlaneseq }
 0x5ed   : > { %v4948_v60 = vrot.slane %v4919_v0, 6  ;;  %v4949_v13 = vrot.slane %v4926_v32, 6  ;;  %v4053_v43 = vmin.f32 %v4051_v28, %v4052_v45  ;;  %v4059_v20 = vmin.f32 %v4057_v17, %v4058_v40  ;;  %v4588_v32 = vld [vmem:[%s10512_s3 + $0x70] sm:$0xff]  ;;  %v4594_v17 = vld [vmem:[%s10512_s3 + $0xa0] sm:$0xff] }
 0x5ee   : > { %v5301_v41 = vadd.f32 %v5300_v3, %v5299_v57  ;;  %v4065_v58 = vmin.f32 %v4063_v22, %v4064_v44  ;;  %v9616_v1 = vand.u32 127, %v11516_v47  ;;  %v9619_v25 = vsel %vm10630_vm8, %v4779_v21, 0.0  ;;  %v4592_v3 = vld [vmem:[%s10512_s3 + $0x90] sm:$0xff] }
 0x5ef   : > { %v9622_v36 = vsel %vm10628_vm10, %v4948_v60, %v4949_v13  ;;  %v4054_v54 = vrot.slane %v4053_v43, 1  ;;  %v4071_v53 = vmin.f32 %v4069_v34, %v4070_v50  ;;  %v4060_v48 = vrot.slane %v4059_v20, 1  ;;  %v4589_v34 = vld [vmem:[%s10512_s3 + $0x78] sm:$0xff] }
 0x5f0   : > { %v5303_v45 = vadd.f32 %v5302_v31, %v5301_v41  ;;  %v4066_v57 = vrot.slane %v4065_v58, 1  ;;  %vm10631_vm12 = vcmask 1040384   ;;  %v9629_v44 = vsel %vm10630_vm8, %v9488_v5, 0.0  ;;  %v4590_v41 = vld [vmem:[%s10512_s3 + $0x80] sm:$0xff]  ;;  %v4591_v5 = vld [vmem:[%s10512_s3 + $0x88] sm:$0xff] }
 0x5f1   : > { %v4055_v38 = vmin.f32 %v4053_v43, %v4054_v54  ;;  %v4072_v39 = vrot.slane %v4071_v53, 1  ;;  %v4113_v59 = vadd.s32 384, %v9616_v1  ;;  %v4061_v60 = vmin.f32 %v4059_v20, %v4060_v48 }
 0x5f2   : > { %5304 = vadd.xlane.f32.xlu1 %v5303_v45  ;;  %v4067_v50 = vmin.f32 %v4065_v58, %v4066_v57  ;;  %vm5213_vm13 = vcmask 1046528   ;;  %v5214_v43 = vrot.slane %v4588_v32, 1  ;;  %v4794_v26 = vrot.slane %v9619_v25, 4 }
 0x5f3   : > { %v4073_v2 = vmin.f32 %v4071_v53, %v4072_v39  ;;  %vm4118_vm14 = vcmp.lt.s32.totalorder %v4113_v59, 400  ;;  %v4124_v4 = vsel %vm10631_vm12, %v4055_v38, 0.0  ;;  %v4125_v28 = vsel %vm10631_vm12, %v4061_v60, 0.0 }
 0x5f4   : > { %v4127_v35 = vsel %vm10631_vm12, %v4067_v50, 0.0  ;;  %v11517_v22 = vrot.slane %v9424_v29, 1  ;;  %v5216_v0 = vrot.slane %v4589_v34, 1  ;;  %v4126_v40 = vadd.f32 %v4125_v28, %v4124_v4 }
 0x5f5   : > { %v4122_v31 = vsel %vm4118_vm14, %v4073_v2, 0.0  ;;  %v5218_v13 = vrot.slane %v4590_v41, 1  ;;  %v5220_v20 = vrot.slane %v4591_v5, 1  ;;  %v11518_v47 = vrot.slane %v9366_v8, 1 }
 0x5f6   : > { %v5215_v21 = vsel %vm5213_vm13, %v11517_v22, %v5214_v43  ;;  %v4129_v58 = vsel %vm10631_vm12, %v4122_v31, 0.0  ;;  %v5222_v53 = vrot.slane %v4592_v3, 1  ;;  %v5224_v32 = vrot.slane %v4593_v9, 1 }
 0x5f7   : > { %v5217_v54 = vsel %vm5213_vm13, %v11518_v47, %v5216_v0  ;;  %v4128_v45 = vadd.f32 %v4127_v35, %v4126_v40  ;;  %v11519_v48 = vrot.slane %v9382_v62, 1  ;;  %v11520_v38 = vrot.slane %v9388_v19, 1 }
 0x5f8   : > { %v5226_v59 = vrot.slane %v4594_v17, 1  ;;  %v11521_v34 = vrot.slane %v9393_v51, 1  ;;  %v11522_v50 = vrot.slane %v9399_v24, 1  ;;  %v9674_v5 = vsub.f32 %v9529_v55, %v5215_v21 }
 0x5f9   : > { %v5219_v57 = vsel %vm5213_vm13, %v11519_v48, %v5218_v13  ;;  %v5221_v39 = vsel %vm5213_vm13, %v11520_v38, %v5220_v20  ;;  %v9677_v2 = vsub.f32 %v9346_v30, %v5217_v54  ;;  %v4130_v4 = vadd.f32 %v4129_v58, %v4128_v45 }
 0x5fa   : > { %v5223_v60 = vsel %vm5213_vm13, %v11521_v34, %v5222_v53  ;;  %v5225_v41 = vsel %vm5213_vm13, %v11522_v50, %v5224_v32  ;;  %v11523_v3 = vrot.slane %v9404_v37, 1  ;;  %v9683_v28 = vsub.f32 %v9351_v63, %v5219_v57 }
 0x5fb   : > { %v9686_v35 = vsub.f32 %v9356_v23, %v5221_v39  ;;  %v9689_v17 = vsub.f32 %v9361_v33, %v5223_v60  ;;  %v9692_v22 = vsub.f32 %v9372_v49, %v5225_v41  ;;  %v9698_v21 = vsub.f32 %v9424_v29, %v5214_v43  ;;  %4131 = vadd.xlane.f32.xlu0 %v4130_v4 }
 0x5fc   : > { %v5227_v9 = vsel %vm5213_vm13, %v11523_v3, %v5226_v59  ;;  %v9701_v31 = vsub.f32 %v9366_v8, %v5216_v0  ;;  %v9704_v63 = vsub.f32 %v9382_v62, %v5218_v13  ;;  %v9707_v23 = vsub.f32 %v9388_v19, %v5220_v20 }
 0x5fd   : > { %v9695_v30 = vsub.f32 %v9377_v14, %v5227_v9  ;;  %v9710_v33 = vsub.f32 %v9393_v51, %v5222_v53  ;;  %v9713_v49 = vsub.f32 %v9399_v24, %v5224_v32  ;;  %v9716_v14 = vsub.f32 %v9404_v37, %v5226_v59 }
 0x5fe   : > { %v5413_v29 = vrot.slane %v9546_v10, 2  ;;  %v5414_v8 = vrot.slane %v9551_v12, 2  ;;  %v5415_v43 = vrot.slane %v9556_v52, 2  ;;  %v5416_v62 = vrot.slane %v9561_v11, 2 }
 0x5ff   : > { %v5417_v19 = vrot.slane %v9566_v42, 2  ;;  %v5418_v0 = vrot.slane %v9571_v27, 2  ;;  %v5419_v51 = vrot.slane %v9576_v46, 2  ;;  %v9742_v50 = vadd.f32 %v4794_v26, %v9619_v25 }
 0x600   : > { %v5427_v24 = vsub.f32 %v9674_v5, %v5413_v29  ;;  %v5428_v40 = vsub.f32 %v9677_v2, %v5414_v8  ;;  %v5434_v37 = vsub.f32 %v9698_v21, %v5413_v29  ;;  %v5429_v13 = vsub.f32 %v9683_v28, %v5415_v43 }
 0x601   : > { %v5430_v20 = vsub.f32 %v9686_v35, %v5416_v62  ;;  %v5431_v58 = vsub.f32 %v9689_v17, %v5417_v19  ;;  %v5432_v47 = vsub.f32 %v9692_v22, %v5418_v0  ;;  %v5433_v54 = vsub.f32 %v9695_v30, %v5419_v51 }
 0x602   : > { %v5435_v53 = vsub.f32 %v9701_v31, %v5414_v8  ;;  %v5436_v32 = vsub.f32 %v9704_v63, %v5415_v43  ;;  %v5437_v45 = vsub.f32 %v9707_v23, %v5416_v62  ;;  %v5438_v48 = vsub.f32 %v9710_v33, %v5417_v19 }
 0x603   : > { %v5439_v57 = vsub.f32 %v9713_v49, %v5418_v0  ;;  %v5440_v38 = vsub.f32 %v9716_v14, %v5419_v51  ;;  %v5441_v39 = vand.u32 2147483647, %v5427_v24  ;;  %v5442_v59 = vand.u32 2147483647, %v5428_v40 }
 0x604   : > { %v5443_v34 = vand.u32 2147483647, %v5429_v13  ;;  %v5444_v60 = vand.u32 2147483647, %v5430_v20  ;;  %v5445_v41 = vand.u32 2147483647, %v5431_v58 }
 0x605   : > { %v5446_v4 = vand.u32 2147483647, %v5432_v47  ;;  %v5447_v3 = vand.u32 2147483647, %v5433_v54  ;;  %v11524_v9 = vrot.slane %v9465_v7, 4  ;;  %v11525_v19 = vrot.slane %v9482_v16, 4 }
 0x606   : > { %v5448_v8 = vand.u32 2147483647, %v5434_v37  ;;  %v5449_v43 = vand.u32 2147483647, %v5435_v53  ;;  %v5450_v62 = vand.u32 2147483647, %v5436_v32 }
 0x607   : > { %v9747_v29 = vadd.f32 %v11524_v9, %v9465_v7  ;;  %v9752_v0 = vadd.f32 %v11525_v19, %v9482_v16  ;;  %v5451_v51 = vand.u32 2147483647, %v5437_v45  ;;  %v5452_v24 = vand.u32 2147483647, %v5438_v48 }
 0x608   : > { %v5453_v25 = vand.u32 2147483647, %v5439_v57  ;;  %v11526_v26 = vrot.slane %v9485_v18, 4  ;;  %v5454_v13 = vand.u32 2147483647, %v5440_v38  ;;  %v5469_v20 = vrot.slane %v5441_v39, 6 }
 0x609   : > { %v5470_v7 = vrot.slane %v5448_v8, 6  ;;  %v5472_v58 = vrot.slane %v5442_v59, 6  ;;  %v5473_v37 = vrot.slane %v5449_v43, 6  ;;  %v5475_v47 = vrot.slane %v5443_v34, 6  ;;  %v4074_v34 = vld [vmem:[#allocation4] sm:$0xff]  ;;  %v4075_v43 = vld [vmem:[#allocation4 + $0x8] sm:$0xff] }
 0x60a   : > { %v9757_v40 = vadd.f32 %v11526_v26, %v9485_v18  ;;  %v5476_v54 = vrot.slane %v5450_v62, 6  ;;  %v5478_v53 = vrot.slane %v5444_v60, 6  ;;  %v5479_v16 = vrot.slane %v5451_v51, 6  ;;  %v4077_v26 = vld [vmem:[#allocation4 + $0x18] sm:$0xff] }
 0x60b   : > { %v5471_v32 = vsel %vm10628_vm10, %v5469_v20, %v5470_v7  ;;  %v5481_v9 = vrot.slane %v5445_v41, 6  ;;  %v5482_v45 = vrot.slane %v5452_v24, 6  ;;  %v5474_v48 = vsel %vm10628_vm10, %v5472_v58, %v5473_v37  ;;  %v4076_v24 = vld [vmem:[#allocation4 + $0x10] sm:$0xff] }
 0x60c   : > { %v5477_v57 = vsel %vm10628_vm10, %v5475_v47, %v5476_v54  ;;  %v5484_v19 = vrot.slane %v5446_v4, 6  ;;  %v5485_v18 = vrot.slane %v5453_v25, 6  ;;  %v5480_v38 = vsel %vm10628_vm10, %v5478_v53, %v5479_v16  ;;  %v4078_v4 = vld [vmem:[#allocation4 + $0x20] sm:$0xff] }
 0x60d   : > { %v5483_v39 = vsel %vm10628_vm10, %v5481_v9, %v5482_v45  ;;  %v5487_v59 = vrot.slane %v5447_v3, 6  ;;  %v5488_v8 = vrot.slane %v5454_v13, 6  ;;  %v5497_v62 = vsel %vm10630_vm8, %v5471_v32, 0.0 }
 0x60e   : > { %v5486_v60 = vsel %vm10628_vm10, %v5484_v19, %v5485_v18  ;;  %v5498_v41 = vsel %vm10630_vm8, %v5474_v48, 0.0  ;;  %v5500_v51 = vsel %vm10630_vm8, %v5477_v57, 0.0  ;;  %v5502_v7 = vsel %vm10630_vm8, %v5480_v38, 0.0 }
 0x60f   : > { %v5489_v25 = vsel %vm10628_vm10, %v5487_v59, %v5488_v8  ;;  %v5499_v20 = vadd.f32 %v5498_v41, %v5497_v62  ;;  %v5504_v3 = vsel %vm10630_vm8, %v5483_v39, 0.0  ;;  %v5506_v13 = vsel %vm10630_vm8, %v5486_v60, 0.0 }
 0x610   : > { %v5508_v58 = vsel %vm10630_vm8, %v5489_v25, 0.0  ;;  %v4079_v37 = vrot.slane %v4074_v34, 4  ;;  %v4085_v47 = vrot.slane %v4075_v43, 4  ;;  %v4091_v53 = vrot.slane %v4076_v24, 4 }
 0x611   : > { %v5501_v54 = vadd.f32 %v5500_v51, %v5499_v20  ;;  %v4097_v32 = vrot.slane %v4077_v26, 4  ;;  %v4103_v16 = vrot.slane %v4078_v4, 4  ;;  %v4114_v48 = vadd.s32 512, %v9616_v1 }
 0x612   : > { %v4080_v9 = vmin.f32 %v4074_v34, %v4079_v37  ;;  %v4086_v45 = vmin.f32 %v4075_v43, %v4085_v47  ;;  %v4796_v57 = vrot.slane %v9742_v50, 2  ;;  %v4092_v18 = vmin.f32 %v4076_v24, %v4091_v53 }
 0x613   : > { %v5503_v19 = vadd.f32 %v5502_v7, %v5501_v54  ;;  %v4098_v38 = vmin.f32 %v4077_v26, %v4097_v32  ;;  %v4104_v39 = vmin.f32 %v4078_v4, %v4103_v16  ;;  %vm4144_vm15 = vcmp.lt.s32.totalorder %v4114_v48, 600 }
 0x614   : > { %v4081_v59 = vrot.slane %v4080_v9, 2  ;;  %v4087_v8 = vrot.slane %v4086_v45, 2  ;;  %v4797_v60 = vadd.f32 %v4796_v57, %v9742_v50  ;;  %v4093_v41 = vrot.slane %v4092_v18, 2 }
 0x615   : > { %v5505_v62 = vadd.f32 %v5504_v3, %v5503_v19  ;;  %v4099_v51 = vrot.slane %v4098_v38, 2  ;;  %v4105_v25 = vrot.slane %v4104_v39, 2  ;;  %v4803_v1 = vrot.slane %v9747_v29, 2 }
 0x616   : > { %v4082_v20 = vmin.f32 %v4080_v9, %v4081_v59  ;;  %v4088_v34 = vmin.f32 %v4086_v45, %v4087_v8  ;;  %v4798_v43 = vrot.slane %v4797_v60, 1  ;;  %v4094_v47 = vmin.f32 %v4092_v18, %v4093_v41 }
 0x617   : > { %v5507_v37 = vadd.f32 %v5506_v13, %v5505_v62  ;;  %v4100_v7 = vmin.f32 %v4098_v38, %v4099_v51  ;;  %v4106_v24 = vmin.f32 %v4104_v39, %v4105_v25  ;;  %v4804_v53 = vadd.f32 %v4803_v1, %v9747_v29 }
 0x618   : > { %v4083_v26 = vrot.slane %v4082_v20, 1  ;;  %v4089_v4 = vrot.slane %v4088_v34, 1  ;;  %v9777_v54 = vadd.f32 %v4798_v43, %v4797_v60  ;;  %v4095_v3 = vrot.slane %v4094_v47, 1 }
 0x619   : > { %v5509_v50 = vadd.f32 %v5508_v58, %v5507_v37  ;;  %v4101_v32 = vrot.slane %v4100_v7, 1  ;;  %v4107_v16 = vrot.slane %v4106_v24, 1  ;;  %v4805_v45 = vrot.slane %v4804_v53, 1 }
 0x61a   : > { %v4084_v57 = vmin.f32 %v4082_v20, %v4083_v26  ;;  %v4090_v9 = vmin.f32 %v4088_v34, %v4089_v4  ;;  %v4810_v19 = vrot.slane %v9752_v0, 2  ;;  %v4096_v13 = vmin.f32 %v4094_v47, %v4095_v3  ;;  %v11530_v3 = vld [vmem:[#allocation256_spill] sm:$0xff] }
 0x61b   : > { %5510 = vadd.xlane.f32.xlu1 %v5509_v50  ;;  %v4102_v18 = vmin.f32 %v4100_v7, %v4101_v32  ;;  %v4108_v38 = vmin.f32 %v4106_v24, %v4107_v16  ;;  %v4817_v39 = vrot.slane %v9757_v40, 2  ;;  %v4976_v59 = vsel %vm10630_vm8, %v9622_v36, 0.0 }
 0x61c   : > { %v4150_v29 = vsel %vm10631_vm12, %v4084_v57, 0.0  ;;  %v4151_v58 = vsel %vm10631_vm12, %v4090_v9, 0.0  ;;  %v4811_v8 = vadd.f32 %v4810_v19, %v9752_v0  ;;  %v4153_v41 = vsel %vm10631_vm12, %v4096_v13, 0.0 }
 0x61d   : > { %v4149_v60 = vsel %vm4144_vm15, %v4108_v38, 0.0  ;;  %v4152_v62 = vadd.f32 %v4151_v58, %v4150_v29  ;;  %v9789_v51 = vadd.f32 %v4805_v45, %v4804_v53  ;;  %v4155_v25 = vsel %vm10631_vm12, %v4102_v18, 0.0 }
 0x61e   : > { %v4812_v20 = vrot.slane %v4811_v8, 1  ;;  %v4818_v34 = vadd.f32 %v4817_v39, %v9757_v40  ;;  %v11527_v36 = vrot.slane %v9498_v61, 4  ;;  %v11528_v0 = vrot.slane %v9501_v15, 4 }
 0x61f   : > { %v4154_v1 = vadd.f32 %v4153_v41, %v4152_v62  ;;  %v11529_v37 = vrot.slane %v9515_v56, 4  ;;  %5858 = vrsqrt.f32 %v9777_v54  ;;  %v4157_v7 = vsel %vm10631_vm12, %v4149_v60, 0.0  ;;  %v11534_v41 = vld [vmem:[#allocation262_spill] sm:$0xff] }
 0x620   : > { %v4823_v43 = vadd.f32 %v11527_v36, %v9498_v61  ;;  %v4830_v48 = vadd.f32 %v11528_v0, %v9501_v15  ;;  %v9804_v24 = vadd.f32 %v4812_v20, %v4811_v8  ;;  %v4819_v40 = vrot.slane %v4818_v34, 1  ;;  %v11532_v8 = vld [vmem:[#allocation261_spill] sm:$0xff]  ;;  %v11536_v36 = vld [vmem:[#allocation263_spill] sm:$0xff] }
 0x621   : > { %v4837_v47 = vadd.f32 %v11529_v37, %v9515_v56  ;;  %v5011_v61 = vsel %vm10630_vm8, %v9491_v6, 0.0  ;;  %v4156_v4 = vadd.f32 %v4155_v25, %v4154_v1  ;;  %v5018_v15 = vsel %vm10630_vm8, %v11530_v3, 0.0  ;;  %v11538_v37 = vld [vmem:[#allocation254_spill] sm:$0xff] }
 0x622   : > { %v4824_v26 = vrot.slane %v4823_v43, 2  ;;  %v4831_v53 = vrot.slane %v4830_v48, 2  ;;  %v9810_v32 = vadd.f32 %v4819_v40, %v4818_v34  ;;  %5860 = vrsqrt.f32 %v9789_v51 }
 0x623   : > { %v4838_v50 = vrot.slane %v4837_v47, 2  ;;  %v4977_v16 = vrot.slane %v4976_v59, 4  ;;  %v4158_v57 = vadd.f32 %v4157_v7, %v4156_v4  ;;  %v5005_v19 = vrot.slane %v9629_v44, 4 }
 0x624   : > { %v4825_v56 = vadd.f32 %v4824_v26, %v4823_v43  ;;  %v4832_v9 = vadd.f32 %v4831_v53, %v4830_v48  ;;  %v5012_v13 = vrot.slane %v5011_v61, 4  ;;  %5862 = vrsqrt.f32 %v9804_v24 }
 0x625   : > { %v4839_v45 = vadd.f32 %v4838_v50, %v4837_v47  ;;  %v5019_v6 = vrot.slane %v5018_v15, 4  ;;  %v11531_v38 = vrot.slane %v9529_v55, 3  ;;  %4159 = vadd.xlane.f32.xlu0 %v4158_v57  ;;  %v11533_v60 = vrot.slane %v11532_v8, 4 }
 0x626   : > { %v4826_v18 = vrot.slane %v4825_v56, 1  ;;  %v4833_v29 = vrot.slane %v4832_v9, 1  ;;  %v11535_v25 = vrot.slane %v11534_v41, 4  ;;  %5864 = vrsqrt.f32 %v9810_v32 }
 0x627   : > { %v4616_v39 = vsub.f32 %v9529_v55, %v11531_v38  ;;  %v4840_v58 = vrot.slane %v4839_v45, 1  ;;  %v4985_v62 = vadd.f32 %v11533_v60, %v11532_v8  ;;  %v11537_v43 = vrot.slane %v11536_v36, 4 }
 0x628   : > { %v4992_v20 = vadd.f32 %v11535_v25, %v11534_v41  ;;  %v9824_v34 = vadd.f32 %v4826_v18, %v4825_v56  ;;  %v4978_v55 = vadd.f32 %v4977_v16, %v4976_v59  ;;  %v9830_v0 = vadd.f32 %v4833_v29, %v4832_v9 }
 0x629   : > { %v4999_v1 = vadd.f32 %v11537_v43, %v11536_v36  ;;  %v9832_v48 = vadd.f32 %v4840_v58, %v4839_v45  ;;  %v9836_v47 = vmul.f32 %v11538_v37, %v11538_v37  ;;  %v5006_v7 = vadd.f32 %v5005_v19, %v9629_v44 }
 0x62a   : > { %v5013_v40 = vadd.f32 %v5012_v13, %v5011_v61  ;;  %5866 = vrsqrt.f32 %v9824_v34  ;;  %v5020_v26 = vadd.f32 %v5019_v6, %v5018_v15  ;;  %v9840_v4 = vmul.f32 %v4616_v39, %v4616_v39 }
 0x62b   : > { %vm4844_vm0 = vcmp.eq.f32.partialorder %v9777_v54, inf  ;;  %5868 = vrsqrt.f32 %v9830_v0  ;;  %v4847_v59 = vand.u32 2147483648, %v9777_v54  ;;  %vm4851_vm6 = vcmp.eq.f32.partialorder %v9789_v51, inf }
 0x62c   : > { %v4854_v53 = vand.u32 2147483648, %v9789_v51  ;;  %5870 = vrsqrt.f32 %v9832_v48  ;;  %vm4846_vm2 = vcmp.eq.f32.partialorder %v9777_v54, 0.0  ;;  %v4979_v44 = vrot.slane %v4978_v55, 2  ;;  %v5859_v15 = vpop.eup %5858 }
 0x62d   : > { %v4986_v61 = vrot.slane %v4985_v62, 2  ;;  %v4993_v50 = vrot.slane %v4992_v20, 2  ;;  %v5000_v3 = vrot.slane %v4999_v1, 2  ;;  %vm4853_vm4 = vcmp.eq.f32.partialorder %v9789_v51, 0.0 }
 0x62e   : > { %vm4858_vm5 = vcmp.eq.f32.partialorder %v9804_v24, inf  ;;  %v4861_v56 = vand.u32 2147483648, %v9804_v24  ;;  %v5007_v16 = vrot.slane %v5006_v7, 2  ;;  %v5014_v57 = vrot.slane %v5013_v40, 2 }
 0x62f   : > { %vm4865_vm1 = vcmp.eq.f32.partialorder %v9810_v32, inf  ;;  %v4980_v9 = vadd.f32 %v4979_v44, %v4978_v55  ;;  %v4987_v45 = vadd.f32 %v4986_v61, %v4985_v62  ;;  %v4994_v19 = vadd.f32 %v4993_v50, %v4992_v20  ;;  %v5861_v39 = vpop.eup %5860 }
 0x630   : > { %v5021_v13 = vrot.slane %v5020_v26, 2  ;;  %v4868_v18 = vand.u32 2147483648, %v9810_v32  ;;  %vm4872_vm3 = vcmp.eq.f32.partialorder %v9824_v34, inf  ;;  %v5001_v6 = vadd.f32 %v5000_v3, %v4999_v1 }
 0x631   : > { %v5008_v38 = vadd.f32 %v5007_v16, %v5006_v7  ;;  %v4843_v29 = vmul.f32 %v5859_v15, %v9777_v54  ;;  %vm4860_vm11 = vcmp.eq.f32.partialorder %v9804_v24, 0.0  ;;  %v4981_v58 = vrot.slane %v4980_v9, 1  ;;  %v5863_v20 = vpop.eup %5862 }
 0x632   : > { %v4988_v8 = vrot.slane %v4987_v45, 1  ;;  %v4995_v60 = vrot.slane %v4994_v19, 1  ;;  %v4850_v41 = vmul.f32 %v5861_v39, %v9789_v51  ;;  %vm4867_vm13 = vcmp.eq.f32.partialorder %v9810_v32, 0.0 }
 0x633   : > { %v4875_v62 = vand.u32 2147483648, %v9824_v34  ;;  %vm4879_vm14 = vcmp.eq.f32.partialorder %v9830_v0, inf  ;;  %v5015_v25 = vadd.f32 %v5014_v57, %v5013_v40  ;;  %vm4874_vm15 = vcmp.eq.f32.partialorder %v9824_v34, 0.0  ;;  %v5865_v44 = vpop.eup %5864 }
 0x634   : > { %v9862_v36 = vadd.f32 %v4981_v58, %v4980_v9  ;;  %v9864_v43 = vadd.f32 %v4988_v8, %v4987_v45  ;;  %v5002_v1 = vrot.slane %v5001_v6, 1  ;;  %v5022_v55 = vadd.f32 %v5021_v13, %v5020_v26 }
 0x635   : > { %vm4881_vm10 = vcmp.eq.f32.partialorder %v9830_v0, 0.0  ;;  %v4882_v37 = vand.u32 2147483648, %v9830_v0  ;;  %vm4886_vm9 = vcmp.eq.f32.partialorder %v9832_v48, inf  ;;  %v5009_v7 = vrot.slane %v5008_v38, 1 }
 0x636   : > { %v4845_v40 = vsel %vm4844_vm0, %v9777_v54, %v4843_v29  ;;  %v4857_v61 = vmul.f32 %v5863_v20, %v9804_v24  ;;  %v9873_v50 = vadd.f32 %v4995_v60, %v4994_v19  ;;  %5872 = vrsqrt.f32 %v9862_v36 }
 0x637   : > { %v4852_v26 = vsel %vm4851_vm6, %v9789_v51, %v4850_v41  ;;  %v4864_v3 = vmul.f32 %v5865_v44, %v9810_v32  ;;  %vm4888_vm8 = vcmp.eq.f32.partialorder %v9832_v48, 0.0  ;;  %v5016_v15 = vrot.slane %v5015_v25, 1  ;;  %v5867_v16 = vpop.eup %5866 }
 0x638   : > { %v4889_v57 = vand.u32 2147483648, %v9832_v48  ;;  %v9882_v9 = vadd.f32 %v5002_v1, %v5001_v6  ;;  %v5023_v45 = vrot.slane %v5022_v55, 1  ;;  %5874 = vrsqrt.f32 %v9864_v43  ;;  %v5869_v19 = vpop.eup %5868 }
 0x639   : > { %v9887_v13 = vsel %vm4846_vm2, %v4847_v59, %v4845_v40  ;;  %v4871_v39 = vmul.f32 %v5867_v16, %v9824_v34  ;;  %v9890_v29 = vadd.f32 %v5009_v7, %v5008_v38  ;;  %v5327_v58 = vrot.slane %v9674_v5, 3  ;;  %v5871_v8 = vpop.eup %5870 }
 0x63a   : > { %v9897_v6 = vsel %vm4853_vm4, %v4854_v53, %v4852_v26  ;;  %v4859_v60 = vsel %vm4858_vm5, %v9804_v24, %v4857_v61  ;;  %v4878_v54 = vmul.f32 %v5869_v19, %v9830_v0  ;;  %5876 = vrsqrt.f32 %v9873_v50 }
 0x63b   : > { %v4866_v59 = vsel %vm4865_vm1, %v9810_v32, %v4864_v3  ;;  %v4885_v5 = vmul.f32 %v5871_v8, %v9832_v48  ;;  %v9908_v38 = vadd.f32 %v5016_v15, %v5015_v25  ;;  %vm5027_vm0 = vcmp.eq.f32.partialorder %v9862_v36, inf }
 0x63c   : > { %v4873_v51 = vsel %vm4872_vm3, %v9824_v34, %v4871_v39  ;;  %v4880_v53 = vsel %vm4879_vm14, %v9830_v0, %v4878_v54  ;;  %v9917_v41 = vadd.f32 %v5023_v45, %v5022_v55  ;;  %vm5029_vm6 = vcmp.eq.f32.partialorder %v9862_v36, 0.0 }
 0x63d   : > { %5878 = vrsqrt.f32 %v9882_v9  ;;  %v9925_v25 = vsel %vm4860_vm11, %v4861_v56, %v4859_v60  ;;  %v4887_v20 = vsel %vm4886_vm9, %v9832_v48, %v4885_v5  ;;  %v5030_v1 = vand.u32 2147483648, %v9862_v36 }
 0x63e   : > { %vm5034_vm2 = vcmp.eq.f32.partialorder %v9864_v43, inf  ;;  %v9936_v55 = vsel %vm4867_vm13, %v4868_v18, %v4866_v59  ;;  %vm5036_vm4 = vcmp.eq.f32.partialorder %v9864_v43, 0.0  ;;  %v5037_v24 = vand.u32 2147483648, %v9864_v43 }
 0x63f   : > { %5880 = vrsqrt.f32 %v9890_v29  ;;  %v9943_v56 = vsel %vm4874_vm15, %v4875_v62, %v4873_v51  ;;  %v9947_v7 = vsel %vm4881_vm10, %v4882_v37, %v4880_v53  ;;  %vm5041_vm9 = vcmp.eq.f32.partialorder %v9873_v50, inf }
 0x640   : > { %v5044_v32 = vand.u32 2147483648, %v9873_v50  ;;  %5882 = vrsqrt.f32 %v9908_v38  ;;  %v9954_v18 = vsel %vm4888_vm8, %v4889_v57, %v4887_v20  ;;  %vm5043_vm5 = vcmp.eq.f32.partialorder %v9873_v50, 0.0 }
 0x641   : > { %v5051_v34 = vand.u32 2147483648, %v9882_v9  ;;  %v5058_v62 = vand.u32 2147483648, %v9890_v29  ;;  %5884 = vrsqrt.f32 %v9917_v41  ;;  %vm5048_vm10 = vcmp.eq.f32.partialorder %v9882_v9, inf }
 0x642   : > { %v5065_v0 = vand.u32 2147483648, %v9908_v38  ;;  %v5072_v37 = vand.u32 2147483648, %v9917_v41  ;;  %v5328_v44 = vrot.slane %v9698_v21, 3  ;;  %v5330_v48 = vrot.slane %v9677_v2, 3 }
 0x643   : > { %vm5050_vm8 = vcmp.eq.f32.partialorder %v9882_v9, 0.0  ;;  %v5331_v40 = vrot.slane %v9701_v31, 3  ;;  %v5333_v61 = vrot.slane %v9683_v28, 3  ;;  %v5334_v26 = vrot.slane %v9704_v63, 3  ;;  %v5873_v15 = vpop.eup %5872 }
 0x644   : > { %v5336_v3 = vrot.slane %v9686_v35, 3  ;;  %vm5055_vm1 = vcmp.eq.f32.partialorder %v9890_v29, inf  ;;  %v5329_v16 = vsel %vm4736_vm7, %v5327_v58, %v5328_v44  ;;  %v5337_v57 = vrot.slane %v9707_v23, 3 }
 0x645   : > { %v5339_v21 = vrot.slane %v9689_v17, 3  ;;  %v5340_v2 = vrot.slane %v9710_v33, 3  ;;  %v5026_v45 = vmul.f32 %v5873_v15, %v9862_v36  ;;  %vm5057_vm3 = vcmp.eq.f32.partialorder %v9890_v29, 0.0  ;;  %v5875_v63 = vpop.eup %5874 }
 0x646   : > { %vm5062_vm11 = vcmp.eq.f32.partialorder %v9908_v38, inf  ;;  %v5332_v28 = vsel %vm4736_vm7, %v5330_v48, %v5331_v40  ;;  %v5335_v35 = vsel %vm4736_vm7, %v5333_v61, %v5334_v26  ;;  %v5342_v31 = vrot.slane %v9692_v22, 3 }
 0x647   : > { %vm5064_vm13 = vcmp.eq.f32.partialorder %v9908_v38, 0.0  ;;  %vm5069_vm14 = vcmp.eq.f32.partialorder %v9917_v41, inf  ;;  %v5338_v17 = vsel %vm4736_vm7, %v5336_v3, %v5337_v57  ;;  %v5341_v23 = vsel %vm4736_vm7, %v5339_v21, %v5340_v2  ;;  %v5877_v60 = vpop.eup %5876 }
 0x648   : > { %v5343_v33 = vrot.slane %v9713_v49, 3  ;;  %v5345_v19 = vrot.slane %v9695_v30, 3  ;;  %v5028_v39 = vsel %vm5027_vm0, %v9862_v36, %v5026_v45  ;;  %v5033_v58 = vmul.f32 %v5875_v63, %v9864_v43 }
 0x649   : > { %vm5071_vm15 = vcmp.eq.f32.partialorder %v9917_v41, 0.0  ;;  %v5346_v22 = vrot.slane %v9716_v14, 3  ;;  %v5355_v8 = vsub.f32 %v9546_v10, %v5329_v16  ;;  %v9996_v54 = vsel %vm5029_vm6, %v5030_v1, %v5028_v39 }
 0x64a   : > { %v5344_v49 = vsel %vm4736_vm7, %v5342_v31, %v5343_v33  ;;  %v5356_v30 = vsub.f32 %v9551_v12, %v5332_v28  ;;  %v5357_v59 = vsub.f32 %v9556_v52, %v5335_v35  ;;  %v5035_v5 = vsel %vm5034_vm2, %v9864_v43, %v5033_v58  ;;  %v5879_v36 = vpop.eup %5878 }
 0x64b   : > { %v5040_v51 = vmul.f32 %v5877_v60, %v9873_v50  ;;  %v5110_v10 = vsub.f32 %v9887_v13, %v9996_v54  ;;  %v5347_v14 = vsel %vm4736_vm7, %v5345_v19, %v5346_v22  ;;  %v10010_v53 = vsel %vm5036_vm4, %v5037_v24, %v5035_v5 }
 0x64c   : > { %v5358_v12 = vsub.f32 %v9561_v11, %v5338_v17  ;;  %v5359_v52 = vsub.f32 %v9566_v42, %v5341_v23  ;;  %v5360_v20 = vsub.f32 %v9571_v27, %v5344_v49  ;;  %v5047_v44 = vmul.f32 %v5879_v36, %v9882_v9  ;;  %v5881_v61 = vpop.eup %5880 }
 0x64d   : > { %v5042_v1 = vsel %vm5041_vm9, %v9873_v50, %v5040_v51  ;;  %v5111_v48 = vsub.f32 %v9897_v6, %v10010_v53  ;;  %v5117_v40 = vmul.f32 %v5110_v10, %v5110_v10  ;;  %v5361_v11 = vsub.f32 %v9576_v46, %v5347_v14  ;;  %v5883_v27 = vpop.eup %5882 }
 0x64e   : > { %v10023_v43 = vsel %vm5043_vm5, %v5044_v32, %v5042_v1  ;;  %v5362_v42 = vand.u32 2147483647, %v5355_v8  ;;  %v5363_v24 = vand.u32 2147483647, %v5356_v30  ;;  %v5049_v26 = vsel %vm5048_vm10, %v9882_v9, %v5047_v44  ;;  %v5885_v57 = vpop.eup %5884 }
 0x64f   : > { %v5054_v3 = vmul.f32 %v5881_v61, %v9890_v29  ;;  %v5112_v15 = vsub.f32 %v9925_v25, %v10023_v43  ;;  %v5118_v16 = vmul.f32 %v5111_v48, %v5111_v48  ;;  %v10036_v50 = vsel %vm5050_vm8, %v5051_v34, %v5049_v26 }
 0x650   : > { %v5061_v46 = vmul.f32 %v5883_v27, %v9908_v38  ;;  %v5124_v32 = vsel %vm10631_vm12, %v5117_v40, 0.0  ;;  %v5364_v21 = vand.u32 2147483647, %v5357_v59  ;;  %v5068_v45 = vmul.f32 %v5885_v57, %v9917_v41  ;;  %v11547_v57 = vld [vmem:[#allocation255_spill] sm:$0xff] }
 0x651   : > { %v5056_v2 = vsel %vm5055_vm1, %v9890_v29, %v5054_v3  ;;  %v5113_v28 = vsub.f32 %v9936_v55, %v10036_v50  ;;  %v5119_v35 = vmul.f32 %v5112_v15, %v5112_v15  ;;  %v5125_v31 = vsel %vm10631_vm12, %v5118_v16, 0.0 }
 0x652   : > { %v10050_v9 = vsel %vm5057_vm3, %v5058_v62, %v5056_v2  ;;  %v5063_v34 = vsel %vm5062_vm11, %v9908_v38, %v5061_v46  ;;  %v5365_v63 = vand.u32 2147483647, %v5358_v12  ;;  %v5070_v23 = vsel %vm5069_vm14, %v9917_v41, %v5068_v45  ;;  %v11549_v45 = vld [vmem:[#allocation257_spill] sm:$0xff] }
 0x653   : > { %v10060_v17 = vsel %vm5064_vm13, %v5065_v0, %v5063_v34  ;;  %v5114_v29 = vsub.f32 %v9943_v56, %v10050_v9  ;;  %v5120_v62 = vmul.f32 %v5113_v28, %v5113_v28  ;;  %v10071_v33 = vsel %vm5071_vm15, %v5072_v37, %v5070_v23  ;;  %v11553_v23 = vld [vmem:[#allocation259_spill] sm:$0xff] }
 0x654   : > { %v5115_v19 = vsub.f32 %v9947_v7, %v10060_v17  ;;  %v5126_v38 = vadd.f32 %v5125_v31, %v5124_v32  ;;  %v5127_v0 = vsel %vm10631_vm12, %v5119_v35, 0.0  ;;  %v5116_v39 = vsub.f32 %v9954_v18, %v10071_v33  ;;  %v11551_v31 = vld [vmem:[#allocation258_spill] sm:$0xff] }
 0x655   : > { %v5121_v58 = vmul.f32 %v5114_v29, %v5114_v29  ;;  %v5129_v22 = vsel %vm10631_vm12, %v5120_v62, 0.0  ;;  %v5366_v8 = vand.u32 2147483647, %v5359_v52  ;;  %v5367_v30 = vand.u32 2147483647, %v5360_v20 }
 0x656   : > { %v5122_v60 = vmul.f32 %v5115_v19, %v5115_v19  ;;  %v5128_v49 = vadd.f32 %v5127_v0, %v5126_v38  ;;  %v5368_v59 = vand.u32 2147483647, %v5361_v11  ;;  %v5123_v41 = vmul.f32 %v5116_v39, %v5116_v39 }
 0x657   : > { %v5131_v37 = vsel %vm10631_vm12, %v5121_v58, 0.0  ;;  %v5376_v5 = vrot.slane %v5362_v42, 3  ;;  %v5377_v51 = vrot.slane %v5363_v24, 3  ;;  %v5378_v36 = vrot.slane %v5364_v21, 3  ;;  %v11555_v58 = vld [vmem:[#allocation260_spill] sm:$0xff] }
 0x658   : > { %v5130_v10 = vadd.f32 %v5129_v22, %v5128_v49  ;;  %v5133_v14 = vsel %vm10631_vm12, %v5122_v60, 0.0  ;;  %v5379_v12 = vrot.slane %v5365_v63, 3  ;;  %v5135_v1 = vsel %vm10631_vm12, %v5123_v41, 0.0 }
 0x659   : > { %v5380_v44 = vrot.slane %v5366_v8, 3  ;;  %v5381_v48 = vrot.slane %v5367_v30, 3  ;;  %v5382_v40 = vrot.slane %v5368_v59, 3  ;;  %vm11539_vm7 = vcmask 1042432  }
 0x65a   : > { %v5132_v52 = vadd.f32 %v5131_v37, %v5130_v10  ;;  %v5390_v61 = vsel %vm11539_vm7, %v5376_v5, 0.0  ;;  %vm11540_vm0 = vmmov %vm11539_vm7  ;;  %vm11558_vm15 = vcmask 7168  }
 0x65b   : > { %v5391_v20 = vsel %vm11540_vm0, %v5377_v51, 0.0  ;;  %vm11541_vm6 = vmmov %vm11540_vm0 }
 0x65c   : > { %v5393_v11 = vsel %vm11541_vm6, %v5378_v36, 0.0  ;;  %v5392_v27 = vadd.f32 %v5391_v20, %v5390_v61  ;;  %vm11542_vm2 = vmmov %vm11540_vm0  ;;  %v5134_v3 = vadd.f32 %v5133_v14, %v5132_v52 }
 0x65d   : > { %v5395_v42 = vsel %vm11542_vm2, %v5379_v12, 0.0  ;;  %vm11543_vm4 = vmmov %vm11540_vm0 }
 0x65e   : > { %v5397_v24 = vsel %vm11543_vm4, %v5380_v44, 0.0  ;;  %vm11544_vm9 = vmmov %vm11540_vm0  ;;  %v5394_v32 = vadd.f32 %v5393_v11, %v5392_v27  ;;  %v5136_v35 = vadd.f32 %v5135_v1, %v5134_v3 }
 0x65f   : > { %v5399_v26 = vsel %vm11544_vm9, %v5381_v48, 0.0  ;;  %vm11545_vm5 = vmmov %vm11540_vm0 }
 0x660   : > { %v5401_v15 = vsel %vm11545_vm5, %v5382_v40, 0.0  ;;  %vm11546_vm10 = vmmov %vm11540_vm0  ;;  %v5396_v62 = vadd.f32 %v5395_v42, %v5394_v32  ;;  %5137 = vadd.xlane.f32.xlu1 %v5136_v35 }
 0x661   : > { %v4631_v16 = vsel %vm11546_vm10, %v9840_v4, 0.0  ;;  %vm11548_vm8 = vmmov %vm11540_vm0 }
 0x662   : > { %v4638_v46 = vsel %vm11548_vm8, %v11547_v57, 0.0  ;;  %v4632_v21 = vrot.slane %v4631_v16, 4  ;;  %vm11550_vm1 = vmmov %vm11540_vm0  ;;  %v5398_v60 = vadd.f32 %v5397_v24, %v5396_v62  ;;  %v4171_v62 = vld [vmem:[#allocation5 + $0x18] sm:$0xff] }
 0x663   : > { %v4639_v2 = vrot.slane %v4638_v46, 4  ;;  %v4645_v28 = vsel %vm11550_vm1, %v11549_v45, 0.0  ;;  %vm11552_vm3 = vmmov %vm11540_vm0 }
 0x664   : > { %v4646_v34 = vrot.slane %v4645_v28, 4  ;;  %v4652_v63 = vsel %vm11552_vm3, %v11551_v31, 0.0  ;;  %vm11554_vm11 = vmmov %vm11540_vm0  ;;  %v4633_v19 = vadd.f32 %v4632_v21, %v4631_v16  ;;  %v5400_v10 = vadd.f32 %v5399_v26, %v5398_v60  ;;  %v4168_v31 = vld [vmem:[#allocation5] sm:$0xff] }
 0x665   : > { %v4659_v29 = vsel %vm11554_vm11, %v11553_v23, 0.0  ;;  %v4640_v4 = vadd.f32 %v4639_v2, %v4638_v46  ;;  %v4653_v38 = vrot.slane %v4652_v63, 4  ;;  %vm11556_vm13 = vmmov %vm11540_vm0  ;;  %v4170_v23 = vld [vmem:[#allocation5 + $0x10] sm:$0xff] }
 0x666   : > { %v4647_v0 = vadd.f32 %v4646_v34, %v4645_v28  ;;  %v4660_v39 = vrot.slane %v4659_v29, 4  ;;  %v4666_v22 = vsel %vm11556_vm13, %v11555_v58, 0.0  ;;  %vm11557_vm14 = vmmov %vm11540_vm0  ;;  %v4634_v49 = vrot.slane %v4633_v19, 2 }
 0x667   : > { %v4673_v8 = vsel %vm11557_vm14, %v9836_v47, 0.0  ;;  %v4641_v30 = vrot.slane %v4640_v4, 2  ;;  %v4654_v59 = vadd.f32 %v4653_v38, %v4652_v63  ;;  %v4667_v5 = vrot.slane %v4666_v22, 4  ;;  %v4169_v63 = vld [vmem:[#allocation5 + $0x8] sm:$0xff]  ;;  %vm11559_vm7 = vmmov %vm11558_vm15  ;;  %v4172_v38 = vld [vmem:[#allocation5 + $0x20] sm:$0xff] }
 0x668   : > { %v4648_v41 = vrot.slane %v4647_v0, 2  ;;  %v4661_v37 = vadd.f32 %v4660_v39, %v4659_v29  ;;  %v4674_v51 = vrot.slane %v4673_v8, 4  ;;  %v4635_v14 = vadd.f32 %v4634_v49, %v4633_v19  ;;  %vm11560_vm0 = vmmov %vm11559_vm7 }
 0x669   : > { %v4642_v36 = vadd.f32 %v4641_v30, %v4640_v4  ;;  %v4655_v12 = vrot.slane %v4654_v59, 2  ;;  %v4668_v48 = vadd.f32 %v4667_v5, %v4666_v22  ;;  %v5402_v52 = vadd.f32 %v5401_v15, %v5400_v10  ;;  %vm11561_vm9 = vmmov %vm11560_vm0  ;;  %v4174_v10 = vld [vmem:[#allocation5 + $0x30] sm:$0xff] }
 0x66a   : > { %v4649_v1 = vadd.f32 %v4648_v41, %v4647_v0  ;;  %v4662_v44 = vrot.slane %v4661_v37, 2  ;;  %v4675_v40 = vadd.f32 %v4674_v51, %v4673_v8  ;;  %v4636_v61 = vrot.slane %v4635_v14, 1  ;;  %vm11562_vm3 = vmmov %vm11560_vm0  ;;  %v4173_v41 = vld [vmem:[#allocation5 + $0x28] sm:$0xff] }
 0x66b   : > { %v4643_v20 = vrot.slane %v4642_v36, 1  ;;  %v4656_v47 = vadd.f32 %v4655_v12, %v4654_v59  ;;  %v4669_v42 = vrot.slane %v4668_v48, 2  ;;  %5403 = vadd.xlane.f32.xlu0 %v5402_v52  ;;  %v4232_v29 = vsel %vm11558_vm15, %v4168_v31, 0.0  ;;  %vm11563_vm12 = vmmov %vm11562_vm3 }
 0x66c   : > { %v4650_v11 = vrot.slane %v4649_v1, 1  ;;  %v4663_v27 = vadd.f32 %v4662_v44, %v4661_v37  ;;  %v4676_v24 = vrot.slane %v4675_v40, 2  ;;  %v10103_v3 = vadd.f32 %v4636_v61, %v4635_v14 }
 0x66d   : > { %v10105_v16 = vadd.f32 %v4643_v20, %v4642_v36  ;;  %v4657_v26 = vrot.slane %v4656_v47, 1  ;;  %v4670_v32 = vadd.f32 %v4669_v42, %v4668_v48  ;;  %v4233_v19 = vsel %vm11559_vm7, %v4169_v63, 0.0 }
 0x66e   : > { %v10107_v57 = vadd.f32 %v4650_v11, %v4649_v1  ;;  %v4664_v46 = vrot.slane %v4663_v27, 1  ;;  %v4677_v21 = vadd.f32 %v4676_v24, %v4675_v40  ;;  %5886 = vrsqrt.f32 %v10103_v3 }
 0x66f   : > { %v10109_v2 = vadd.f32 %v4657_v26, %v4656_v47  ;;  %v4671_v45 = vrot.slane %v4670_v32, 1  ;;  %5888 = vrsqrt.f32 %v10105_v16  ;;  %v4235_v4 = vsel %vm11560_vm0, %v4170_v23, 0.0 }
 0x670   : > { %v10112_v15 = vadd.f32 %v4664_v46, %v4663_v27  ;;  %v4678_v28 = vrot.slane %v4677_v21, 1  ;;  %5890 = vrsqrt.f32 %v10107_v57  ;;  %vm4682_vm6 = vcmp.eq.f32.partialorder %v10103_v3, inf }
 0x671   : > { %v10115_v35 = vadd.f32 %v4671_v45, %v4670_v32  ;;  %5892 = vrsqrt.f32 %v10109_v2  ;;  %v4234_v0 = vadd.f32 %v4233_v19, %v4232_v29  ;;  %vm4684_vm2 = vcmp.eq.f32.partialorder %v10103_v3, 0.0 }
 0x672   : > { %v10117_v34 = vadd.f32 %v4678_v28, %v4677_v21  ;;  %5894 = vrsqrt.f32 %v10112_v15  ;;  %v4685_v39 = vand.u32 2147483648, %v10103_v3  ;;  %vm4689_vm4 = vcmp.eq.f32.partialorder %v10105_v16, inf }
 0x673   : > { %5896 = vrsqrt.f32 %v10115_v35  ;;  %v4237_v58 = vsel %vm11561_vm9, %v4171_v62, 0.0  ;;  %vm4691_vm5 = vcmp.eq.f32.partialorder %v10105_v16, 0.0  ;;  %v4692_v22 = vand.u32 2147483648, %v10105_v16 }
 0x674   : > { %5898 = vrsqrt.f32 %v10117_v34  ;;  %vm4696_vm10 = vcmp.eq.f32.partialorder %v10107_v57, inf  ;;  %v4236_v8 = vadd.f32 %v4235_v4, %v4234_v0  ;;  %vm4698_vm8 = vcmp.eq.f32.partialorder %v10107_v57, 0.0 }
 0x675   : > { %v4699_v60 = vand.u32 2147483648, %v10107_v57  ;;  %vm4703_vm1 = vcmp.eq.f32.partialorder %v10109_v2, inf  ;;  %v4239_v49 = vsel %vm11562_vm3, %v4172_v38, 0.0  ;;  %vm4705_vm11 = vcmp.eq.f32.partialorder %v10109_v2, 0.0 }
 0x676   : > { %v4706_v59 = vand.u32 2147483648, %v10109_v2  ;;  %vm4710_vm13 = vcmp.eq.f32.partialorder %v10112_v15, inf  ;;  %v4238_v37 = vadd.f32 %v4237_v58, %v4236_v8  ;;  %vm4712_vm14 = vcmp.eq.f32.partialorder %v10112_v15, 0.0 }
 0x677   : > { %v4713_v51 = vand.u32 2147483648, %v10112_v15  ;;  %vm4717_vm15 = vcmp.eq.f32.partialorder %v10115_v35, inf  ;;  %vm4719_vm7 = vcmp.eq.f32.partialorder %v10115_v35, 0.0  ;;  %v4720_v36 = vand.u32 2147483648, %v10115_v35 }
 0x678   : > { %vm4724_vm0 = vcmp.eq.f32.partialorder %v10117_v34, inf  ;;  %v4240_v12 = vadd.f32 %v4239_v49, %v4238_v37  ;;  %vm4726_vm9 = vcmp.eq.f32.partialorder %v10117_v34, 0.0  ;;  %v4241_v40 = vsel %vm11562_vm3, %v4173_v41, 0.0 }
 0x679   : > { %v4727_v47 = vand.u32 2147483648, %v10117_v34  ;;  %v4243_v11 = vsel %vm11563_vm12, %v4174_v10, 0.0  ;;  %vm11564_vm12 = vcmask 1040384  }
 0x67a   : > { %v4242_v28 = vadd.f32 %v4241_v40, %v4240_v12 }
 0x67b   : > { %v5887_v30 = vpop.eup %5886 }
 0x67c   : > { %v4681_v5 = vmul.f32 %v5887_v30, %v10103_v3  ;;  %v5889_v14 = vpop.eup %5888  ;;  %v4244_v41 = vadd.f32 %v4243_v11, %v4242_v28 }
 0x67d   : > { %v5891_v1 = vpop.eup %5890  ;;  %v4688_v48 = vmul.f32 %v5889_v14, %v10105_v16  ;;  %v4175_v14 = vld [vmem:[#allocation5 + $0x38] sm:$0xff] }
 0x67e   : > { %v4683_v44 = vsel %vm4682_vm6, %v10103_v3, %v4681_v5  ;;  %v5893_v52 = vpop.eup %5892  ;;  %v4695_v20 = vmul.f32 %v5891_v1, %v10107_v57  ;;  %vm11565_vm6 = vmmov %vm11564_vm12 }
 0x67f   : > { %v4686_v61 = vsel %vm4684_vm2, %v4685_v39, %v4683_v44  ;;  %v5895_v27 = vpop.eup %5894  ;;  %v4690_v42 = vsel %vm4689_vm4, %v10105_v16, %v4688_v48  ;;  %v4702_v24 = vmul.f32 %v5893_v52, %v10109_v2  ;;  %vm11566_vm2 = vmmov %vm11565_vm6 }
 0x680   : > { %v5074_v26 = vsub.f32 %v4686_v61, %v9887_v13  ;;  %v5147_v46 = vsub.f32 %v9996_v54, %v4686_v61  ;;  %v5897_v32 = vpop.eup %5896  ;;  %v4693_v3 = vsel %vm4691_vm5, %v4692_v22, %v4690_v42  ;;  %v4697_v21 = vsel %vm4696_vm10, %v10107_v57, %v4695_v20  ;;  %vm11567_vm4 = vmmov %vm11566_vm2  ;;  %v4176_v61 = vld [vmem:[#allocation5 + $0x40] sm:$0xff] }
 0x681   : > { %v4709_v45 = vmul.f32 %v5895_v27, %v10112_v15  ;;  %v5899_v31 = vpop.eup %5898  ;;  %v4700_v63 = vsel %vm4698_vm8, %v4699_v60, %v4697_v21  ;;  %v4704_v13 = vsel %vm4703_vm1, %v10109_v2, %v4702_v24  ;;  %v4716_v54 = vmul.f32 %v5897_v32, %v10115_v35  ;;  %vm11568_vm5 = vmmov %vm11566_vm2  ;;  %v4177_v27 = vld [vmem:[#allocation5 + $0x48] sm:$0xff] }
 0x682   : > { %v5075_v16 = vsub.f32 %v4693_v3, %v9897_v6  ;;  %v4707_v23 = vsel %vm4705_vm11, %v4706_v59, %v4704_v13  ;;  %v4723_v62 = vmul.f32 %v5899_v31, %v10117_v34  ;;  %v5076_v57 = vsub.f32 %v4700_v63, %v9925_v25  ;;  %vm11569_vm10 = vmmov %vm11566_vm2 }
 0x683   : > { %v4711_v29 = vsel %vm4710_vm13, %v10112_v15, %v4709_v45  ;;  %v4718_v4 = vsel %vm4717_vm15, %v10115_v35, %v4716_v54  ;;  %v5077_v6 = vsub.f32 %v4707_v23, %v9936_v55  ;;  %v5081_v38 = vmul.f32 %v5074_v26, %v5074_v26  ;;  %vm11570_vm8 = vmmov %vm11566_vm2  ;;  %v4179_v54 = vld [vmem:[#allocation5 + $0x58] sm:$0xff] }
 0x684   : > { %v4714_v19 = vsel %vm4712_vm14, %v4713_v51, %v4711_v29  ;;  %v4721_v2 = vsel %vm4719_vm7, %v4720_v36, %v4718_v4  ;;  %v4725_v0 = vsel %vm4724_vm0, %v10117_v34, %v4723_v62  ;;  %v5082_v25 = vmul.f32 %v5075_v16, %v5075_v16  ;;  %vm11571_vm1 = vmmov %vm11562_vm3 }
 0x685   : > { %v5078_v39 = vsub.f32 %v4714_v19, %v9943_v56  ;;  %v4728_v15 = vsel %vm4726_vm9, %v4727_v47, %v4725_v0  ;;  %v5079_v58 = vsub.f32 %v4721_v2, %v9947_v7  ;;  %v5083_v22 = vmul.f32 %v5076_v57, %v5076_v57  ;;  %vm11572_vm11 = vmmov %vm11566_vm2  ;;  %v4180_v57 = vld [vmem:[#allocation5 + $0x60] sm:$0xff] }
 0x686   : > { %v5084_v8 = vmul.f32 %v5077_v6, %v5077_v6  ;;  %v5080_v55 = vsub.f32 %v4728_v15, %v9954_v18  ;;  %v5088_v35 = vsel %vm11564_vm12, %v5081_v38, 0.0  ;;  %v5089_v49 = vsel %vm11565_vm6, %v5082_v25, 0.0  ;;  %vm11573_vm13 = vmmov %vm11566_vm2  ;;  %v4182_v25 = vld [vmem:[#allocation5 + $0x70] sm:$0xff] }
 0x687   : > { %v5085_v60 = vmul.f32 %v5078_v39, %v5078_v39  ;;  %v5090_v30 = vadd.f32 %v5089_v49, %v5088_v35  ;;  %v5091_v59 = vsel %vm11566_vm2, %v5083_v22, 0.0  ;;  %v5086_v56 = vmul.f32 %v5079_v58, %v5079_v58  ;;  %vm11574_vm14 = vmmov %vm11566_vm2  ;;  %v4184_v22 = vld [vmem:[#allocation5 + $0x80] sm:$0xff] }
 0x688   : > { %v5093_v37 = vsel %vm11567_vm4, %v5084_v8, 0.0  ;;  %v5148_v34 = vsub.f32 %v10010_v53, %v4693_v3  ;;  %v5149_v7 = vsub.f32 %v10023_v43, %v4700_v63  ;;  %v5087_v5 = vmul.f32 %v5080_v55, %v5080_v55  ;;  %vm11575_vm15 = vmmov %vm11571_vm1  ;;  %v4178_v3 = vld [vmem:[#allocation5 + $0x50] sm:$0xff]  ;;  %v4185_v8 = vld [vmem:[#allocation5 + $0x88] sm:$0xff] }
 0x689   : > { %v5092_v51 = vadd.f32 %v5091_v59, %v5090_v30  ;;  %v5150_v18 = vsub.f32 %v10036_v50, %v4707_v23  ;;  %v5151_v10 = vsub.f32 %v10050_v9, %v4714_v19  ;;  %v5095_v36 = vsel %vm11568_vm5, %v5085_v60, 0.0  ;;  %vm11576_vm7 = vmmov %vm11566_vm2  ;;  %v4186_v55 = vld [vmem:[#allocation5 + $0x90] sm:$0xff]  ;;  %v4187_v30 = vld [vmem:[#allocation5 + $0x98] sm:$0xff] }
 0x68a   : > { %v5152_v12 = vsub.f32 %v10060_v17, %v4721_v2  ;;  %v5153_v1 = vsub.f32 %v10071_v33, %v4728_v15  ;;  %v5154_v44 = vmul.f32 %v5147_v46, %v5147_v46  ;;  %v5155_v40 = vmul.f32 %v5148_v34, %v5148_v34  ;;  %vm11577_vm0 = vmmov %vm11571_vm1  ;;  %v4181_v2 = vld [vmem:[#allocation5 + $0x68] sm:$0xff]  ;;  %v4183_v15 = vld [vmem:[#allocation5 + $0x78] sm:$0xff] }
 0x68b   : > { %v5094_v48 = vadd.f32 %v5093_v37, %v5092_v51  ;;  %v5156_v52 = vmul.f32 %v5149_v7, %v5149_v7  ;;  %v5157_v53 = vmul.f32 %v5150_v18, %v5150_v18  ;;  %v5097_v43 = vsel %vm11569_vm10, %v5086_v56, 0.0  ;;  %vm11578_vm9 = vmmov %vm11566_vm2  ;;  %v4188_v59 = vld [vmem:[#allocation5 + $0xa0] sm:$0xff]  ;;  %v10242_v18 = vld [vmem:[%s10513_s4 + $0x30] sm:$0xff] }
 0x68c   : > { %v5161_v20 = vsel %vm11570_vm8, %v5154_v44, 0.0  ;;  %v4245_v50 = vsel %vm11571_vm1, %v4175_v14, 0.0  ;;  %v5158_v47 = vmul.f32 %v5151_v10, %v5151_v10  ;;  %v5162_v11 = vsel %vm11572_vm11, %v5155_v40, 0.0  ;;  %vm11579_vm3 = vmmov %vm11577_vm0  ;;  %v10233_v37 = vld [vmem:[%s10513_s4 + $0x28] sm:$0xff]  ;;  %v10247_v10 = vld [vmem:[%s10513_s4 + $0x38] sm:$0xff] }
 0x68d   : > { %v5096_v9 = vadd.f32 %v5095_v36, %v5094_v48  ;;  %v5164_v17 = vsel %vm11573_vm13, %v5156_v52, 0.0  ;;  %v5099_v33 = vsel %vm11574_vm14, %v5087_v5, 0.0  ;;  %v5163_v42 = vadd.f32 %v5162_v11, %v5161_v20  ;;  %vm11580_vm12 = vmmov %vm11566_vm2  ;;  %v10252_v36 = vld [vmem:[%s10513_s4] sm:$0xff] }
 0x68e   : > { %v4247_v24 = vsel %vm11575_vm15, %v4176_v61, 0.0  ;;  %v5159_v46 = vmul.f32 %v5152_v12, %v5152_v12  ;;  %v5166_v32 = vsel %vm11576_vm7, %v5157_v53, 0.0  ;;  %v4246_v21 = vadd.f32 %v4245_v50, %v4244_v41  ;;  %vm11581_vm6 = vmmov %vm11577_vm0  ;;  %v10257_v12 = vld [vmem:[%s10513_s4 + $0x40] sm:$0xff]  ;;  %v10272_v61 = vld [vmem:[%s10513_s4 + $0x8] sm:$0xff] }
 0x68f   : > { %v5098_v26 = vadd.f32 %v5097_v43, %v5096_v9  ;;  %v5165_v45 = vadd.f32 %v5164_v17, %v5163_v42  ;;  %v4249_v28 = vsel %vm11577_vm0, %v4177_v27, 0.0  ;;  %v5160_v63 = vmul.f32 %v5153_v1, %v5153_v1  ;;  %vm11582_vm4 = vmmov %vm11577_vm0  ;;  %v10262_v1 = vld [vmem:[%s10513_s4 + $0x48] sm:$0xff]  ;;  %v10277_v43 = vld [vmem:[%s10513_s4 + $0x10] sm:$0xff] }
 0x690   : > { %v5168_v13 = vsel %vm11578_vm9, %v5158_v47, 0.0  ;;  %v4248_v16 = vadd.f32 %v4247_v24, %v4246_v21  ;;  %v4251_v29 = vsel %vm11579_vm3, %v4178_v3, 0.0  ;;  %v5170_v62 = vsel %vm11580_vm12, %v5159_v46, 0.0  ;;  %vm11583_vm5 = vmmov %vm11577_vm0  ;;  %v10284_v47 = vld [vmem:[%s10513_s4 + $0x18] sm:$0xff]  ;;  %v10289_v11 = vld [vmem:[%s10513_s4 + $0x20] sm:$0xff] }
 0x691   : > { %v5100_v31 = vadd.f32 %v5099_v33, %v5098_v26  ;;  %v5167_v23 = vadd.f32 %v5166_v32, %v5165_v45  ;;  %v4253_v6 = vsel %vm11581_vm6, %v4179_v54, 0.0  ;;  %v5172_v38 = vsel %vm11566_vm2, %v5160_v63, 0.0  ;;  %vm11584_vm10 = vmmov %vm11577_vm0 }
 0x692   : > { %v4250_v19 = vadd.f32 %v4249_v28, %v4248_v16  ;;  %v4255_v58 = vsel %vm11582_vm4, %v4180_v57, 0.0  ;;  %v4257_v49 = vsel %vm11583_vm5, %v4181_v2, 0.0  ;;  %v4259_v56 = vsel %vm11584_vm10, %v4182_v25, 0.0  ;;  %vm11585_vm8 = vmmov %vm11577_vm0 }
 0x693   : > { %5101 = vadd.xlane.f32.xlu0 %v5100_v31  ;;  %v5169_v4 = vadd.f32 %v5168_v13, %v5167_v23  ;;  %v4261_v34 = vsel %vm11585_vm8, %v4183_v15, 0.0  ;;  %vm11586_vm1 = vmmov %vm11577_vm0  ;;  %v5536_v44 = vrot.slane %v10233_v37, 3  ;;  %v5537_v48 = vrot.slane %v10242_v18, 3 }
 0x694   : > { %v4252_v0 = vadd.f32 %v4251_v29, %v4250_v19  ;;  %v4263_v7 = vsel %vm11586_vm1, %v4184_v22, 0.0  ;;  %vm11587_vm11 = vmmov %vm11577_vm0  ;;  %v5538_v40 = vrot.slane %v10247_v10, 3  ;;  %v5539_v20 = vrot.slane %v10257_v12, 3  ;;  %v4189_v22 = vld [vmem:[#allocation5 + $0xa8] sm:$0xff] }
 0x695   : > { %v5171_v39 = vadd.f32 %v5170_v62, %v5169_v4  ;;  %v4265_v5 = vsel %vm11587_vm11, %v4185_v8, 0.0  ;;  %vm11588_vm13 = vmmov %vm11577_vm0  ;;  %v5540_v50 = vrot.slane %v10262_v1, 3  ;;  %v5546_v17 = vsub.f32 %v10252_v36, %v5536_v44 }
 0x696   : > { %v4254_v60 = vadd.f32 %v4253_v6, %v4252_v0  ;;  %v4267_v51 = vsel %vm11588_vm13, %v4186_v55, 0.0  ;;  %vm11589_vm14 = vmmov %vm11577_vm0  ;;  %v5547_v27 = vsub.f32 %v10272_v61, %v5537_v48  ;;  %v5548_v33 = vsub.f32 %v10277_v43, %v5538_v40 }
 0x697   : > { %v5173_v35 = vadd.f32 %v5172_v38, %v5171_v39  ;;  %v4269_v52 = vsel %vm11589_vm14, %v4187_v30, 0.0  ;;  %vm11590_vm15 = vmmov %vm11577_vm0  ;;  %v5549_v42 = vsub.f32 %v10284_v47, %v5539_v20  ;;  %v5550_v24 = vsub.f32 %v10289_v11, %v5540_v50 }
 0x698   : > { %v4256_v41 = vadd.f32 %v4255_v58, %v4254_v60  ;;  %v4271_v53 = vsel %vm11590_vm15, %v4188_v59, 0.0  ;;  %v5551_v26 = vsub.f32 %v10233_v37, %v5536_v44  ;;  %v5552_v46 = vsub.f32 %v10242_v18, %v5537_v48  ;;  %vm11598_vm4 = vmmov %vm11586_vm1  ;;  %v4191_v48 = vld [vmem:[#allocation5 + $0xb8] sm:$0xff] }
 0x699   : > { %5174 = vadd.xlane.f32.xlu0 %v5173_v35  ;;  %v5553_v3 = vsub.f32 %v10247_v10, %v5538_v40  ;;  %v5554_v21 = vsub.f32 %v10257_v12, %v5539_v20  ;;  %v5555_v45 = vsub.f32 %v10262_v1, %v5540_v50  ;;  %v5556_v28 = vmul.f32 %v5546_v17, %v5546_v17  ;;  %vm11601_vm8 = vmmov %vm11586_vm1  ;;  %v4368_v17 = vld [vmem:[#allocation6] sm:$0xff] }
 0x69a   : > { %v4258_v14 = vadd.f32 %v4257_v49, %v4256_v41  ;;  %v5557_v31 = vmul.f32 %v5547_v27, %v5547_v27  ;;  %v5558_v63 = vmul.f32 %v5548_v33, %v5548_v33  ;;  %v5559_v13 = vmul.f32 %v5549_v42, %v5549_v42  ;;  %v4369_v27 = vld [vmem:[#allocation6 + $0x8] sm:$0xff]  ;;  %v4370_v33 = vld [vmem:[#allocation6 + $0x10] sm:$0xff]  ;;  %vm11603_vm11 = vmmov %vm11598_vm4 }
 0x69b   : > { %v5560_v16 = vmul.f32 %v5550_v24, %v5550_v24  ;;  %v5561_v23 = vmul.f32 %v5551_v26, %v5551_v26  ;;  %v5562_v29 = vmul.f32 %v5552_v46, %v5552_v46  ;;  %v5563_v62 = vmul.f32 %v5553_v3, %v5553_v3  ;;  %v4193_v3 = vld [vmem:[#allocation5 + $0xc8] sm:$0xff]  ;;  %vm11604_vm13 = vmmov %vm11598_vm4 }
 0x69c   : > { %v4260_v9 = vadd.f32 %v4259_v56, %v4258_v14  ;;  %v5564_v57 = vmul.f32 %v5554_v21, %v5554_v21  ;;  %v5565_v19 = vmul.f32 %v5555_v45, %v5555_v45  ;;  %v5576_v4 = vrot.slane %v5556_v28, 6  ;;  %v4190_v56 = vld [vmem:[#allocation5 + $0xb0] sm:$0xff]  ;;  %vm11605_vm14 = vmmov %vm11598_vm4 }
 0x69d   : > { %v5577_v38 = vrot.slane %v5561_v23, 6  ;;  %v5579_v2 = vrot.slane %v5557_v31, 6  ;;  %v5580_v0 = vrot.slane %v5562_v29, 6  ;;  %v5582_v39 = vrot.slane %v5558_v63, 6  ;;  %vm11606_vm15 = vmmov %vm11598_vm4 }
 0x69e   : > { %v4262_v32 = vadd.f32 %v4261_v34, %v4260_v9  ;;  %v5583_v25 = vrot.slane %v5563_v62, 6  ;;  %v5585_v15 = vrot.slane %v5559_v13, 6  ;;  %v5586_v58 = vrot.slane %v5564_v57, 6  ;;  %v4372_v13 = vld [vmem:[#allocation6 + $0x20] sm:$0xff]  ;;  %v4195_v62 = vld [vmem:[#allocation5 + $0xd8] sm:$0xff] }
 0x69f   : > { %vm11591_vm7 = vcmask 1041408   ;;  %v5588_v35 = vrot.slane %v5560_v16, 6  ;;  %v5589_v59 = vrot.slane %v5565_v19, 6  ;;  %vm11595_vm12 = vcmask 1042432   ;;  %v4194_v16 = vld [vmem:[#allocation5 + $0xd0] sm:$0xff]  ;;  %v4373_v19 = vld [vmem:[#allocation6 + $0x28] sm:$0xff] }
 0x6a0   : > { %v4264_v54 = vadd.f32 %v4263_v7, %v4262_v32  ;;  %v5578_v55 = vsel %vm11591_vm7, %v5576_v4, %v5577_v38  ;;  %vm11592_vm0 = vmmov %vm11591_vm7  ;;  %v4275_v50 = vsel %vm11601_vm8, %v4190_v56, 0.0  ;;  %v4277_v26 = vsel %vm11603_vm11, %v4191_v48, 0.0  ;;  %v4371_v32 = vld [vmem:[#allocation6 + $0x18] sm:$0xff]  ;;  %v4197_v38 = vld [vmem:[#allocation5 + $0xe8] sm:$0xff] }
 0x6a1   : > { %v5581_v60 = vsel %vm11592_vm0, %v5579_v2, %v5580_v0  ;;  %vm11593_vm9 = vmmov %vm11592_vm0  ;;  %v5596_v41 = vsel %vm11595_vm12, %v5578_v55, 0.0  ;;  %v4433_v45 = vsel %vm11605_vm14, %v4369_v27, 0.0  ;;  %v4435_v28 = vsel %vm11606_vm15, %v4370_v33, 0.0  ;;  %v4198_v2 = vld [vmem:[#allocation5 + $0xf0] sm:$0xff]  ;;  %v4201_v55 = vld [vmem:[#allocation5 + $0x108] sm:$0xff] }
 0x6a2   : > { %v4266_v6 = vadd.f32 %v4265_v5, %v4264_v54  ;;  %v5584_v49 = vsel %vm11593_vm9, %v5582_v39, %v5583_v25  ;;  %vm11594_vm3 = vmmov %vm11592_vm0  ;;  %v4199_v25 = vld [vmem:[#allocation5 + $0xf8] sm:$0xff]  ;;  %v4205_v56 = vld [vmem:[#allocation5 + $0x128] sm:$0xff] }
 0x6a3   : > { %v5587_v30 = vsel %vm11594_vm3, %v5585_v15, %v5586_v58  ;;  %vm11596_vm6 = vmmov %vm11595_vm12  ;;  %v4200_v15 = vld [vmem:[#allocation5 + $0x100] sm:$0xff]  ;;  %v4207_v48 = vld [vmem:[#allocation5 + $0x138] sm:$0xff] }
 0x6a4   : > { %v4268_v8 = vadd.f32 %v4267_v51, %v4266_v6  ;;  %v5597_v7 = vsel %vm11596_vm6, %v5581_v60, 0.0  ;;  %vm11597_vm2 = vmmov %vm11596_vm6  ;;  %v4273_v51 = vsel %vm11598_vm4, %v4189_v22, 0.0  ;;  %v4196_v6 = vld [vmem:[#allocation5 + $0xe0] sm:$0xff]  ;;  %v4374_v22 = vld [vmem:[#allocation6 + $0x30] sm:$0xff] }
 0x6a5   : > { %v5599_v5 = vsel %vm11597_vm2, %v5584_v49, 0.0  ;;  %vm11599_vm5 = vmmov %vm11592_vm0  ;;  %v5598_v44 = vadd.f32 %v5597_v7, %v5596_v41  ;;  %v4202_v60 = vld [vmem:[#allocation5 + $0x110] sm:$0xff]  ;;  %v4204_v41 = vld [vmem:[#allocation5 + $0x120] sm:$0xff] }
 0x6a6   : > { %v4270_v34 = vadd.f32 %v4269_v52, %v4268_v8  ;;  %v5590_v14 = vsel %vm11599_vm5, %v5588_v35, %v5589_v59  ;;  %vm11600_vm10 = vmmov %vm11597_vm2  ;;  %v4192_v52 = vld [vmem:[#allocation5 + $0xc0] sm:$0xff]  ;;  %v4203_v35 = vld [vmem:[#allocation5 + $0x118] sm:$0xff] }
 0x6a7   : > { %v5601_v20 = vsel %vm11600_vm10, %v5587_v30, 0.0  ;;  %v5600_v9 = vadd.f32 %v5599_v5, %v5598_v44  ;;  %vm11602_vm1 = vmmov %vm11597_vm2  ;;  %v4206_v44 = vld [vmem:[#allocation5 + $0x130] sm:$0xff] }
 0x6a8   : > { %v4272_v40 = vadd.f32 %v4271_v53, %v4270_v34  ;;  %v5603_v24 = vsel %vm11602_vm1, %v5590_v14, 0.0  ;;  %v4432_v53 = vsel %vm11604_vm13, %v4368_v17, 0.0  ;;  %vm11607_vm7 = vmmov %vm11598_vm4 }
 0x6a9   : > { %v5602_v46 = vadd.f32 %v5601_v20, %v5600_v9  ;;  %v4279_v31 = vsel %vm11607_vm7, %v4192_v52, 0.0  ;;  %v4434_v54 = vadd.f32 %v4433_v45, %v4432_v53  ;;  %vm11608_vm0 = vmmov %vm11598_vm4  ;;  %v4376_v52 = vld [vmem:[#allocation6 + $0x40] sm:$0xff]  ;;  %v4210_v53 = vld [vmem:[#allocation5 + $0x150] sm:$0xff] }
 0x6aa   : > { %v4274_v42 = vadd.f32 %v4273_v51, %v4272_v40  ;;  %v4437_v29 = vsel %vm11608_vm0, %v4371_v32, 0.0  ;;  %vm11609_vm9 = vmmov %vm11608_vm0  ;;  %v4375_v51 = vld [vmem:[#allocation6 + $0x38] sm:$0xff] }
 0x6ab   : > { %v5604_v63 = vadd.f32 %v5603_v24, %v5602_v46  ;;  %v4281_v57 = vsel %vm11609_vm9, %v4193_v3, 0.0  ;;  %v4436_v4 = vadd.f32 %v4435_v28, %v4434_v54  ;;  %vm11610_vm3 = vmmov %vm11608_vm0  ;;  %v4208_v24 = vld [vmem:[#allocation5 + $0x140] sm:$0xff]  ;;  %v10343_v3 = vsel %vm11608_vm0, %v4205_v56, 0.0  ;;  %v4211_v45 = vld [vmem:[#allocation5 + $0x158] sm:$0xff] }
 0x6ac   : > { %v4276_v21 = vadd.f32 %v4275_v50, %v4274_v42  ;;  %v4439_v39 = vsel %vm11610_vm3, %v4372_v13, 0.0  ;;  %vm11611_vm12 = vmmov %vm11608_vm0  ;;  %v4377_v13 = vld [vmem:[#allocation6 + $0x48] sm:$0xff] }
 0x6ad   : > { %5605 = vadd.xlane.f32.xlu0 %v5604_v63  ;;  %v4283_v58 = vsel %vm11611_vm12, %v4194_v16, 0.0  ;;  %v4438_v8 = vadd.f32 %v4437_v29, %v4436_v4  ;;  %vm11612_vm6 = vmmov %vm11608_vm0  ;;  %v5620_v63 = vrot.slane %v10252_v36, 3  ;;  %v4212_v16 = vld [vmem:[#allocation5 + $0x160] sm:$0xff]  ;;  %v5621_v29 = vrot.slane %v10272_v61, 3 }
 0x6ae   : > { %v4278_v23 = vadd.f32 %v4277_v26, %v4276_v21  ;;  %v4285_v30 = vsel %vm11612_vm6, %v4195_v62, 0.0  ;;  %vm11613_vm2 = vmmov %vm11608_vm0  ;;  %v4209_v26 = vld [vmem:[#allocation5 + $0x148] sm:$0xff]  ;;  %v5622_v62 = vrot.slane %v10277_v43, 3 }
 0x6af   : > { %v4441_v59 = vsel %vm11613_vm2, %v4373_v19, 0.0  ;;  %vm11614_vm4 = vmmov %vm11608_vm0  ;;  %v4440_v14 = vadd.f32 %v4439_v39, %v4438_v8  ;;  %v5630_v8 = vsub.f32 %v10252_v36, %v5620_v63 }
 0x6b0   : > { %v4280_v0 = vadd.f32 %v4279_v31, %v4278_v23  ;;  %v4287_v34 = vsel %vm11614_vm4, %v4196_v6, 0.0  ;;  %vm11615_vm5 = vmmov %vm11608_vm0  ;;  %v5623_v6 = vrot.slane %v10284_v47, 3 }
 0x6b1   : > { %v4289_v7 = vsel %vm11615_vm5, %v4197_v38, 0.0  ;;  %vm11616_vm10 = vmmov %vm11608_vm0  ;;  %v4442_v42 = vadd.f32 %v4441_v59, %v4440_v14  ;;  %v4378_v38 = vld [vmem:[#allocation6 + $0x50] sm:$0xff]  ;;  %v4380_v59 = vld [vmem:[#allocation6 + $0x60] sm:$0xff] }
 0x6b2   : > { %v4282_v49 = vadd.f32 %v4281_v57, %v4280_v0  ;;  %v4291_v5 = vsel %vm11616_vm10, %v4198_v2, 0.0  ;;  %vm11617_vm8 = vmmov %vm11608_vm0  ;;  %v5633_v56 = vsub.f32 %v10284_v47, %v5623_v6  ;;  %v4382_v14 = vld [vmem:[#allocation6 + $0x70] sm:$0xff]  ;;  %v5639_v47 = vrot.slane %v10262_v1, 1  ;;  %v4387_v6 = vld [vmem:[#allocation6 + $0x98] sm:$0xff] }
 0x6b3   : > { %v4293_v20 = vsel %vm11617_vm8, %v4199_v25, 0.0  ;;  %vm11618_vm1 = vmmov %vm11608_vm0 }
 0x6b4   : > { %v4284_v40 = vadd.f32 %v4283_v58, %v4282_v49  ;;  %v4295_v50 = vsel %vm11618_vm1, %v4200_v15, 0.0  ;;  %vm11619_vm11 = vmmov %vm11608_vm0  ;;  %v5631_v49 = vsub.f32 %v10272_v61, %v5621_v29  ;;  %v5638_v61 = vrot.slane %v10257_v12, 1 }
 0x6b5   : > { %v4443_v9 = vsel %vm11619_vm11, %v4374_v22, 0.0  ;;  %vm11620_vm13 = vmmov %vm11608_vm0  ;;  %v5624_v22 = vrot.slane %v10289_v11, 3 }
 0x6b6   : > { %v10331_v17 = vsel %vm11620_vm13, %v4201_v55, 0.0  ;;  %vm11621_vm14 = vmmov %vm11608_vm0  ;;  %v4286_v46 = vadd.f32 %v4285_v30, %v4284_v40  ;;  %v4444_v54 = vadd.f32 %v4443_v9, %v4442_v42  ;;  %v4379_v55 = vld [vmem:[#allocation6 + $0x58] sm:$0xff]  ;;  %v5632_v30 = vsub.f32 %v10277_v43, %v5622_v62  ;;  %v4384_v40 = vld [vmem:[#allocation6 + $0x80] sm:$0xff] }
 0x6b7   : > { %v10334_v27 = vsel %vm11621_vm14, %v4202_v60, 0.0  ;;  %vm11622_vm15 = vmmov %vm11608_vm0  ;;  %v4385_v43 = vld [vmem:[#allocation6 + $0x88] sm:$0xff]  ;;  %v5648_v63 = vmul.f32 %v5638_v61, %v5633_v56 }
 0x6b8   : > { %v10337_v33 = vsel %vm11622_vm15, %v4203_v35, 0.0  ;;  %vm11623_vm7 = vmmov %vm11608_vm0  ;;  %v4288_v23 = vadd.f32 %v4287_v34, %v4286_v46  ;;  %v5635_v34 = vrot.slane %v10233_v37, 1 }
 0x6b9   : > { %v10340_v32 = vsel %vm11623_vm7, %v4204_v41, 0.0  ;;  %vm11624_vm9 = vmmov %vm11608_vm0 }
 0x6ba   : > { %v4445_v21 = vsel %vm11624_vm9, %v4375_v51, 0.0  ;;  %vm11625_vm3 = vmmov %vm11608_vm0  ;;  %v4290_v0 = vadd.f32 %v4289_v7, %v4288_v23  ;;  %v5636_v7 = vrot.slane %v10242_v18, 1  ;;  %v4381_v51 = vld [vmem:[#allocation6 + $0x68] sm:$0xff] }
 0x6bb   : > { %v10347_v28 = vsel %vm11625_vm3, %v4206_v44, 0.0  ;;  %vm11626_vm12 = vmmov %vm11608_vm0  ;;  %v4446_v2 = vadd.f32 %v4445_v21, %v4444_v54  ;;  %v4383_v44 = vld [vmem:[#allocation6 + $0x78] sm:$0xff] }
 0x6bc   : > { %v10350_v31 = vsel %vm11626_vm12, %v4207_v48, 0.0  ;;  %vm11627_vm6 = vmmov %vm11608_vm0  ;;  %v4292_v35 = vadd.f32 %v4291_v5, %v4290_v0  ;;  %v5637_v5 = vrot.slane %v10247_v10, 1  ;;  %v4461_v10 = vsel %vm11608_vm0, %v4383_v44, 0.0 }
 0x6bd   : > { %v4447_v57 = vsel %vm11627_vm6, %v4376_v52, 0.0  ;;  %vm11628_vm2 = vmmov %vm11608_vm0  ;;  %v5634_v52 = vsub.f32 %v10289_v11, %v5624_v22  ;;  %v5646_v1 = vmul.f32 %v5636_v7, %v5631_v49  ;;  %vm11642_vm6 = vcmask 1042432  }
 0x6be   : > { %v10357_v19 = vsel %vm11628_vm2, %v4208_v24, 0.0  ;;  %vm11629_vm4 = vmmov %vm11608_vm0  ;;  %v4448_v60 = vadd.f32 %v4447_v57, %v4446_v2  ;;  %v4294_v48 = vadd.f32 %v4293_v20, %v4292_v35  ;;  %v4386_v24 = vld [vmem:[#allocation6 + $0x90] sm:$0xff] }
 0x6bf   : > { %v10360_v4 = vsel %vm11629_vm4, %v4209_v26, 0.0  ;;  %vm11630_vm5 = vmmov %vm11608_vm0  ;;  %v5649_v54 = vmul.f32 %v5639_v47, %v5634_v52 }
 0x6c0   : > { %v10364_v39 = vsel %vm11630_vm5, %v4210_v53, 0.0  ;;  %vm11631_vm10 = vmmov %vm11608_vm0  ;;  %v4296_v42 = vadd.f32 %v4295_v50, %v4294_v48  ;;  %v5645_v53 = vmul.f32 %v5635_v34, %v5630_v8 }
 0x6c1   : > { %v10367_v25 = vsel %vm11631_vm10, %v4211_v45, 0.0  ;;  %vm11632_vm8 = vmmov %vm11608_vm0  ;;  %v5647_v45 = vmul.f32 %v5637_v5, %v5632_v30 }
 0x6c2   : > { %v4449_v15 = vsel %vm11632_vm8, %v4377_v13, 0.0  ;;  %vm11633_vm1 = vmmov %vm11608_vm0  ;;  %v4298_v11 = vadd.f32 %v10331_v17, %v4296_v42  ;;  %v4389_v42 = vld [vmem:[#allocation6 + $0xa8] sm:$0xff] }
 0x6c3   : > { %v10371_v58 = vsel %vm11633_vm1, %v4212_v16, 0.0  ;;  %vm11634_vm11 = vmmov %vm11608_vm0  ;;  %v4450_v36 = vadd.f32 %v4449_v15, %v4448_v60  ;;  %v5650_v16 = vsel %vm11642_vm6, %v5645_v53, 0.0  ;;  %v4388_v60 = vld [vmem:[#allocation6 + $0xa0] sm:$0xff] }
 0x6c4   : > { %v4451_v41 = vsel %vm11634_vm11, %v4378_v38, 0.0  ;;  %vm11635_vm13 = vmmov %vm11608_vm0  ;;  %v4300_v23 = vadd.f32 %v10334_v27, %v4298_v11  ;;  %v5651_v29 = vrot.slane %v5650_v16, 4 }
 0x6c5   : > { %v4453_v9 = vsel %vm11635_vm13, %v4379_v55, 0.0  ;;  %v4452_v37 = vadd.f32 %v4451_v41, %v4450_v36  ;;  %vm11636_vm14 = vmmov %vm11608_vm0 }
 0x6c6   : > { %v4455_v18 = vsel %vm11636_vm14, %v4380_v59, 0.0  ;;  %vm11637_vm15 = vmmov %vm11608_vm0  ;;  %v4302_v15 = vadd.f32 %v10337_v33, %v4300_v23  ;;  %v5652_v22 = vadd.f32 %v5651_v29, %v5650_v16  ;;  %v4132_v33 = vpop.xlane.xlu0 %4131  ;;  %v4390_v23 = vld [vmem:[#allocation6 + $0xb0] sm:$0xff]  ;;  %vm11651_vm14 = vcmask 1040384  }
 0x6c7   : > { %v4457_v26 = vsel %vm11637_vm15, %v4381_v51, 0.0  ;;  %vm11638_vm7 = vmmov %vm11608_vm0  ;;  %v4454_v12 = vadd.f32 %v4453_v9, %v4452_v37 }
 0x6c8   : > { %v4459_v20 = vsel %vm11638_vm7, %v4382_v14, 0.0  ;;  %vm11639_vm9 = vmmov %vm11608_vm0  ;;  %v4304_v59 = vadd.f32 %v10340_v32, %v4302_v15  ;;  %v5653_v56 = vrot.slane %v5652_v22, 2 }
 0x6c9   : > { %v4463_v46 = vsel %vm11639_vm9, %v4384_v40, 0.0  ;;  %vm11640_vm3 = vmmov %vm11608_vm0  ;;  %v4456_v13 = vadd.f32 %v4455_v18, %v4454_v12  ;;  %v4133_v18 = vrot.slane %v4132_v33, 4 }
 0x6ca   : > { %v4465_v21 = vsel %vm11640_vm3, %v4385_v43, 0.0  ;;  %vm11641_vm12 = vmmov %vm11608_vm0  ;;  %v4306_v36 = vadd.f32 %v10343_v3, %v4304_v59  ;;  %v5654_v5 = vadd.f32 %v5653_v56, %v5652_v22 }
 0x6cb   : > { %v4467_v50 = vsel %vm11641_vm12, %v4386_v24, 0.0  ;;  %vm11643_vm2 = vmmov %vm11642_vm6  ;;  %v4458_v38 = vadd.f32 %v4457_v26, %v4456_v13  ;;  %v4134_v11 = vadd.f32 %v4133_v18, %v4132_v33  ;;  %v4216_v18 = vld [vmem:[#allocation5 + $0x180] sm:$0xff] }
 0x6cc   : > { %v5657_v62 = vsel %vm11643_vm2, %v5646_v1, 0.0  ;;  %vm11644_vm4 = vmmov %vm11643_vm2  ;;  %v4308_v32 = vadd.f32 %v10347_v28, %v4306_v36  ;;  %v5655_v47 = vrot.slane %v5654_v5, 1 }
 0x6cd   : > { %v5664_v57 = vsel %vm11644_vm4, %v5647_v45, 0.0  ;;  %v5658_v2 = vrot.slane %v5657_v62, 4  ;;  %vm11645_vm5 = vmmov %vm11643_vm2  ;;  %v4460_v35 = vadd.f32 %v4459_v20, %v4458_v38 }
 0x6ce   : > { %v5665_v17 = vrot.slane %v5664_v57, 4  ;;  %v5671_v0 = vsel %vm11645_vm5, %v5648_v63, 0.0  ;;  %vm11646_vm10 = vmmov %vm11643_vm2  ;;  %v4310_v3 = vadd.f32 %v10350_v31, %v4308_v32  ;;  %v5656_v12 = vadd.f32 %v5655_v47, %v5654_v5  ;;  %v4215_v5 = vld [vmem:[#allocation5 + $0x178] sm:$0xff] }
 0x6cf   : > { %v5672_v8 = vrot.slane %v5671_v0, 4  ;;  %v5678_v55 = vsel %vm11646_vm10, %v5649_v54, 0.0  ;;  %v5659_v27 = vadd.f32 %v5658_v2, %v5657_v62  ;;  %vm11647_vm8 = vmmov %vm11608_vm0  ;;  %v4462_v7 = vadd.f32 %v4461_v10, %v4460_v35 }
 0x6d0   : > { %v5666_v49 = vadd.f32 %v5665_v17, %v5664_v57  ;;  %v5679_v30 = vrot.slane %v5678_v55, 4  ;;  %v4469_v41 = vsel %vm11647_vm8, %v4387_v6, 0.0  ;;  %vm11648_vm1 = vmmov %vm11608_vm0  ;;  %v4312_v13 = vadd.f32 %v10357_v19, %v4310_v3  ;;  %v4213_v6 = vld [vmem:[#allocation5 + $0x168] sm:$0xff]  ;;  %v4391_v17 = vld [vmem:[#allocation6 + $0xb8] sm:$0xff] }
 0x6d1   : > { %v5673_v34 = vadd.f32 %v5672_v8, %v5671_v0  ;;  %v5660_v51 = vrot.slane %v5659_v27, 2  ;;  %v4471_v48 = vsel %vm11648_vm1, %v4388_v60, 0.0  ;;  %v4464_v40 = vadd.f32 %v4463_v46, %v4462_v7  ;;  %vm11649_vm11 = vmmov %vm11608_vm0 }
 0x6d2   : > { %v5667_v14 = vrot.slane %v5666_v49, 2  ;;  %v5680_v44 = vadd.f32 %v5679_v30, %v5678_v55  ;;  %v4473_v28 = vsel %vm11649_vm11, %v4389_v42, 0.0  ;;  %v5685_v16 = vmin.f32 %v5656_v12, 0.0  ;;  %vm11650_vm13 = vmmov %vm11608_vm0  ;;  %v4392_v30 = vld [vmem:[#allocation6 + $0xc0] sm:$0xff] }
 0x6d3   : > { %v5674_v61 = vrot.slane %v5673_v34, 2  ;;  %v5661_v43 = vadd.f32 %v5660_v51, %v5659_v27  ;;  %v4466_v24 = vadd.f32 %v4465_v21, %v4464_v40  ;;  %v4314_v31 = vadd.f32 %v10360_v4, %v4312_v13  ;;  %v4160_v27 = vpop.xlane.xlu0 %4159  ;;  %vm11652_vm15 = vmmov %vm11651_vm14 }
 0x6d4   : > { %v5668_v9 = vadd.f32 %v5667_v14, %v5666_v49  ;;  %v5681_v52 = vrot.slane %v5680_v44, 2  ;;  %v5690_v2 = vand.u32 2147483647, %v5685_v16  ;;  %v4475_v55 = vsel %vm11650_vm13, %v4390_v23, 0.0  ;;  %v4214_v49 = vld [vmem:[#allocation5 + $0x170] sm:$0xff]  ;;  %vm11653_vm7 = vmmov %vm11651_vm14  ;;  %v4393_v14 = vld [vmem:[#allocation6 + $0xc8] sm:$0xff] }
 0x6d5   : > { %v5675_v37 = vadd.f32 %v5674_v61, %v5673_v34  ;;  %v5662_v26 = vrot.slane %v5661_v43, 1  ;;  %v4468_v1 = vadd.f32 %v4467_v50, %v4466_v24  ;;  %v4135_v50 = vrot.slane %v4134_v11, 2  ;;  %vm11654_vm9 = vmmov %vm11608_vm0 }
 0x6d6   : > { %v5669_v20 = vrot.slane %v5668_v9, 1  ;;  %v5682_v10 = vadd.f32 %v5681_v52, %v5680_v44  ;;  %v4316_v8 = vadd.f32 %v10364_v39, %v4314_v31  ;;  %v5695_v35 = vsel %vm11651_vm14, %v5690_v2, 0.0  ;;  %vm11655_vm3 = vmmov %vm11653_vm7 }
 0x6d7   : > { %v5676_v53 = vrot.slane %v5675_v37, 1  ;;  %v5663_v46 = vadd.f32 %v5662_v26, %v5661_v43  ;;  %v4470_v21 = vadd.f32 %v4469_v41, %v4468_v1  ;;  %v4321_v7 = vsel %vm11608_vm0, %v4213_v6, 0.0  ;;  %vm11656_vm12 = vmmov %vm11608_vm0  ;;  %v4219_v6 = vld [vmem:[#allocation5 + $0x198] sm:$0xff] }
 0x6d8   : > { %v5670_v45 = vadd.f32 %v5669_v20, %v5668_v9  ;;  %v5683_v63 = vrot.slane %v5682_v10, 1  ;;  %v4318_v34 = vadd.f32 %v10367_v25, %v4316_v8  ;;  %v4477_v39 = vsel %vm11654_vm9, %v4391_v17, 0.0  ;;  %vm11657_vm6 = vmmov %vm11608_vm0  ;;  %v4394_v25 = vld [vmem:[#allocation6 + $0xd0] sm:$0xff] }
 0x6d9   : > { %v5677_v54 = vadd.f32 %v5676_v53, %v5675_v37  ;;  %v5686_v62 = vmin.f32 %v5663_v46, 0.0  ;;  %v4472_v0 = vadd.f32 %v4471_v48, %v4470_v21  ;;  %v4161_v36 = vrot.slane %v4160_v27, 4  ;;  %vm11658_vm2 = vmmov %vm11655_vm3  ;;  %v4217_v53 = vld [vmem:[#allocation5 + $0x188] sm:$0xff] }
 0x6da   : > { %v5684_v29 = vadd.f32 %v5683_v63, %v5682_v10  ;;  %v5687_v57 = vmin.f32 %v5670_v45, 0.0  ;;  %v4136_v48 = vadd.f32 %v4135_v50, %v4134_v11  ;;  %v4320_v61 = vadd.f32 %v10371_v58, %v4318_v34  ;;  %vm11659_vm4 = vmmov %vm11608_vm0  ;;  %v4395_v10 = vld [vmem:[#allocation6 + $0xd8] sm:$0xff]  ;;  %v4396_v63 = vld [vmem:[#allocation6 + $0xe0] sm:$0xff] }
 0x6db   : > { %v5688_v38 = vmin.f32 %v5677_v54, 0.0  ;;  %v5691_v22 = vand.u32 2147483647, %v5686_v62  ;;  %v4474_v59 = vadd.f32 %v4473_v28, %v4472_v0  ;;  %v4323_v40 = vsel %vm11656_vm12, %v4214_v49, 0.0  ;;  %vm11660_vm5 = vmmov %vm11608_vm0  ;;  %v4218_v54 = vld [vmem:[#allocation5 + $0x190] sm:$0xff] }
 0x6dc   : > { %v5689_v15 = vmin.f32 %v5684_v29, 0.0  ;;  %v5692_v19 = vand.u32 2147483647, %v5687_v57  ;;  %v4479_v43 = vsel %vm11657_vm6, %v4392_v30, 0.0  ;;  %v4162_v47 = vadd.f32 %v4161_v36, %v4160_v27  ;;  %vm11661_vm10 = vmmov %vm11608_vm0  ;;  %v4397_v29 = vld [vmem:[#allocation6 + $0xe8] sm:$0xff]  ;;  %v4398_v50 = vld [vmem:[#allocation6 + $0xf0] sm:$0xff] }
 0x6dd   : > { %v5693_v60 = vand.u32 2147483647, %v5688_v38  ;;  %v5696_v41 = vsel %vm11652_vm15, %v5691_v22, 0.0  ;;  %v4476_v44 = vadd.f32 %v4475_v55, %v4474_v59  ;;  %v4137_v37 = vrot.slane %v4136_v48, 1  ;;  %vm11662_vm8 = vmmov %vm11608_vm0  ;;  %v4399_v55 = vld [vmem:[#allocation6 + $0xf8] sm:$0xff]  ;;  %v4400_v59 = vld [vmem:[#allocation6 + $0x100] sm:$0xff] }
 0x6de   : > { %v5694_v4 = vand.u32 2147483647, %v5689_v15  ;;  %v5698_v56 = vsel %vm11653_vm7, %v5692_v19, 0.0  ;;  %v5697_v51 = vadd.f32 %v5696_v41, %v5695_v35  ;;  %v4322_v42 = vadd.f32 %v4321_v7, %v4320_v61  ;;  %vm11663_vm1 = vmmov %vm11608_vm0  ;;  %v4220_v15 = vld [vmem:[#allocation5 + $0x1a0] sm:$0xff]  ;;  %v4221_v35 = vld [vmem:[#allocation5 + $0x1a8] sm:$0xff] }
 0x6df   : > { %v5700_v33 = vsel %vm11655_vm3, %v5693_v60, 0.0  ;;  %v4478_v52 = vadd.f32 %v4477_v39, %v4476_v44  ;;  %v4481_v24 = vsel %vm11659_vm4, %v4393_v14, 0.0  ;;  %v4325_v20 = vsel %vm11660_vm5, %v4215_v5, 0.0  ;;  %vm11664_vm11 = vmmov %vm11608_vm0  ;;  %v4222_v41 = vld [vmem:[#allocation5 + $0x1b0] sm:$0xff]  ;;  %v4401_v39 = vld [vmem:[#allocation6 + $0x108] sm:$0xff] }
 0x6e0   : > { %v5699_v9 = vadd.f32 %v5698_v56, %v5697_v51  ;;  %v5702_v32 = vsel %vm11658_vm2, %v5694_v4, 0.0  ;;  %v4163_v3 = vrot.slane %v4162_v47, 2  ;;  %v4138_v12 = vadd.f32 %v4137_v37, %v4136_v48  ;;  %vm11665_vm13 = vmmov %vm11608_vm0  ;;  %v4223_v14 = vld [vmem:[#allocation5 + $0x1b8] sm:$0xff]  ;;  %v4402_v48 = vld [vmem:[#allocation6 + $0x110] sm:$0xff] }
 0x6e1   : > { %v4480_v58 = vadd.f32 %v4479_v43, %v4478_v52  ;;  %v4324_v11 = vadd.f32 %v4323_v40, %v4322_v42  ;;  %v4483_v1 = vsel %vm11661_vm10, %v4394_v25, 0.0  ;;  %v4327_v45 = vsel %vm11662_vm8, %v4216_v18, 0.0  ;;  %vm11666_vm14 = vmmov %vm11608_vm0  ;;  %v4224_v61 = vld [vmem:[#allocation5 + $0x1c0] sm:$0xff]  ;;  %v4403_v25 = vld [vmem:[#allocation6 + $0x118] sm:$0xff] }
 0x6e2   : > { %v5701_v26 = vadd.f32 %v5700_v33, %v5699_v9  ;;  %5791 = vpush %v4138_v12  ;;  %v4164_v28 = vadd.f32 %v4163_v3, %v4162_v47  ;;  %v4485_v23 = vsel %vm11663_vm1, %v4395_v10, 0.0  ;;  %v4329_v21 = vsel %vm11664_vm11, %v4217_v53, 0.0  ;;  %vm11667_vm15 = vmmov %vm11608_vm0  ;;  %v4404_v42 = vld [vmem:[#allocation6 + $0x120] sm:$0xff]  ;;  %v4405_v3 = vld [vmem:[#allocation6 + $0x128] sm:$0xff] }
 0x6e3   : > { %v4482_v13 = vadd.f32 %v4481_v24, %v4480_v58  ;;  %v4326_v16 = vadd.f32 %v4325_v20, %v4324_v11  ;;  %v4487_v38 = vsel %vm11665_vm13, %v4396_v63, 0.0  ;;  %v4331_v2 = vsel %vm11666_vm14, %v4218_v54, 0.0  ;;  %vm11668_vm7 = vmmov %vm11608_vm0  ;;  %v4227_v53 = vld [vmem:[#allocation5 + $0x1d8] sm:$0xff]  ;;  %v4406_v63 = vld [vmem:[#allocation6 + $0x130] sm:$0xff] }
 0x6e4   : > { %v10426_v46 = vadd.f32 %v5702_v32, %v5701_v26  ;;  %v4165_v57 = vrot.slane %v4164_v28, 1  ;;  %v4489_v19 = vsel %vm11667_vm15, %v4397_v29, 0.0  ;;  %v4333_v8 = vsel %vm11668_vm7, %v4219_v6, 0.0  ;;  %vm11669_vm9 = vmmov %vm11608_vm0  ;;  %v4225_v32 = vld [vmem:[#allocation5 + $0x1c8] sm:$0xff]  ;;  %v4226_v26 = vld [vmem:[#allocation5 + $0x1d0] sm:$0xff] }
 0x6e5   : > { %v4484_v62 = vadd.f32 %v4483_v1, %v4482_v13  ;;  %v4328_v31 = vadd.f32 %v4327_v45, %v4326_v16  ;;  %v4491_v49 = vsel %vm11608_vm0, %v4398_v50, 0.0  ;;  %v4335_v30 = vsel %vm11669_vm9, %v4220_v15, 0.0  ;;  %vm11670_vm3 = vmmov %vm11608_vm0  ;;  %v4230_v50 = vld [vmem:[#allocation5 + $0x1f0] sm:$0xff] }
 0x6e6   : > { %v4166_v0 = vadd.f32 %v4165_v57, %v4164_v28  ;;  %v4493_v34 = vsel %vm11670_vm3, %v4399_v55, 0.0  ;;  %vm11671_vm12 = vmmov %vm11608_vm0  ;;  %v4228_v28 = vld [vmem:[#allocation5 + $0x1e0] sm:$0xff]  ;;  %v4507_v6 = vsel %vm11608_vm0, %v4406_v63, 0.0 }
 0x6e7   : > { %v4486_v17 = vadd.f32 %v4485_v23, %v4484_v62  ;;  %v4330_v22 = vadd.f32 %v4329_v21, %v4328_v31  ;;  %v4337_v7 = vsel %vm11671_vm12, %v4221_v35, 0.0  ;;  %vm11672_vm6 = vmmov %vm11608_vm0  ;;  %v4407_v21 = vld [vmem:[#allocation6 + $0x138] sm:$0xff]  ;;  %v4229_v62 = vld [vmem:[#allocation5 + $0x1e8] sm:$0xff] }
 0x6e8   : > { %5793 = vpush %v4166_v0  ;;  %v4495_v33 = vsel %vm11672_vm6, %v4400_v59, 0.0  ;;  %vm11673_vm2 = vmmov %vm11608_vm0 }
 0x6e9   : > { %v4488_v60 = vadd.f32 %v4487_v38, %v4486_v17  ;;  %v4332_v27 = vadd.f32 %v4331_v2, %v4330_v22  ;;  %v4339_v36 = vsel %vm11673_vm2, %v4222_v41, 0.0  ;;  %vm11674_vm4 = vmmov %vm11608_vm0  ;;  %v4408_v38 = vld [vmem:[#allocation6 + $0x140] sm:$0xff]  ;;  %v4409_v22 = vld [vmem:[#allocation6 + $0x148] sm:$0xff] }
 0x6ea   : > { %v4497_v43 = vsel %vm11674_vm4, %v4401_v39, 0.0  ;;  %vm11675_vm5 = vmmov %vm11608_vm0  ;;  %v4411_v41 = vld [vmem:[#allocation6 + $0x158] sm:$0xff]  ;;  %v4412_v39 = vld [vmem:[#allocation6 + $0x160] sm:$0xff] }
 0x6eb   : > { %v4490_v4 = vadd.f32 %v4489_v19, %v4488_v60  ;;  %v4334_v56 = vadd.f32 %v4333_v8, %v4332_v27  ;;  %v4341_v9 = vsel %vm11675_vm5, %v4223_v14, 0.0  ;;  %vm11676_vm10 = vmmov %vm11608_vm0  ;;  %v4231_v8 = vld [vmem:[#allocation5 + $0x1f8] sm:$0xff]  ;;  %v4410_v27 = vld [vmem:[#allocation6 + $0x150] sm:$0xff] }
 0x6ec   : > { %v4499_v37 = vsel %vm11676_vm10, %v4402_v48, 0.0  ;;  %vm11677_vm8 = vmmov %vm11608_vm0 }
 0x6ed   : > { %v4492_v51 = vadd.f32 %v4491_v49, %v4490_v4  ;;  %v4336_v44 = vadd.f32 %v4335_v30, %v4334_v56  ;;  %v4343_v18 = vsel %vm11677_vm8, %v4224_v61, 0.0  ;;  %vm11678_vm1 = vmmov %vm11608_vm0 }
 0x6ee   : > { %v4501_v10 = vsel %vm11678_vm1, %v4403_v25, 0.0  ;;  %vm11679_vm11 = vmmov %vm11608_vm0 }
 0x6ef   : > { %v4494_v5 = vadd.f32 %v4493_v34, %v4492_v51  ;;  %v4338_v40 = vadd.f32 %v4337_v7, %v4336_v44  ;;  %v4345_v58 = vsel %vm11679_vm11, %v4225_v32, 0.0  ;;  %vm11680_vm13 = vmmov %vm11608_vm0 }
 0x6f0   : > { %v4503_v1 = vsel %vm11680_vm13, %v4404_v42, 0.0  ;;  %vm11681_vm14 = vmmov %vm11608_vm0 }
 0x6f1   : > { %v4496_v52 = vadd.f32 %v4495_v33, %v4494_v5  ;;  %v4340_v47 = vadd.f32 %v4339_v36, %v4338_v40  ;;  %v4347_v45 = vsel %vm11681_vm14, %v4226_v26, 0.0  ;;  %vm11682_vm15 = vmmov %vm11608_vm0  ;;  %v4413_v33 = vld [vmem:[#allocation6 + $0x168] sm:$0xff]  ;;  %v4414_v5 = vld [vmem:[#allocation6 + $0x170] sm:$0xff] }
 0x6f2   : > { %v4505_v16 = vsel %vm11682_vm15, %v4405_v3, 0.0  ;;  %vm11683_vm7 = vmmov %vm11608_vm0 }
 0x6f3   : > { %v4498_v24 = vadd.f32 %v4497_v43, %v4496_v52  ;;  %v4342_v20 = vadd.f32 %v4341_v9, %v4340_v47  ;;  %v4349_v23 = vsel %vm11683_vm7, %v4227_v53, 0.0  ;;  %vm11684_vm9 = vmmov %vm11608_vm0  ;;  %v4415_v43 = vld [vmem:[#allocation6 + $0x178] sm:$0xff]  ;;  %v4416_v52 = vld [vmem:[#allocation6 + $0x180] sm:$0xff] }
 0x6f4   : > { %v4351_v31 = vsel %vm11684_vm9, %v4228_v28, 0.0  ;;  %vm11685_vm3 = vmmov %vm11608_vm0 }
 0x6f5   : > { %v4500_v12 = vadd.f32 %v4499_v37, %v4498_v24  ;;  %v4344_v11 = vadd.f32 %v4343_v18, %v4342_v20  ;;  %v4509_v0 = vsel %vm11685_vm3, %v4407_v21, 0.0  ;;  %vm11686_vm12 = vmmov %vm11608_vm0  ;;  %v4417_v37 = vld [vmem:[#allocation6 + $0x188] sm:$0xff]  ;;  %v4418_v24 = vld [vmem:[#allocation6 + $0x190] sm:$0xff] }
 0x6f6   : > { %v4353_v15 = vsel %vm11686_vm12, %v4229_v62, 0.0  ;;  %vm11687_vm6 = vmmov %vm11608_vm0  ;;  %v4531_v3 = vsel %vm11608_vm0, %v4418_v24, 0.0 }
 0x6f7   : > { %v4502_v13 = vadd.f32 %v4501_v10, %v4500_v12  ;;  %v4346_v54 = vadd.f32 %v4345_v58, %v4344_v11  ;;  %v4511_v60 = vsel %vm11687_vm6, %v4408_v38, 0.0  ;;  %vm11688_vm2 = vmmov %vm11608_vm0  ;;  %v4419_v10 = vld [vmem:[#allocation6 + $0x198] sm:$0xff]  ;;  %v4420_v12 = vld [vmem:[#allocation6 + $0x1a0] sm:$0xff] }
 0x6f8   : > { %v4355_v35 = vsel %vm11688_vm2, %v4230_v50, 0.0  ;;  %vm11689_vm4 = vmmov %vm11608_vm0 }
 0x6f9   : > { %v4504_v29 = vadd.f32 %v4503_v1, %v4502_v13  ;;  %v4348_v57 = vadd.f32 %v4347_v45, %v4346_v54  ;;  %v4513_v59 = vsel %vm11689_vm4, %v4409_v22, 0.0  ;;  %vm11690_vm5 = vmmov %vm11608_vm0  ;;  %v4421_v1 = vld [vmem:[#allocation6 + $0x1a8] sm:$0xff]  ;;  %v4422_v13 = vld [vmem:[#allocation6 + $0x1b0] sm:$0xff] }
 0x6fa   : > { %v4357_v4 = vsel %vm11690_vm5, %v4231_v8, 0.0  ;;  %vm11691_vm10 = vmmov %vm11608_vm0 }
 0x6fb   : > { %v4506_v2 = vadd.f32 %v4505_v16, %v4504_v29  ;;  %v4350_v17 = vadd.f32 %v4349_v23, %v4348_v57  ;;  %v4515_v7 = vsel %vm11691_vm10, %v4410_v27, 0.0  ;;  %vm11692_vm8 = vmmov %vm11608_vm0  ;;  %v4423_v16 = vld [vmem:[#allocation6 + $0x1b8] sm:$0xff]  ;;  %v4424_v29 = vld [vmem:[#allocation6 + $0x1c0] sm:$0xff] }
 0x6fc   : > { %v4517_v44 = vsel %vm11692_vm8, %v4411_v41, 0.0  ;;  %vm11693_vm1 = vmmov %vm11608_vm0 }
 0x6fd   : > { %v4508_v19 = vadd.f32 %v4507_v6, %v4506_v2  ;;  %v4352_v55 = vadd.f32 %v4351_v31, %v4350_v17  ;;  %v4519_v48 = vsel %vm11693_vm1, %v4412_v39, 0.0  ;;  %vm11694_vm11 = vmmov %vm11608_vm0  ;;  %v4425_v6 = vld [vmem:[#allocation6 + $0x1c8] sm:$0xff]  ;;  %v4426_v2 = vld [vmem:[#allocation6 + $0x1d0] sm:$0xff] }
 0x6fe   : > { %v4521_v40 = vsel %vm11694_vm11, %v4413_v33, 0.0  ;;  %vm11695_vm13 = vmmov %vm11608_vm0  ;;  %v5930_v33 = vmov 0.0  }
 0x6ff   : > { %v4510_v49 = vadd.f32 %v4509_v0, %v4508_v19  ;;  %v4354_v30 = vadd.f32 %v4353_v15, %v4352_v55  ;;  %v4523_v25 = vsel %vm11695_vm13, %v4414_v5, 0.0  ;;  %vm11696_vm14 = vmmov %vm11608_vm0  ;;  %v4427_v0 = vld [vmem:[#allocation6 + $0x1d8] sm:$0xff]  ;;  %v4428_v19 = vld [vmem:[#allocation6 + $0x1e0] sm:$0xff]  ;;  %5726 = vst [vmem:[%s10514_s5 + $0x6] sm:$0x1] %v5930_v33 }
 0x700   : > { %v4525_v47 = vsel %vm11696_vm14, %v4415_v43, 0.0  ;;  %vm11697_vm15 = vmmov %vm11608_vm0  ;;  %5727 = vst [vmem:[%s10514_s5 + $0x7] sm:$0x1] %v5930_v33 }
 0x701   : > { %v4512_v56 = vadd.f32 %v4511_v60, %v4510_v49  ;;  %v4356_v34 = vadd.f32 %v4355_v35, %v4354_v30  ;;  %v4527_v42 = vsel %vm11697_vm15, %v4416_v52, 0.0  ;;  %vm11698_vm7 = vmmov %vm11608_vm0  ;;  %v4429_v60 = vld [vmem:[#allocation6 + $0x1e8] sm:$0xff]  ;;  %v4430_v49 = vld [vmem:[#allocation6 + $0x1f0] sm:$0xff] }
 0x702   : > { %v4529_v20 = vsel %vm11698_vm7, %v4417_v37, 0.0  ;;  %vm11699_vm9 = vmmov %vm11608_vm0 }
 0x703   : > { %v4514_v51 = vadd.f32 %v4513_v59, %v4512_v56  ;;  %v4358_v14 = vadd.f32 %v4357_v4, %v4356_v34  ;;  %v4533_v11 = vsel %vm11699_vm9, %v4419_v10, 0.0  ;;  %vm11700_vm3 = vmmov %vm11608_vm0  ;;  %v4431_v4 = vld [vmem:[#allocation6 + $0x1f8] sm:$0xff] }
 0x704   : > { %v4535_v63 = vsel %vm11700_vm3, %v4420_v12, 0.0  ;;  %vm11701_vm12 = vmmov %vm11608_vm0 }
 0x705   : > { %v4516_v36 = vadd.f32 %v4515_v7, %v4514_v51  ;;  %4359 = vadd.xlane.f32.xlu1 %v4358_v14  ;;  %v4537_v54 = vsel %vm11701_vm12, %v4421_v1, 0.0  ;;  %vm11702_vm6 = vmmov %vm11608_vm0  ;;  %v5305_v14 = vpop.xlane.xlu1 %5304 }
 0x706   : > { %v4539_v21 = vsel %vm11702_vm6, %v4422_v13, 0.0  ;;  %vm11703_vm2 = vmmov %vm11608_vm0 }
 0x707   : > { %v4518_v61 = vadd.f32 %v4517_v44, %v4516_v36  ;;  %v4541_v57 = vsel %vm11703_vm2, %v4423_v16, 0.0  ;;  %vm11704_vm4 = vmmov %vm11608_vm0 }
 0x708   : > { %v4543_v38 = vsel %vm11704_vm4, %v4424_v29, 0.0  ;;  %vm11705_vm5 = vmmov %vm11608_vm0 }
 0x709   : > { %v4520_v9 = vadd.f32 %v4519_v48, %v4518_v61  ;;  %v4545_v17 = vsel %vm11705_vm5, %v4425_v6, 0.0  ;;  %vm11706_vm10 = vmmov %vm11608_vm0  ;;  %v5511_v44 = vpop.xlane.xlu1 %5510 }
 0x70a   : > { %v4547_v22 = vsel %vm11706_vm10, %v4426_v2, 0.0  ;;  %vm11707_vm8 = vmmov %vm11608_vm0  ;;  %v5512_v10 = vrot.slane %v5511_v44, 4 }
 0x70b   : > { %v4522_v32 = vadd.f32 %v4521_v40, %v4520_v9  ;;  %v4549_v55 = vsel %vm11707_vm8, %v4427_v0, 0.0  ;;  %vm11708_vm1 = vmmov %vm11608_vm0 }
 0x70c   : > { %v4551_v27 = vsel %vm11708_vm1, %v4428_v19, 0.0  ;;  %vm11709_vm11 = vmmov %vm11608_vm0 }
 0x70d   : > { %v4524_v18 = vadd.f32 %v4523_v25, %v4522_v32  ;;  %v4553_v59 = vsel %vm11709_vm11, %v4429_v60, 0.0  ;;  %vm11710_vm13 = vmmov %vm11608_vm0  ;;  %v5138_v36 = vpop.xlane.xlu1 %5137 }
 0x70e   : > { %v4555_v56 = vsel %vm11710_vm13, %v4430_v49, 0.0  ;;  %vm11711_vm14 = vmmov %vm11608_vm0  ;;  %v5139_v37 = vrot.slane %v5138_v36, 4 }
 0x70f   : > { %v4526_v26 = vadd.f32 %v4525_v47, %v4524_v18  ;;  %v4557_v7 = vsel %vm11711_vm14, %v4431_v4, 0.0 }
 0x711   : > { %v4528_v58 = vadd.f32 %v4527_v42, %v4526_v26  ;;  %v5306_v42 = vrot.slane %v5305_v14, 4 }
 0x713   : > { %v4530_v53 = vadd.f32 %v4529_v20, %v4528_v58  ;;  %v5140_v58 = vadd.f32 %v5139_v37, %v5138_v36  ;;  %s5792_s11 = spop %5791 }
 0x714   : > { %s4569_s13 = smul.f32 0.0025, %s5792_s11 }
 0x715   : > { %v4532_v45 = vadd.f32 %v4531_v3, %v4530_v53  ;;  %v5307_v53 = vadd.f32 %v5306_v42, %v5305_v14  ;;  %v5141_v13 = vrot.slane %v5140_v58, 2 }
 0x717   : > { %v4534_v28 = vadd.f32 %v4533_v11, %v4532_v45  ;;  %v5142_v2 = vadd.f32 %v5141_v13, %v5140_v58 }
 0x719   : > { %v4536_v23 = vadd.f32 %v4535_v63, %v4534_v28  ;;  %v5513_v63 = vadd.f32 %v5512_v10, %v5511_v44  ;;  %s5794_s12 = spop %5793 }
 0x71a   : > { %s4572_s21 = smul.f32 0.0016666667, %s5794_s12 }
 0x71b   : > { %v4538_v62 = vadd.f32 %v4537_v54, %v4536_v23  ;;  %v5308_v23 = vrot.slane %v5307_v53, 2  ;;  %v5514_v6 = vrot.slane %v5513_v63, 2 }
 0x71d   : > { %v4540_v31 = vadd.f32 %v4539_v21, %v4538_v62 }
 0x71f   : > { %v4542_v50 = vadd.f32 %v4541_v57, %v4540_v31 }
 0x721   : > { %v4544_v15 = vadd.f32 %v4543_v38, %v4542_v50 }
 0x723   : > { %v4546_v8 = vadd.f32 %v4545_v17, %v4544_v15 }
 0x725   : > { %v4548_v35 = vadd.f32 %v4547_v22, %v4546_v8  ;;  %v5309_v22 = vadd.f32 %v5308_v23, %v5307_v53 }
 0x727   : > { %v4550_v30 = vadd.f32 %v4549_v55, %v4548_v35  ;;  %v5143_v35 = vrot.slane %v5142_v2, 1 }
 0x729   : > { %v4552_v41 = vadd.f32 %v4551_v27, %v4550_v30  ;;  %v5515_v27 = vadd.f32 %v5514_v6, %v5513_v63 }
 0x72b   : > { %v4554_v34 = vadd.f32 %v4553_v59, %v4552_v41  ;;  %v5310_v41 = vrot.slane %v5309_v22, 1 }
 0x72d   : > { %v4556_v39 = vadd.f32 %v4555_v56, %v4554_v34  ;;  %v5311_v33 = vadd.f32 %v5310_v41, %v5309_v22 }
 0x72f   : > { %v4558_v51 = vadd.f32 %v4557_v7, %v4556_v39  ;;  %v5144_v7 = vadd.f32 %v5143_v35, %v5142_v2  ;;  %v5516_v39 = vrot.slane %v5515_v27, 1 }
 0x731   : > { %4559 = vadd.xlane.f32.xlu1 %v4558_v51 }
 0x735   : > { %5704 = vadd.xlane.f32.xlu1 %v10426_v46  ;;  %v5404_v46 = vpop.xlane.xlu0 %5403 }
 0x736   : > { %v5405_v26 = vrot.slane %v5404_v46, 4 }
 0x738   : > { %v5406_v11 = vadd.f32 %v5405_v26, %v5404_v46 }
 0x739   : > { %v5102_v52 = vpop.xlane.xlu0 %5101 }
 0x73a   : > { %v5103_v47 = vrot.slane %v5102_v52, 4  ;;  %v5407_v29 = vrot.slane %v5406_v11, 2 }
 0x73c   : > { %v5104_v20 = vadd.f32 %v5103_v47, %v5102_v52  ;;  %v5408_v8 = vadd.f32 %v5407_v29, %v5406_v11 }
 0x73d   : > { %v5175_v32 = vpop.xlane.xlu0 %5174 }
 0x73e   : > { %v5176_v18 = vrot.slane %v5175_v32, 4  ;;  %v5105_v1 = vrot.slane %v5104_v20, 2  ;;  %v5409_v34 = vrot.slane %v5408_v8, 1 }
 0x740   : > { %v5177_v3 = vadd.f32 %v5176_v18, %v5175_v32  ;;  %v5106_v57 = vadd.f32 %v5105_v1, %v5104_v20  ;;  %v5410_v36 = vadd.f32 %v5409_v34, %v5408_v8 }
 0x741   : > { %v5606_v24 = vpop.xlane.xlu0 %5605 }
 0x742   : > { %v5607_v12 = vrot.slane %v5606_v24, 4  ;;  %v5178_v54 = vrot.slane %v5177_v3, 2  ;;  %v5107_v19 = vrot.slane %v5106_v57, 1 }
 0x744   : > { %v5608_v16 = vadd.f32 %v5607_v12, %v5606_v24  ;;  %v5179_v17 = vadd.f32 %v5178_v54, %v5177_v3  ;;  %v5108_v56 = vadd.f32 %v5107_v19, %v5106_v57 }
 0x746   : > { %v5609_v50 = vrot.slane %v5608_v16, 2  ;;  %v5180_v30 = vrot.slane %v5179_v17, 1 }
 0x748   : > { %v5610_v49 = vadd.f32 %v5609_v50, %v5608_v16  ;;  %v5181_v14 = vadd.f32 %v5180_v30, %v5179_v17 }
 0x74a   : > { %v5611_v44 = vrot.slane %v5610_v49, 1 }
 0x78e   : > { %v4360_v48 = vpop.xlane.xlu1 %4359 }
 0x78f   : > { %v4361_v5 = vrot.slane %v4360_v48, 4 }
 0x791   : > { %v4362_v61 = vadd.f32 %v4361_v5, %v4360_v48  ;;  %v5517_v48 = vadd.f32 %v5516_v39, %v5515_v27 }
 0x793   : > { %v4363_v40 = vrot.slane %v4362_v61, 2 }
 0x795   : > { %v4364_v43 = vadd.f32 %v4363_v40, %v4362_v61  ;;  %v5612_v61 = vadd.f32 %v5611_v44, %v5610_v49 }
 0x797   : > { %v4365_v9 = vrot.slane %v4364_v43, 1 }
 0x799   : > { %v4366_v25 = vadd.f32 %v4365_v9, %v4364_v43 }
 0x79b   : > { %5795 = vpush %v4366_v25 }
 0x7ba   : > { %v4560_v45 = vpop.xlane.xlu1 %4559 }
 0x7bb   : > { %v4561_v28 = vrot.slane %v4560_v45, 4 }
 0x7bd   : > { %v4562_v21 = vadd.f32 %v4561_v28, %v4560_v45 }
 0x7be   : > { %v5705_v62 = vpop.xlane.xlu1 %5704 }
 0x7bf   : > { %v4563_v31 = vrot.slane %v4562_v21, 2  ;;  %v5706_v38 = vrot.slane %v5705_v62, 4 }
 0x7c1   : > { %v5707_v0 = vadd.f32 %v5706_v38, %v5705_v62  ;;  %v4564_v15 = vadd.f32 %v4563_v31, %v4562_v21 }
 0x7c3   : > { %v5708_v55 = vrot.slane %v5707_v0, 2  ;;  %v4565_v60 = vrot.slane %v4564_v15, 1 }
 0x7c5   : > { %v5709_v59 = vadd.f32 %v5708_v55, %v5707_v0  ;;  %v4566_v4 = vadd.f32 %v4565_v60, %v4564_v15 }
 0x7c7   : > { %5797 = vpush %v4566_v4  ;;  %v5710_v51 = vrot.slane %v5709_v59, 1 }
 0x7c8   : > { %5799 = vpush %v5108_v56 }
 0x7c9   : > { %5801 = vpush %v5144_v7  ;;  %v5711_v5 = vadd.f32 %v5710_v51, %v5709_v59 }
 0x7ca   : > { %5803 = vpush %v5181_v14 }
 0x7cb   : > { %5805 = vpush %v5311_v33 }
 0x7cc   : > { %5807 = vpush %v5410_v36  ;;  %s5796_s14 = spop %5795 }
 0x7cd   : > { %5809 = vpush %v5517_v48  ;;  %s4568_s15 = smul.f32 0.0016666667, %s5796_s14 }
 0x7ce   : > { %5811 = vpush %v5612_v61 }
 0x7cf   : > { %5813 = vpush %v5711_v5  ;;  %s4570_s16 = sadd.f32 %s4569_s13, %s4568_s15 }
 0x7d1   : > { %v5714_v40 = vstv %s4570_s16 }
 0x7d2   : > { %5715 = vst [vmem:[%s10514_s5] sm:$0x1] %v5714_v40 }
 0x7f8   : > { %s5798_s22 = spop %5797 }
 0x7f9   : > { %s4571_s23 = smul.f32 0.0016666667, %s5798_s22  ;;  %s5800_s24 = spop %5799 }
 0x7fa   : > { %s5802_s25 = spop %5801 }
 0x7fb   : > { %s4573_s26 = sadd.f32 %s4572_s21, %s4571_s23  ;;  %s5804_s19 = spop %5803 }
 0x7fc   : > { %s5146_s27 = sadd.f32 %s5802_s25, %s5800_s24  ;;  %s5806_s28 = spop %5805 }
 0x7fd   : > { %v5724_v43 = vstv %s4573_s26  ;;  %s5808_s29 = spop %5807 }
 0x7fe   : > { %5725 = vst [vmem:[%s10514_s5 + $0x5] sm:$0x1] %v5724_v43  ;;  %s5183_s7 = sadd.f32 %s5804_s19, %s5146_s27  ;;  %s5810_s8 = spop %5809 }
 0x7ff   : > { %s5412_s9 = sadd.f32 %s5808_s29, %s5806_s28  ;;  %s5812_s10 = spop %5811 }
 0x800   : > { %s5184_s11 = smul.f32 0.00125, %s5183_s7  ;;  %s5814_s12 = spop %5813 }
 0x801   : > { %s5519_s13 = sadd.f32 %s5810_s8, %s5412_s9  ;;  %s5614_s14 = smul.f32 0.00055555557, %s5812_s10 }
 0x802   : > { %v5716_v9 = vstv %s5184_s11  ;;  %s5713_s15 = smul.f32 0.0016666667, %s5814_s12 }
 0x803   : > { %5717 = vst [vmem:[%s10514_s5 + $0x1] sm:$0x1] %v5716_v9  ;;  %s5520_s20 = smul.f32 0.00041666668, %s5519_s13  ;;  %v5720_v25 = vstv %s5614_s14 }
 0x804   : > { %5721 = vst [vmem:[%s10514_s5 + $0x3] sm:$0x1] %v5720_v25  ;;  %v5722_v46 = vstv %s5713_s15 }
 0x805   : > { %v5718_v52 = vstv %s5520_s20  ;;  %5723 = vst [vmem:[%s10514_s5 + $0x4] sm:$0x1] %v5722_v46 }
 0x806   : > { %5719 = vst [vmem:[%s10514_s5 + $0x2] sm:$0x1] %v5718_v52 }
 0x807 PF: > { %s15_s18 = sadd.s32 1, %s5914_s18  }
 0x808   : > { %p12_p8 = scmp.ge.s32.totalorder %s15_s18, 4  }
 0x80a   :  { %14 = sbr.rel (!%p12_p8) target bundleno = 1 (0x1), region = 114 }

</bundles_post_ra>
